<compile_context>
chip_gen: v7x
topology: tpu7x:2x2x1
jax: 0.10.0
libtpu: 0.0.40
codegen_flags: <defaults>
</compile_context>

<pallas_src>
import math

import jax
import jax.numpy as jnp
from jax import lax
from jax.experimental import pallas as pl
from jax.experimental.pallas import tpu as pltpu

_NEG_INF = -1e30  # padded-vocab logit value -> softmax prob exactly 0


def _round_up(x: int, m: int) -> int:
    return ((x + m - 1) // m) * m


# ----------------------------------------------------------------------------
# Kernel 1: multi-layer LSTM recurrence (grid-less; inherently serial in time).
# Ref order: x, (wih, whh, b) * num_layers, out(hidden states), xg(scratch).
# ----------------------------------------------------------------------------
def make_lstm_kernel(num_layers: int, seq_len: int, hidden: int,
                     wide_gates: bool):
    H = hidden

    def kernel(*refs):
        x_ref = refs[0]
        layer_refs = refs[1:1 + 3 * num_layers]
        out_ref, xg_ref = refs[1 + 3 * num_layers:]

        def lstm_layer(in_ref, wih_ref, whh_ref, b_ref):
            # Hoisted input projection: ONE well-shaped MXU matmul for all
            # timesteps (PyTorch gate order i,f,g,o; b = b_ih + b_hh).
            # This fully consumes in_ref before the loop, so overwriting the
            # hidden buffer (out_ref) inside the loop is safe for layers >= 1.
            xg_ref[...] = (
                jnp.dot(in_ref[...].astype(wih_ref.dtype), wih_ref[...],
                        preferred_element_type=jnp.float32)
                + b_ref[...])

            def step(t, carry):
                h, c = carry
                gates = xg_ref[pl.ds(t, 1), :] + jnp.dot(
                    h.astype(whh_ref.dtype), whh_ref[...],
                    preferred_element_type=jnp.float32)        # (1, 4H)
                if wide_gates:
                    # H not lane-dense: 2 full-width transcendentals instead of
                    # 4 masked partial-vreg ones (4H == 128 -> one vreg each).
                    sg = jax.nn.sigmoid(gates)
                    tg = jnp.tanh(gates)
                    i_g = sg[:, 0 * H:1 * H]
                    f_g = sg[:, 1 * H:2 * H]
                    g_g = tg[:, 2 * H:3 * H]
                    o_g = sg[:, 3 * H:4 * H]
                else:
                    # H % 128 == 0: per-gate slices are already full vregs.
                    i_g = jax.nn.sigmoid(gates[:, 0 * H:1 * H])
                    f_g = jax.nn.sigmoid(gates[:, 1 * H:2 * H])
                    g_g = jnp.tanh(gates[:, 2 * H:3 * H])
                    o_g = jax.nn.sigmoid(gates[:, 3 * H:4 * H])
                c_new = f_g * c + i_g * g_g
                h_new = o_g * jnp.tanh(c_new)
                out_ref[pl.ds(t, 1), :] = h_new
                return (h_new, c_new)

            h0 = jnp.zeros((1, H), jnp.float32)
            c0 = jnp.zeros((1, H), jnp.float32)
            # Fully unroll the short, fixed-length recurrence (latency-bound).
            lax.fori_loop(0, seq_len, step, (h0, c0), unroll=True)

        # Layer 0 consumes the embedded inputs; layers 1..L-1 consume out_ref.
        lstm_layer(x_ref, layer_refs[0], layer_refs[1], layer_refs[2])
        for l in range(1, num_layers):
            lstm_layer(out_ref, layer_refs[3 * l], layer_refs[3 * l + 1],
                       layer_refs[3 * l + 2])

    return kernel


# ----------------------------------------------------------------------------
# Kernel 2: vocab projection + softmax, gridded over S tiles ("parallel").
# ----------------------------------------------------------------------------
def proj_softmax_kernel(h_ref, wout_ref, bout_ref, out_ref):
    logits = (jnp.dot(h_ref[...].astype(wout_ref.dtype), wout_ref[...],
                      preferred_element_type=jnp.float32)
              + bout_ref[...])                                   # (tS, V_pad)
    m = jnp.max(logits, axis=1, keepdims=True)
    e = jnp.exp(logits - m)
    denom = jnp.sum(e, axis=1, keepdims=True)
    out_ref[...] = e * pl.reciprocal(denom, approx=False)


# ----------------------------------------------------------------------------
# Wrapper
# ----------------------------------------------------------------------------
def lm_forward(token_seq, params, *, config, weight_dtype=jnp.float32,
               s_tile: int = 8):
    S = token_seq.shape[0]
    H = config['hidden']
    V = config['vocab_size']
    L = config['num_layers']

    S_pad = _round_up(S, s_tile)       # sublane-friendly time axis
    V_pad = _round_up(V, 128)          # lane-dense vocab axis

    # Embedding lookup (gather) stays in plain JAX glue; pad time axis with
    # zero rows (causal recurrence -> real timesteps are unaffected).
    x = jnp.take(params['embedding'], token_seq, axis=0).astype(jnp.float32)
    if S_pad != S:
        x = jnp.pad(x, ((0, S_pad - S), (0, 0)))

    lstm_args = [x]
    for l in range(L):
        lstm_args += [params[f'wih_{l}'].astype(weight_dtype),
                      params[f'whh_{l}'].astype(weight_dtype),
                      params[f'b_{l}']]

    vmem = pl.BlockSpec(memory_space=pltpu.MemorySpace.VMEM)
    wide_gates = (H % 128) != 0
    hstates = pl.pallas_call(
        make_lstm_kernel(L, S_pad, H, wide_gates),
        out_shape=jax.ShapeDtypeStruct((S_pad, H), jnp.float32),
        in_specs=[vmem] * len(lstm_args),
        out_specs=vmem,
        scratch_shapes=[pltpu.VMEM((S_pad, 4 * H), jnp.float32)],
    )(*lstm_args)

    # Pad the vocab projection to a lane-dense width (zero weight columns,
    # -inf bias -> padded probs are exactly 0 and get sliced off below).
    wout = params['wout'].astype(weight_dtype)          # (H, V)
    bout = params['bout']                               # (1, V), f32
    if V_pad != V:
        wout = jnp.pad(wout, ((0, 0), (0, V_pad - V)))
        bout = jnp.pad(bout, ((0, 0), (0, V_pad - V)), constant_values=_NEG_INF)

    # TODO(synk): for large real vocabularies on v7x (64 MiB VMEM), also tile
    # the vocab axis (~512-2048 lanes) with a two-pass/online softmax instead
    # of keeping the full (H, V_pad) weight block resident.
    grid = (S_pad // s_tile,)
    prob_padded = pl.pallas_call(
        proj_softmax_kernel,
        out_shape=jax.ShapeDtypeStruct((S_pad, V_pad), jnp.float32),
        grid=grid,
        in_specs=[pl.BlockSpec((s_tile, H), lambda i: (i, 0)),
                  pl.BlockSpec((H, V_pad), lambda i: (0, 0)),
                  pl.BlockSpec((1, V_pad), lambda i: (0, 0))],
        out_specs=pl.BlockSpec((s_tile, V_pad), lambda i: (i, 0)),
        compiler_params=pltpu.CompilerParams(
            dimension_semantics=("parallel",),
            vmem_limit_bytes=32 * 1024 * 1024),
    )(hstates, wout, bout)

    return prob_padded[:S, :V]


# ----------------------------------------------------------------------------
# Deterministic synthetic parameters (GloVe file loading replaced by random
# init) with the same shapes / init style as the PyTorch module.
# ----------------------------------------------------------------------------
def init_params(key, config):
    V = config['vocab_size']
    E = config['embedding']
    H = config['hidden']
    L = config['num_layers']
    bound = 1.0 / math.sqrt(H)

    keys = iter(jax.random.split(key, 4 + 4 * L))
    params = {}

    emb = jax.random.normal(next(keys), (V, E), jnp.float32)
    emb = emb.at[0].set(0.0)                       # [PAD]-style zero row
    emb = emb.at[1].set(jnp.mean(emb, axis=0))     # embedding[1] = mean(embedding)
    params['embedding'] = emb

    for l in range(L):
        in_dim = E if l == 0 else H
        w_ih = jax.random.uniform(next(keys), (4 * H, in_dim), jnp.float32,
                                  -bound, bound)
        w_hh = jax.random.uniform(next(keys), (4 * H, H), jnp.float32,
                                  -bound, bound)
        b_ih = jax.random.uniform(next(keys), (4 * H,), jnp.float32, -bound, bound)
        b_hh = jax.random.uniform(next(keys), (4 * H,), jnp.float32, -bound, bound)
        params[f'wih_{l}'] = w_ih.T                       # (in_dim, 4H)
        params[f'whh_{l}'] = w_hh.T                       # (H, 4H)
        params[f'b_{l}'] = (b_ih + b_hh).reshape(1, 4 * H)

    w_out = jax.random.uniform(next(keys), (V, H), jnp.float32, -bound, bound)
    b_out = jax.random.uniform(next(keys), (V,), jnp.float32, -bound, bound)
    params['wout'] = w_out.T                              # (H, V)
    params['bout'] = b_out.reshape(1, V)
    return params


def lm_reference(token_seq, params, config):
    """Pure-JAX f32 reference reproducing the torch forward semantics."""
    H = config['hidden']
    inp = params['embedding'][token_seq]
    for l in range(config['num_layers']):
        wih, whh, b = params[f'wih_{l}'], params[f'whh_{l}'], params[f'b_{l}']
        h = jnp.zeros((1, H), jnp.float32)
        c = jnp.zeros((1, H), jnp.float32)
        outs = []
        for t in range(inp.shape[0]):
            gates = inp[t:t + 1] @ wih + h @ whh + b
            i = jax.nn.sigmoid(gates[:, :H])
            f = jax.nn.sigmoid(gates[:, H:2 * H])
            g = jnp.tanh(gates[:, 2 * H:3 * H])
            o = jax.nn.sigmoid(gates[:, 3 * H:])
            c = f * c + i * g
            h = o * jnp.tanh(c)
            outs.append(h)
        inp = jnp.concatenate(outs, axis=0)
    logits = inp @ params['wout'] + params['bout']
    return jax.nn.softmax(logits, axis=1)


def _run_check(name, config, seq_len, key, weight_dtype, atol, rtol):
    k_tok, k_par = jax.random.split(key)
    token_seq = jax.random.randint(k_tok, (seq_len,), 0, config['vocab_size'],
                                   dtype=jnp.int32)
    params = init_params(k_par, config)

    prob = lm_forward(token_seq, params, config=config,
                      weight_dtype=weight_dtype)
    prob = jax.block_until_ready(prob)

    assert prob.shape == (seq_len, config['vocab_size']), name
    assert bool(jnp.allclose(jnp.sum(prob, axis=1), 1.0, atol=1e-3)), name

    ref = lm_reference(token_seq, params, config)
    err = float(jnp.max(jnp.abs(prob - ref)))
    assert bool(jnp.allclose(prob, ref, atol=atol, rtol=rtol)), (
        f"{name}: max|diff|={err}")


if __name__ == "__main__":
    key = jax.random.PRNGKey(0)
    k_a, k_b, k_c = jax.random.split(key, 3)

    # A: lane-dense hidden (H=128); vocab (200) and seq (13) are not multiples
    #    of 128 / 8, exercising the vocab- and time-padding paths.
    cfg_a = {'num_layers': 2, 'embedding': 64, 'hidden': 128, 'vocab_size': 200}
    _run_check("A/f32", cfg_a, seq_len=13, key=k_a,
               weight_dtype=jnp.float32, atol=2e-3, rtol=1e-3)

    # B: tiny non-lane-dense hidden (H=32) -> exercises the full-width
    #    sigmoid/tanh gate path (4H == 128 lanes == exactly one vreg).
    cfg_b = {'num_layers': 1, 'embedding': 32, 'hidden': 32, 'vocab_size': 64}
    _run_check("B/f32", cfg_b, seq_len=8, key=k_b,
               weight_dtype=jnp.float32, atol=2e-3, rtol=1e-3)

    # A with bf16 weights on the MXU (f32 accumulation, f32 gate/state math) —
    # the v5e/v6e-friendly path; looser tolerance vs the f32 reference.
    _run_check("A/bf16", cfg_a, seq_len=13, key=k_c,
               weight_dtype=jnp.bfloat16, atol=2e-2, rtol=2e-2)

    print("KERNEL_OK")
</pallas_src>

<mosaic_0001>
module attributes {stable_mosaic.version = 11 : i64} {
  func.func @kernel(%arg0: memref<16x64xf32, #tpu.memory_space<vmem>>, %arg1: memref<64x512xf32, #tpu.memory_space<vmem>>, %arg2: memref<128x512xf32, #tpu.memory_space<vmem>>, %arg3: memref<1x512xf32, #tpu.memory_space<vmem>>, %arg4: memref<128x512xf32, #tpu.memory_space<vmem>>, %arg5: memref<128x512xf32, #tpu.memory_space<vmem>>, %arg6: memref<1x512xf32, #tpu.memory_space<vmem>>, %arg7: memref<16x128xf32, #tpu.memory_space<vmem>>, %arg8: memref<16x512xf32, #tpu.memory_space<vmem>>) attributes {dimension_semantics = [], scalar_prefetch = 0 : i64, scratch_operands = 1 : i64, tpu.core_type = #tpu.core_type<tc>} {
    %c0 = arith.constant 0 : index
    %c0_0 = arith.constant 0 : index
    %0 = vector.load %arg0[%c0, %c0_0] : memref<16x64xf32, #tpu.memory_space<vmem>>, vector<16x64xf32>
    %c0_1 = arith.constant 0 : index
    %c0_2 = arith.constant 0 : index
    %1 = vector.load %arg1[%c0_1, %c0_2] : memref<64x512xf32, #tpu.memory_space<vmem>>, vector<64x512xf32>
    %cst = arith.constant dense<0.000000e+00> : vector<16x512xf32>
    %2 = tpu.matmul %0, %1, %cst {dimension_numbers = #tpu.dot_dimension_numbers<[1], [0], [0], [1], [0, 0, 1, 1], [], []>} : vector<16x64xf32>, vector<64x512xf32>, vector<16x512xf32> -> vector<16x512xf32>
    %c0_3 = arith.constant 0 : index
    %c0_4 = arith.constant 0 : index
    %3 = vector.load %arg3[%c0_3, %c0_4] : memref<1x512xf32, #tpu.memory_space<vmem>>, vector<1x512xf32>
    %4 = vector.broadcast %3 : vector<1x512xf32> to vector<16x512xf32>
    %5 = arith.addf %2, %4 : vector<16x512xf32>
    %c0_5 = arith.constant 0 : index
    %c0_6 = arith.constant 0 : index
    %6 = vector.load %arg8[%c0_5, %c0_6] : memref<16x512xf32, #tpu.memory_space<vmem>>, vector<16x512xf32>
    tpu.vector_store %arg8[%c0_5, %c0_6], %5 {strides = array<i32>} : memref<16x512xf32, #tpu.memory_space<vmem>>, vector<16x512xf32>,
    %cst_7 = arith.constant 0.000000e+00 : f32
    %7 = vector.broadcast %cst_7 : f32 to vector<1x128xf32>
    %cst_8 = arith.constant 0.000000e+00 : f32
    %8 = vector.broadcast %cst_8 : f32 to vector<1x128xf32>
    %c0_i32 = arith.constant 0 : i32
    %9 = arith.index_cast %c0_i32 : i32 to index
    %c0_9 = arith.constant 0 : index
    %10 = vector.load %arg8[%9, %c0_9] : memref<16x512xf32, #tpu.memory_space<vmem>>, vector<1x512xf32>
    %c0_10 = arith.constant 0 : index
    %c0_11 = arith.constant 0 : index
    %11 = vector.load %arg2[%c0_10, %c0_11] : memref<128x512xf32, #tpu.memory_space<vmem>>, vector<128x512xf32>
    %cst_12 = arith.constant dense<0.000000e+00> : vector<1x512xf32>
    %12 = tpu.matmul %7, %11, %cst_12 {dimension_numbers = #tpu.dot_dimension_numbers<[1], [0], [0], [1], [0, 0, 1, 1], [], []>} : vector<1x128xf32>, vector<128x512xf32>, vector<1x512xf32> -> vector<1x512xf32>
    %13 = arith.addf %10, %12 : vector<1x512xf32>
    %14 = vector.extract_strided_slice %13 {offsets = [0, 0], sizes = [1, 128], strides = [1, 1]} : vector<1x512xf32> to vector<1x128xf32>
    %15 = arith.negf %14 : vector<1x128xf32>
    %16 = math.exp %15 : vector<1x128xf32>
    %cst_13 = arith.constant 1.000000e+00 : f32
    %17 = vector.broadcast %cst_13 : f32 to vector<1x128xf32>
    %18 = arith.addf %17, %16 : vector<1x128xf32>
    %19 = arith.divf %17, %18 : vector<1x128xf32>
    %20 = vector.extract_strided_slice %13 {offsets = [0, 128], sizes = [1, 128], strides = [1, 1]} : vector<1x512xf32> to vector<1x128xf32>
    %21 = arith.negf %20 : vector<1x128xf32>
    %22 = math.exp %21 : vector<1x128xf32>
    %cst_14 = arith.constant 1.000000e+00 : f32
    %23 = vector.broadcast %cst_14 : f32 to vector<1x128xf32>
    %24 = arith.addf %23, %22 : vector<1x128xf32>
    %25 = arith.divf %23, %24 : vector<1x128xf32>
    %26 = vector.extract_strided_slice %13 {offsets = [0, 256], sizes = [1, 128], strides = [1, 1]} : vector<1x512xf32> to vector<1x128xf32>
    %27 = math.tanh %26 : vector<1x128xf32>
    %28 = vector.extract_strided_slice %13 {offsets = [0, 384], sizes = [1, 128], strides = [1, 1]} : vector<1x512xf32> to vector<1x128xf32>
    %29 = arith.negf %28 : vector<1x128xf32>
    %30 = math.exp %29 : vector<1x128xf32>
    %cst_15 = arith.constant 1.000000e+00 : f32
    %31 = vector.broadcast %cst_15 : f32 to vector<1x128xf32>
    %32 = arith.addf %31, %30 : vector<1x128xf32>
    %33 = arith.divf %31, %32 : vector<1x128xf32>
    %34 = arith.mulf %25, %8 : vector<1x128xf32>
    %35 = arith.mulf %19, %27 : vector<1x128xf32>
    %36 = arith.addf %34, %35 : vector<1x128xf32>
    %37 = math.tanh %36 : vector<1x128xf32>
    %38 = arith.mulf %33, %37 : vector<1x128xf32>
    %39 = arith.index_cast %c0_i32 : i32 to index
    %c0_16 = arith.constant 0 : index
    %40 = vector.load %arg7[%39, %c0_16] : memref<16x128xf32, #tpu.memory_space<vmem>>, vector<1x128xf32>
    tpu.vector_store %arg7[%39, %c0_16], %38 {strides = array<i32>} : memref<16x128xf32, #tpu.memory_space<vmem>>, vector<1x128xf32>,
    %c1_i32 = arith.constant 1 : i32
    %41 = arith.index_cast %c1_i32 : i32 to index
    %c0_17 = arith.constant 0 : index
    %42 = vector.load %arg8[%41, %c0_17] : memref<16x512xf32, #tpu.memory_space<vmem>>, vector<1x512xf32>
    %c0_18 = arith.constant 0 : index
    %c0_19 = arith.constant 0 : index
    %43 = vector.load %arg2[%c0_18, %c0_19] : memref<128x512xf32, #tpu.memory_space<vmem>>, vector<128x512xf32>
    %cst_20 = arith.constant dense<0.000000e+00> : vector<1x512xf32>
    %44 = tpu.matmul %38, %43, %cst_20 {dimension_numbers = #tpu.dot_dimension_numbers<[1], [0], [0], [1], [0, 0, 1, 1], [], []>} : vector<1x128xf32>, vector<128x512xf32>, vector<1x512xf32> -> vector<1x512xf32>
    %45 = arith.addf %42, %44 : vector<1x512xf32>
    %46 = vector.extract_strided_slice %45 {offsets = [0, 0], sizes = [1, 128], strides = [1, 1]} : vector<1x512xf32> to vector<1x128xf32>
    %47 = arith.negf %46 : vector<1x128xf32>
    %48 = math.exp %47 : vector<1x128xf32>
    %cst_21 = arith.constant 1.000000e+00 : f32
    %49 = vector.broadcast %cst_21 : f32 to vector<1x128xf32>
    %50 = arith.addf %49, %48 : vector<1x128xf32>
    %51 = arith.divf %49, %50 : vector<1x128xf32>
    %52 = vector.extract_strided_slice %45 {offsets = [0, 128], sizes = [1, 128], strides = [1, 1]} : vector<1x512xf32> to vector<1x128xf32>
    %53 = arith.negf %52 : vector<1x128xf32>
    %54 = math.exp %53 : vector<1x128xf32>
    %cst_22 = arith.constant 1.000000e+00 : f32
    %55 = vector.broadcast %cst_22 : f32 to vector<1x128xf32>
    %56 = arith.addf %55, %54 : vector<1x128xf32>
    %57 = arith.divf %55, %56 : vector<1x128xf32>
    %58 = vector.extract_strided_slice %45 {offsets = [0, 256], sizes = [1, 128], strides = [1, 1]} : vector<1x512xf32> to vector<1x128xf32>
    %59 = math.tanh %58 : vector<1x128xf32>
    %60 = vector.extract_strided_slice %45 {offsets = [0, 384], sizes = [1, 128], strides = [1, 1]} : vector<1x512xf32> to vector<1x128xf32>
    %61 = arith.negf %60 : vector<1x128xf32>
    %62 = math.exp %61 : vector<1x128xf32>
    %cst_23 = arith.constant 1.000000e+00 : f32
    %63 = vector.broadcast %cst_23 : f32 to vector<1x128xf32>
    %64 = arith.addf %63, %62 : vector<1x128xf32>
    %65 = arith.divf %63, %64 : vector<1x128xf32>
    %66 = arith.mulf %57, %36 : vector<1x128xf32>
    %67 = arith.mulf %51, %59 : vector<1x128xf32>
    %68 = arith.addf %66, %67 : vector<1x128xf32>
    %69 = math.tanh %68 : vector<1x128xf32>
    %70 = arith.mulf %65, %69 : vector<1x128xf32>
    %71 = arith.index_cast %c1_i32 : i32 to index
    %c0_24 = arith.constant 0 : index
    %72 = vector.load %arg7[%71, %c0_24] : memref<16x128xf32, #tpu.memory_space<vmem>>, vector<1x128xf32>
    tpu.vector_store %arg7[%71, %c0_24], %70 {strides = array<i32>} : memref<16x128xf32, #tpu.memory_space<vmem>>, vector<1x128xf32>,
    %c2_i32 = arith.constant 2 : i32
    %73 = arith.index_cast %c2_i32 : i32 to index
    %c0_25 = arith.constant 0 : index
    %74 = vector.load %arg8[%73, %c0_25] : memref<16x512xf32, #tpu.memory_space<vmem>>, vector<1x512xf32>
    %c0_26 = arith.constant 0 : index
    %c0_27 = arith.constant 0 : index
    %75 = vector.load %arg2[%c0_26, %c0_27] : memref<128x512xf32, #tpu.memory_space<vmem>>, vector<128x512xf32>
    %cst_28 = arith.constant dense<0.000000e+00> : vector<1x512xf32>
    %76 = tpu.matmul %70, %75, %cst_28 {dimension_numbers = #tpu.dot_dimension_numbers<[1], [0], [0], [1], [0, 0, 1, 1], [], []>} : vector<1x128xf32>, vector<128x512xf32>, vector<1x512xf32> -> vector<1x512xf32>
    %77 = arith.addf %74, %76 : vector<1x512xf32>
    %78 = vector.extract_strided_slice %77 {offsets = [0, 0], sizes = [1, 128], strides = [1, 1]} : vector<1x512xf32> to vector<1x128xf32>
    %79 = arith.negf %78 : vector<1x128xf32>
    %80 = math.exp %79 : vector<1x128xf32>
    %cst_29 = arith.constant 1.000000e+00 : f32
    %81 = vector.broadcast %cst_29 : f32 to vector<1x128xf32>
    %82 = arith.addf %81, %80 : vector<1x128xf32>
    %83 = arith.divf %81, %82 : vector<1x128xf32>
    %84 = vector.extract_strided_slice %77 {offsets = [0, 128], sizes = [1, 128], strides = [1, 1]} : vector<1x512xf32> to vector<1x128xf32>
    %85 = arith.negf %84 : vector<1x128xf32>
    %86 = math.exp %85 : vector<1x128xf32>
    %cst_30 = arith.constant 1.000000e+00 : f32
    %87 = vector.broadcast %cst_30 : f32 to vector<1x128xf32>
    %88 = arith.addf %87, %86 : vector<1x128xf32>
    %89 = arith.divf %87, %88 : vector<1x128xf32>
    %90 = vector.extract_strided_slice %77 {offsets = [0, 256], sizes = [1, 128], strides = [1, 1]} : vector<1x512xf32> to vector<1x128xf32>
    %91 = math.tanh %90 : vector<1x128xf32>
    %92 = vector.extract_strided_slice %77 {offsets = [0, 384], sizes = [1, 128], strides = [1, 1]} : vector<1x512xf32> to vector<1x128xf32>
    %93 = arith.negf %92 : vector<1x128xf32>
    %94 = math.exp %93 : vector<1x128xf32>
    %cst_31 = arith.constant 1.000000e+00 : f32
    %95 = vector.broadcast %cst_31 : f32 to vector<1x128xf32>
    %96 = arith.addf %95, %94 : vector<1x128xf32>
    %97 = arith.divf %95, %96 : vector<1x128xf32>
    %98 = arith.mulf %89, %68 : vector<1x128xf32>
    %99 = arith.mulf %83, %91 : vector<1x128xf32>
    %100 = arith.addf %98, %99 : vector<1x128xf32>
    %101 = math.tanh %100 : vector<1x128xf32>
    %102 = arith.mulf %97, %101 : vector<1x128xf32>
    %103 = arith.index_cast %c2_i32 : i32 to index
    %c0_32 = arith.constant 0 : index
    %104 = vector.load %arg7[%103, %c0_32] : memref<16x128xf32, #tpu.memory_space<vmem>>, vector<1x128xf32>
    tpu.vector_store %arg7[%103, %c0_32], %102 {strides = array<i32>} : memref<16x128xf32, #tpu.memory_space<vmem>>, vector<1x128xf32>,
    %c3_i32 = arith.constant 3 : i32
    %105 = arith.index_cast %c3_i32 : i32 to index
    %c0_33 = arith.constant 0 : index
    %106 = vector.load %arg8[%105, %c0_33] : memref<16x512xf32, #tpu.memory_space<vmem>>, vector<1x512xf32>
    %c0_34 = arith.constant 0 : index
    %c0_35 = arith.constant 0 : index
    %107 = vector.load %arg2[%c0_34, %c0_35] : memref<128x512xf32, #tpu.memory_space<vmem>>, vector<128x512xf32>
    %cst_36 = arith.constant dense<0.000000e+00> : vector<1x512xf32>
    %108 = tpu.matmul %102, %107, %cst_36 {dimension_numbers = #tpu.dot_dimension_numbers<[1], [0], [0], [1], [0, 0, 1, 1], [], []>} : vector<1x128xf32>, vector<128x512xf32>, vector<1x512xf32> -> vector<1x512xf32>
    %109 = arith.addf %106, %108 : vector<1x512xf32>
    %110 = vector.extract_strided_slice %109 {offsets = [0, 0], sizes = [1, 128], strides = [1, 1]} : vector<1x512xf32> to vector<1x128xf32>
    %111 = arith.negf %110 : vector<1x128xf32>
    %112 = math.exp %111 : vector<1x128xf32>
    %cst_37 = arith.constant 1.000000e+00 : f32
    %113 = vector.broadcast %cst_37 : f32 to vector<1x128xf32>
    %114 = arith.addf %113, %112 : vector<1x128xf32>
    %115 = arith.divf %113, %114 : vector<1x128xf32>
    %116 = vector.extract_strided_slice %109 {offsets = [0, 128], sizes = [1, 128], strides = [1, 1]} : vector<1x512xf32> to vector<1x128xf32>
    %117 = arith.negf %116 : vector<1x128xf32>
    %118 = math.exp %117 : vector<1x128xf32>
    %cst_38 = arith.constant 1.000000e+00 : f32
    %119 = vector.broadcast %cst_38 : f32 to vector<1x128xf32>
    %120 = arith.addf %119, %118 : vector<1x128xf32>
    %121 = arith.divf %119, %120 : vector<1x128xf32>
    %122 = vector.extract_strided_slice %109 {offsets = [0, 256], sizes = [1, 128], strides = [1, 1]} : vector<1x512xf32> to vector<1x128xf32>
    %123 = math.tanh %122 : vector<1x128xf32>
    %124 = vector.extract_strided_slice %109 {offsets = [0, 384], sizes = [1, 128], strides = [1, 1]} : vector<1x512xf32> to vector<1x128xf32>
    %125 = arith.negf %124 : vector<1x128xf32>
    %126 = math.exp %125 : vector<1x128xf32>
    %cst_39 = arith.constant 1.000000e+00 : f32
    %127 = vector.broadcast %cst_39 : f32 to vector<1x128xf32>
    %128 = arith.addf %127, %126 : vector<1x128xf32>
    %129 = arith.divf %127, %128 : vector<1x128xf32>
    %130 = arith.mulf %121, %100 : vector<1x128xf32>
    %131 = arith.mulf %115, %123 : vector<1x128xf32>
    %132 = arith.addf %130, %131 : vector<1x128xf32>
    %133 = math.tanh %132 : vector<1x128xf32>
    %134 = arith.mulf %129, %133 : vector<1x128xf32>
    %135 = arith.index_cast %c3_i32 : i32 to index
    %c0_40 = arith.constant 0 : index
    %136 = vector.load %arg7[%135, %c0_40] : memref<16x128xf32, #tpu.memory_space<vmem>>, vector<1x128xf32>
    tpu.vector_store %arg7[%135, %c0_40], %134 {strides = array<i32>} : memref<16x128xf32, #tpu.memory_space<vmem>>, vector<1x128xf32>,
    %c4_i32 = arith.constant 4 : i32
    %137 = arith.index_cast %c4_i32 : i32 to index
    %c0_41 = arith.constant 0 : index
    %138 = vector.load %arg8[%137, %c0_41] : memref<16x512xf32, #tpu.memory_space<vmem>>, vector<1x512xf32>
    %c0_42 = arith.constant 0 : index
    %c0_43 = arith.constant 0 : index
    %139 = vector.load %arg2[%c0_42, %c0_43] : memref<128x512xf32, #tpu.memory_space<vmem>>, vector<128x512xf32>
    %cst_44 = arith.constant dense<0.000000e+00> : vector<1x512xf32>
    %140 = tpu.matmul %134, %139, %cst_44 {dimension_numbers = #tpu.dot_dimension_numbers<[1], [0], [0], [1], [0, 0, 1, 1], [], []>} : vector<1x128xf32>, vector<128x512xf32>, vector<1x512xf32> -> vector<1x512xf32>
    %141 = arith.addf %138, %140 : vector<1x512xf32>
    %142 = vector.extract_strided_slice %141 {offsets = [0, 0], sizes = [1, 128], strides = [1, 1]} : vector<1x512xf32> to vector<1x128xf32>
    %143 = arith.negf %142 : vector<1x128xf32>
    %144 = math.exp %143 : vector<1x128xf32>
    %cst_45 = arith.constant 1.000000e+00 : f32
    %145 = vector.broadcast %cst_45 : f32 to vector<1x128xf32>
    %146 = arith.addf %145, %144 : vector<1x128xf32>
    %147 = arith.divf %145, %146 : vector<1x128xf32>
    %148 = vector.extract_strided_slice %141 {offsets = [0, 128], sizes = [1, 128], strides = [1, 1]} : vector<1x512xf32> to vector<1x128xf32>
    %149 = arith.negf %148 : vector<1x128xf32>
    %150 = math.exp %149 : vector<1x128xf32>
    %cst_46 = arith.constant 1.000000e+00 : f32
    %151 = vector.broadcast %cst_46 : f32 to vector<1x128xf32>
    %152 = arith.addf %151, %150 : vector<1x128xf32>
    %153 = arith.divf %151, %152 : vector<1x128xf32>
    %154 = vector.extract_strided_slice %141 {offsets = [0, 256], sizes = [1, 128], strides = [1, 1]} : vector<1x512xf32> to vector<1x128xf32>
    %155 = math.tanh %154 : vector<1x128xf32>
    %156 = vector.extract_strided_slice %141 {offsets = [0, 384], sizes = [1, 128], strides = [1, 1]} : vector<1x512xf32> to vector<1x128xf32>
    %157 = arith.negf %156 : vector<1x128xf32>
    %158 = math.exp %157 : vector<1x128xf32>
    %cst_47 = arith.constant 1.000000e+00 : f32
    %159 = vector.broadcast %cst_47 : f32 to vector<1x128xf32>
    %160 = arith.addf %159, %158 : vector<1x128xf32>
    %161 = arith.divf %159, %160 : vector<1x128xf32>
    %162 = arith.mulf %153, %132 : vector<1x128xf32>
    %163 = arith.mulf %147, %155 : vector<1x128xf32>
    %164 = arith.addf %162, %163 : vector<1x128xf32>
    %165 = math.tanh %164 : vector<1x128xf32>
    %166 = arith.mulf %161, %165 : vector<1x128xf32>
    %167 = arith.index_cast %c4_i32 : i32 to index
    %c0_48 = arith.constant 0 : index
    %168 = vector.load %arg7[%167, %c0_48] : memref<16x128xf32, #tpu.memory_space<vmem>>, vector<1x128xf32>
    tpu.vector_store %arg7[%167, %c0_48], %166 {strides = array<i32>} : memref<16x128xf32, #tpu.memory_space<vmem>>, vector<1x128xf32>,
    %c5_i32 = arith.constant 5 : i32
    %169 = arith.index_cast %c5_i32 : i32 to index
    %c0_49 = arith.constant 0 : index
    %170 = vector.load %arg8[%169, %c0_49] : memref<16x512xf32, #tpu.memory_space<vmem>>, vector<1x512xf32>
    %c0_50 = arith.constant 0 : index
    %c0_51 = arith.constant 0 : index
    %171 = vector.load %arg2[%c0_50, %c0_51] : memref<128x512xf32, #tpu.memory_space<vmem>>, vector<128x512xf32>
    %cst_52 = arith.constant dense<0.000000e+00> : vector<1x512xf32>
    %172 = tpu.matmul %166, %171, %cst_52 {dimension_numbers = #tpu.dot_dimension_numbers<[1], [0], [0], [1], [0, 0, 1, 1], [], []>} : vector<1x128xf32>, vector<128x512xf32>, vector<1x512xf32> -> vector<1x512xf32>
    %173 = arith.addf %170, %172 : vector<1x512xf32>
    %174 = vector.extract_strided_slice %173 {offsets = [0, 0], sizes = [1, 128], strides = [1, 1]} : vector<1x512xf32> to vector<1x128xf32>
    %175 = arith.negf %174 : vector<1x128xf32>
    %176 = math.exp %175 : vector<1x128xf32>
    %cst_53 = arith.constant 1.000000e+00 : f32
    %177 = vector.broadcast %cst_53 : f32 to vector<1x128xf32>
    %178 = arith.addf %177, %176 : vector<1x128xf32>
    %179 = arith.divf %177, %178 : vector<1x128xf32>
    %180 = vector.extract_strided_slice %173 {offsets = [0, 128], sizes = [1, 128], strides = [1, 1]} : vector<1x512xf32> to vector<1x128xf32>
    %181 = arith.negf %180 : vector<1x128xf32>
    %182 = math.exp %181 : vector<1x128xf32>
    %cst_54 = arith.constant 1.000000e+00 : f32
    %183 = vector.broadcast %cst_54 : f32 to vector<1x128xf32>
    %184 = arith.addf %183, %182 : vector<1x128xf32>
    %185 = arith.divf %183, %184 : vector<1x128xf32>
    %186 = vector.extract_strided_slice %173 {offsets = [0, 256], sizes = [1, 128], strides = [1, 1]} : vector<1x512xf32> to vector<1x128xf32>
    %187 = math.tanh %186 : vector<1x128xf32>
    %188 = vector.extract_strided_slice %173 {offsets = [0, 384], sizes = [1, 128], strides = [1, 1]} : vector<1x512xf32> to vector<1x128xf32>
    %189 = arith.negf %188 : vector<1x128xf32>
    %190 = math.exp %189 : vector<1x128xf32>
    %cst_55 = arith.constant 1.000000e+00 : f32
    %191 = vector.broadcast %cst_55 : f32 to vector<1x128xf32>
    %192 = arith.addf %191, %190 : vector<1x128xf32>
    %193 = arith.divf %191, %192 : vector<1x128xf32>
    %194 = arith.mulf %185, %164 : vector<1x128xf32>
    %195 = arith.mulf %179, %187 : vector<1x128xf32>
    %196 = arith.addf %194, %195 : vector<1x128xf32>
    %197 = math.tanh %196 : vector<1x128xf32>
    %198 = arith.mulf %193, %197 : vector<1x128xf32>
    %199 = arith.index_cast %c5_i32 : i32 to index
    %c0_56 = arith.constant 0 : index
    %200 = vector.load %arg7[%199, %c0_56] : memref<16x128xf32, #tpu.memory_space<vmem>>, vector<1x128xf32>
    tpu.vector_store %arg7[%199, %c0_56], %198 {strides = array<i32>} : memref<16x128xf32, #tpu.memory_space<vmem>>, vector<1x128xf32>,
    %c6_i32 = arith.constant 6 : i32
    %201 = arith.index_cast %c6_i32 : i32 to index
    %c0_57 = arith.constant 0 : index
    %202 = vector.load %arg8[%201, %c0_57] : memref<16x512xf32, #tpu.memory_space<vmem>>, vector<1x512xf32>
    %c0_58 = arith.constant 0 : index
    %c0_59 = arith.constant 0 : index
    %203 = vector.load %arg2[%c0_58, %c0_59] : memref<128x512xf32, #tpu.memory_space<vmem>>, vector<128x512xf32>
    %cst_60 = arith.constant dense<0.000000e+00> : vector<1x512xf32>
    %204 = tpu.matmul %198, %203, %cst_60 {dimension_numbers = #tpu.dot_dimension_numbers<[1], [0], [0], [1], [0, 0, 1, 1], [], []>} : vector<1x128xf32>, vector<128x512xf32>, vector<1x512xf32> -> vector<1x512xf32>
    %205 = arith.addf %202, %204 : vector<1x512xf32>
    %206 = vector.extract_strided_slice %205 {offsets = [0, 0], sizes = [1, 128], strides = [1, 1]} : vector<1x512xf32> to vector<1x128xf32>
    %207 = arith.negf %206 : vector<1x128xf32>
    %208 = math.exp %207 : vector<1x128xf32>
    %cst_61 = arith.constant 1.000000e+00 : f32
    %209 = vector.broadcast %cst_61 : f32 to vector<1x128xf32>
    %210 = arith.addf %209, %208 : vector<1x128xf32>
    %211 = arith.divf %209, %210 : vector<1x128xf32>
    %212 = vector.extract_strided_slice %205 {offsets = [0, 128], sizes = [1, 128], strides = [1, 1]} : vector<1x512xf32> to vector<1x128xf32>
    %213 = arith.negf %212 : vector<1x128xf32>
    %214 = math.exp %213 : vector<1x128xf32>
    %cst_62 = arith.constant 1.000000e+00 : f32
    %215 = vector.broadcast %cst_62 : f32 to vector<1x128xf32>
    %216 = arith.addf %215, %214 : vector<1x128xf32>
    %217 = arith.divf %215, %216 : vector<1x128xf32>
    %218 = vector.extract_strided_slice %205 {offsets = [0, 256], sizes = [1, 128], strides = [1, 1]} : vector<1x512xf32> to vector<1x128xf32>
    %219 = math.tanh %218 : vector<1x128xf32>
    %220 = vector.extract_strided_slice %205 {offsets = [0, 384], sizes = [1, 128], strides = [1, 1]} : vector<1x512xf32> to vector<1x128xf32>
    %221 = arith.negf %220 : vector<1x128xf32>
    %222 = math.exp %221 : vector<1x128xf32>
    %cst_63 = arith.constant 1.000000e+00 : f32
    %223 = vector.broadcast %cst_63 : f32 to vector<1x128xf32>
    %224 = arith.addf %223, %222 : vector<1x128xf32>
    %225 = arith.divf %223, %224 : vector<1x128xf32>
    %226 = arith.mulf %217, %196 : vector<1x128xf32>
    %227 = arith.mulf %211, %219 : vector<1x128xf32>
    %228 = arith.addf %226, %227 : vector<1x128xf32>
    %229 = math.tanh %228 : vector<1x128xf32>
    %230 = arith.mulf %225, %229 : vector<1x128xf32>
    %231 = arith.index_cast %c6_i32 : i32 to index
    %c0_64 = arith.constant 0 : index
    %232 = vector.load %arg7[%231, %c0_64] : memref<16x128xf32, #tpu.memory_space<vmem>>, vector<1x128xf32>
    tpu.vector_store %arg7[%231, %c0_64], %230 {strides = array<i32>} : memref<16x128xf32, #tpu.memory_space<vmem>>, vector<1x128xf32>,
    %c7_i32 = arith.constant 7 : i32
    %233 = arith.index_cast %c7_i32 : i32 to index
    %c0_65 = arith.constant 0 : index
    %234 = vector.load %arg8[%233, %c0_65] : memref<16x512xf32, #tpu.memory_space<vmem>>, vector<1x512xf32>
    %c0_66 = arith.constant 0 : index
    %c0_67 = arith.constant 0 : index
    %235 = vector.load %arg2[%c0_66, %c0_67] : memref<128x512xf32, #tpu.memory_space<vmem>>, vector<128x512xf32>
    %cst_68 = arith.constant dense<0.000000e+00> : vector<1x512xf32>
    %236 = tpu.matmul %230, %235, %cst_68 {dimension_numbers = #tpu.dot_dimension_numbers<[1], [0], [0], [1], [0, 0, 1, 1], [], []>} : vector<1x128xf32>, vector<128x512xf32>, vector<1x512xf32> -> vector<1x512xf32>
    %237 = arith.addf %234, %236 : vector<1x512xf32>
    %238 = vector.extract_strided_slice %237 {offsets = [0, 0], sizes = [1, 128], strides = [1, 1]} : vector<1x512xf32> to vector<1x128xf32>
    %239 = arith.negf %238 : vector<1x128xf32>
    %240 = math.exp %239 : vector<1x128xf32>
    %cst_69 = arith.constant 1.000000e+00 : f32
    %241 = vector.broadcast %cst_69 : f32 to vector<1x128xf32>
    %242 = arith.addf %241, %240 : vector<1x128xf32>
    %243 = arith.divf %241, %242 : vector<1x128xf32>
    %244 = vector.extract_strided_slice %237 {offsets = [0, 128], sizes = [1, 128], strides = [1, 1]} : vector<1x512xf32> to vector<1x128xf32>
    %245 = arith.negf %244 : vector<1x128xf32>
    %246 = math.exp %245 : vector<1x128xf32>
    %cst_70 = arith.constant 1.000000e+00 : f32
    %247 = vector.broadcast %cst_70 : f32 to vector<1x128xf32>
    %248 = arith.addf %247, %246 : vector<1x128xf32>
    %249 = arith.divf %247, %248 : vector<1x128xf32>
    %250 = vector.extract_strided_slice %237 {offsets = [0, 256], sizes = [1, 128], strides = [1, 1]} : vector<1x512xf32> to vector<1x128xf32>
    %251 = math.tanh %250 : vector<1x128xf32>
    %252 = vector.extract_strided_slice %237 {offsets = [0, 384], sizes = [1, 128], strides = [1, 1]} : vector<1x512xf32> to vector<1x128xf32>
    %253 = arith.negf %252 : vector<1x128xf32>
    %254 = math.exp %253 : vector<1x128xf32>
    %cst_71 = arith.constant 1.000000e+00 : f32
    %255 = vector.broadcast %cst_71 : f32 to vector<1x128xf32>
    %256 = arith.addf %255, %254 : vector<1x128xf32>
    %257 = arith.divf %255, %256 : vector<1x128xf32>
    %258 = arith.mulf %249, %228 : vector<1x128xf32>
    %259 = arith.mulf %243, %251 : vector<1x128xf32>
    %260 = arith.addf %258, %259 : vector<1x128xf32>
    %261 = math.tanh %260 : vector<1x128xf32>
    %262 = arith.mulf %257, %261 : vector<1x128xf32>
    %263 = arith.index_cast %c7_i32 : i32 to index
    %c0_72 = arith.constant 0 : index
    %264 = vector.load %arg7[%263, %c0_72] : memref<16x128xf32, #tpu.memory_space<vmem>>, vector<1x128xf32>
    tpu.vector_store %arg7[%263, %c0_72], %262 {strides = array<i32>} : memref<16x128xf32, #tpu.memory_space<vmem>>, vector<1x128xf32>,
    %c8_i32 = arith.constant 8 : i32
    %265 = arith.index_cast %c8_i32 : i32 to index
    %c0_73 = arith.constant 0 : index
    %266 = vector.load %arg8[%265, %c0_73] : memref<16x512xf32, #tpu.memory_space<vmem>>, vector<1x512xf32>
    %c0_74 = arith.constant 0 : index
    %c0_75 = arith.constant 0 : index
    %267 = vector.load %arg2[%c0_74, %c0_75] : memref<128x512xf32, #tpu.memory_space<vmem>>, vector<128x512xf32>
    %cst_76 = arith.constant dense<0.000000e+00> : vector<1x512xf32>
    %268 = tpu.matmul %262, %267, %cst_76 {dimension_numbers = #tpu.dot_dimension_numbers<[1], [0], [0], [1], [0, 0, 1, 1], [], []>} : vector<1x128xf32>, vector<128x512xf32>, vector<1x512xf32> -> vector<1x512xf32>
    %269 = arith.addf %266, %268 : vector<1x512xf32>
    %270 = vector.extract_strided_slice %269 {offsets = [0, 0], sizes = [1, 128], strides = [1, 1]} : vector<1x512xf32> to vector<1x128xf32>
    %271 = arith.negf %270 : vector<1x128xf32>
    %272 = math.exp %271 : vector<1x128xf32>
    %cst_77 = arith.constant 1.000000e+00 : f32
    %273 = vector.broadcast %cst_77 : f32 to vector<1x128xf32>
    %274 = arith.addf %273, %272 : vector<1x128xf32>
    %275 = arith.divf %273, %274 : vector<1x128xf32>
    %276 = vector.extract_strided_slice %269 {offsets = [0, 128], sizes = [1, 128], strides = [1, 1]} : vector<1x512xf32> to vector<1x128xf32>
    %277 = arith.negf %276 : vector<1x128xf32>
    %278 = math.exp %277 : vector<1x128xf32>
    %cst_78 = arith.constant 1.000000e+00 : f32
    %279 = vector.broadcast %cst_78 : f32 to vector<1x128xf32>
    %280 = arith.addf %279, %278 : vector<1x128xf32>
    %281 = arith.divf %279, %280 : vector<1x128xf32>
    %282 = vector.extract_strided_slice %269 {offsets = [0, 256], sizes = [1, 128], strides = [1, 1]} : vector<1x512xf32> to vector<1x128xf32>
    %283 = math.tanh %282 : vector<1x128xf32>
    %284 = vector.extract_strided_slice %269 {offsets = [0, 384], sizes = [1, 128], strides = [1, 1]} : vector<1x512xf32> to vector<1x128xf32>
    %285 = arith.negf %284 : vector<1x128xf32>
    %286 = math.exp %285 : vector<1x128xf32>
    %cst_79 = arith.constant 1.000000e+00 : f32
    %287 = vector.broadcast %cst_79 : f32 to vector<1x128xf32>
    %288 = arith.addf %287, %286 : vector<1x128xf32>
    %289 = arith.divf %287, %288 : vector<1x128xf32>
    %290 = arith.mulf %281, %260 : vector<1x128xf32>
    %291 = arith.mulf %275, %283 : vector<1x128xf32>
    %292 = arith.addf %290, %291 : vector<1x128xf32>
    %293 = math.tanh %292 : vector<1x128xf32>
    %294 = arith.mulf %289, %293 : vector<1x128xf32>
    %295 = arith.index_cast %c8_i32 : i32 to index
    %c0_80 = arith.constant 0 : index
    %296 = vector.load %arg7[%295, %c0_80] : memref<16x128xf32, #tpu.memory_space<vmem>>, vector<1x128xf32>
    tpu.vector_store %arg7[%295, %c0_80], %294 {strides = array<i32>} : memref<16x128xf32, #tpu.memory_space<vmem>>, vector<1x128xf32>,
    %c9_i32 = arith.constant 9 : i32
    %297 = arith.index_cast %c9_i32 : i32 to index
    %c0_81 = arith.constant 0 : index
    %298 = vector.load %arg8[%297, %c0_81] : memref<16x512xf32, #tpu.memory_space<vmem>>, vector<1x512xf32>
    %c0_82 = arith.constant 0 : index
    %c0_83 = arith.constant 0 : index
    %299 = vector.load %arg2[%c0_82, %c0_83] : memref<128x512xf32, #tpu.memory_space<vmem>>, vector<128x512xf32>
    %cst_84 = arith.constant dense<0.000000e+00> : vector<1x512xf32>
    %300 = tpu.matmul %294, %299, %cst_84 {dimension_numbers = #tpu.dot_dimension_numbers<[1], [0], [0], [1], [0, 0, 1, 1], [], []>} : vector<1x128xf32>, vector<128x512xf32>, vector<1x512xf32> -> vector<1x512xf32>
    %301 = arith.addf %298, %300 : vector<1x512xf32>
    %302 = vector.extract_strided_slice %301 {offsets = [0, 0], sizes = [1, 128], strides = [1, 1]} : vector<1x512xf32> to vector<1x128xf32>
    %303 = arith.negf %302 : vector<1x128xf32>
    %304 = math.exp %303 : vector<1x128xf32>
    %cst_85 = arith.constant 1.000000e+00 : f32
    %305 = vector.broadcast %cst_85 : f32 to vector<1x128xf32>
    %306 = arith.addf %305, %304 : vector<1x128xf32>
    %307 = arith.divf %305, %306 : vector<1x128xf32>
    %308 = vector.extract_strided_slice %301 {offsets = [0, 128], sizes = [1, 128], strides = [1, 1]} : vector<1x512xf32> to vector<1x128xf32>
    %309 = arith.negf %308 : vector<1x128xf32>
    %310 = math.exp %309 : vector<1x128xf32>
    %cst_86 = arith.constant 1.000000e+00 : f32
    %311 = vector.broadcast %cst_86 : f32 to vector<1x128xf32>
    %312 = arith.addf %311, %310 : vector<1x128xf32>
    %313 = arith.divf %311, %312 : vector<1x128xf32>
    %314 = vector.extract_strided_slice %301 {offsets = [0, 256], sizes = [1, 128], strides = [1, 1]} : vector<1x512xf32> to vector<1x128xf32>
    %315 = math.tanh %314 : vector<1x128xf32>
    %316 = vector.extract_strided_slice %301 {offsets = [0, 384], sizes = [1, 128], strides = [1, 1]} : vector<1x512xf32> to vector<1x128xf32>
    %317 = arith.negf %316 : vector<1x128xf32>
    %318 = math.exp %317 : vector<1x128xf32>
    %cst_87 = arith.constant 1.000000e+00 : f32
    %319 = vector.broadcast %cst_87 : f32 to vector<1x128xf32>
    %320 = arith.addf %319, %318 : vector<1x128xf32>
    %321 = arith.divf %319, %320 : vector<1x128xf32>
    %322 = arith.mulf %313, %292 : vector<1x128xf32>
    %323 = arith.mulf %307, %315 : vector<1x128xf32>
    %324 = arith.addf %322, %323 : vector<1x128xf32>
    %325 = math.tanh %324 : vector<1x128xf32>
    %326 = arith.mulf %321, %325 : vector<1x128xf32>
    %327 = arith.index_cast %c9_i32 : i32 to index
    %c0_88 = arith.constant 0 : index
    %328 = vector.load %arg7[%327, %c0_88] : memref<16x128xf32, #tpu.memory_space<vmem>>, vector<1x128xf32>
    tpu.vector_store %arg7[%327, %c0_88], %326 {strides = array<i32>} : memref<16x128xf32, #tpu.memory_space<vmem>>, vector<1x128xf32>,
    %c10_i32 = arith.constant 10 : i32
    %329 = arith.index_cast %c10_i32 : i32 to index
    %c0_89 = arith.constant 0 : index
    %330 = vector.load %arg8[%329, %c0_89] : memref<16x512xf32, #tpu.memory_space<vmem>>, vector<1x512xf32>
    %c0_90 = arith.constant 0 : index
    %c0_91 = arith.constant 0 : index
    %331 = vector.load %arg2[%c0_90, %c0_91] : memref<128x512xf32, #tpu.memory_space<vmem>>, vector<128x512xf32>
    %cst_92 = arith.constant dense<0.000000e+00> : vector<1x512xf32>
    %332 = tpu.matmul %326, %331, %cst_92 {dimension_numbers = #tpu.dot_dimension_numbers<[1], [0], [0], [1], [0, 0, 1, 1], [], []>} : vector<1x128xf32>, vector<128x512xf32>, vector<1x512xf32> -> vector<1x512xf32>
    %333 = arith.addf %330, %332 : vector<1x512xf32>
    %334 = vector.extract_strided_slice %333 {offsets = [0, 0], sizes = [1, 128], strides = [1, 1]} : vector<1x512xf32> to vector<1x128xf32>
    %335 = arith.negf %334 : vector<1x128xf32>
    %336 = math.exp %335 : vector<1x128xf32>
    %cst_93 = arith.constant 1.000000e+00 : f32
    %337 = vector.broadcast %cst_93 : f32 to vector<1x128xf32>
    %338 = arith.addf %337, %336 : vector<1x128xf32>
    %339 = arith.divf %337, %338 : vector<1x128xf32>
    %340 = vector.extract_strided_slice %333 {offsets = [0, 128], sizes = [1, 128], strides = [1, 1]} : vector<1x512xf32> to vector<1x128xf32>
    %341 = arith.negf %340 : vector<1x128xf32>
    %342 = math.exp %341 : vector<1x128xf32>
    %cst_94 = arith.constant 1.000000e+00 : f32
    %343 = vector.broadcast %cst_94 : f32 to vector<1x128xf32>
    %344 = arith.addf %343, %342 : vector<1x128xf32>
    %345 = arith.divf %343, %344 : vector<1x128xf32>
    %346 = vector.extract_strided_slice %333 {offsets = [0, 256], sizes = [1, 128], strides = [1, 1]} : vector<1x512xf32> to vector<1x128xf32>
    %347 = math.tanh %346 : vector<1x128xf32>
    %348 = vector.extract_strided_slice %333 {offsets = [0, 384], sizes = [1, 128], strides = [1, 1]} : vector<1x512xf32> to vector<1x128xf32>
    %349 = arith.negf %348 : vector<1x128xf32>
    %350 = math.exp %349 : vector<1x128xf32>
    %cst_95 = arith.constant 1.000000e+00 : f32
    %351 = vector.broadcast %cst_95 : f32 to vector<1x128xf32>
    %352 = arith.addf %351, %350 : vector<1x128xf32>
    %353 = arith.divf %351, %352 : vector<1x128xf32>
    %354 = arith.mulf %345, %324 : vector<1x128xf32>
    %355 = arith.mulf %339, %347 : vector<1x128xf32>
    %356 = arith.addf %354, %355 : vector<1x128xf32>
    %357 = math.tanh %356 : vector<1x128xf32>
    %358 = arith.mulf %353, %357 : vector<1x128xf32>
    %359 = arith.index_cast %c10_i32 : i32 to index
    %c0_96 = arith.constant 0 : index
    %360 = vector.load %arg7[%359, %c0_96] : memref<16x128xf32, #tpu.memory_space<vmem>>, vector<1x128xf32>
    tpu.vector_store %arg7[%359, %c0_96], %358 {strides = array<i32>} : memref<16x128xf32, #tpu.memory_space<vmem>>, vector<1x128xf32>,
    %c11_i32 = arith.constant 11 : i32
    %361 = arith.index_cast %c11_i32 : i32 to index
    %c0_97 = arith.constant 0 : index
    %362 = vector.load %arg8[%361, %c0_97] : memref<16x512xf32, #tpu.memory_space<vmem>>, vector<1x512xf32>
    %c0_98 = arith.constant 0 : index
    %c0_99 = arith.constant 0 : index
    %363 = vector.load %arg2[%c0_98, %c0_99] : memref<128x512xf32, #tpu.memory_space<vmem>>, vector<128x512xf32>
    %cst_100 = arith.constant dense<0.000000e+00> : vector<1x512xf32>
    %364 = tpu.matmul %358, %363, %cst_100 {dimension_numbers = #tpu.dot_dimension_numbers<[1], [0], [0], [1], [0, 0, 1, 1], [], []>} : vector<1x128xf32>, vector<128x512xf32>, vector<1x512xf32> -> vector<1x512xf32>
    %365 = arith.addf %362, %364 : vector<1x512xf32>
    %366 = vector.extract_strided_slice %365 {offsets = [0, 0], sizes = [1, 128], strides = [1, 1]} : vector<1x512xf32> to vector<1x128xf32>
    %367 = arith.negf %366 : vector<1x128xf32>
    %368 = math.exp %367 : vector<1x128xf32>
    %cst_101 = arith.constant 1.000000e+00 : f32
    %369 = vector.broadcast %cst_101 : f32 to vector<1x128xf32>
    %370 = arith.addf %369, %368 : vector<1x128xf32>
    %371 = arith.divf %369, %370 : vector<1x128xf32>
    %372 = vector.extract_strided_slice %365 {offsets = [0, 128], sizes = [1, 128], strides = [1, 1]} : vector<1x512xf32> to vector<1x128xf32>
    %373 = arith.negf %372 : vector<1x128xf32>
    %374 = math.exp %373 : vector<1x128xf32>
    %cst_102 = arith.constant 1.000000e+00 : f32
    %375 = vector.broadcast %cst_102 : f32 to vector<1x128xf32>
    %376 = arith.addf %375, %374 : vector<1x128xf32>
    %377 = arith.divf %375, %376 : vector<1x128xf32>
    %378 = vector.extract_strided_slice %365 {offsets = [0, 256], sizes = [1, 128], strides = [1, 1]} : vector<1x512xf32> to vector<1x128xf32>
    %379 = math.tanh %378 : vector<1x128xf32>
    %380 = vector.extract_strided_slice %365 {offsets = [0, 384], sizes = [1, 128], strides = [1, 1]} : vector<1x512xf32> to vector<1x128xf32>
    %381 = arith.negf %380 : vector<1x128xf32>
    %382 = math.exp %381 : vector<1x128xf32>
    %cst_103 = arith.constant 1.000000e+00 : f32
    %383 = vector.broadcast %cst_103 : f32 to vector<1x128xf32>
    %384 = arith.addf %383, %382 : vector<1x128xf32>
    %385 = arith.divf %383, %384 : vector<1x128xf32>
    %386 = arith.mulf %377, %356 : vector<1x128xf32>
    %387 = arith.mulf %371, %379 : vector<1x128xf32>
    %388 = arith.addf %386, %387 : vector<1x128xf32>
    %389 = math.tanh %388 : vector<1x128xf32>
    %390 = arith.mulf %385, %389 : vector<1x128xf32>
    %391 = arith.index_cast %c11_i32 : i32 to index
    %c0_104 = arith.constant 0 : index
    %392 = vector.load %arg7[%391, %c0_104] : memref<16x128xf32, #tpu.memory_space<vmem>>, vector<1x128xf32>
    tpu.vector_store %arg7[%391, %c0_104], %390 {strides = array<i32>} : memref<16x128xf32, #tpu.memory_space<vmem>>, vector<1x128xf32>,
    %c12_i32 = arith.constant 12 : i32
    %393 = arith.index_cast %c12_i32 : i32 to index
    %c0_105 = arith.constant 0 : index
    %394 = vector.load %arg8[%393, %c0_105] : memref<16x512xf32, #tpu.memory_space<vmem>>, vector<1x512xf32>
    %c0_106 = arith.constant 0 : index
    %c0_107 = arith.constant 0 : index
    %395 = vector.load %arg2[%c0_106, %c0_107] : memref<128x512xf32, #tpu.memory_space<vmem>>, vector<128x512xf32>
    %cst_108 = arith.constant dense<0.000000e+00> : vector<1x512xf32>
    %396 = tpu.matmul %390, %395, %cst_108 {dimension_numbers = #tpu.dot_dimension_numbers<[1], [0], [0], [1], [0, 0, 1, 1], [], []>} : vector<1x128xf32>, vector<128x512xf32>, vector<1x512xf32> -> vector<1x512xf32>
    %397 = arith.addf %394, %396 : vector<1x512xf32>
    %398 = vector.extract_strided_slice %397 {offsets = [0, 0], sizes = [1, 128], strides = [1, 1]} : vector<1x512xf32> to vector<1x128xf32>
    %399 = arith.negf %398 : vector<1x128xf32>
    %400 = math.exp %399 : vector<1x128xf32>
    %cst_109 = arith.constant 1.000000e+00 : f32
    %401 = vector.broadcast %cst_109 : f32 to vector<1x128xf32>
    %402 = arith.addf %401, %400 : vector<1x128xf32>
    %403 = arith.divf %401, %402 : vector<1x128xf32>
    %404 = vector.extract_strided_slice %397 {offsets = [0, 128], sizes = [1, 128], strides = [1, 1]} : vector<1x512xf32> to vector<1x128xf32>
    %405 = arith.negf %404 : vector<1x128xf32>
    %406 = math.exp %405 : vector<1x128xf32>
    %cst_110 = arith.constant 1.000000e+00 : f32
    %407 = vector.broadcast %cst_110 : f32 to vector<1x128xf32>
    %408 = arith.addf %407, %406 : vector<1x128xf32>
    %409 = arith.divf %407, %408 : vector<1x128xf32>
    %410 = vector.extract_strided_slice %397 {offsets = [0, 256], sizes = [1, 128], strides = [1, 1]} : vector<1x512xf32> to vector<1x128xf32>
    %411 = math.tanh %410 : vector<1x128xf32>
    %412 = vector.extract_strided_slice %397 {offsets = [0, 384], sizes = [1, 128], strides = [1, 1]} : vector<1x512xf32> to vector<1x128xf32>
    %413 = arith.negf %412 : vector<1x128xf32>
    %414 = math.exp %413 : vector<1x128xf32>
    %cst_111 = arith.constant 1.000000e+00 : f32
    %415 = vector.broadcast %cst_111 : f32 to vector<1x128xf32>
    %416 = arith.addf %415, %414 : vector<1x128xf32>
    %417 = arith.divf %415, %416 : vector<1x128xf32>
    %418 = arith.mulf %409, %388 : vector<1x128xf32>
    %419 = arith.mulf %403, %411 : vector<1x128xf32>
    %420 = arith.addf %418, %419 : vector<1x128xf32>
    %421 = math.tanh %420 : vector<1x128xf32>
    %422 = arith.mulf %417, %421 : vector<1x128xf32>
    %423 = arith.index_cast %c12_i32 : i32 to index
    %c0_112 = arith.constant 0 : index
    %424 = vector.load %arg7[%423, %c0_112] : memref<16x128xf32, #tpu.memory_space<vmem>>, vector<1x128xf32>
    tpu.vector_store %arg7[%423, %c0_112], %422 {strides = array<i32>} : memref<16x128xf32, #tpu.memory_space<vmem>>, vector<1x128xf32>,
    %c13_i32 = arith.constant 13 : i32
    %425 = arith.index_cast %c13_i32 : i32 to index
    %c0_113 = arith.constant 0 : index
    %426 = vector.load %arg8[%425, %c0_113] : memref<16x512xf32, #tpu.memory_space<vmem>>, vector<1x512xf32>
    %c0_114 = arith.constant 0 : index
    %c0_115 = arith.constant 0 : index
    %427 = vector.load %arg2[%c0_114, %c0_115] : memref<128x512xf32, #tpu.memory_space<vmem>>, vector<128x512xf32>
    %cst_116 = arith.constant dense<0.000000e+00> : vector<1x512xf32>
    %428 = tpu.matmul %422, %427, %cst_116 {dimension_numbers = #tpu.dot_dimension_numbers<[1], [0], [0], [1], [0, 0, 1, 1], [], []>} : vector<1x128xf32>, vector<128x512xf32>, vector<1x512xf32> -> vector<1x512xf32>
    %429 = arith.addf %426, %428 : vector<1x512xf32>
    %430 = vector.extract_strided_slice %429 {offsets = [0, 0], sizes = [1, 128], strides = [1, 1]} : vector<1x512xf32> to vector<1x128xf32>
    %431 = arith.negf %430 : vector<1x128xf32>
    %432 = math.exp %431 : vector<1x128xf32>
    %cst_117 = arith.constant 1.000000e+00 : f32
    %433 = vector.broadcast %cst_117 : f32 to vector<1x128xf32>
    %434 = arith.addf %433, %432 : vector<1x128xf32>
    %435 = arith.divf %433, %434 : vector<1x128xf32>
    %436 = vector.extract_strided_slice %429 {offsets = [0, 128], sizes = [1, 128], strides = [1, 1]} : vector<1x512xf32> to vector<1x128xf32>
    %437 = arith.negf %436 : vector<1x128xf32>
    %438 = math.exp %437 : vector<1x128xf32>
    %cst_118 = arith.constant 1.000000e+00 : f32
    %439 = vector.broadcast %cst_118 : f32 to vector<1x128xf32>
    %440 = arith.addf %439, %438 : vector<1x128xf32>
    %441 = arith.divf %439, %440 : vector<1x128xf32>
    %442 = vector.extract_strided_slice %429 {offsets = [0, 256], sizes = [1, 128], strides = [1, 1]} : vector<1x512xf32> to vector<1x128xf32>
    %443 = math.tanh %442 : vector<1x128xf32>
    %444 = vector.extract_strided_slice %429 {offsets = [0, 384], sizes = [1, 128], strides = [1, 1]} : vector<1x512xf32> to vector<1x128xf32>
    %445 = arith.negf %444 : vector<1x128xf32>
    %446 = math.exp %445 : vector<1x128xf32>
    %cst_119 = arith.constant 1.000000e+00 : f32
    %447 = vector.broadcast %cst_119 : f32 to vector<1x128xf32>
    %448 = arith.addf %447, %446 : vector<1x128xf32>
    %449 = arith.divf %447, %448 : vector<1x128xf32>
    %450 = arith.mulf %441, %420 : vector<1x128xf32>
    %451 = arith.mulf %435, %443 : vector<1x128xf32>
    %452 = arith.addf %450, %451 : vector<1x128xf32>
    %453 = math.tanh %452 : vector<1x128xf32>
    %454 = arith.mulf %449, %453 : vector<1x128xf32>
    %455 = arith.index_cast %c13_i32 : i32 to index
    %c0_120 = arith.constant 0 : index
    %456 = vector.load %arg7[%455, %c0_120] : memref<16x128xf32, #tpu.memory_space<vmem>>, vector<1x128xf32>
    tpu.vector_store %arg7[%455, %c0_120], %454 {strides = array<i32>} : memref<16x128xf32, #tpu.memory_space<vmem>>, vector<1x128xf32>,
    %c14_i32 = arith.constant 14 : i32
    %457 = arith.index_cast %c14_i32 : i32 to index
    %c0_121 = arith.constant 0 : index
    %458 = vector.load %arg8[%457, %c0_121] : memref<16x512xf32, #tpu.memory_space<vmem>>, vector<1x512xf32>
    %c0_122 = arith.constant 0 : index
    %c0_123 = arith.constant 0 : index
    %459 = vector.load %arg2[%c0_122, %c0_123] : memref<128x512xf32, #tpu.memory_space<vmem>>, vector<128x512xf32>
    %cst_124 = arith.constant dense<0.000000e+00> : vector<1x512xf32>
    %460 = tpu.matmul %454, %459, %cst_124 {dimension_numbers = #tpu.dot_dimension_numbers<[1], [0], [0], [1], [0, 0, 1, 1], [], []>} : vector<1x128xf32>, vector<128x512xf32>, vector<1x512xf32> -> vector<1x512xf32>
    %461 = arith.addf %458, %460 : vector<1x512xf32>
    %462 = vector.extract_strided_slice %461 {offsets = [0, 0], sizes = [1, 128], strides = [1, 1]} : vector<1x512xf32> to vector<1x128xf32>
    %463 = arith.negf %462 : vector<1x128xf32>
    %464 = math.exp %463 : vector<1x128xf32>
    %cst_125 = arith.constant 1.000000e+00 : f32
    %465 = vector.broadcast %cst_125 : f32 to vector<1x128xf32>
    %466 = arith.addf %465, %464 : vector<1x128xf32>
    %467 = arith.divf %465, %466 : vector<1x128xf32>
    %468 = vector.extract_strided_slice %461 {offsets = [0, 128], sizes = [1, 128], strides = [1, 1]} : vector<1x512xf32> to vector<1x128xf32>
    %469 = arith.negf %468 : vector<1x128xf32>
    %470 = math.exp %469 : vector<1x128xf32>
    %cst_126 = arith.constant 1.000000e+00 : f32
    %471 = vector.broadcast %cst_126 : f32 to vector<1x128xf32>
    %472 = arith.addf %471, %470 : vector<1x128xf32>
    %473 = arith.divf %471, %472 : vector<1x128xf32>
    %474 = vector.extract_strided_slice %461 {offsets = [0, 256], sizes = [1, 128], strides = [1, 1]} : vector<1x512xf32> to vector<1x128xf32>
    %475 = math.tanh %474 : vector<1x128xf32>
    %476 = vector.extract_strided_slice %461 {offsets = [0, 384], sizes = [1, 128], strides = [1, 1]} : vector<1x512xf32> to vector<1x128xf32>
    %477 = arith.negf %476 : vector<1x128xf32>
    %478 = math.exp %477 : vector<1x128xf32>
    %cst_127 = arith.constant 1.000000e+00 : f32
    %479 = vector.broadcast %cst_127 : f32 to vector<1x128xf32>
    %480 = arith.addf %479, %478 : vector<1x128xf32>
    %481 = arith.divf %479, %480 : vector<1x128xf32>
    %482 = arith.mulf %473, %452 : vector<1x128xf32>
    %483 = arith.mulf %467, %475 : vector<1x128xf32>
    %484 = arith.addf %482, %483 : vector<1x128xf32>
    %485 = math.tanh %484 : vector<1x128xf32>
    %486 = arith.mulf %481, %485 : vector<1x128xf32>
    %487 = arith.index_cast %c14_i32 : i32 to index
    %c0_128 = arith.constant 0 : index
    %488 = vector.load %arg7[%487, %c0_128] : memref<16x128xf32, #tpu.memory_space<vmem>>, vector<1x128xf32>
    tpu.vector_store %arg7[%487, %c0_128], %486 {strides = array<i32>} : memref<16x128xf32, #tpu.memory_space<vmem>>, vector<1x128xf32>,
    %c15_i32 = arith.constant 15 : i32
    %489 = arith.index_cast %c15_i32 : i32 to index
    %c0_129 = arith.constant 0 : index
    %490 = vector.load %arg8[%489, %c0_129] : memref<16x512xf32, #tpu.memory_space<vmem>>, vector<1x512xf32>
    %c0_130 = arith.constant 0 : index
    %c0_131 = arith.constant 0 : index
    %491 = vector.load %arg2[%c0_130, %c0_131] : memref<128x512xf32, #tpu.memory_space<vmem>>, vector<128x512xf32>
    %cst_132 = arith.constant dense<0.000000e+00> : vector<1x512xf32>
    %492 = tpu.matmul %486, %491, %cst_132 {dimension_numbers = #tpu.dot_dimension_numbers<[1], [0], [0], [1], [0, 0, 1, 1], [], []>} : vector<1x128xf32>, vector<128x512xf32>, vector<1x512xf32> -> vector<1x512xf32>
    %493 = arith.addf %490, %492 : vector<1x512xf32>
    %494 = vector.extract_strided_slice %493 {offsets = [0, 0], sizes = [1, 128], strides = [1, 1]} : vector<1x512xf32> to vector<1x128xf32>
    %495 = arith.negf %494 : vector<1x128xf32>
    %496 = math.exp %495 : vector<1x128xf32>
    %cst_133 = arith.constant 1.000000e+00 : f32
    %497 = vector.broadcast %cst_133 : f32 to vector<1x128xf32>
    %498 = arith.addf %497, %496 : vector<1x128xf32>
    %499 = arith.divf %497, %498 : vector<1x128xf32>
    %500 = vector.extract_strided_slice %493 {offsets = [0, 128], sizes = [1, 128], strides = [1, 1]} : vector<1x512xf32> to vector<1x128xf32>
    %501 = arith.negf %500 : vector<1x128xf32>
    %502 = math.exp %501 : vector<1x128xf32>
    %cst_134 = arith.constant 1.000000e+00 : f32
    %503 = vector.broadcast %cst_134 : f32 to vector<1x128xf32>
    %504 = arith.addf %503, %502 : vector<1x128xf32>
    %505 = arith.divf %503, %504 : vector<1x128xf32>
    %506 = vector.extract_strided_slice %493 {offsets = [0, 256], sizes = [1, 128], strides = [1, 1]} : vector<1x512xf32> to vector<1x128xf32>
    %507 = math.tanh %506 : vector<1x128xf32>
    %508 = vector.extract_strided_slice %493 {offsets = [0, 384], sizes = [1, 128], strides = [1, 1]} : vector<1x512xf32> to vector<1x128xf32>
    %509 = arith.negf %508 : vector<1x128xf32>
    %510 = math.exp %509 : vector<1x128xf32>
    %cst_135 = arith.constant 1.000000e+00 : f32
    %511 = vector.broadcast %cst_135 : f32 to vector<1x128xf32>
    %512 = arith.addf %511, %510 : vector<1x128xf32>
    %513 = arith.divf %511, %512 : vector<1x128xf32>
    %514 = arith.mulf %505, %484 : vector<1x128xf32>
    %515 = arith.mulf %499, %507 : vector<1x128xf32>
    %516 = arith.addf %514, %515 : vector<1x128xf32>
    %517 = math.tanh %516 : vector<1x128xf32>
    %518 = arith.mulf %513, %517 : vector<1x128xf32>
    %519 = arith.index_cast %c15_i32 : i32 to index
    %c0_136 = arith.constant 0 : index
    %520 = vector.load %arg7[%519, %c0_136] : memref<16x128xf32, #tpu.memory_space<vmem>>, vector<1x128xf32>
    tpu.vector_store %arg7[%519, %c0_136], %518 {strides = array<i32>} : memref<16x128xf32, #tpu.memory_space<vmem>>, vector<1x128xf32>,
    %c16_i32 = arith.constant 16 : i32
    %c0_137 = arith.constant 0 : index
    %c0_138 = arith.constant 0 : index
    %521 = vector.load %arg7[%c0_137, %c0_138] : memref<16x128xf32, #tpu.memory_space<vmem>>, vector<16x128xf32>
    %c0_139 = arith.constant 0 : index
    %c0_140 = arith.constant 0 : index
    %522 = vector.load %arg4[%c0_139, %c0_140] : memref<128x512xf32, #tpu.memory_space<vmem>>, vector<128x512xf32>
    %cst_141 = arith.constant dense<0.000000e+00> : vector<16x512xf32>
    %523 = tpu.matmul %521, %522, %cst_141 {dimension_numbers = #tpu.dot_dimension_numbers<[1], [0], [0], [1], [0, 0, 1, 1], [], []>} : vector<16x128xf32>, vector<128x512xf32>, vector<16x512xf32> -> vector<16x512xf32>
    %c0_142 = arith.constant 0 : index
    %c0_143 = arith.constant 0 : index
    %524 = vector.load %arg6[%c0_142, %c0_143] : memref<1x512xf32, #tpu.memory_space<vmem>>, vector<1x512xf32>
    %525 = vector.broadcast %524 : vector<1x512xf32> to vector<16x512xf32>
    %526 = arith.addf %523, %525 : vector<16x512xf32>
    %c0_144 = arith.constant 0 : index
    %c0_145 = arith.constant 0 : index
    %527 = vector.load %arg8[%c0_144, %c0_145] : memref<16x512xf32, #tpu.memory_space<vmem>>, vector<16x512xf32>
    tpu.vector_store %arg8[%c0_144, %c0_145], %526 {strides = array<i32>} : memref<16x512xf32, #tpu.memory_space<vmem>>, vector<16x512xf32>,
    %cst_146 = arith.constant 0.000000e+00 : f32
    %528 = vector.broadcast %cst_146 : f32 to vector<1x128xf32>
    %cst_147 = arith.constant 0.000000e+00 : f32
    %529 = vector.broadcast %cst_147 : f32 to vector<1x128xf32>
    %c0_i32_148 = arith.constant 0 : i32
    %530 = arith.index_cast %c0_i32_148 : i32 to index
    %c0_149 = arith.constant 0 : index
    %531 = vector.load %arg8[%530, %c0_149] : memref<16x512xf32, #tpu.memory_space<vmem>>, vector<1x512xf32>
    %c0_150 = arith.constant 0 : index
    %c0_151 = arith.constant 0 : index
    %532 = vector.load %arg5[%c0_150, %c0_151] : memref<128x512xf32, #tpu.memory_space<vmem>>, vector<128x512xf32>
    %cst_152 = arith.constant dense<0.000000e+00> : vector<1x512xf32>
    %533 = tpu.matmul %528, %532, %cst_152 {dimension_numbers = #tpu.dot_dimension_numbers<[1], [0], [0], [1], [0, 0, 1, 1], [], []>} : vector<1x128xf32>, vector<128x512xf32>, vector<1x512xf32> -> vector<1x512xf32>
    %534 = arith.addf %531, %533 : vector<1x512xf32>
    %535 = vector.extract_strided_slice %534 {offsets = [0, 0], sizes = [1, 128], strides = [1, 1]} : vector<1x512xf32> to vector<1x128xf32>
    %536 = arith.negf %535 : vector<1x128xf32>
    %537 = math.exp %536 : vector<1x128xf32>
    %cst_153 = arith.constant 1.000000e+00 : f32
    %538 = vector.broadcast %cst_153 : f32 to vector<1x128xf32>
    %539 = arith.addf %538, %537 : vector<1x128xf32>
    %540 = arith.divf %538, %539 : vector<1x128xf32>
    %541 = vector.extract_strided_slice %534 {offsets = [0, 128], sizes = [1, 128], strides = [1, 1]} : vector<1x512xf32> to vector<1x128xf32>
    %542 = arith.negf %541 : vector<1x128xf32>
    %543 = math.exp %542 : vector<1x128xf32>
    %cst_154 = arith.constant 1.000000e+00 : f32
    %544 = vector.broadcast %cst_154 : f32 to vector<1x128xf32>
    %545 = arith.addf %544, %543 : vector<1x128xf32>
    %546 = arith.divf %544, %545 : vector<1x128xf32>
    %547 = vector.extract_strided_slice %534 {offsets = [0, 256], sizes = [1, 128], strides = [1, 1]} : vector<1x512xf32> to vector<1x128xf32>
    %548 = math.tanh %547 : vector<1x128xf32>
    %549 = vector.extract_strided_slice %534 {offsets = [0, 384], sizes = [1, 128], strides = [1, 1]} : vector<1x512xf32> to vector<1x128xf32>
    %550 = arith.negf %549 : vector<1x128xf32>
    %551 = math.exp %550 : vector<1x128xf32>
    %cst_155 = arith.constant 1.000000e+00 : f32
    %552 = vector.broadcast %cst_155 : f32 to vector<1x128xf32>
    %553 = arith.addf %552, %551 : vector<1x128xf32>
    %554 = arith.divf %552, %553 : vector<1x128xf32>
    %555 = arith.mulf %546, %529 : vector<1x128xf32>
    %556 = arith.mulf %540, %548 : vector<1x128xf32>
    %557 = arith.addf %555, %556 : vector<1x128xf32>
    %558 = math.tanh %557 : vector<1x128xf32>
    %559 = arith.mulf %554, %558 : vector<1x128xf32>
    %560 = arith.index_cast %c0_i32_148 : i32 to index
    %c0_156 = arith.constant 0 : index
    %561 = vector.load %arg7[%560, %c0_156] : memref<16x128xf32, #tpu.memory_space<vmem>>, vector<1x128xf32>
    tpu.vector_store %arg7[%560, %c0_156], %559 {strides = array<i32>} : memref<16x128xf32, #tpu.memory_space<vmem>>, vector<1x128xf32>,
    %c1_i32_157 = arith.constant 1 : i32
    %562 = arith.index_cast %c1_i32_157 : i32 to index
    %c0_158 = arith.constant 0 : index
    %563 = vector.load %arg8[%562, %c0_158] : memref<16x512xf32, #tpu.memory_space<vmem>>, vector<1x512xf32>
    %c0_159 = arith.constant 0 : index
    %c0_160 = arith.constant 0 : index
    %564 = vector.load %arg5[%c0_159, %c0_160] : memref<128x512xf32, #tpu.memory_space<vmem>>, vector<128x512xf32>
    %cst_161 = arith.constant dense<0.000000e+00> : vector<1x512xf32>
    %565 = tpu.matmul %559, %564, %cst_161 {dimension_numbers = #tpu.dot_dimension_numbers<[1], [0], [0], [1], [0, 0, 1, 1], [], []>} : vector<1x128xf32>, vector<128x512xf32>, vector<1x512xf32> -> vector<1x512xf32>
    %566 = arith.addf %563, %565 : vector<1x512xf32>
    %567 = vector.extract_strided_slice %566 {offsets = [0, 0], sizes = [1, 128], strides = [1, 1]} : vector<1x512xf32> to vector<1x128xf32>
    %568 = arith.negf %567 : vector<1x128xf32>
    %569 = math.exp %568 : vector<1x128xf32>
    %cst_162 = arith.constant 1.000000e+00 : f32
    %570 = vector.broadcast %cst_162 : f32 to vector<1x128xf32>
    %571 = arith.addf %570, %569 : vector<1x128xf32>
    %572 = arith.divf %570, %571 : vector<1x128xf32>
    %573 = vector.extract_strided_slice %566 {offsets = [0, 128], sizes = [1, 128], strides = [1, 1]} : vector<1x512xf32> to vector<1x128xf32>
    %574 = arith.negf %573 : vector<1x128xf32>
    %575 = math.exp %574 : vector<1x128xf32>
    %cst_163 = arith.constant 1.000000e+00 : f32
    %576 = vector.broadcast %cst_163 : f32 to vector<1x128xf32>
    %577 = arith.addf %576, %575 : vector<1x128xf32>
    %578 = arith.divf %576, %577 : vector<1x128xf32>
    %579 = vector.extract_strided_slice %566 {offsets = [0, 256], sizes = [1, 128], strides = [1, 1]} : vector<1x512xf32> to vector<1x128xf32>
    %580 = math.tanh %579 : vector<1x128xf32>
    %581 = vector.extract_strided_slice %566 {offsets = [0, 384], sizes = [1, 128], strides = [1, 1]} : vector<1x512xf32> to vector<1x128xf32>
    %582 = arith.negf %581 : vector<1x128xf32>
    %583 = math.exp %582 : vector<1x128xf32>
    %cst_164 = arith.constant 1.000000e+00 : f32
    %584 = vector.broadcast %cst_164 : f32 to vector<1x128xf32>
    %585 = arith.addf %584, %583 : vector<1x128xf32>
    %586 = arith.divf %584, %585 : vector<1x128xf32>
    %587 = arith.mulf %578, %557 : vector<1x128xf32>
    %588 = arith.mulf %572, %580 : vector<1x128xf32>
    %589 = arith.addf %587, %588 : vector<1x128xf32>
    %590 = math.tanh %589 : vector<1x128xf32>
    %591 = arith.mulf %586, %590 : vector<1x128xf32>
    %592 = arith.index_cast %c1_i32_157 : i32 to index
    %c0_165 = arith.constant 0 : index
    %593 = vector.load %arg7[%592, %c0_165] : memref<16x128xf32, #tpu.memory_space<vmem>>, vector<1x128xf32>
    tpu.vector_store %arg7[%592, %c0_165], %591 {strides = array<i32>} : memref<16x128xf32, #tpu.memory_space<vmem>>, vector<1x128xf32>,
    %c2_i32_166 = arith.constant 2 : i32
    %594 = arith.index_cast %c2_i32_166 : i32 to index
    %c0_167 = arith.constant 0 : index
    %595 = vector.load %arg8[%594, %c0_167] : memref<16x512xf32, #tpu.memory_space<vmem>>, vector<1x512xf32>
    %c0_168 = arith.constant 0 : index
    %c0_169 = arith.constant 0 : index
    %596 = vector.load %arg5[%c0_168, %c0_169] : memref<128x512xf32, #tpu.memory_space<vmem>>, vector<128x512xf32>
    %cst_170 = arith.constant dense<0.000000e+00> : vector<1x512xf32>
    %597 = tpu.matmul %591, %596, %cst_170 {dimension_numbers = #tpu.dot_dimension_numbers<[1], [0], [0], [1], [0, 0, 1, 1], [], []>} : vector<1x128xf32>, vector<128x512xf32>, vector<1x512xf32> -> vector<1x512xf32>
    %598 = arith.addf %595, %597 : vector<1x512xf32>
    %599 = vector.extract_strided_slice %598 {offsets = [0, 0], sizes = [1, 128], strides = [1, 1]} : vector<1x512xf32> to vector<1x128xf32>
    %600 = arith.negf %599 : vector<1x128xf32>
    %601 = math.exp %600 : vector<1x128xf32>
    %cst_171 = arith.constant 1.000000e+00 : f32
    %602 = vector.broadcast %cst_171 : f32 to vector<1x128xf32>
    %603 = arith.addf %602, %601 : vector<1x128xf32>
    %604 = arith.divf %602, %603 : vector<1x128xf32>
    %605 = vector.extract_strided_slice %598 {offsets = [0, 128], sizes = [1, 128], strides = [1, 1]} : vector<1x512xf32> to vector<1x128xf32>
    %606 = arith.negf %605 : vector<1x128xf32>
    %607 = math.exp %606 : vector<1x128xf32>
    %cst_172 = arith.constant 1.000000e+00 : f32
    %608 = vector.broadcast %cst_172 : f32 to vector<1x128xf32>
    %609 = arith.addf %608, %607 : vector<1x128xf32>
    %610 = arith.divf %608, %609 : vector<1x128xf32>
    %611 = vector.extract_strided_slice %598 {offsets = [0, 256], sizes = [1, 128], strides = [1, 1]} : vector<1x512xf32> to vector<1x128xf32>
    %612 = math.tanh %611 : vector<1x128xf32>
    %613 = vector.extract_strided_slice %598 {offsets = [0, 384], sizes = [1, 128], strides = [1, 1]} : vector<1x512xf32> to vector<1x128xf32>
    %614 = arith.negf %613 : vector<1x128xf32>
    %615 = math.exp %614 : vector<1x128xf32>
    %cst_173 = arith.constant 1.000000e+00 : f32
    %616 = vector.broadcast %cst_173 : f32 to vector<1x128xf32>
    %617 = arith.addf %616, %615 : vector<1x128xf32>
    %618 = arith.divf %616, %617 : vector<1x128xf32>
    %619 = arith.mulf %610, %589 : vector<1x128xf32>
    %620 = arith.mulf %604, %612 : vector<1x128xf32>
    %621 = arith.addf %619, %620 : vector<1x128xf32>
    %622 = math.tanh %621 : vector<1x128xf32>
    %623 = arith.mulf %618, %622 : vector<1x128xf32>
    %624 = arith.index_cast %c2_i32_166 : i32 to index
    %c0_174 = arith.constant 0 : index
    %625 = vector.load %arg7[%624, %c0_174] : memref<16x128xf32, #tpu.memory_space<vmem>>, vector<1x128xf32>
    tpu.vector_store %arg7[%624, %c0_174], %623 {strides = array<i32>} : memref<16x128xf32, #tpu.memory_space<vmem>>, vector<1x128xf32>,
    %c3_i32_175 = arith.constant 3 : i32
    %626 = arith.index_cast %c3_i32_175 : i32 to index
    %c0_176 = arith.constant 0 : index
    %627 = vector.load %arg8[%626, %c0_176] : memref<16x512xf32, #tpu.memory_space<vmem>>, vector<1x512xf32>
    %c0_177 = arith.constant 0 : index
    %c0_178 = arith.constant 0 : index
    %628 = vector.load %arg5[%c0_177, %c0_178] : memref<128x512xf32, #tpu.memory_space<vmem>>, vector<128x512xf32>
    %cst_179 = arith.constant dense<0.000000e+00> : vector<1x512xf32>
    %629 = tpu.matmul %623, %628, %cst_179 {dimension_numbers = #tpu.dot_dimension_numbers<[1], [0], [0], [1], [0, 0, 1, 1], [], []>} : vector<1x128xf32>, vector<128x512xf32>, vector<1x512xf32> -> vector<1x512xf32>
    %630 = arith.addf %627, %629 : vector<1x512xf32>
    %631 = vector.extract_strided_slice %630 {offsets = [0, 0], sizes = [1, 128], strides = [1, 1]} : vector<1x512xf32> to vector<1x128xf32>
    %632 = arith.negf %631 : vector<1x128xf32>
    %633 = math.exp %632 : vector<1x128xf32>
    %cst_180 = arith.constant 1.000000e+00 : f32
    %634 = vector.broadcast %cst_180 : f32 to vector<1x128xf32>
    %635 = arith.addf %634, %633 : vector<1x128xf32>
    %636 = arith.divf %634, %635 : vector<1x128xf32>
    %637 = vector.extract_strided_slice %630 {offsets = [0, 128], sizes = [1, 128], strides = [1, 1]} : vector<1x512xf32> to vector<1x128xf32>
    %638 = arith.negf %637 : vector<1x128xf32>
    %639 = math.exp %638 : vector<1x128xf32>
    %cst_181 = arith.constant 1.000000e+00 : f32
    %640 = vector.broadcast %cst_181 : f32 to vector<1x128xf32>
    %641 = arith.addf %640, %639 : vector<1x128xf32>
    %642 = arith.divf %640, %641 : vector<1x128xf32>
    %643 = vector.extract_strided_slice %630 {offsets = [0, 256], sizes = [1, 128], strides = [1, 1]} : vector<1x512xf32> to vector<1x128xf32>
    %644 = math.tanh %643 : vector<1x128xf32>
    %645 = vector.extract_strided_slice %630 {offsets = [0, 384], sizes = [1, 128], strides = [1, 1]} : vector<1x512xf32> to vector<1x128xf32>
    %646 = arith.negf %645 : vector<1x128xf32>
    %647 = math.exp %646 : vector<1x128xf32>
    %cst_182 = arith.constant 1.000000e+00 : f32
    %648 = vector.broadcast %cst_182 : f32 to vector<1x128xf32>
    %649 = arith.addf %648, %647 : vector<1x128xf32>
    %650 = arith.divf %648, %649 : vector<1x128xf32>
    %651 = arith.mulf %642, %621 : vector<1x128xf32>
    %652 = arith.mulf %636, %644 : vector<1x128xf32>
    %653 = arith.addf %651, %652 : vector<1x128xf32>
    %654 = math.tanh %653 : vector<1x128xf32>
    %655 = arith.mulf %650, %654 : vector<1x128xf32>
    %656 = arith.index_cast %c3_i32_175 : i32 to index
    %c0_183 = arith.constant 0 : index
    %657 = vector.load %arg7[%656, %c0_183] : memref<16x128xf32, #tpu.memory_space<vmem>>, vector<1x128xf32>
    tpu.vector_store %arg7[%656, %c0_183], %655 {strides = array<i32>} : memref<16x128xf32, #tpu.memory_space<vmem>>, vector<1x128xf32>,
    %c4_i32_184 = arith.constant 4 : i32
    %658 = arith.index_cast %c4_i32_184 : i32 to index
    %c0_185 = arith.constant 0 : index
    %659 = vector.load %arg8[%658, %c0_185] : memref<16x512xf32, #tpu.memory_space<vmem>>, vector<1x512xf32>
    %c0_186 = arith.constant 0 : index
    %c0_187 = arith.constant 0 : index
    %660 = vector.load %arg5[%c0_186, %c0_187] : memref<128x512xf32, #tpu.memory_space<vmem>>, vector<128x512xf32>
    %cst_188 = arith.constant dense<0.000000e+00> : vector<1x512xf32>
    %661 = tpu.matmul %655, %660, %cst_188 {dimension_numbers = #tpu.dot_dimension_numbers<[1], [0], [0], [1], [0, 0, 1, 1], [], []>} : vector<1x128xf32>, vector<128x512xf32>, vector<1x512xf32> -> vector<1x512xf32>
    %662 = arith.addf %659, %661 : vector<1x512xf32>
    %663 = vector.extract_strided_slice %662 {offsets = [0, 0], sizes = [1, 128], strides = [1, 1]} : vector<1x512xf32> to vector<1x128xf32>
    %664 = arith.negf %663 : vector<1x128xf32>
    %665 = math.exp %664 : vector<1x128xf32>
    %cst_189 = arith.constant 1.000000e+00 : f32
    %666 = vector.broadcast %cst_189 : f32 to vector<1x128xf32>
    %667 = arith.addf %666, %665 : vector<1x128xf32>
    %668 = arith.divf %666, %667 : vector<1x128xf32>
    %669 = vector.extract_strided_slice %662 {offsets = [0, 128], sizes = [1, 128], strides = [1, 1]} : vector<1x512xf32> to vector<1x128xf32>
    %670 = arith.negf %669 : vector<1x128xf32>
    %671 = math.exp %670 : vector<1x128xf32>
    %cst_190 = arith.constant 1.000000e+00 : f32
    %672 = vector.broadcast %cst_190 : f32 to vector<1x128xf32>
    %673 = arith.addf %672, %671 : vector<1x128xf32>
    %674 = arith.divf %672, %673 : vector<1x128xf32>
    %675 = vector.extract_strided_slice %662 {offsets = [0, 256], sizes = [1, 128], strides = [1, 1]} : vector<1x512xf32> to vector<1x128xf32>
    %676 = math.tanh %675 : vector<1x128xf32>
    %677 = vector.extract_strided_slice %662 {offsets = [0, 384], sizes = [1, 128], strides = [1, 1]} : vector<1x512xf32> to vector<1x128xf32>
    %678 = arith.negf %677 : vector<1x128xf32>
    %679 = math.exp %678 : vector<1x128xf32>
    %cst_191 = arith.constant 1.000000e+00 : f32
    %680 = vector.broadcast %cst_191 : f32 to vector<1x128xf32>
    %681 = arith.addf %680, %679 : vector<1x128xf32>
    %682 = arith.divf %680, %681 : vector<1x128xf32>
    %683 = arith.mulf %674, %653 : vector<1x128xf32>
    %684 = arith.mulf %668, %676 : vector<1x128xf32>
    %685 = arith.addf %683, %684 : vector<1x128xf32>
    %686 = math.tanh %685 : vector<1x128xf32>
    %687 = arith.mulf %682, %686 : vector<1x128xf32>
    %688 = arith.index_cast %c4_i32_184 : i32 to index
    %c0_192 = arith.constant 0 : index
    %689 = vector.load %arg7[%688, %c0_192] : memref<16x128xf32, #tpu.memory_space<vmem>>, vector<1x128xf32>
    tpu.vector_store %arg7[%688, %c0_192], %687 {strides = array<i32>} : memref<16x128xf32, #tpu.memory_space<vmem>>, vector<1x128xf32>,
    %c5_i32_193 = arith.constant 5 : i32
    %690 = arith.index_cast %c5_i32_193 : i32 to index
    %c0_194 = arith.constant 0 : index
    %691 = vector.load %arg8[%690, %c0_194] : memref<16x512xf32, #tpu.memory_space<vmem>>, vector<1x512xf32>
    %c0_195 = arith.constant 0 : index
    %c0_196 = arith.constant 0 : index
    %692 = vector.load %arg5[%c0_195, %c0_196] : memref<128x512xf32, #tpu.memory_space<vmem>>, vector<128x512xf32>
    %cst_197 = arith.constant dense<0.000000e+00> : vector<1x512xf32>
    %693 = tpu.matmul %687, %692, %cst_197 {dimension_numbers = #tpu.dot_dimension_numbers<[1], [0], [0], [1], [0, 0, 1, 1], [], []>} : vector<1x128xf32>, vector<128x512xf32>, vector<1x512xf32> -> vector<1x512xf32>
    %694 = arith.addf %691, %693 : vector<1x512xf32>
    %695 = vector.extract_strided_slice %694 {offsets = [0, 0], sizes = [1, 128], strides = [1, 1]} : vector<1x512xf32> to vector<1x128xf32>
    %696 = arith.negf %695 : vector<1x128xf32>
    %697 = math.exp %696 : vector<1x128xf32>
    %cst_198 = arith.constant 1.000000e+00 : f32
    %698 = vector.broadcast %cst_198 : f32 to vector<1x128xf32>
    %699 = arith.addf %698, %697 : vector<1x128xf32>
    %700 = arith.divf %698, %699 : vector<1x128xf32>
    %701 = vector.extract_strided_slice %694 {offsets = [0, 128], sizes = [1, 128], strides = [1, 1]} : vector<1x512xf32> to vector<1x128xf32>
    %702 = arith.negf %701 : vector<1x128xf32>
    %703 = math.exp %702 : vector<1x128xf32>
    %cst_199 = arith.constant 1.000000e+00 : f32
    %704 = vector.broadcast %cst_199 : f32 to vector<1x128xf32>
    %705 = arith.addf %704, %703 : vector<1x128xf32>
    %706 = arith.divf %704, %705 : vector<1x128xf32>
    %707 = vector.extract_strided_slice %694 {offsets = [0, 256], sizes = [1, 128], strides = [1, 1]} : vector<1x512xf32> to vector<1x128xf32>
    %708 = math.tanh %707 : vector<1x128xf32>
    %709 = vector.extract_strided_slice %694 {offsets = [0, 384], sizes = [1, 128], strides = [1, 1]} : vector<1x512xf32> to vector<1x128xf32>
    %710 = arith.negf %709 : vector<1x128xf32>
    %711 = math.exp %710 : vector<1x128xf32>
    %cst_200 = arith.constant 1.000000e+00 : f32
    %712 = vector.broadcast %cst_200 : f32 to vector<1x128xf32>
    %713 = arith.addf %712, %711 : vector<1x128xf32>
    %714 = arith.divf %712, %713 : vector<1x128xf32>
    %715 = arith.mulf %706, %685 : vector<1x128xf32>
    %716 = arith.mulf %700, %708 : vector<1x128xf32>
    %717 = arith.addf %715, %716 : vector<1x128xf32>
    %718 = math.tanh %717 : vector<1x128xf32>
    %719 = arith.mulf %714, %718 : vector<1x128xf32>
    %720 = arith.index_cast %c5_i32_193 : i32 to index
    %c0_201 = arith.constant 0 : index
    %721 = vector.load %arg7[%720, %c0_201] : memref<16x128xf32, #tpu.memory_space<vmem>>, vector<1x128xf32>
    tpu.vector_store %arg7[%720, %c0_201], %719 {strides = array<i32>} : memref<16x128xf32, #tpu.memory_space<vmem>>, vector<1x128xf32>,
    %c6_i32_202 = arith.constant 6 : i32
    %722 = arith.index_cast %c6_i32_202 : i32 to index
    %c0_203 = arith.constant 0 : index
    %723 = vector.load %arg8[%722, %c0_203] : memref<16x512xf32, #tpu.memory_space<vmem>>, vector<1x512xf32>
    %c0_204 = arith.constant 0 : index
    %c0_205 = arith.constant 0 : index
    %724 = vector.load %arg5[%c0_204, %c0_205] : memref<128x512xf32, #tpu.memory_space<vmem>>, vector<128x512xf32>
    %cst_206 = arith.constant dense<0.000000e+00> : vector<1x512xf32>
    %725 = tpu.matmul %719, %724, %cst_206 {dimension_numbers = #tpu.dot_dimension_numbers<[1], [0], [0], [1], [0, 0, 1, 1], [], []>} : vector<1x128xf32>, vector<128x512xf32>, vector<1x512xf32> -> vector<1x512xf32>
    %726 = arith.addf %723, %725 : vector<1x512xf32>
    %727 = vector.extract_strided_slice %726 {offsets = [0, 0], sizes = [1, 128], strides = [1, 1]} : vector<1x512xf32> to vector<1x128xf32>
    %728 = arith.negf %727 : vector<1x128xf32>
    %729 = math.exp %728 : vector<1x128xf32>
    %cst_207 = arith.constant 1.000000e+00 : f32
    %730 = vector.broadcast %cst_207 : f32 to vector<1x128xf32>
    %731 = arith.addf %730, %729 : vector<1x128xf32>
    %732 = arith.divf %730, %731 : vector<1x128xf32>
    %733 = vector.extract_strided_slice %726 {offsets = [0, 128], sizes = [1, 128], strides = [1, 1]} : vector<1x512xf32> to vector<1x128xf32>
    %734 = arith.negf %733 : vector<1x128xf32>
    %735 = math.exp %734 : vector<1x128xf32>
    %cst_208 = arith.constant 1.000000e+00 : f32
    %736 = vector.broadcast %cst_208 : f32 to vector<1x128xf32>
    %737 = arith.addf %736, %735 : vector<1x128xf32>
    %738 = arith.divf %736, %737 : vector<1x128xf32>
    %739 = vector.extract_strided_slice %726 {offsets = [0, 256], sizes = [1, 128], strides = [1, 1]} : vector<1x512xf32> to vector<1x128xf32>
    %740 = math.tanh %739 : vector<1x128xf32>
    %741 = vector.extract_strided_slice %726 {offsets = [0, 384], sizes = [1, 128], strides = [1, 1]} : vector<1x512xf32> to vector<1x128xf32>
    %742 = arith.negf %741 : vector<1x128xf32>
    %743 = math.exp %742 : vector<1x128xf32>
    %cst_209 = arith.constant 1.000000e+00 : f32
    %744 = vector.broadcast %cst_209 : f32 to vector<1x128xf32>
    %745 = arith.addf %744, %743 : vector<1x128xf32>
    %746 = arith.divf %744, %745 : vector<1x128xf32>
    %747 = arith.mulf %738, %717 : vector<1x128xf32>
    %748 = arith.mulf %732, %740 : vector<1x128xf32>
    %749 = arith.addf %747, %748 : vector<1x128xf32>
    %750 = math.tanh %749 : vector<1x128xf32>
    %751 = arith.mulf %746, %750 : vector<1x128xf32>
    %752 = arith.index_cast %c6_i32_202 : i32 to index
    %c0_210 = arith.constant 0 : index
    %753 = vector.load %arg7[%752, %c0_210] : memref<16x128xf32, #tpu.memory_space<vmem>>, vector<1x128xf32>
    tpu.vector_store %arg7[%752, %c0_210], %751 {strides = array<i32>} : memref<16x128xf32, #tpu.memory_space<vmem>>, vector<1x128xf32>,
    %c7_i32_211 = arith.constant 7 : i32
    %754 = arith.index_cast %c7_i32_211 : i32 to index
    %c0_212 = arith.constant 0 : index
    %755 = vector.load %arg8[%754, %c0_212] : memref<16x512xf32, #tpu.memory_space<vmem>>, vector<1x512xf32>
    %c0_213 = arith.constant 0 : index
    %c0_214 = arith.constant 0 : index
    %756 = vector.load %arg5[%c0_213, %c0_214] : memref<128x512xf32, #tpu.memory_space<vmem>>, vector<128x512xf32>
    %cst_215 = arith.constant dense<0.000000e+00> : vector<1x512xf32>
    %757 = tpu.matmul %751, %756, %cst_215 {dimension_numbers = #tpu.dot_dimension_numbers<[1], [0], [0], [1], [0, 0, 1, 1], [], []>} : vector<1x128xf32>, vector<128x512xf32>, vector<1x512xf32> -> vector<1x512xf32>
    %758 = arith.addf %755, %757 : vector<1x512xf32>
    %759 = vector.extract_strided_slice %758 {offsets = [0, 0], sizes = [1, 128], strides = [1, 1]} : vector<1x512xf32> to vector<1x128xf32>
    %760 = arith.negf %759 : vector<1x128xf32>
    %761 = math.exp %760 : vector<1x128xf32>
    %cst_216 = arith.constant 1.000000e+00 : f32
    %762 = vector.broadcast %cst_216 : f32 to vector<1x128xf32>
    %763 = arith.addf %762, %761 : vector<1x128xf32>
    %764 = arith.divf %762, %763 : vector<1x128xf32>
    %765 = vector.extract_strided_slice %758 {offsets = [0, 128], sizes = [1, 128], strides = [1, 1]} : vector<1x512xf32> to vector<1x128xf32>
    %766 = arith.negf %765 : vector<1x128xf32>
    %767 = math.exp %766 : vector<1x128xf32>
    %cst_217 = arith.constant 1.000000e+00 : f32
    %768 = vector.broadcast %cst_217 : f32 to vector<1x128xf32>
    %769 = arith.addf %768, %767 : vector<1x128xf32>
    %770 = arith.divf %768, %769 : vector<1x128xf32>
    %771 = vector.extract_strided_slice %758 {offsets = [0, 256], sizes = [1, 128], strides = [1, 1]} : vector<1x512xf32> to vector<1x128xf32>
    %772 = math.tanh %771 : vector<1x128xf32>
    %773 = vector.extract_strided_slice %758 {offsets = [0, 384], sizes = [1, 128], strides = [1, 1]} : vector<1x512xf32> to vector<1x128xf32>
    %774 = arith.negf %773 : vector<1x128xf32>
    %775 = math.exp %774 : vector<1x128xf32>
    %cst_218 = arith.constant 1.000000e+00 : f32
    %776 = vector.broadcast %cst_218 : f32 to vector<1x128xf32>
    %777 = arith.addf %776, %775 : vector<1x128xf32>
    %778 = arith.divf %776, %777 : vector<1x128xf32>
    %779 = arith.mulf %770, %749 : vector<1x128xf32>
    %780 = arith.mulf %764, %772 : vector<1x128xf32>
    %781 = arith.addf %779, %780 : vector<1x128xf32>
    %782 = math.tanh %781 : vector<1x128xf32>
    %783 = arith.mulf %778, %782 : vector<1x128xf32>
    %784 = arith.index_cast %c7_i32_211 : i32 to index
    %c0_219 = arith.constant 0 : index
    %785 = vector.load %arg7[%784, %c0_219] : memref<16x128xf32, #tpu.memory_space<vmem>>, vector<1x128xf32>
    tpu.vector_store %arg7[%784, %c0_219], %783 {strides = array<i32>} : memref<16x128xf32, #tpu.memory_space<vmem>>, vector<1x128xf32>,
    %c8_i32_220 = arith.constant 8 : i32
    %786 = arith.index_cast %c8_i32_220 : i32 to index
    %c0_221 = arith.constant 0 : index
    %787 = vector.load %arg8[%786, %c0_221] : memref<16x512xf32, #tpu.memory_space<vmem>>, vector<1x512xf32>
    %c0_222 = arith.constant 0 : index
    %c0_223 = arith.constant 0 : index
    %788 = vector.load %arg5[%c0_222, %c0_223] : memref<128x512xf32, #tpu.memory_space<vmem>>, vector<128x512xf32>
    %cst_224 = arith.constant dense<0.000000e+00> : vector<1x512xf32>
    %789 = tpu.matmul %783, %788, %cst_224 {dimension_numbers = #tpu.dot_dimension_numbers<[1], [0], [0], [1], [0, 0, 1, 1], [], []>} : vector<1x128xf32>, vector<128x512xf32>, vector<1x512xf32> -> vector<1x512xf32>
    %790 = arith.addf %787, %789 : vector<1x512xf32>
    %791 = vector.extract_strided_slice %790 {offsets = [0, 0], sizes = [1, 128], strides = [1, 1]} : vector<1x512xf32> to vector<1x128xf32>
    %792 = arith.negf %791 : vector<1x128xf32>
    %793 = math.exp %792 : vector<1x128xf32>
    %cst_225 = arith.constant 1.000000e+00 : f32
    %794 = vector.broadcast %cst_225 : f32 to vector<1x128xf32>
    %795 = arith.addf %794, %793 : vector<1x128xf32>
    %796 = arith.divf %794, %795 : vector<1x128xf32>
    %797 = vector.extract_strided_slice %790 {offsets = [0, 128], sizes = [1, 128], strides = [1, 1]} : vector<1x512xf32> to vector<1x128xf32>
    %798 = arith.negf %797 : vector<1x128xf32>
    %799 = math.exp %798 : vector<1x128xf32>
    %cst_226 = arith.constant 1.000000e+00 : f32
    %800 = vector.broadcast %cst_226 : f32 to vector<1x128xf32>
    %801 = arith.addf %800, %799 : vector<1x128xf32>
    %802 = arith.divf %800, %801 : vector<1x128xf32>
    %803 = vector.extract_strided_slice %790 {offsets = [0, 256], sizes = [1, 128], strides = [1, 1]} : vector<1x512xf32> to vector<1x128xf32>
    %804 = math.tanh %803 : vector<1x128xf32>
    %805 = vector.extract_strided_slice %790 {offsets = [0, 384], sizes = [1, 128], strides = [1, 1]} : vector<1x512xf32> to vector<1x128xf32>
    %806 = arith.negf %805 : vector<1x128xf32>
    %807 = math.exp %806 : vector<1x128xf32>
    %cst_227 = arith.constant 1.000000e+00 : f32
    %808 = vector.broadcast %cst_227 : f32 to vector<1x128xf32>
    %809 = arith.addf %808, %807 : vector<1x128xf32>
    %810 = arith.divf %808, %809 : vector<1x128xf32>
    %811 = arith.mulf %802, %781 : vector<1x128xf32>
    %812 = arith.mulf %796, %804 : vector<1x128xf32>
    %813 = arith.addf %811, %812 : vector<1x128xf32>
    %814 = math.tanh %813 : vector<1x128xf32>
    %815 = arith.mulf %810, %814 : vector<1x128xf32>
    %816 = arith.index_cast %c8_i32_220 : i32 to index
    %c0_228 = arith.constant 0 : index
    %817 = vector.load %arg7[%816, %c0_228] : memref<16x128xf32, #tpu.memory_space<vmem>>, vector<1x128xf32>
    tpu.vector_store %arg7[%816, %c0_228], %815 {strides = array<i32>} : memref<16x128xf32, #tpu.memory_space<vmem>>, vector<1x128xf32>,
    %c9_i32_229 = arith.constant 9 : i32
    %818 = arith.index_cast %c9_i32_229 : i32 to index
    %c0_230 = arith.constant 0 : index
    %819 = vector.load %arg8[%818, %c0_230] : memref<16x512xf32, #tpu.memory_space<vmem>>, vector<1x512xf32>
    %c0_231 = arith.constant 0 : index
    %c0_232 = arith.constant 0 : index
    %820 = vector.load %arg5[%c0_231, %c0_232] : memref<128x512xf32, #tpu.memory_space<vmem>>, vector<128x512xf32>
    %cst_233 = arith.constant dense<0.000000e+00> : vector<1x512xf32>
    %821 = tpu.matmul %815, %820, %cst_233 {dimension_numbers = #tpu.dot_dimension_numbers<[1], [0], [0], [1], [0, 0, 1, 1], [], []>} : vector<1x128xf32>, vector<128x512xf32>, vector<1x512xf32> -> vector<1x512xf32>
    %822 = arith.addf %819, %821 : vector<1x512xf32>
    %823 = vector.extract_strided_slice %822 {offsets = [0, 0], sizes = [1, 128], strides = [1, 1]} : vector<1x512xf32> to vector<1x128xf32>
    %824 = arith.negf %823 : vector<1x128xf32>
    %825 = math.exp %824 : vector<1x128xf32>
    %cst_234 = arith.constant 1.000000e+00 : f32
    %826 = vector.broadcast %cst_234 : f32 to vector<1x128xf32>
    %827 = arith.addf %826, %825 : vector<1x128xf32>
    %828 = arith.divf %826, %827 : vector<1x128xf32>
    %829 = vector.extract_strided_slice %822 {offsets = [0, 128], sizes = [1, 128], strides = [1, 1]} : vector<1x512xf32> to vector<1x128xf32>
    %830 = arith.negf %829 : vector<1x128xf32>
    %831 = math.exp %830 : vector<1x128xf32>
    %cst_235 = arith.constant 1.000000e+00 : f32
    %832 = vector.broadcast %cst_235 : f32 to vector<1x128xf32>
    %833 = arith.addf %832, %831 : vector<1x128xf32>
    %834 = arith.divf %832, %833 : vector<1x128xf32>
    %835 = vector.extract_strided_slice %822 {offsets = [0, 256], sizes = [1, 128], strides = [1, 1]} : vector<1x512xf32> to vector<1x128xf32>
    %836 = math.tanh %835 : vector<1x128xf32>
    %837 = vector.extract_strided_slice %822 {offsets = [0, 384], sizes = [1, 128], strides = [1, 1]} : vector<1x512xf32> to vector<1x128xf32>
    %838 = arith.negf %837 : vector<1x128xf32>
    %839 = math.exp %838 : vector<1x128xf32>
    %cst_236 = arith.constant 1.000000e+00 : f32
    %840 = vector.broadcast %cst_236 : f32 to vector<1x128xf32>
    %841 = arith.addf %840, %839 : vector<1x128xf32>
    %842 = arith.divf %840, %841 : vector<1x128xf32>
    %843 = arith.mulf %834, %813 : vector<1x128xf32>
    %844 = arith.mulf %828, %836 : vector<1x128xf32>
    %845 = arith.addf %843, %844 : vector<1x128xf32>
    %846 = math.tanh %845 : vector<1x128xf32>
    %847 = arith.mulf %842, %846 : vector<1x128xf32>
    %848 = arith.index_cast %c9_i32_229 : i32 to index
    %c0_237 = arith.constant 0 : index
    %849 = vector.load %arg7[%848, %c0_237] : memref<16x128xf32, #tpu.memory_space<vmem>>, vector<1x128xf32>
    tpu.vector_store %arg7[%848, %c0_237], %847 {strides = array<i32>} : memref<16x128xf32, #tpu.memory_space<vmem>>, vector<1x128xf32>,
    %c10_i32_238 = arith.constant 10 : i32
    %850 = arith.index_cast %c10_i32_238 : i32 to index
    %c0_239 = arith.constant 0 : index
    %851 = vector.load %arg8[%850, %c0_239] : memref<16x512xf32, #tpu.memory_space<vmem>>, vector<1x512xf32>
    %c0_240 = arith.constant 0 : index
    %c0_241 = arith.constant 0 : index
    %852 = vector.load %arg5[%c0_240, %c0_241] : memref<128x512xf32, #tpu.memory_space<vmem>>, vector<128x512xf32>
    %cst_242 = arith.constant dense<0.000000e+00> : vector<1x512xf32>
    %853 = tpu.matmul %847, %852, %cst_242 {dimension_numbers = #tpu.dot_dimension_numbers<[1], [0], [0], [1], [0, 0, 1, 1], [], []>} : vector<1x128xf32>, vector<128x512xf32>, vector<1x512xf32> -> vector<1x512xf32>
    %854 = arith.addf %851, %853 : vector<1x512xf32>
    %855 = vector.extract_strided_slice %854 {offsets = [0, 0], sizes = [1, 128], strides = [1, 1]} : vector<1x512xf32> to vector<1x128xf32>
    %856 = arith.negf %855 : vector<1x128xf32>
    %857 = math.exp %856 : vector<1x128xf32>
    %cst_243 = arith.constant 1.000000e+00 : f32
    %858 = vector.broadcast %cst_243 : f32 to vector<1x128xf32>
    %859 = arith.addf %858, %857 : vector<1x128xf32>
    %860 = arith.divf %858, %859 : vector<1x128xf32>
    %861 = vector.extract_strided_slice %854 {offsets = [0, 128], sizes = [1, 128], strides = [1, 1]} : vector<1x512xf32> to vector<1x128xf32>
    %862 = arith.negf %861 : vector<1x128xf32>
    %863 = math.exp %862 : vector<1x128xf32>
    %cst_244 = arith.constant 1.000000e+00 : f32
    %864 = vector.broadcast %cst_244 : f32 to vector<1x128xf32>
    %865 = arith.addf %864, %863 : vector<1x128xf32>
    %866 = arith.divf %864, %865 : vector<1x128xf32>
    %867 = vector.extract_strided_slice %854 {offsets = [0, 256], sizes = [1, 128], strides = [1, 1]} : vector<1x512xf32> to vector<1x128xf32>
    %868 = math.tanh %867 : vector<1x128xf32>
    %869 = vector.extract_strided_slice %854 {offsets = [0, 384], sizes = [1, 128], strides = [1, 1]} : vector<1x512xf32> to vector<1x128xf32>
    %870 = arith.negf %869 : vector<1x128xf32>
    %871 = math.exp %870 : vector<1x128xf32>
    %cst_245 = arith.constant 1.000000e+00 : f32
    %872 = vector.broadcast %cst_245 : f32 to vector<1x128xf32>
    %873 = arith.addf %872, %871 : vector<1x128xf32>
    %874 = arith.divf %872, %873 : vector<1x128xf32>
    %875 = arith.mulf %866, %845 : vector<1x128xf32>
    %876 = arith.mulf %860, %868 : vector<1x128xf32>
    %877 = arith.addf %875, %876 : vector<1x128xf32>
    %878 = math.tanh %877 : vector<1x128xf32>
    %879 = arith.mulf %874, %878 : vector<1x128xf32>
    %880 = arith.index_cast %c10_i32_238 : i32 to index
    %c0_246 = arith.constant 0 : index
    %881 = vector.load %arg7[%880, %c0_246] : memref<16x128xf32, #tpu.memory_space<vmem>>, vector<1x128xf32>
    tpu.vector_store %arg7[%880, %c0_246], %879 {strides = array<i32>} : memref<16x128xf32, #tpu.memory_space<vmem>>, vector<1x128xf32>,
    %c11_i32_247 = arith.constant 11 : i32
    %882 = arith.index_cast %c11_i32_247 : i32 to index
    %c0_248 = arith.constant 0 : index
    %883 = vector.load %arg8[%882, %c0_248] : memref<16x512xf32, #tpu.memory_space<vmem>>, vector<1x512xf32>
    %c0_249 = arith.constant 0 : index
    %c0_250 = arith.constant 0 : index
    %884 = vector.load %arg5[%c0_249, %c0_250] : memref<128x512xf32, #tpu.memory_space<vmem>>, vector<128x512xf32>
    %cst_251 = arith.constant dense<0.000000e+00> : vector<1x512xf32>
    %885 = tpu.matmul %879, %884, %cst_251 {dimension_numbers = #tpu.dot_dimension_numbers<[1], [0], [0], [1], [0, 0, 1, 1], [], []>} : vector<1x128xf32>, vector<128x512xf32>, vector<1x512xf32> -> vector<1x512xf32>
    %886 = arith.addf %883, %885 : vector<1x512xf32>
    %887 = vector.extract_strided_slice %886 {offsets = [0, 0], sizes = [1, 128], strides = [1, 1]} : vector<1x512xf32> to vector<1x128xf32>
    %888 = arith.negf %887 : vector<1x128xf32>
    %889 = math.exp %888 : vector<1x128xf32>
    %cst_252 = arith.constant 1.000000e+00 : f32
    %890 = vector.broadcast %cst_252 : f32 to vector<1x128xf32>
    %891 = arith.addf %890, %889 : vector<1x128xf32>
    %892 = arith.divf %890, %891 : vector<1x128xf32>
    %893 = vector.extract_strided_slice %886 {offsets = [0, 128], sizes = [1, 128], strides = [1, 1]} : vector<1x512xf32> to vector<1x128xf32>
    %894 = arith.negf %893 : vector<1x128xf32>
    %895 = math.exp %894 : vector<1x128xf32>
    %cst_253 = arith.constant 1.000000e+00 : f32
    %896 = vector.broadcast %cst_253 : f32 to vector<1x128xf32>
    %897 = arith.addf %896, %895 : vector<1x128xf32>
    %898 = arith.divf %896, %897 : vector<1x128xf32>
    %899 = vector.extract_strided_slice %886 {offsets = [0, 256], sizes = [1, 128], strides = [1, 1]} : vector<1x512xf32> to vector<1x128xf32>
    %900 = math.tanh %899 : vector<1x128xf32>
    %901 = vector.extract_strided_slice %886 {offsets = [0, 384], sizes = [1, 128], strides = [1, 1]} : vector<1x512xf32> to vector<1x128xf32>
    %902 = arith.negf %901 : vector<1x128xf32>
    %903 = math.exp %902 : vector<1x128xf32>
    %cst_254 = arith.constant 1.000000e+00 : f32
    %904 = vector.broadcast %cst_254 : f32 to vector<1x128xf32>
    %905 = arith.addf %904, %903 : vector<1x128xf32>
    %906 = arith.divf %904, %905 : vector<1x128xf32>
    %907 = arith.mulf %898, %877 : vector<1x128xf32>
    %908 = arith.mulf %892, %900 : vector<1x128xf32>
    %909 = arith.addf %907, %908 : vector<1x128xf32>
    %910 = math.tanh %909 : vector<1x128xf32>
    %911 = arith.mulf %906, %910 : vector<1x128xf32>
    %912 = arith.index_cast %c11_i32_247 : i32 to index
    %c0_255 = arith.constant 0 : index
    %913 = vector.load %arg7[%912, %c0_255] : memref<16x128xf32, #tpu.memory_space<vmem>>, vector<1x128xf32>
    tpu.vector_store %arg7[%912, %c0_255], %911 {strides = array<i32>} : memref<16x128xf32, #tpu.memory_space<vmem>>, vector<1x128xf32>,
    %c12_i32_256 = arith.constant 12 : i32
    %914 = arith.index_cast %c12_i32_256 : i32 to index
    %c0_257 = arith.constant 0 : index
    %915 = vector.load %arg8[%914, %c0_257] : memref<16x512xf32, #tpu.memory_space<vmem>>, vector<1x512xf32>
    %c0_258 = arith.constant 0 : index
    %c0_259 = arith.constant 0 : index
    %916 = vector.load %arg5[%c0_258, %c0_259] : memref<128x512xf32, #tpu.memory_space<vmem>>, vector<128x512xf32>
    %cst_260 = arith.constant dense<0.000000e+00> : vector<1x512xf32>
    %917 = tpu.matmul %911, %916, %cst_260 {dimension_numbers = #tpu.dot_dimension_numbers<[1], [0], [0], [1], [0, 0, 1, 1], [], []>} : vector<1x128xf32>, vector<128x512xf32>, vector<1x512xf32> -> vector<1x512xf32>
    %918 = arith.addf %915, %917 : vector<1x512xf32>
    %919 = vector.extract_strided_slice %918 {offsets = [0, 0], sizes = [1, 128], strides = [1, 1]} : vector<1x512xf32> to vector<1x128xf32>
    %920 = arith.negf %919 : vector<1x128xf32>
    %921 = math.exp %920 : vector<1x128xf32>
    %cst_261 = arith.constant 1.000000e+00 : f32
    %922 = vector.broadcast %cst_261 : f32 to vector<1x128xf32>
    %923 = arith.addf %922, %921 : vector<1x128xf32>
    %924 = arith.divf %922, %923 : vector<1x128xf32>
    %925 = vector.extract_strided_slice %918 {offsets = [0, 128], sizes = [1, 128], strides = [1, 1]} : vector<1x512xf32> to vector<1x128xf32>
    %926 = arith.negf %925 : vector<1x128xf32>
    %927 = math.exp %926 : vector<1x128xf32>
    %cst_262 = arith.constant 1.000000e+00 : f32
    %928 = vector.broadcast %cst_262 : f32 to vector<1x128xf32>
    %929 = arith.addf %928, %927 : vector<1x128xf32>
    %930 = arith.divf %928, %929 : vector<1x128xf32>
    %931 = vector.extract_strided_slice %918 {offsets = [0, 256], sizes = [1, 128], strides = [1, 1]} : vector<1x512xf32> to vector<1x128xf32>
    %932 = math.tanh %931 : vector<1x128xf32>
    %933 = vector.extract_strided_slice %918 {offsets = [0, 384], sizes = [1, 128], strides = [1, 1]} : vector<1x512xf32> to vector<1x128xf32>
    %934 = arith.negf %933 : vector<1x128xf32>
    %935 = math.exp %934 : vector<1x128xf32>
    %cst_263 = arith.constant 1.000000e+00 : f32
    %936 = vector.broadcast %cst_263 : f32 to vector<1x128xf32>
    %937 = arith.addf %936, %935 : vector<1x128xf32>
    %938 = arith.divf %936, %937 : vector<1x128xf32>
    %939 = arith.mulf %930, %909 : vector<1x128xf32>
    %940 = arith.mulf %924, %932 : vector<1x128xf32>
    %941 = arith.addf %939, %940 : vector<1x128xf32>
    %942 = math.tanh %941 : vector<1x128xf32>
    %943 = arith.mulf %938, %942 : vector<1x128xf32>
    %944 = arith.index_cast %c12_i32_256 : i32 to index
    %c0_264 = arith.constant 0 : index
    %945 = vector.load %arg7[%944, %c0_264] : memref<16x128xf32, #tpu.memory_space<vmem>>, vector<1x128xf32>
    tpu.vector_store %arg7[%944, %c0_264], %943 {strides = array<i32>} : memref<16x128xf32, #tpu.memory_space<vmem>>, vector<1x128xf32>,
    %c13_i32_265 = arith.constant 13 : i32
    %946 = arith.index_cast %c13_i32_265 : i32 to index
    %c0_266 = arith.constant 0 : index
    %947 = vector.load %arg8[%946, %c0_266] : memref<16x512xf32, #tpu.memory_space<vmem>>, vector<1x512xf32>
    %c0_267 = arith.constant 0 : index
    %c0_268 = arith.constant 0 : index
    %948 = vector.load %arg5[%c0_267, %c0_268] : memref<128x512xf32, #tpu.memory_space<vmem>>, vector<128x512xf32>
    %cst_269 = arith.constant dense<0.000000e+00> : vector<1x512xf32>
    %949 = tpu.matmul %943, %948, %cst_269 {dimension_numbers = #tpu.dot_dimension_numbers<[1], [0], [0], [1], [0, 0, 1, 1], [], []>} : vector<1x128xf32>, vector<128x512xf32>, vector<1x512xf32> -> vector<1x512xf32>
    %950 = arith.addf %947, %949 : vector<1x512xf32>
    %951 = vector.extract_strided_slice %950 {offsets = [0, 0], sizes = [1, 128], strides = [1, 1]} : vector<1x512xf32> to vector<1x128xf32>
    %952 = arith.negf %951 : vector<1x128xf32>
    %953 = math.exp %952 : vector<1x128xf32>
    %cst_270 = arith.constant 1.000000e+00 : f32
    %954 = vector.broadcast %cst_270 : f32 to vector<1x128xf32>
    %955 = arith.addf %954, %953 : vector<1x128xf32>
    %956 = arith.divf %954, %955 : vector<1x128xf32>
    %957 = vector.extract_strided_slice %950 {offsets = [0, 128], sizes = [1, 128], strides = [1, 1]} : vector<1x512xf32> to vector<1x128xf32>
    %958 = arith.negf %957 : vector<1x128xf32>
    %959 = math.exp %958 : vector<1x128xf32>
    %cst_271 = arith.constant 1.000000e+00 : f32
    %960 = vector.broadcast %cst_271 : f32 to vector<1x128xf32>
    %961 = arith.addf %960, %959 : vector<1x128xf32>
    %962 = arith.divf %960, %961 : vector<1x128xf32>
    %963 = vector.extract_strided_slice %950 {offsets = [0, 256], sizes = [1, 128], strides = [1, 1]} : vector<1x512xf32> to vector<1x128xf32>
    %964 = math.tanh %963 : vector<1x128xf32>
    %965 = vector.extract_strided_slice %950 {offsets = [0, 384], sizes = [1, 128], strides = [1, 1]} : vector<1x512xf32> to vector<1x128xf32>
    %966 = arith.negf %965 : vector<1x128xf32>
    %967 = math.exp %966 : vector<1x128xf32>
    %cst_272 = arith.constant 1.000000e+00 : f32
    %968 = vector.broadcast %cst_272 : f32 to vector<1x128xf32>
    %969 = arith.addf %968, %967 : vector<1x128xf32>
    %970 = arith.divf %968, %969 : vector<1x128xf32>
    %971 = arith.mulf %962, %941 : vector<1x128xf32>
    %972 = arith.mulf %956, %964 : vector<1x128xf32>
    %973 = arith.addf %971, %972 : vector<1x128xf32>
    %974 = math.tanh %973 : vector<1x128xf32>
    %975 = arith.mulf %970, %974 : vector<1x128xf32>
    %976 = arith.index_cast %c13_i32_265 : i32 to index
    %c0_273 = arith.constant 0 : index
    %977 = vector.load %arg7[%976, %c0_273] : memref<16x128xf32, #tpu.memory_space<vmem>>, vector<1x128xf32>
    tpu.vector_store %arg7[%976, %c0_273], %975 {strides = array<i32>} : memref<16x128xf32, #tpu.memory_space<vmem>>, vector<1x128xf32>,
    %c14_i32_274 = arith.constant 14 : i32
    %978 = arith.index_cast %c14_i32_274 : i32 to index
    %c0_275 = arith.constant 0 : index
    %979 = vector.load %arg8[%978, %c0_275] : memref<16x512xf32, #tpu.memory_space<vmem>>, vector<1x512xf32>
    %c0_276 = arith.constant 0 : index
    %c0_277 = arith.constant 0 : index
    %980 = vector.load %arg5[%c0_276, %c0_277] : memref<128x512xf32, #tpu.memory_space<vmem>>, vector<128x512xf32>
    %cst_278 = arith.constant dense<0.000000e+00> : vector<1x512xf32>
    %981 = tpu.matmul %975, %980, %cst_278 {dimension_numbers = #tpu.dot_dimension_numbers<[1], [0], [0], [1], [0, 0, 1, 1], [], []>} : vector<1x128xf32>, vector<128x512xf32>, vector<1x512xf32> -> vector<1x512xf32>
    %982 = arith.addf %979, %981 : vector<1x512xf32>
    %983 = vector.extract_strided_slice %982 {offsets = [0, 0], sizes = [1, 128], strides = [1, 1]} : vector<1x512xf32> to vector<1x128xf32>
    %984 = arith.negf %983 : vector<1x128xf32>
    %985 = math.exp %984 : vector<1x128xf32>
    %cst_279 = arith.constant 1.000000e+00 : f32
    %986 = vector.broadcast %cst_279 : f32 to vector<1x128xf32>
    %987 = arith.addf %986, %985 : vector<1x128xf32>
    %988 = arith.divf %986, %987 : vector<1x128xf32>
    %989 = vector.extract_strided_slice %982 {offsets = [0, 128], sizes = [1, 128], strides = [1, 1]} : vector<1x512xf32> to vector<1x128xf32>
    %990 = arith.negf %989 : vector<1x128xf32>
    %991 = math.exp %990 : vector<1x128xf32>
    %cst_280 = arith.constant 1.000000e+00 : f32
    %992 = vector.broadcast %cst_280 : f32 to vector<1x128xf32>
    %993 = arith.addf %992, %991 : vector<1x128xf32>
    %994 = arith.divf %992, %993 : vector<1x128xf32>
    %995 = vector.extract_strided_slice %982 {offsets = [0, 256], sizes = [1, 128], strides = [1, 1]} : vector<1x512xf32> to vector<1x128xf32>
    %996 = math.tanh %995 : vector<1x128xf32>
    %997 = vector.extract_strided_slice %982 {offsets = [0, 384], sizes = [1, 128], strides = [1, 1]} : vector<1x512xf32> to vector<1x128xf32>
    %998 = arith.negf %997 : vector<1x128xf32>
    %999 = math.exp %998 : vector<1x128xf32>
    %cst_281 = arith.constant 1.000000e+00 : f32
    %1000 = vector.broadcast %cst_281 : f32 to vector<1x128xf32>
    %1001 = arith.addf %1000, %999 : vector<1x128xf32>
    %1002 = arith.divf %1000, %1001 : vector<1x128xf32>
    %1003 = arith.mulf %994, %973 : vector<1x128xf32>
    %1004 = arith.mulf %988, %996 : vector<1x128xf32>
    %1005 = arith.addf %1003, %1004 : vector<1x128xf32>
    %1006 = math.tanh %1005 : vector<1x128xf32>
    %1007 = arith.mulf %1002, %1006 : vector<1x128xf32>
    %1008 = arith.index_cast %c14_i32_274 : i32 to index
    %c0_282 = arith.constant 0 : index
    %1009 = vector.load %arg7[%1008, %c0_282] : memref<16x128xf32, #tpu.memory_space<vmem>>, vector<1x128xf32>
    tpu.vector_store %arg7[%1008, %c0_282], %1007 {strides = array<i32>} : memref<16x128xf32, #tpu.memory_space<vmem>>, vector<1x128xf32>,
    %c15_i32_283 = arith.constant 15 : i32
    %1010 = arith.index_cast %c15_i32_283 : i32 to index
    %c0_284 = arith.constant 0 : index
    %1011 = vector.load %arg8[%1010, %c0_284] : memref<16x512xf32, #tpu.memory_space<vmem>>, vector<1x512xf32>
    %c0_285 = arith.constant 0 : index
    %c0_286 = arith.constant 0 : index
    %1012 = vector.load %arg5[%c0_285, %c0_286] : memref<128x512xf32, #tpu.memory_space<vmem>>, vector<128x512xf32>
    %cst_287 = arith.constant dense<0.000000e+00> : vector<1x512xf32>
    %1013 = tpu.matmul %1007, %1012, %cst_287 {dimension_numbers = #tpu.dot_dimension_numbers<[1], [0], [0], [1], [0, 0, 1, 1], [], []>} : vector<1x128xf32>, vector<128x512xf32>, vector<1x512xf32> -> vector<1x512xf32>
    %1014 = arith.addf %1011, %1013 : vector<1x512xf32>
    %1015 = vector.extract_strided_slice %1014 {offsets = [0, 0], sizes = [1, 128], strides = [1, 1]} : vector<1x512xf32> to vector<1x128xf32>
    %1016 = arith.negf %1015 : vector<1x128xf32>
    %1017 = math.exp %1016 : vector<1x128xf32>
    %cst_288 = arith.constant 1.000000e+00 : f32
    %1018 = vector.broadcast %cst_288 : f32 to vector<1x128xf32>
    %1019 = arith.addf %1018, %1017 : vector<1x128xf32>
    %1020 = arith.divf %1018, %1019 : vector<1x128xf32>
    %1021 = vector.extract_strided_slice %1014 {offsets = [0, 128], sizes = [1, 128], strides = [1, 1]} : vector<1x512xf32> to vector<1x128xf32>
    %1022 = arith.negf %1021 : vector<1x128xf32>
    %1023 = math.exp %1022 : vector<1x128xf32>
    %cst_289 = arith.constant 1.000000e+00 : f32
    %1024 = vector.broadcast %cst_289 : f32 to vector<1x128xf32>
    %1025 = arith.addf %1024, %1023 : vector<1x128xf32>
    %1026 = arith.divf %1024, %1025 : vector<1x128xf32>
    %1027 = vector.extract_strided_slice %1014 {offsets = [0, 256], sizes = [1, 128], strides = [1, 1]} : vector<1x512xf32> to vector<1x128xf32>
    %1028 = math.tanh %1027 : vector<1x128xf32>
    %1029 = vector.extract_strided_slice %1014 {offsets = [0, 384], sizes = [1, 128], strides = [1, 1]} : vector<1x512xf32> to vector<1x128xf32>
    %1030 = arith.negf %1029 : vector<1x128xf32>
    %1031 = math.exp %1030 : vector<1x128xf32>
    %cst_290 = arith.constant 1.000000e+00 : f32
    %1032 = vector.broadcast %cst_290 : f32 to vector<1x128xf32>
    %1033 = arith.addf %1032, %1031 : vector<1x128xf32>
    %1034 = arith.divf %1032, %1033 : vector<1x128xf32>
    %1035 = arith.mulf %1026, %1005 : vector<1x128xf32>
    %1036 = arith.mulf %1020, %1028 : vector<1x128xf32>
    %1037 = arith.addf %1035, %1036 : vector<1x128xf32>
    %1038 = math.tanh %1037 : vector<1x128xf32>
    %1039 = arith.mulf %1034, %1038 : vector<1x128xf32>
    %1040 = arith.index_cast %c15_i32_283 : i32 to index
    %c0_291 = arith.constant 0 : index
    %1041 = vector.load %arg7[%1040, %c0_291] : memref<16x128xf32, #tpu.memory_space<vmem>>, vector<1x128xf32>
    tpu.vector_store %arg7[%1040, %c0_291], %1039 {strides = array<i32>} : memref<16x128xf32, #tpu.memory_space<vmem>>, vector<1x128xf32>,
    %c16_i32_292 = arith.constant 16 : i32
    return
  }
}

</mosaic_0001>

<bundles_post_ra>
// kernel: tpu_custom_call.1
= control target key start
LH: loop header
LB: loop body
LE: loop exit
PB: predicated region body
PF: predicated region fallthrough
CT: control target
= control target key end

     0   :  { %12 = vsyncpa [#allocation4], 0  ;;  %s14105_s0 = inlined_call_operand.hbm [shape: f32[16,64], index: 0, kind: input, shape index: {}]   ;;  %s14106_s1 = inlined_call_operand.hbm [shape: f32[64,512], index: 1, kind: input, shape index: {}]   ;;  %s14107_s2 = inlined_call_operand.hbm [shape: f32[128,512], index: 2, kind: input, shape index: {}]   ;;  %s14108_s3 = inlined_call_operand.vmem [shape: f32[1,512], index: 3, kind: input, shape index: {}]   ;;  %s14109_s4 = inlined_call_operand.hbm [shape: f32[128,512], index: 4, kind: input, shape index: {}]   ;;  %s14110_s5 = inlined_call_operand.hbm [shape: f32[128,512], index: 5, kind: input, shape index: {}]   ;;  %s14111_s6 = inlined_call_operand.vmem [shape: f32[1,512], index: 6, kind: input, shape index: {}]   ;;  %s14112_s7 = inlined_call_operand.hbm [shape: f32[16,128], index: 7, kind: output, shape index: {}]  }
   0x1   :  { %13 = vsyncpa [#allocation7], 0 }
   0x2   :  { %14 = vsyncpa [#allocation10], 0 }
   0x3   :  { %15 = vsyncpa [#allocation5], 0  ;;  %s12120_s24 = smov [#allocation6]   ;;  %s11980_s28 = scalar_lea.hbm %s14106_s1, 4096 }
   0x4   :  { %s33_s25 = sshll.u32 %s12120_s24, 4  ;;  %p11981_p0 = scmp.ne.s32.totalorder %s14106_s1, %s11980_s28  ;;  %s34_s25 = int_to_ptr.vmem [resolvable:$true] %s33_s25 }
   0x5   :  { %p11984_p1 = scmp.lt.u32.totalorder %s11980_s28, %s14106_s1 }
   0x7   :  { %p11986_p2 = pnand %p11984_p1, %p11981_p0 }
   0x9   :  { %11989 = shalt.err (!%p11986_p2)
}
   0xa   :  { %s11990_s10 = scalar_lea.vmem %s34_s25, 4096  ;;  %p11995_p4 = scmp.lt.s32.totalorder %s34_s25, %s34_s25 }
   0xb   :  { %p11991_p3 = scmp.ne.s32.totalorder %s34_s25, %s11990_s10  ;;  %p11996_p5 = scmp.lt.s32.totalorder %s11990_s10, %s11990_s10 }
   0xd   :  { %p11997_p6 = por %p11996_p5, %p11995_p4 }
   0xf   :  { %p11998_p7 = pnand %p11997_p6, %p11991_p3 }
  0x11   :  { %12001 = shalt.err (!%p11998_p7)
}
  0x12   :  { %s12121_s11 = smov 512   ;;  %s12122_s12 = smov 32  }
  0x13   :  { %39 = dma.hbm_to_vmem [thread:$0]  %s14106_s1, 4096, %s34_s25, [#allocation7], %s12121_s11, %s12121_s11, %s12122_s12  }
  0x14   :  { %s12123_s15 = smov [#allocation9]   ;;  %s12124_s17 = smov [#allocation3]  }
  0x15   :  { %s59_s16 = sshll.u32 %s12123_s15, 4  ;;  %s21_s18 = sshll.u32 %s12124_s17, 4  ;;  %s60_s16 = int_to_ptr.vmem [resolvable:$true] %s59_s16  ;;  %s22_s18 = int_to_ptr.vmem [resolvable:$true] %s21_s18 }
  0x16   :  { %s12002_s21 = scalar_lea.hbm %s14109_s4, 8192 }
  0x17   :  { %p12003_p8 = scmp.ne.s32.totalorder %s14109_s4, %s12002_s21  ;;  %p12006_p9 = scmp.lt.u32.totalorder %s12002_s21, %s14109_s4 }
  0x19   :  { %p12008_p10 = pnand %p12006_p9, %p12003_p8 }
  0x1b   :  { %12011 = shalt.err (!%p12008_p10)
}
  0x1c   :  { %s12012_s1 = scalar_lea.vmem %s60_s16, 8192  ;;  %p12017_p12 = scmp.lt.s32.totalorder %s60_s16, %s60_s16 }
  0x1d   :  { %p12013_p11 = scmp.ne.s32.totalorder %s60_s16, %s12012_s1  ;;  %p12018_p13 = scmp.lt.s32.totalorder %s12012_s1, %s12012_s1 }
  0x1f   :  { %p12019_p0 = por %p12018_p13, %p12017_p12 }
  0x21   :  { %p12020_p1 = pnand %p12019_p0, %p12013_p11 }
  0x23   :  { %12023 = shalt.err (!%p12020_p1)
}
  0x24   :  { %65 = dma.hbm_to_vmem [thread:$0]  %s14109_s4, 8192, %s60_s16, [#allocation10], %s12121_s11, %s12121_s11, %s12122_s12  }
  0x25   :  { %s12024_s30 = scalar_lea.hbm %s14105_s0, 256 }
  0x26   :  { %p12025_p2 = scmp.ne.s32.totalorder %s14105_s0, %s12024_s30  ;;  %p12028_p3 = scmp.lt.u32.totalorder %s12024_s30, %s14105_s0 }
  0x28   :  { %p12030_p4 = pnand %p12028_p3, %p12025_p2 }
  0x2a   :  { %12033 = shalt.err (!%p12030_p4)
}
  0x2b   :  { %s12034_s14 = scalar_lea.vmem %s22_s18, 256  ;;  %p12039_p6 = scmp.lt.s32.totalorder %s22_s18, %s22_s18 }
  0x2c   :  { %p12035_p5 = scmp.ne.s32.totalorder %s22_s18, %s12034_s14  ;;  %p12040_p7 = scmp.lt.s32.totalorder %s12034_s14, %s12034_s14 }
  0x2e   :  { %p12041_p8 = por %p12040_p7, %p12039_p6 }
  0x30   :  { %p12042_p9 = pnand %p12041_p8, %p12035_p5 }
  0x32   :  { %12045 = shalt.err (!%p12042_p9)
}
  0x33   :  { %s12125_s4 = smov 128   ;;  %s12126_s15 = smov 8  }
  0x34   :  { %27 = dma.hbm_to_vmem [thread:$0]  %s14105_s0, 256, %s22_s18, [#allocation4], %s12125_s4, %s12125_s4, %s12126_s15  }
  0x35   :  { %s12127_s19 = smov [#allocation8]   ;;  %s12128_s21 = smov [#allocation11]  }
  0x36   :  { %s45_s20 = sshll.u32 %s12127_s19, 4  ;;  %s71_s22 = sshll.u32 %s12128_s21, 4  ;;  %s46_s20 = int_to_ptr.vmem [resolvable:$true] %s45_s20  ;;  %s72_s22 = int_to_ptr.vmem [resolvable:$true] %s71_s22 }
  0x37   :  { %s12046_s26 = scalar_lea.hbm %s14107_s2, 8192 }
  0x38   :  { %p12047_p10 = scmp.ne.s32.totalorder %s14107_s2, %s12046_s26  ;;  %p12050_p11 = scmp.lt.u32.totalorder %s12046_s26, %s14107_s2 }
  0x3a   :  { %p12052_p12 = pnand %p12050_p11, %p12047_p10 }
  0x3c   :  { %12055 = shalt.err (!%p12052_p12)
}
  0x3d   :  { %s12056_s0 = scalar_lea.vmem %s46_s20, 8192  ;;  %p12061_p0 = scmp.lt.s32.totalorder %s46_s20, %s46_s20 }
  0x3e   :  { %p12057_p13 = scmp.ne.s32.totalorder %s46_s20, %s12056_s0  ;;  %p12062_p1 = scmp.lt.s32.totalorder %s12056_s0, %s12056_s0 }
  0x40   :  { %p12063_p2 = por %p12062_p1, %p12061_p0 }
  0x42   :  { %p12064_p3 = pnand %p12063_p2, %p12057_p13 }
  0x44   :  { %12067 = shalt.err (!%p12064_p3)
}
  0x45   :  { %51 = dma.hbm_to_vmem [thread:$0]  %s14107_s2, 8192, %s46_s20, [#allocation7], %s12121_s11, %s12121_s11, %s12122_s12  }
  0x46   :  { %s12068_s9 = scalar_lea.hbm %s14110_s5, 8192 }
  0x47   :  { %p12069_p4 = scmp.ne.s32.totalorder %s14110_s5, %s12068_s9  ;;  %p12072_p5 = scmp.lt.u32.totalorder %s12068_s9, %s14110_s5 }
  0x49   :  { %p12074_p6 = pnand %p12072_p5, %p12069_p4 }
  0x4b   :  { %12077 = shalt.err (!%p12074_p6)
}
  0x4c   :  { %s12078_s17 = scalar_lea.vmem %s72_s22, 8192  ;;  %p12083_p8 = scmp.lt.s32.totalorder %s72_s22, %s72_s22 }
  0x4d   :  { %p12079_p7 = scmp.ne.s32.totalorder %s72_s22, %s12078_s17  ;;  %p12084_p9 = scmp.lt.s32.totalorder %s12078_s17, %s12078_s17 }
  0x4f   :  { %p12085_p10 = por %p12084_p9, %p12083_p8 }
  0x51   :  { %p12086_p11 = pnand %p12085_p10, %p12079_p7 }
  0x53   :  { %12089 = shalt.err (!%p12086_p11)
}
  0x54   :  { %77 = dma.hbm_to_vmem [thread:$0]  %s14110_s5, 8192, %s72_s22, [#allocation10], %s12121_s11, %s12121_s11, %s12122_s12  }
  0x55   :  { %12112 = dma.done.wait [#allocation4], 256  }
  0x56   :  { %12113 = vsyncadd [#allocation4], 4294967040 }
  0x57   :  { %12114 = dma.done.wait [#allocation7], 12288  }
  0x58   :  { %12115 = vsyncadd [#allocation7], 4294955008 }
  0x59   :  { %12116 = dma.done.wait [#allocation10], 16384  }
  0x5a   :  { %12117 = vsyncadd [#allocation10], 4294950912  ;;  %v12129_v0 = vmov 0.0   ;;  %v98_v1 = vld [vmem:[#allocation6 + $0x8] sm:$0xff]  ;;  %v100_v3 = vld [vmem:[#allocation6 + $0x18] sm:$0xff]  ;;  %vm151_vm0 = vcmask 523264  }
  0x5b   :  { %222 = vmatprep.mubr.f32.mxu0 %v12129_v0  ;;  %299 = vmatprep.mubr.f32.mxu1 %v12129_v0  ;;  %v102_v2 = vld [vmem:[#allocation6 + $0x28] sm:$0xff]  ;;  %v104_v5 = vld [vmem:[#allocation6 + $0x38] sm:$0xff]  ;;  %v97_v6 = vld [vmem:[#allocation6] sm:$0xff] }
  0x5c   :  { %v9312_v4 = vpack.c.bf16 %v102_v2, %v98_v1  ;;  %v101_v7 = vld [vmem:[#allocation6 + $0x20] sm:$0xff]  ;;  %v9328_v8 = vpack.c.bf16 %v104_v5, %v100_v3  ;;  %v99_v10 = vld [vmem:[#allocation6 + $0x10] sm:$0xff]  ;;  %v106_v12 = vld [vmem:[#allocation6 + $0x48] sm:$0xff] }
  0x5d   :  { %v9314_v9 = vpack.c.bf16 %v101_v7, %v97_v6  ;;  %v103_v11 = vld [vmem:[#allocation6 + $0x30] sm:$0xff]  ;;  %v110_v14 = vld [vmem:[#allocation6 + $0x68] sm:$0xff]  ;;  %v108_v15 = vld [vmem:[#allocation6 + $0x58] sm:$0xff] }
  0x5e   :  { %9313 = vmatprep.subr.bf16.mxu0 %v9312_v4  ;;  %v9330_v13 = vpack.c.bf16 %v103_v11, %v99_v10  ;;  %v112_v16 = vld [vmem:[#allocation6 + $0x78] sm:$0xff]  ;;  %9329 = vmatprep.subr.bf16.mxu1 %v9328_v8  ;;  %v9316_v17 = vpack.c.bf16 %v110_v14, %v106_v12  ;;  %v105_v19 = vld [vmem:[#allocation6 + $0x40] sm:$0xff]  ;;  %v107_v21 = vld [vmem:[#allocation6 + $0x50] sm:$0xff] }
  0x5f   :  { %9315 = vmatpush1.bf16.msra.mxu0 %v9314_v9  ;;  %v9332_v18 = vpack.c.bf16 %v112_v16, %v108_v15  ;;  %v109_v20 = vld [vmem:[#allocation6 + $0x60] sm:$0xff]  ;;  %v111_v23 = vld [vmem:[#allocation6 + $0x70] sm:$0xff]  ;;  %v114_v24 = vld [vmem:[#allocation6 + $0x88] sm:$0xff] }
  0x60   :  { %9331 = vmatpush1.bf16.msra.mxu1 %v9330_v13  ;;  %v9318_v22 = vpack.c.bf16 %v109_v20, %v105_v19  ;;  %v118_v25 = vld [vmem:[#allocation6 + $0xa8] sm:$0xff]  ;;  %9317 = vmatprep.subr.bf16.mxu0 %v9316_v17  ;;  %v9334_v26 = vpack.c.bf16 %v111_v23, %v107_v21  ;;  %v116_v28 = vld [vmem:[#allocation6 + $0x98] sm:$0xff]  ;;  %v113_v30 = vld [vmem:[#allocation6 + $0x80] sm:$0xff] }
  0x61   :  { %9333 = vmatprep.subr.bf16.mxu1 %v9332_v18  ;;  %v9320_v27 = vpack.c.bf16 %v118_v25, %v114_v24  ;;  %v120_v29 = vld [vmem:[#allocation6 + $0xb8] sm:$0xff]  ;;  %v117_v32 = vld [vmem:[#allocation6 + $0xa0] sm:$0xff]  ;;  %v115_v33 = vld [vmem:[#allocation6 + $0x90] sm:$0xff] }
  0x62   :  { %v9336_v31 = vpack.c.bf16 %v120_v29, %v116_v28  ;;  %v119_v34 = vld [vmem:[#allocation6 + $0xb0] sm:$0xff]  ;;  %v9322_v35 = vpack.c.bf16 %v117_v32, %v113_v30  ;;  %v122_v36 = vld [vmem:[#allocation6 + $0xc8] sm:$0xff]  ;;  %v124_v38 = vld [vmem:[#allocation6 + $0xd8] sm:$0xff] }
  0x63   :  { %9319 = vmatpush1.bf16.msra.mxu0 %v9318_v22  ;;  %v126_v37 = vld [vmem:[#allocation6 + $0xe8] sm:$0xff]  ;;  %v9338_v39 = vpack.c.bf16 %v119_v34, %v115_v33  ;;  %v128_v41 = vld [vmem:[#allocation6 + $0xf8] sm:$0xff]  ;;  %v121_v42 = vld [vmem:[#allocation6 + $0xc0] sm:$0xff] }
  0x64   :  { %9335 = vmatpush1.bf16.msra.mxu1 %v9334_v26  ;;  %9321 = vmatprep.subr.bf16.mxu0 %v9320_v27  ;;  %v9324_v40 = vpack.c.bf16 %v126_v37, %v122_v36  ;;  %v125_v43 = vld [vmem:[#allocation6 + $0xe0] sm:$0xff]  ;;  %v9340_v44 = vpack.c.bf16 %v128_v41, %v124_v38  ;;  %v123_v45 = vld [vmem:[#allocation6 + $0xd0] sm:$0xff]  ;;  %v322_v47 = vld [vmem:[#allocation8 + $0x8] sm:$0xff] }
  0x65   :  { %9337 = vmatprep.subr.bf16.mxu1 %v9336_v31  ;;  %v127_v46 = vld [vmem:[#allocation6 + $0xf0] sm:$0xff]  ;;  %v326_v48 = vld [vmem:[#allocation8 + $0x28] sm:$0xff]  ;;  %v324_v49 = vld [vmem:[#allocation8 + $0x18] sm:$0xff]  ;;  %v9326_v50 = vpack.c.bf16 %v125_v43, %v121_v42 }
  0x66   :  { %v328_v51 = vld [vmem:[#allocation8 + $0x38] sm:$0xff]  ;;  %v9342_v52 = vpack.c.bf16 %v127_v46, %v123_v45  ;;  %v12249_v53 = vpack.c.bf16 %v326_v48, %v322_v47  ;;  %v321_v54 = vld [vmem:[#allocation8] sm:$0xff]  ;;  %v323_v56 = vld [vmem:[#allocation8 + $0x10] sm:$0xff] }
  0x67   :  { %9323 = vmatpush1.bf16.msra.mxu0 %v9322_v35  ;;  %v325_v55 = vld [vmem:[#allocation8 + $0x20] sm:$0xff]  ;;  %v12251_v57 = vpack.c.bf16 %v328_v51, %v324_v49  ;;  %v327_v58 = vld [vmem:[#allocation8 + $0x30] sm:$0xff]  ;;  %v330_v59 = vld [vmem:[#allocation8 + $0x48] sm:$0xff] }
  0x68   :  { %9339 = vmatpush1.bf16.msra.mxu1 %v9338_v39  ;;  %9325 = vmatprep.subr.bf16.mxu0 %v9324_v40  ;;  %v334_v60 = vld [vmem:[#allocation8 + $0x68] sm:$0xff]  ;;  %v332_v61 = vld [vmem:[#allocation8 + $0x58] sm:$0xff]  ;;  %v95_v63 = vld [vmem:[#allocation3] sm:$0xff]  ;;  %v12253_v1 = vpack.c.bf16 %v325_v55, %v321_v54  ;;  %v12256_v2 = vpack.c.bf16 %v327_v58, %v323_v56 }
  0x69   :  { %9341 = vmatprep.subr.bf16.mxu1 %v9340_v44  ;;  %v336_v62 = vld [vmem:[#allocation8 + $0x78] sm:$0xff]  ;;  %v12258_v3 = vpack.c.bf16 %v334_v60, %v330_v59  ;;  %v329_v4 = vld [vmem:[#allocation8 + $0x40] sm:$0xff]  ;;  %v331_v6 = vld [vmem:[#allocation8 + $0x50] sm:$0xff] }
  0x6a   :  { %v333_v5 = vld [vmem:[#allocation8 + $0x60] sm:$0xff]  ;;  %v12261_v7 = vpack.c.bf16 %v336_v62, %v332_v61  ;;  %v335_v8 = vld [vmem:[#allocation8 + $0x70] sm:$0xff]  ;;  %v338_v9 = vld [vmem:[#allocation8 + $0x88] sm:$0xff] }
  0x6b   :  { %9327 = vmatpush1.bf16.msra.mxu0 %v9326_v50  ;;  %v342_v10 = vld [vmem:[#allocation8 + $0xa8] sm:$0xff]  ;;  %v340_v11 = vld [vmem:[#allocation8 + $0x98] sm:$0xff]  ;;  %v12266_v13 = vpack.c.bf16 %v333_v5, %v329_v4  ;;  %v12270_v14 = vpack.c.bf16 %v335_v8, %v331_v6  ;;  %v337_v16 = vld [vmem:[#allocation8 + $0x80] sm:$0xff] }
  0x6c   :  { %9343 = vmatpush1.bf16.msra.mxu1 %v9342_v52  ;;  %9345 = vmatprep.subr.bf16.mxu0 %v12249_v53  ;;  %v344_v12 = vld [vmem:[#allocation8 + $0xb8] sm:$0xff]  ;;  %v12272_v15 = vpack.c.bf16 %v342_v10, %v338_v9  ;;  %v341_v17 = vld [vmem:[#allocation8 + $0xa0] sm:$0xff]  ;;  %v339_v18 = vld [vmem:[#allocation8 + $0x90] sm:$0xff] }
  0x6d   :  { %9377 = vmatprep.subr.bf16.mxu1 %v12251_v57  ;;  %v12275_v19 = vpack.c.bf16 %v344_v12, %v340_v11  ;;  %v343_v20 = vld [vmem:[#allocation8 + $0xb0] sm:$0xff]  ;;  %v346_v21 = vld [vmem:[#allocation8 + $0xc8] sm:$0xff]  ;;  %v348_v23 = vld [vmem:[#allocation8 + $0xd8] sm:$0xff]  ;;  %v12280_v25 = vpack.c.bf16 %v341_v17, %v337_v16 }
  0x6e   :  { %9212 = vmatmul.mubr.msk.f32.vlgmr.msra.gmra.mrb[0].mxu0 %vm151_vm0, %v95_v63  ;;  %v350_v22 = vld [vmem:[#allocation8 + $0xe8] sm:$0xff]  ;;  %v352_v24 = vld [vmem:[#allocation8 + $0xf8] sm:$0xff]  ;;  %v12284_v26 = vpack.c.bf16 %v343_v20, %v339_v18  ;;  %v345_v28 = vld [vmem:[#allocation8 + $0xc0] sm:$0xff] }
  0x6f   :  { %9214 = vmatmul.mubr.msk.f32.vlgmr.msra.gmra.mrb[0].mxu1 %vm151_vm0, %v95_v63  ;;  %9347 = vmatpush1.bf16.msra.mxu0 %v12253_v1  ;;  %v12286_v27 = vpack.c.bf16 %v350_v22, %v346_v21  ;;  %v349_v29 = vld [vmem:[#allocation8 + $0xe0] sm:$0xff]  ;;  %v347_v30 = vld [vmem:[#allocation8 + $0xd0] sm:$0xff]  ;;  %v12289_v31 = vpack.c.bf16 %v352_v24, %v348_v23  ;;  %v354_v33 = vld [vmem:[#allocation8 + $0x108] sm:$0xff] }
  0x70   :  { %9379 = vmatpush1.bf16.msra.mxu1 %v12256_v2  ;;  %9349 = vmatprep.subr.bf16.mxu0 %v12258_v3  ;;  %v351_v32 = vld [vmem:[#allocation8 + $0xf0] sm:$0xff]  ;;  %v358_v34 = vld [vmem:[#allocation8 + $0x128] sm:$0xff]  ;;  %v356_v35 = vld [vmem:[#allocation8 + $0x118] sm:$0xff]  ;;  %v12292_v37 = vpack.c.bf16 %v349_v29, %v345_v28 }
  0x71   :  { %9381 = vmatprep.subr.bf16.mxu1 %v12261_v7  ;;  %228 = vmatprep.mubr.f32.mxu0 %v12129_v0  ;;  %v360_v36 = vld [vmem:[#allocation8 + $0x138] sm:$0xff]  ;;  %v353_v38 = vld [vmem:[#allocation8 + $0x100] sm:$0xff]  ;;  %v12296_v39 = vpack.c.bf16 %v351_v32, %v347_v30  ;;  %v12298_v40 = vpack.c.bf16 %v358_v34, %v354_v33  ;;  %v355_v42 = vld [vmem:[#allocation8 + $0x110] sm:$0xff] }
  0x72   :  { %305 = vmatprep.mubr.f32.mxu1 %v12129_v0  ;;  %v357_v41 = vld [vmem:[#allocation8 + $0x120] sm:$0xff]  ;;  %v96_v43 = vld [vmem:[#allocation3 + $0x8] sm:$0xff]  ;;  %v12301_v44 = vpack.c.bf16 %v360_v36, %v356_v35  ;;  %v359_v45 = vld [vmem:[#allocation8 + $0x130] sm:$0xff]  ;;  %v131_v35 = vlaneseq }
  0x73   :  { %9351 = vmatpush1.bf16.msra.mxu0 %v12266_v13  ;;  %v362_v46 = vld [vmem:[#allocation8 + $0x148] sm:$0xff]  ;;  %v364_v48 = vld [vmem:[#allocation8 + $0x158] sm:$0xff]  ;;  %9215 = vmatmul.mubr.msk.f32.gmra.mrb[2].mxu1 %vm151_vm0, %v96_v43  ;;  %v12307_v50 = vpack.c.bf16 %v357_v41, %v353_v38  ;;  %v12312_v51 = vpack.c.bf16 %v359_v45, %v355_v42  ;;  %v361_v54 = vld [vmem:[#allocation8 + $0x140] sm:$0xff] }
  0x74   :  { %9383 = vmatpush1.bf16.msra.mxu1 %v12270_v14  ;;  %9353 = vmatprep.subr.bf16.mxu0 %v12272_v15  ;;  %v366_v47 = vld [vmem:[#allocation8 + $0x168] sm:$0xff]  ;;  %v368_v49 = vld [vmem:[#allocation8 + $0x178] sm:$0xff]  ;;  %v365_v55 = vld [vmem:[#allocation8 + $0x160] sm:$0xff]  ;;  %v12391_v36 = vshrl.u32 %v131_v35, 7 }
  0x75   :  { %9385 = vmatprep.subr.bf16.mxu1 %v12275_v19  ;;  %9213 = vmatmul.mubr.msk.f32.gmra.mrb[2].mxu0 %vm151_vm0, %v96_v43  ;;  %v12314_v52 = vpack.c.bf16 %v366_v47, %v362_v46  ;;  %v363_v56 = vld [vmem:[#allocation8 + $0x150] sm:$0xff]  ;;  %v12317_v58 = vpack.c.bf16 %v368_v49, %v364_v48  ;;  %v370_v60 = vld [vmem:[#allocation8 + $0x188] sm:$0xff]  ;;  %v372_v62 = vld [vmem:[#allocation8 + $0x198] sm:$0xff]  ;;  %v12320_v4 = vpack.c.bf16 %v365_v55, %v361_v54 }
  0x76   :  { %449 = vmatprep.mubr.f32.mxu0 %v12129_v0  ;;  %520 = vmatprep.mubr.f32.mxu1 %v12129_v0  ;;  %v367_v59 = vld [vmem:[#allocation8 + $0x170] sm:$0xff]  ;;  %v374_v61 = vld [vmem:[#allocation8 + $0x1a8] sm:$0xff]  ;;  %v376_v63 = vld [vmem:[#allocation8 + $0x1b8] sm:$0xff]  ;;  %v133_v38 = vsub.s32 0, %v12391_v36  ;;  %v141_v42 = vsub.s32 2, %v12391_v36  ;;  %v137_v43 = vsub.s32 1, %v12391_v36 }
  0x77   :  { %9355 = vmatpush1.bf16.msra.mxu0 %v12280_v25  ;;  %v12324_v5 = vpack.c.bf16 %v367_v59, %v363_v56  ;;  %v12326_v6 = vpack.c.bf16 %v374_v61, %v370_v60  ;;  %v369_v8 = vld [vmem:[#allocation8 + $0x180] sm:$0xff]  ;;  %v371_v10 = vld [vmem:[#allocation8 + $0x190] sm:$0xff]  ;;  %v12329_v11 = vpack.c.bf16 %v376_v63, %v372_v62  ;;  %v378_v16 = vld [vmem:[#allocation8 + $0x1c8] sm:$0xff]  ;;  %v145_v45 = vsub.s32 3, %v12391_v36 }
  0x78   :  { %9387 = vmatpush1.bf16.msra.mxu1 %v12284_v26  ;;  %9357 = vmatprep.subr.bf16.mxu0 %v12286_v27  ;;  %v373_v9 = vld [vmem:[#allocation8 + $0x1a0] sm:$0xff]  ;;  %v375_v12 = vld [vmem:[#allocation8 + $0x1b0] sm:$0xff]  ;;  %v382_v17 = vld [vmem:[#allocation8 + $0x1e8] sm:$0xff] }
  0x79   :  { %9389 = vmatprep.subr.bf16.mxu1 %v12289_v31  ;;  %v380_v18 = vld [vmem:[#allocation8 + $0x1d8] sm:$0xff]  ;;  %v12332_v21 = vpack.c.bf16 %v373_v9, %v369_v8  ;;  %v12336_v22 = vpack.c.bf16 %v375_v12, %v371_v10  ;;  %v12338_v23 = vpack.c.bf16 %v382_v17, %v378_v16  ;;  %v377_v24 = vld [vmem:[#allocation8 + $0x1c0] sm:$0xff]  ;;  %v379_v30 = vld [vmem:[#allocation8 + $0x1d0] sm:$0xff] }
  0x7a   :  { %v384_v20 = vld [vmem:[#allocation8 + $0x1f8] sm:$0xff]  ;;  %v381_v28 = vld [vmem:[#allocation8 + $0x1e0] sm:$0xff]  ;;  %v383_v32 = vld [vmem:[#allocation8 + $0x1f0] sm:$0xff] }
  0x7b   :  { %9359 = vmatpush1.bf16.msra.mxu0 %v12292_v37  ;;  %v12341_v29 = vpack.c.bf16 %v384_v20, %v380_v18  ;;  %v12344_v33 = vpack.c.bf16 %v381_v28, %v377_v24  ;;  %v12348_v34 = vpack.c.bf16 %v383_v32, %v379_v30  ;;  %v129_v41 = vld [vmem:[%s14108_s3] sm:$0xf]  ;;  %v12130_v18 = vmov 1966171168  }
  0x7c   :  { %9391 = vmatpush1.bf16.msra.mxu1 %v12296_v39  ;;  %9361 = vmatprep.subr.bf16.mxu0 %v12298_v40  ;;  %v138_v46 = vrot.slane %v129_v41, %v137_v43  ;;  %v146_v47 = vrot.slane %v129_v41, %v145_v45  ;;  %v534_v20 = vunpack.c.l.s4 %v12130_v18 }
  0x7d   :  { %9393 = vmatprep.subr.bf16.mxu1 %v12301_v44 }
  0x7e   :  { %v535_v24 = vunpack.c.0.s8 %v534_v20 }
  0x7f   :  { %9363 = vmatpush1.bf16.msra.mxu0 %v12307_v50 }
  0x80   :  { %9395 = vmatpush1.bf16.msra.mxu1 %v12312_v51  ;;  %9365 = vmatprep.subr.bf16.mxu0 %v12314_v52  ;;  %v12409_v28 = vsub.s32 %v535_v24, %v12391_v36 }
  0x81   :  { %9397 = vmatprep.subr.bf16.mxu1 %v12317_v58 }
  0x83   :  { %9367 = vmatpush1.bf16.msra.mxu0 %v12320_v4 }
  0x84   :  { %9399 = vmatpush1.bf16.msra.mxu1 %v12324_v5  ;;  %9369 = vmatprep.subr.bf16.mxu0 %v12326_v6 }
  0x85   :  { %9401 = vmatprep.subr.bf16.mxu1 %v12329_v11 }
  0x87   :  { %9371 = vmatpush1.bf16.msra.mxu0 %v12332_v21 }
  0x88   :  { %9403 = vmatpush1.bf16.msra.mxu1 %v12336_v22  ;;  %9373 = vmatprep.subr.bf16.mxu0 %v12338_v23 }
  0x89   :  { %9405 = vmatprep.subr.bf16.mxu1 %v12341_v29 }
  0x8b   :  { %9375 = vmatpush1.bf16.msra.mxu0 %v12344_v33 }
  0x8c   :  { %9407 = vmatpush1.bf16.msra.mxu1 %v12348_v34  ;;  %9409 = vmatprep.subr.bf16.mxu0 %v12249_v53 }
  0x8d   :  { %9441 = vmatprep.subr.bf16.mxu1 %v12251_v57 }
  0x8e   :  { %450 = vmatmul.mubr.f32.vlgmr.msra.gmra.mrb[4].mxu0 %v12129_v0 }
  0x8f   :  { %521 = vmatmul.mubr.f32.vlgmr.msra.gmra.mrb[4].mxu1 %v12129_v0  ;;  %9411 = vmatpush1.bf16.msra.mxu0 %v12253_v1 }
  0x90   :  { %9443 = vmatpush1.bf16.msra.mxu1 %v12256_v2  ;;  %9413 = vmatprep.subr.bf16.mxu0 %v12258_v3 }
  0x91   :  { %9445 = vmatprep.subr.bf16.mxu1 %v12261_v7  ;;  %719 = vmatprep.mubr.f32.mxu0 %v12129_v0 }
  0x92   :  { %790 = vmatprep.mubr.f32.mxu1 %v12129_v0 }
  0x93   :  { %9415 = vmatpush1.bf16.msra.mxu0 %v12266_v13 }
  0x94   :  { %9447 = vmatpush1.bf16.msra.mxu1 %v12270_v14  ;;  %9417 = vmatprep.subr.bf16.mxu0 %v12272_v15 }
  0x95   :  { %9449 = vmatprep.subr.bf16.mxu1 %v12275_v19 }
  0x97   :  { %9419 = vmatpush1.bf16.msra.mxu0 %v12280_v25 }
  0x98   :  { %9451 = vmatpush1.bf16.msra.mxu1 %v12284_v26  ;;  %9421 = vmatprep.subr.bf16.mxu0 %v12286_v27 }
  0x99   :  { %9453 = vmatprep.subr.bf16.mxu1 %v12289_v31 }
  0x9b   :  { %9423 = vmatpush1.bf16.msra.mxu0 %v12292_v37 }
  0x9c   :  { %9455 = vmatpush1.bf16.msra.mxu1 %v12296_v39  ;;  %9425 = vmatprep.subr.bf16.mxu0 %v12298_v40 }
  0x9d   :  { %9457 = vmatprep.subr.bf16.mxu1 %v12301_v44 }
  0x9f   :  { %9427 = vmatpush1.bf16.msra.mxu0 %v12307_v50 }
  0xa0   :  { %9459 = vmatpush1.bf16.msra.mxu1 %v12312_v51  ;;  %9429 = vmatprep.subr.bf16.mxu0 %v12314_v52 }
  0xa1   :  { %9461 = vmatprep.subr.bf16.mxu1 %v12317_v58 }
  0xa3   :  { %9431 = vmatpush1.bf16.msra.mxu0 %v12320_v4 }
  0xa4   :  { %9463 = vmatpush1.bf16.msra.mxu1 %v12324_v5  ;;  %9433 = vmatprep.subr.bf16.mxu0 %v12326_v6 }
  0xa5   :  { %9465 = vmatprep.subr.bf16.mxu1 %v12329_v11 }
  0xa7   :  { %9435 = vmatpush1.bf16.msra.mxu0 %v12332_v21 }
  0xa8   :  { %9467 = vmatpush1.bf16.msra.mxu1 %v12336_v22  ;;  %9437 = vmatprep.subr.bf16.mxu0 %v12338_v23 }
  0xa9   :  { %9469 = vmatprep.subr.bf16.mxu1 %v12341_v29 }
  0xab   :  { %9439 = vmatpush1.bf16.msra.mxu0 %v12344_v33 }
  0xac   :  { %9471 = vmatpush1.bf16.msra.mxu1 %v12348_v34  ;;  %9473 = vmatprep.subr.bf16.mxu0 %v12249_v53  ;;  %v134_v53 = vrot.slane %v129_v41, %v133_v38 }
  0xad   :  { %9505 = vmatprep.subr.bf16.mxu1 %v12251_v57  ;;  %v142_v57 = vrot.slane %v129_v41, %v141_v42 }
 0x141   :  { %v224_v48 = vpop.f32.mrb[0].mxu0 }
 0x142   :  { %v225_v49 = vadd.f32 %v224_v48, %v134_v53  ;;  %v301_v54 = vpop.f32.mrb[0].mxu1  ;;  %v226_v55 = vpop.f32.mrb[1].mxu0 }
 0x143   :  { %v302_v56 = vadd.f32 %v301_v54, %v142_v57  ;;  %v227_v59 = vadd.f32 %v226_v55, %v138_v46  ;;  %v303_v60 = vpop.f32.mrb[1].mxu1 }
 0x144   :  { %312 = vst [vmem:[#allocation2] sm:$0xff] %v225_v49  ;;  %v304_v61 = vadd.f32 %v303_v60, %v146_v47 }
 0x145   :  { %314 = vst [vmem:[#allocation2 + $0x10] sm:$0xff] %v302_v56  ;;  %313 = vst [vmem:[#allocation2 + $0x8] sm:$0xff] %v227_v59 }
 0x146   :  { %315 = vst [vmem:[#allocation2 + $0x18] sm:$0xff] %v304_v61  ;;  %v307_v8 = vpop.f32.mrb[2].mxu1 }
 0x147   :  { %v308_v10 = vadd.f32 %v307_v8, %v142_v57  ;;  %v309_v16 = vpop.f32.mrb[3].mxu1 }
 0x148   :  { %v230_v62 = vpop.f32.mrb[2].mxu0  ;;  %v310_v17 = vadd.f32 %v309_v16, %v146_v47 }
 0x149   :  { %v231_v63 = vadd.f32 %v230_v62, %v134_v53  ;;  %v232_v9 = vpop.f32.mrb[3].mxu0  ;;  %318 = vst [vmem:[#allocation2 + $0x30] sm:$0xff] %v308_v10 }
 0x14a   :  { %v233_v12 = vadd.f32 %v232_v9, %v138_v46  ;;  %319 = vst [vmem:[#allocation2 + $0x38] sm:$0xff] %v310_v17 }
 0x14b   :  { %316 = vst [vmem:[#allocation2 + $0x20] sm:$0xff] %v231_v63 }
 0x14c   :  { %317 = vst [vmem:[#allocation2 + $0x28] sm:$0xff] %v233_v12 }
 0x14d   :  { %v320_v54 = vld [vmem:[#allocation2] ss:$8 sm:$0xf] }
 0x161   :  { %v451_v30 = vpop.f32.mrb[4].mxu0 }
 0x162   :  { %v522_v32 = vpop.f32.mrb[4].mxu1  ;;  %v453_v35 = vpop.f32.mrb[5].mxu0 }
 0x163   :  { %v531_v41 = vcombine.low %v451_v30, %v453_v35  ;;  %v524_v53 = vpop.f32.mrb[5].mxu1 }
 0x164   :  { %v532_v48 = vcombine.low %v522_v32, %v524_v53 }
 0x165   :  { %v539_v57 = vrot.slane %v531_v41, %v12409_v28 }
 0x166   :  { %v546_v46 = vrot.slane %v532_v48, %v12409_v28 }
 0x168   :  { %v547_v47 = vcombine.low %v539_v57, %v546_v46 }
 0x16a   :  { %v554_v49 = vrot.slane %v547_v47, %v12409_v28 }
 0x16c   :  { %v556_v55 = vadd.f32 %v554_v49, %v320_v54  ;;  %v1132_v49 = vld [vmem:[#allocation8 + $0x8] sm:$0xff] }
 0x16d   :  { %v1136_v54 = vld [vmem:[#allocation8 + $0x28] sm:$0xff] }
 0x16e   :  { %v9216_v56 = vmul.f32 -1.442695, %v556_v55  ;;  %v564_v59 = vrot.slane %v556_v55, 1  ;;  %v575_v61 = vrot.slane %v556_v55, 3  ;;  %v572_v8 = vrot.slane %v556_v55, 2  ;;  %v1134_v55 = vld [vmem:[#allocation8 + $0x18] sm:$0xff] }
 0x170   :  { %11468 = vpow2.f32 %v9216_v56  ;;  %v9217_v60 = vmul.f32 -1.442695, %v564_v59  ;;  %v9218_v62 = vmul.f32 -1.442695, %v575_v61  ;;  %v12458_v56 = vpack.c.bf16 %v1136_v54, %v1132_v49  ;;  %v1138_v59 = vld [vmem:[#allocation8 + $0x38] sm:$0xff]  ;;  %v1135_v61 = vld [vmem:[#allocation8 + $0x20] sm:$0xff] }
 0x171   :  { %v1165_v49 = vld [vmem:[#allocation8 + $0x110] sm:$0xff] }
 0x172   :  { %11470 = vpow2.f32 %v9217_v60  ;;  %v1131_v60 = vld [vmem:[#allocation8] sm:$0xff]  ;;  %v1169_v54 = vld [vmem:[#allocation8 + $0x130] sm:$0xff] }
 0x173   :  { %11472 = vpow2.f32 %v9218_v62  ;;  %v12460_v62 = vpack.c.bf16 %v1138_v59, %v1134_v55  ;;  %v1172_v55 = vld [vmem:[#allocation8 + $0x148] sm:$0xff] }
 0x174   :  { %v1176_v59 = vld [vmem:[#allocation8 + $0x168] sm:$0xff] }
 0x17a   :  { %v11469_v63 = vpop.eup %11468 }
 0x17b   :  { %v560_v9 = vadd.f32 1.0, %v11469_v63  ;;  %v12462_v63 = vpack.c.bf16 %v1135_v61, %v1131_v60  ;;  %v1174_v60 = vld [vmem:[#allocation8 + $0x158] sm:$0xff] }
 0x17c   :  { %v11471_v10 = vpop.eup %11470  ;;  %v1178_v61 = vld [vmem:[#allocation8 + $0x178] sm:$0xff] }
 0x17d   :  { %11474 = vrcp.f32 %v560_v9  ;;  %v569_v12 = vadd.f32 1.0, %v11471_v10  ;;  %v11473_v16 = vpop.eup %11472  ;;  %v1137_v9 = vld [vmem:[#allocation8 + $0x30] sm:$0xff] }
 0x17e   :  { %11476 = vtanh.f32 %v572_v8  ;;  %v580_v24 = vadd.f32 1.0, %v11473_v16  ;;  %v1133_v8 = vld [vmem:[#allocation8 + $0x10] sm:$0xff]  ;;  %v1144_v16 = vld [vmem:[#allocation8 + $0x68] sm:$0xff] }
 0x17f   :  { %11478 = vrcp.f32 %v569_v12  ;;  %v12465_v10 = vpack.c.bf16 %v1137_v9, %v1133_v8  ;;  %v1140_v12 = vld [vmem:[#allocation8 + $0x48] sm:$0xff]  ;;  %v12513_v9 = vpack.c.bf16 %v1169_v54, %v1165_v49 }
 0x180   :  { %11480 = vrcp.f32 %v580_v24  ;;  %v1139_v24 = vld [vmem:[#allocation8 + $0x40] sm:$0xff] }
 0x187   :  { %v11475_v17 = vpop.eup %11474 }
 0x188   :  { %v11477_v18 = vpop.eup %11476 }
 0x189   :  { %v11479_v20 = vpop.eup %11478  ;;  %v584_v32 = vmul.f32 %v11477_v18, %v11475_v17  ;;  %v1142_v17 = vld [vmem:[#allocation8 + $0x58] sm:$0xff]  ;;  %v12470_v18 = vpack.c.bf16 %v1144_v16, %v1140_v12  ;;  %v12515_v12 = vpack.c.bf16 %v1176_v59, %v1172_v55  ;;  %v1171_v16 = vld [vmem:[#allocation8 + $0x140] sm:$0xff] }
 0x18a   :  { %v583_v30 = vmul.f32 0.0, %v11479_v20  ;;  %v11481_v41 = vpop.eup %11480  ;;  %v1146_v20 = vld [vmem:[#allocation8 + $0x78] sm:$0xff] }
 0x18c   :  { %v12414_v35 = vadd.f32 %v584_v32, %v583_v30  ;;  %v1143_v30 = vld [vmem:[#allocation8 + $0x60] sm:$0xff]  ;;  %v12472_v32 = vpack.c.bf16 %v1146_v20, %v1142_v17  ;;  %v1173_v20 = vld [vmem:[#allocation8 + $0x150] sm:$0xff] }
 0x18d   :  { %v1175_v17 = vld [vmem:[#allocation8 + $0x160] sm:$0xff] }
 0x18e   :  { %11482 = vtanh.f32 %v12414_v35 }
 0x198   :  { %v11483_v53 = vpop.eup %11482 }
 0x199   :  { %v587_v48 = vmul.f32 %v11483_v53, %v11481_v41  ;;  %v1141_v41 = vld [vmem:[#allocation8 + $0x50] sm:$0xff] }
 0x19a   :  { %v1145_v53 = vld [vmem:[#allocation8 + $0x70] sm:$0xff] }
 0x19b   :  { %588 = vst [vmem:[#allocation12] sm:$0x1] %v587_v48  ;;  %720 = vmatmul.mubr.f32.vlgmr.msra.gmra.mrb[6].mxu0 %v587_v48  ;;  %791 = vmatmul.mubr.f32.vlgmr.msra.gmra.mrb[6].mxu1 %v587_v48  ;;  %v1148_v48 = vld [vmem:[#allocation8 + $0x88] sm:$0xff] }
 0x19c   :  { %9475 = vmatpush1.bf16.msra.mxu0 %v12253_v1  ;;  %9507 = vmatpush1.bf16.msra.mxu1 %v12256_v2 }
 0x19d   :  { %9477 = vmatprep.subr.bf16.mxu0 %v12258_v3  ;;  %9509 = vmatprep.subr.bf16.mxu1 %v12261_v7 }
 0x19e   :  { %989 = vmatprep.mubr.f32.mxu0 %v12129_v0  ;;  %1060 = vmatprep.mubr.f32.mxu1 %v12129_v0 }
 0x1a0   :  { %9479 = vmatpush1.bf16.msra.mxu0 %v12266_v13  ;;  %9511 = vmatpush1.bf16.msra.mxu1 %v12270_v14 }
 0x1a1   :  { %9481 = vmatprep.subr.bf16.mxu0 %v12272_v15  ;;  %9513 = vmatprep.subr.bf16.mxu1 %v12275_v19 }
 0x1a4   :  { %9483 = vmatpush1.bf16.msra.mxu0 %v12280_v25  ;;  %9515 = vmatpush1.bf16.msra.mxu1 %v12284_v26 }
 0x1a5   :  { %9485 = vmatprep.subr.bf16.mxu0 %v12286_v27  ;;  %9517 = vmatprep.subr.bf16.mxu1 %v12289_v31  ;;  %v590_v27 = vld [vmem:[#allocation2 + $0x1] ss:$8 sm:$0xf] }
 0x1a8   :  { %9487 = vmatpush1.bf16.msra.mxu0 %v12292_v37  ;;  %9519 = vmatpush1.bf16.msra.mxu1 %v12296_v39 }
 0x1a9   :  { %9489 = vmatprep.subr.bf16.mxu0 %v12298_v40  ;;  %9521 = vmatprep.subr.bf16.mxu1 %v12301_v44 }
 0x1ac   :  { %9491 = vmatpush1.bf16.msra.mxu0 %v12307_v50  ;;  %9523 = vmatpush1.bf16.msra.mxu1 %v12312_v51 }
 0x1ad   :  { %9493 = vmatprep.subr.bf16.mxu0 %v12314_v52  ;;  %9525 = vmatprep.subr.bf16.mxu1 %v12317_v58 }
 0x1b0   :  { %9495 = vmatpush1.bf16.msra.mxu0 %v12320_v4  ;;  %9527 = vmatpush1.bf16.msra.mxu1 %v12324_v5 }
 0x1b1   :  { %9497 = vmatprep.subr.bf16.mxu0 %v12326_v6  ;;  %9529 = vmatprep.subr.bf16.mxu1 %v12329_v11 }
 0x1b4   :  { %9499 = vmatpush1.bf16.msra.mxu0 %v12332_v21  ;;  %9531 = vmatpush1.bf16.msra.mxu1 %v12336_v22 }
 0x1b5   :  { %9501 = vmatprep.subr.bf16.mxu0 %v12338_v23  ;;  %9533 = vmatprep.subr.bf16.mxu1 %v12341_v29 }
 0x1b8   :  { %9503 = vmatpush1.bf16.msra.mxu0 %v12344_v33  ;;  %9535 = vmatpush1.bf16.msra.mxu1 %v12348_v34 }
 0x1b9   :  { %9537 = vmatprep.subr.bf16.mxu0 %v12458_v56  ;;  %9569 = vmatprep.subr.bf16.mxu1 %v12460_v62 }
 0x26e   :  { %v721_v1 = vpop.f32.mrb[6].mxu0  ;;  %v792_v2 = vpop.f32.mrb[6].mxu1 }
 0x26f   :  { %v723_v3 = vpop.f32.mrb[7].mxu0  ;;  %v794_v7 = vpop.f32.mrb[7].mxu1 }
 0x270   :  { %v801_v13 = vcombine.low %v721_v1, %v723_v3  ;;  %v802_v14 = vcombine.low %v792_v2, %v794_v7  ;;  %v12477_v1 = vpack.c.bf16 %v1145_v53, %v1141_v41  ;;  %v1152_v2 = vld [vmem:[#allocation8 + $0xa8] sm:$0xff]  ;;  %v1150_v3 = vld [vmem:[#allocation8 + $0x98] sm:$0xff] }
 0x271   :  { %v1154_v7 = vld [vmem:[#allocation8 + $0xb8] sm:$0xff]  ;;  %v1180_v41 = vld [vmem:[#allocation8 + $0x188] sm:$0xff] }
 0x272   :  { %v809_v15 = vrot.slane %v801_v13, %v12409_v28  ;;  %v816_v19 = vrot.slane %v802_v14, %v12409_v28  ;;  %v12481_v13 = vpack.c.bf16 %v1152_v2, %v1148_v48  ;;  %v12483_v14 = vpack.c.bf16 %v1154_v7, %v1150_v3  ;;  %v1184_v53 = vld [vmem:[#allocation8 + $0x1a8] sm:$0xff]  ;;  %v1182_v48 = vld [vmem:[#allocation8 + $0x198] sm:$0xff] }
 0x273   :  { %v1186_v2 = vld [vmem:[#allocation8 + $0x1b8] sm:$0xff]  ;;  %v12521_v3 = vpack.c.bf16 %v1175_v17, %v1171_v16 }
 0x274   :  { %v817_v25 = vcombine.low %v809_v15, %v816_v19  ;;  %v1147_v15 = vld [vmem:[#allocation8 + $0x80] sm:$0xff] }
 0x275   :  { %v1151_v19 = vld [vmem:[#allocation8 + $0xa0] sm:$0xff] }
 0x276   :  { %v824_v26 = vrot.slane %v817_v25, %v12409_v28  ;;  %v1149_v25 = vld [vmem:[#allocation8 + $0x90] sm:$0xff] }
 0x278   :  { %v826_v31 = vadd.f32 %v824_v26, %v590_v27  ;;  %v12486_v26 = vpack.c.bf16 %v1151_v19, %v1147_v15  ;;  %v1153_v27 = vld [vmem:[#allocation8 + $0xb0] sm:$0xff]  ;;  %v12527_v15 = vpack.c.bf16 %v1184_v53, %v1180_v41  ;;  %v1179_v19 = vld [vmem:[#allocation8 + $0x180] sm:$0xff] }
 0x27a   :  { %v9219_v37 = vmul.f32 -1.442695, %v826_v31  ;;  %v834_v39 = vrot.slane %v826_v31, 1  ;;  %v845_v44 = vrot.slane %v826_v31, 3  ;;  %v842_v52 = vrot.slane %v826_v31, 2  ;;  %v1156_v31 = vld [vmem:[#allocation8 + $0xc8] sm:$0xff] }
 0x27c   :  { %11484 = vpow2.f32 %v9219_v37  ;;  %v9220_v40 = vmul.f32 -1.442695, %v834_v39  ;;  %v9221_v50 = vmul.f32 -1.442695, %v845_v44  ;;  %v1160_v37 = vld [vmem:[#allocation8 + $0xe8] sm:$0xff]  ;;  %v12490_v39 = vpack.c.bf16 %v1153_v27, %v1149_v25  ;;  %v1158_v44 = vld [vmem:[#allocation8 + $0xd8] sm:$0xff] }
 0x27d   :  { %v1183_v25 = vld [vmem:[#allocation8 + $0x1a0] sm:$0xff]  ;;  %v1181_v27 = vld [vmem:[#allocation8 + $0x190] sm:$0xff] }
 0x27e   :  { %11486 = vpow2.f32 %v9220_v40  ;;  %v12492_v40 = vpack.c.bf16 %v1160_v37, %v1156_v31  ;;  %v12530_v31 = vpack.c.bf16 %v1186_v2, %v1182_v48  ;;  %v1185_v37 = vld [vmem:[#allocation8 + $0x1b0] sm:$0xff] }
 0x27f   :  { %11488 = vpow2.f32 %v9221_v50  ;;  %v1162_v50 = vld [vmem:[#allocation8 + $0xf8] sm:$0xff] }
 0x280   :  { %v860_v48 = vld [vmem:[#allocation2 + $0x2] ss:$8 sm:$0xf] }
 0x286   :  { %v11485_v51 = vpop.eup %11484 }
 0x287   :  { %v830_v58 = vadd.f32 1.0, %v11485_v51  ;;  %v1155_v51 = vld [vmem:[#allocation8 + $0xc0] sm:$0xff] }
 0x288   :  { %v11487_v4 = vpop.eup %11486 }
 0x289   :  { %11490 = vrcp.f32 %v830_v58  ;;  %v839_v5 = vadd.f32 1.0, %v11487_v4  ;;  %v11489_v6 = vpop.eup %11488  ;;  %v1159_v58 = vld [vmem:[#allocation8 + $0xe0] sm:$0xff]  ;;  %v1157_v4 = vld [vmem:[#allocation8 + $0xd0] sm:$0xff] }
 0x28a   :  { %11492 = vtanh.f32 %v842_v52  ;;  %v850_v23 = vadd.f32 1.0, %v11489_v6  ;;  %v12494_v52 = vpack.c.bf16 %v1162_v50, %v1158_v44  ;;  %v12497_v6 = vpack.c.bf16 %v1159_v58, %v1155_v51  ;;  %v1188_v44 = vld [vmem:[#allocation8 + $0x1c8] sm:$0xff]  ;;  %v1190_v51 = vld [vmem:[#allocation8 + $0x1d8] sm:$0xff] }
 0x28b   :  { %11494 = vrcp.f32 %v839_v5  ;;  %v1161_v5 = vld [vmem:[#allocation8 + $0xf0] sm:$0xff]  ;;  %v1192_v50 = vld [vmem:[#allocation8 + $0x1e8] sm:$0xff]  ;;  %v1194_v58 = vld [vmem:[#allocation8 + $0x1f8] sm:$0xff] }
 0x28c   :  { %11496 = vrcp.f32 %v850_v23  ;;  %v12501_v23 = vpack.c.bf16 %v1161_v5, %v1157_v4  ;;  %v12533_v4 = vpack.c.bf16 %v1183_v25, %v1179_v19  ;;  %v12537_v5 = vpack.c.bf16 %v1185_v37, %v1181_v27 }
 0x293   :  { %v11491_v11 = vpop.eup %11490 }
 0x294   :  { %v11493_v21 = vpop.eup %11492 }
 0x295   :  { %v11495_v22 = vpop.eup %11494  ;;  %v854_v33 = vmul.f32 %v11493_v21, %v11491_v11  ;;  %v1164_v11 = vld [vmem:[#allocation8 + $0x108] sm:$0xff] }
 0x296   :  { %v853_v29 = vmul.f32 %v11495_v22, %v12414_v35  ;;  %v11497_v57 = vpop.eup %11496  ;;  %v12474_v35 = vpack.c.bf16 %v1143_v30, %v1139_v24  ;;  %v1168_v21 = vld [vmem:[#allocation8 + $0x128] sm:$0xff]  ;;  %v1166_v22 = vld [vmem:[#allocation8 + $0x118] sm:$0xff]  ;;  %v12518_v24 = vpack.c.bf16 %v1178_v61, %v1174_v60  ;;  %v1177_v30 = vld [vmem:[#allocation8 + $0x170] sm:$0xff] }
 0x297   :  { %v12525_v7 = vpack.c.bf16 %v1177_v30, %v1173_v20 }
 0x298   :  { %v12453_v34 = vadd.f32 %v854_v33, %v853_v29  ;;  %v12503_v29 = vpack.c.bf16 %v1168_v21, %v1164_v11  ;;  %v1170_v33 = vld [vmem:[#allocation8 + $0x138] sm:$0xff]  ;;  %v12539_v11 = vpack.c.bf16 %v1192_v50, %v1188_v44  ;;  %v1187_v21 = vld [vmem:[#allocation8 + $0x1c0] sm:$0xff] }
 0x29a   :  { %11498 = vtanh.f32 %v12453_v34 }
 0x2a4   :  { %v11499_v46 = vpop.eup %11498 }
 0x2a5   :  { %v857_v47 = vmul.f32 %v11499_v46, %v11497_v57  ;;  %v1163_v57 = vld [vmem:[#allocation8 + $0x100] sm:$0xff] }
 0x2a6   :  { %v1167_v46 = vld [vmem:[#allocation8 + $0x120] sm:$0xff] }
 0x2a7   :  { %858 = vst [vmem:[#allocation12 + $0x1] sm:$0x1] %v857_v47  ;;  %990 = vmatmul.mubr.f32.vlgmr.msra.gmra.mrb[8].mxu0 %v857_v47  ;;  %1061 = vmatmul.mubr.f32.vlgmr.msra.gmra.mrb[8].mxu1 %v857_v47  ;;  %v12506_v47 = vpack.c.bf16 %v1170_v33, %v1166_v22  ;;  %v12509_v8 = vpack.c.bf16 %v1167_v46, %v1163_v57  ;;  %v1191_v22 = vld [vmem:[#allocation8 + $0x1e0] sm:$0xff]  ;;  %v1189_v57 = vld [vmem:[#allocation8 + $0x1d0] sm:$0xff] }
 0x2a8   :  { %1259 = vmatprep.mubr.f32.mxu0 %v12129_v0  ;;  %1330 = vmatprep.mubr.f32.mxu1 %v12129_v0  ;;  %v12542_v33 = vpack.c.bf16 %v1194_v58, %v1190_v51  ;;  %v1193_v46 = vld [vmem:[#allocation8 + $0x1f0] sm:$0xff]  ;;  %v12545_v49 = vpack.c.bf16 %v1191_v22, %v1187_v21 }
 0x2a9   :  { %9539 = vmatpush1.bf16.msra.mxu0 %v12462_v63  ;;  %9571 = vmatpush1.bf16.msra.mxu1 %v12465_v10  ;;  %v12549_v54 = vpack.c.bf16 %v1193_v46, %v1189_v57 }
 0x2aa   :  { %9541 = vmatprep.subr.bf16.mxu0 %v12470_v18  ;;  %9573 = vmatprep.subr.bf16.mxu1 %v12472_v32 }
 0x2ad   :  { %9543 = vmatpush1.bf16.msra.mxu0 %v12474_v35  ;;  %9575 = vmatpush1.bf16.msra.mxu1 %v12477_v1 }
 0x2ae   :  { %9545 = vmatprep.subr.bf16.mxu0 %v12481_v13  ;;  %9577 = vmatprep.subr.bf16.mxu1 %v12483_v14 }
 0x2b1   :  { %9547 = vmatpush1.bf16.msra.mxu0 %v12486_v26  ;;  %9579 = vmatpush1.bf16.msra.mxu1 %v12490_v39 }
 0x2b2   :  { %9549 = vmatprep.subr.bf16.mxu0 %v12492_v40  ;;  %9581 = vmatprep.subr.bf16.mxu1 %v12494_v52 }
 0x2b5   :  { %9551 = vmatpush1.bf16.msra.mxu0 %v12497_v6  ;;  %9583 = vmatpush1.bf16.msra.mxu1 %v12501_v23 }
 0x2b6   :  { %9553 = vmatprep.subr.bf16.mxu0 %v12503_v29  ;;  %9585 = vmatprep.subr.bf16.mxu1 %v12506_v47 }
 0x2b9   :  { %9555 = vmatpush1.bf16.msra.mxu0 %v12509_v8  ;;  %9587 = vmatpush1.bf16.msra.mxu1 %v12513_v9 }
 0x2ba   :  { %9557 = vmatprep.subr.bf16.mxu0 %v12515_v12  ;;  %9589 = vmatprep.subr.bf16.mxu1 %v12518_v24 }
 0x2bd   :  { %9559 = vmatpush1.bf16.msra.mxu0 %v12521_v3  ;;  %9591 = vmatpush1.bf16.msra.mxu1 %v12525_v7 }
 0x2be   :  { %9561 = vmatprep.subr.bf16.mxu0 %v12527_v15  ;;  %9593 = vmatprep.subr.bf16.mxu1 %v12530_v31 }
 0x2c1   :  { %9563 = vmatpush1.bf16.msra.mxu0 %v12533_v4  ;;  %9595 = vmatpush1.bf16.msra.mxu1 %v12537_v5 }
 0x2c2   :  { %9565 = vmatprep.subr.bf16.mxu0 %v12539_v11  ;;  %9597 = vmatprep.subr.bf16.mxu1 %v12542_v33 }
 0x2c5   :  { %9567 = vmatpush1.bf16.msra.mxu0 %v12545_v49  ;;  %9599 = vmatpush1.bf16.msra.mxu1 %v12549_v54 }
 0x2c6   :  { %9601 = vmatprep.subr.bf16.mxu0 %v12458_v56  ;;  %9633 = vmatprep.subr.bf16.mxu1 %v12460_v62 }
 0x37a   :  { %v991_v55 = vpop.f32.mrb[8].mxu0  ;;  %v1062_v59 = vpop.f32.mrb[8].mxu1 }
 0x37b   :  { %v993_v60 = vpop.f32.mrb[9].mxu0  ;;  %v1064_v61 = vpop.f32.mrb[9].mxu1 }
 0x37c   :  { %v1071_v16 = vcombine.low %v991_v55, %v993_v60  ;;  %v1072_v17 = vcombine.low %v1062_v59, %v1064_v61 }
 0x37e   :  { %v1079_v20 = vrot.slane %v1071_v16, %v12409_v28  ;;  %v1086_v30 = vrot.slane %v1072_v17, %v12409_v28 }
 0x380   :  { %v1087_v41 = vcombine.low %v1079_v20, %v1086_v30 }
 0x382   :  { %v1094_v53 = vrot.slane %v1087_v41, %v12409_v28 }
 0x384   :  { %v1096_v2 = vadd.f32 %v1094_v53, %v860_v48 }
 0x386   :  { %v9222_v19 = vmul.f32 -1.442695, %v1096_v2  ;;  %v1104_v25 = vrot.slane %v1096_v2, 1  ;;  %v1115_v37 = vrot.slane %v1096_v2, 3  ;;  %v1112_v51 = vrot.slane %v1096_v2, 2 }
 0x388   :  { %11500 = vpow2.f32 %v9222_v19  ;;  %v9223_v27 = vmul.f32 -1.442695, %v1104_v25  ;;  %v9224_v44 = vmul.f32 -1.442695, %v1115_v37 }
 0x38a   :  { %11502 = vpow2.f32 %v9223_v27 }
 0x38b   :  { %11504 = vpow2.f32 %v9224_v44 }
 0x392   :  { %v11501_v50 = vpop.eup %11500 }
 0x393   :  { %v1100_v58 = vadd.f32 1.0, %v11501_v50 }
 0x394   :  { %v11503_v21 = vpop.eup %11502 }
 0x395   :  { %11506 = vrcp.f32 %v1100_v58  ;;  %v1109_v22 = vadd.f32 1.0, %v11503_v21  ;;  %v11505_v57 = vpop.eup %11504 }
 0x396   :  { %11508 = vtanh.f32 %v1112_v51  ;;  %v1120_v60 = vadd.f32 1.0, %v11505_v57  ;;  %v1130_v51 = vld [vmem:[#allocation2 + $0x3] ss:$8 sm:$0xf] }
 0x397   :  { %11510 = vrcp.f32 %v1109_v22 }
 0x398   :  { %11512 = vrcp.f32 %v1120_v60 }
 0x39f   :  { %v11507_v46 = vpop.eup %11506 }
 0x3a0   :  { %v11509_v55 = vpop.eup %11508 }
 0x3a1   :  { %v11511_v59 = vpop.eup %11510  ;;  %v1124_v16 = vmul.f32 %v11509_v55, %v11507_v46 }
 0x3a2   :  { %v1123_v61 = vmul.f32 %v11511_v59, %v12453_v34  ;;  %v11513_v20 = vpop.eup %11512 }
 0x3a4   :  { %v12560_v17 = vadd.f32 %v1124_v16, %v1123_v61 }
 0x3a6   :  { %11514 = vtanh.f32 %v12560_v17 }
 0x3b0   :  { %v11515_v30 = vpop.eup %11514 }
 0x3b1   :  { %v1127_v41 = vmul.f32 %v11515_v30, %v11513_v20 }
 0x3b3   :  { %1128 = vst [vmem:[#allocation12 + $0x2] sm:$0x1] %v1127_v41  ;;  %1260 = vmatmul.mubr.f32.vlgmr.msra.gmra.mrb[10].mxu0 %v1127_v41  ;;  %1331 = vmatmul.mubr.f32.vlgmr.msra.gmra.mrb[10].mxu1 %v1127_v41 }
 0x3b4   :  { %9603 = vmatpush1.bf16.msra.mxu0 %v12462_v63  ;;  %9635 = vmatpush1.bf16.msra.mxu1 %v12465_v10 }
 0x3b5   :  { %9605 = vmatprep.subr.bf16.mxu0 %v12470_v18  ;;  %9637 = vmatprep.subr.bf16.mxu1 %v12472_v32 }
 0x3b6   :  { %1529 = vmatprep.mubr.f32.mxu0 %v12129_v0  ;;  %1600 = vmatprep.mubr.f32.mxu1 %v12129_v0 }
 0x3b8   :  { %9607 = vmatpush1.bf16.msra.mxu0 %v12474_v35  ;;  %9639 = vmatpush1.bf16.msra.mxu1 %v12477_v1 }
 0x3b9   :  { %9609 = vmatprep.subr.bf16.mxu0 %v12481_v13  ;;  %9641 = vmatprep.subr.bf16.mxu1 %v12483_v14 }
 0x3bc   :  { %9611 = vmatpush1.bf16.msra.mxu0 %v12486_v26  ;;  %9643 = vmatpush1.bf16.msra.mxu1 %v12490_v39 }
 0x3bd   :  { %9613 = vmatprep.subr.bf16.mxu0 %v12492_v40  ;;  %9645 = vmatprep.subr.bf16.mxu1 %v12494_v52 }
 0x3c0   :  { %9615 = vmatpush1.bf16.msra.mxu0 %v12497_v6  ;;  %9647 = vmatpush1.bf16.msra.mxu1 %v12501_v23 }
 0x3c1   :  { %9617 = vmatprep.subr.bf16.mxu0 %v12503_v29  ;;  %9649 = vmatprep.subr.bf16.mxu1 %v12506_v47 }
 0x3c4   :  { %9619 = vmatpush1.bf16.msra.mxu0 %v12509_v8  ;;  %9651 = vmatpush1.bf16.msra.mxu1 %v12513_v9 }
 0x3c5   :  { %9621 = vmatprep.subr.bf16.mxu0 %v12515_v12  ;;  %9653 = vmatprep.subr.bf16.mxu1 %v12518_v24 }
 0x3c8   :  { %9623 = vmatpush1.bf16.msra.mxu0 %v12521_v3  ;;  %9655 = vmatpush1.bf16.msra.mxu1 %v12525_v7 }
 0x3c9   :  { %9625 = vmatprep.subr.bf16.mxu0 %v12527_v15  ;;  %9657 = vmatprep.subr.bf16.mxu1 %v12530_v31 }
 0x3cc   :  { %9627 = vmatpush1.bf16.msra.mxu0 %v12533_v4  ;;  %9659 = vmatpush1.bf16.msra.mxu1 %v12537_v5 }
 0x3cd   :  { %9629 = vmatprep.subr.bf16.mxu0 %v12539_v11  ;;  %9661 = vmatprep.subr.bf16.mxu1 %v12542_v33 }
 0x3d0   :  { %9631 = vmatpush1.bf16.msra.mxu0 %v12545_v49  ;;  %9663 = vmatpush1.bf16.msra.mxu1 %v12549_v54 }
 0x3d1   :  { %9665 = vmatprep.subr.bf16.mxu0 %v12458_v56  ;;  %9697 = vmatprep.subr.bf16.mxu1 %v12460_v62 }
 0x486   :  { %v1261_v34 = vpop.f32.mrb[10].mxu0  ;;  %v1332_v53 = vpop.f32.mrb[10].mxu1 }
 0x487   :  { %v1263_v48 = vpop.f32.mrb[11].mxu0  ;;  %v1334_v2 = vpop.f32.mrb[11].mxu1 }
 0x488   :  { %v1341_v19 = vcombine.low %v1261_v34, %v1263_v48  ;;  %v1342_v25 = vcombine.low %v1332_v53, %v1334_v2 }
 0x48a   :  { %v1349_v27 = vrot.slane %v1341_v19, %v12409_v28  ;;  %v1356_v37 = vrot.slane %v1342_v25, %v12409_v28 }
 0x48c   :  { %v1357_v44 = vcombine.low %v1349_v27, %v1356_v37 }
 0x48e   :  { %v1364_v50 = vrot.slane %v1357_v44, %v12409_v28 }
 0x490   :  { %v1366_v58 = vadd.f32 %v1364_v50, %v1130_v51 }
 0x492   :  { %v9225_v21 = vmul.f32 -1.442695, %v1366_v58  ;;  %v1374_v22 = vrot.slane %v1366_v58, 1  ;;  %v1385_v46 = vrot.slane %v1366_v58, 3  ;;  %v1382_v60 = vrot.slane %v1366_v58, 2 }
 0x494   :  { %11516 = vpow2.f32 %v9225_v21  ;;  %v9226_v57 = vmul.f32 -1.442695, %v1374_v22  ;;  %v9227_v55 = vmul.f32 -1.442695, %v1385_v46 }
 0x496   :  { %11518 = vpow2.f32 %v9226_v57 }
 0x497   :  { %11520 = vpow2.f32 %v9227_v55 }
 0x49e   :  { %v11517_v59 = vpop.eup %11516 }
 0x49f   :  { %v1370_v61 = vadd.f32 1.0, %v11517_v59 }
 0x4a0   :  { %v11519_v16 = vpop.eup %11518 }
 0x4a1   :  { %11522 = vrcp.f32 %v1370_v61  ;;  %v1379_v20 = vadd.f32 1.0, %v11519_v16  ;;  %v11521_v30 = vpop.eup %11520 }
 0x4a2   :  { %11524 = vtanh.f32 %v1382_v60  ;;  %v1390_v48 = vadd.f32 1.0, %v11521_v30  ;;  %v1400_v60 = vld [vmem:[#allocation2 + $0x4] ss:$8 sm:$0xf] }
 0x4a3   :  { %11526 = vrcp.f32 %v1379_v20 }
 0x4a4   :  { %11528 = vrcp.f32 %v1390_v48 }
 0x4ab   :  { %v11523_v41 = vpop.eup %11522 }
 0x4ac   :  { %v11525_v34 = vpop.eup %11524 }
 0x4ad   :  { %v11527_v53 = vpop.eup %11526  ;;  %v1394_v19 = vmul.f32 %v11525_v34, %v11523_v41 }
 0x4ae   :  { %v1393_v2 = vmul.f32 %v11527_v53, %v12560_v17  ;;  %v11529_v27 = vpop.eup %11528 }
 0x4b0   :  { %v12601_v25 = vadd.f32 %v1394_v19, %v1393_v2 }
 0x4b2   :  { %11530 = vtanh.f32 %v12601_v25 }
 0x4bc   :  { %v11531_v37 = vpop.eup %11530 }
 0x4bd   :  { %v1397_v44 = vmul.f32 %v11531_v37, %v11529_v27 }
 0x4bf   :  { %1398 = vst [vmem:[#allocation12 + $0x3] sm:$0x1] %v1397_v44  ;;  %1530 = vmatmul.mubr.f32.vlgmr.msra.gmra.mrb[12].mxu0 %v1397_v44  ;;  %1601 = vmatmul.mubr.f32.vlgmr.msra.gmra.mrb[12].mxu1 %v1397_v44 }
 0x4c0   :  { %9667 = vmatpush1.bf16.msra.mxu0 %v12462_v63  ;;  %9699 = vmatpush1.bf16.msra.mxu1 %v12465_v10 }
 0x4c1   :  { %9669 = vmatprep.subr.bf16.mxu0 %v12470_v18  ;;  %9701 = vmatprep.subr.bf16.mxu1 %v12472_v32 }
 0x4c2   :  { %1799 = vmatprep.mubr.f32.mxu0 %v12129_v0  ;;  %1870 = vmatprep.mubr.f32.mxu1 %v12129_v0 }
 0x4c4   :  { %9671 = vmatpush1.bf16.msra.mxu0 %v12474_v35  ;;  %9703 = vmatpush1.bf16.msra.mxu1 %v12477_v1 }
 0x4c5   :  { %9673 = vmatprep.subr.bf16.mxu0 %v12481_v13  ;;  %9705 = vmatprep.subr.bf16.mxu1 %v12483_v14 }
 0x4c8   :  { %9675 = vmatpush1.bf16.msra.mxu0 %v12486_v26  ;;  %9707 = vmatpush1.bf16.msra.mxu1 %v12490_v39 }
 0x4c9   :  { %9677 = vmatprep.subr.bf16.mxu0 %v12492_v40  ;;  %9709 = vmatprep.subr.bf16.mxu1 %v12494_v52 }
 0x4cc   :  { %9679 = vmatpush1.bf16.msra.mxu0 %v12497_v6  ;;  %9711 = vmatpush1.bf16.msra.mxu1 %v12501_v23 }
 0x4cd   :  { %9681 = vmatprep.subr.bf16.mxu0 %v12503_v29  ;;  %9713 = vmatprep.subr.bf16.mxu1 %v12506_v47 }
 0x4d0   :  { %9683 = vmatpush1.bf16.msra.mxu0 %v12509_v8  ;;  %9715 = vmatpush1.bf16.msra.mxu1 %v12513_v9 }
 0x4d1   :  { %9685 = vmatprep.subr.bf16.mxu0 %v12515_v12  ;;  %9717 = vmatprep.subr.bf16.mxu1 %v12518_v24 }
 0x4d4   :  { %9687 = vmatpush1.bf16.msra.mxu0 %v12521_v3  ;;  %9719 = vmatpush1.bf16.msra.mxu1 %v12525_v7 }
 0x4d5   :  { %9689 = vmatprep.subr.bf16.mxu0 %v12527_v15  ;;  %9721 = vmatprep.subr.bf16.mxu1 %v12530_v31 }
 0x4d8   :  { %9691 = vmatpush1.bf16.msra.mxu0 %v12533_v4  ;;  %9723 = vmatpush1.bf16.msra.mxu1 %v12537_v5 }
 0x4d9   :  { %9693 = vmatprep.subr.bf16.mxu0 %v12539_v11  ;;  %9725 = vmatprep.subr.bf16.mxu1 %v12542_v33 }
 0x4dc   :  { %9695 = vmatpush1.bf16.msra.mxu0 %v12545_v49  ;;  %9727 = vmatpush1.bf16.msra.mxu1 %v12549_v54 }
 0x4dd   :  { %9729 = vmatprep.subr.bf16.mxu0 %v12458_v56  ;;  %9761 = vmatprep.subr.bf16.mxu1 %v12460_v62 }
 0x592   :  { %v1531_v17 = vpop.f32.mrb[12].mxu0  ;;  %v1602_v50 = vpop.f32.mrb[12].mxu1 }
 0x593   :  { %v1533_v51 = vpop.f32.mrb[13].mxu0  ;;  %v1604_v58 = vpop.f32.mrb[13].mxu1 }
 0x594   :  { %v1611_v21 = vcombine.low %v1531_v17, %v1533_v51  ;;  %v1612_v22 = vcombine.low %v1602_v50, %v1604_v58 }
 0x596   :  { %v1619_v57 = vrot.slane %v1611_v21, %v12409_v28  ;;  %v1626_v46 = vrot.slane %v1612_v22, %v12409_v28 }
 0x598   :  { %v1627_v55 = vcombine.low %v1619_v57, %v1626_v46 }
 0x59a   :  { %v1634_v59 = vrot.slane %v1627_v55, %v12409_v28 }
 0x59c   :  { %v1636_v61 = vadd.f32 %v1634_v59, %v1400_v60  ;;  %v2212_v59 = vld [vmem:[#allocation8 + $0x8] sm:$0xff] }
 0x59d   :  { %v2216_v60 = vld [vmem:[#allocation8 + $0x28] sm:$0xff] }
 0x59e   :  { %v9228_v16 = vmul.f32 -1.442695, %v1636_v61  ;;  %v1644_v20 = vrot.slane %v1636_v61, 1  ;;  %v1655_v62 = vrot.slane %v1636_v61, 3  ;;  %v1652_v34 = vrot.slane %v1636_v61, 2  ;;  %v2214_v61 = vld [vmem:[#allocation8 + $0x18] sm:$0xff] }
 0x5a0   :  { %11532 = vpow2.f32 %v9228_v16  ;;  %v9229_v56 = vmul.f32 -1.442695, %v1644_v20  ;;  %v9230_v30 = vmul.f32 -1.442695, %v1655_v62  ;;  %v12686_v16 = vpack.c.bf16 %v2216_v60, %v2212_v59  ;;  %v2218_v20 = vld [vmem:[#allocation8 + $0x38] sm:$0xff]  ;;  %v2215_v62 = vld [vmem:[#allocation8 + $0x20] sm:$0xff] }
 0x5a1   :  { %v2249_v60 = vld [vmem:[#allocation8 + $0x130] sm:$0xff] }
 0x5a2   :  { %11534 = vpow2.f32 %v9229_v56  ;;  %v2211_v56 = vld [vmem:[#allocation8] sm:$0xff] }
 0x5a3   :  { %11536 = vpow2.f32 %v9230_v30  ;;  %v12688_v30 = vpack.c.bf16 %v2218_v20, %v2214_v61  ;;  %v2252_v61 = vld [vmem:[#allocation8 + $0x148] sm:$0xff] }
 0x5a4   :  { %v2256_v20 = vld [vmem:[#allocation8 + $0x168] sm:$0xff] }
 0x5aa   :  { %v11533_v41 = vpop.eup %11532 }
 0x5ab   :  { %v1640_v53 = vadd.f32 1.0, %v11533_v41  ;;  %v12690_v41 = vpack.c.bf16 %v2215_v62, %v2211_v56  ;;  %v2254_v56 = vld [vmem:[#allocation8 + $0x158] sm:$0xff] }
 0x5ac   :  { %v11535_v48 = vpop.eup %11534  ;;  %v2258_v62 = vld [vmem:[#allocation8 + $0x178] sm:$0xff] }
 0x5ad   :  { %11538 = vrcp.f32 %v1640_v53  ;;  %v1649_v2 = vadd.f32 1.0, %v11535_v48  ;;  %v11537_v19 = vpop.eup %11536  ;;  %v2217_v53 = vld [vmem:[#allocation8 + $0x30] sm:$0xff] }
 0x5ae   :  { %11540 = vtanh.f32 %v1652_v34  ;;  %v1660_v17 = vadd.f32 1.0, %v11537_v19  ;;  %v2213_v34 = vld [vmem:[#allocation8 + $0x10] sm:$0xff]  ;;  %v2224_v19 = vld [vmem:[#allocation8 + $0x68] sm:$0xff] }
 0x5af   :  { %11542 = vrcp.f32 %v1649_v2  ;;  %v12693_v48 = vpack.c.bf16 %v2217_v53, %v2213_v34  ;;  %v2220_v2 = vld [vmem:[#allocation8 + $0x48] sm:$0xff] }
 0x5b0   :  { %11544 = vrcp.f32 %v1660_v17  ;;  %v2219_v17 = vld [vmem:[#allocation8 + $0x40] sm:$0xff] }
 0x5b7   :  { %v11539_v27 = vpop.eup %11538 }
 0x5b8   :  { %v11541_v37 = vpop.eup %11540 }
 0x5b9   :  { %v11543_v44 = vpop.eup %11542  ;;  %v1664_v51 = vmul.f32 %v11541_v37, %v11539_v27  ;;  %v2222_v27 = vld [vmem:[#allocation8 + $0x58] sm:$0xff]  ;;  %v12697_v37 = vpack.c.bf16 %v2224_v19, %v2220_v2  ;;  %v12743_v2 = vpack.c.bf16 %v2256_v20, %v2252_v61  ;;  %v2251_v19 = vld [vmem:[#allocation8 + $0x140] sm:$0xff] }
 0x5ba   :  { %v1663_v50 = vmul.f32 %v11543_v44, %v12601_v25  ;;  %v11545_v21 = vpop.eup %11544  ;;  %v2226_v44 = vld [vmem:[#allocation8 + $0x78] sm:$0xff] }
 0x5bc   :  { %v12642_v58 = vadd.f32 %v1664_v51, %v1663_v50  ;;  %v2223_v50 = vld [vmem:[#allocation8 + $0x60] sm:$0xff]  ;;  %v12700_v51 = vpack.c.bf16 %v2226_v44, %v2222_v27  ;;  %v2253_v44 = vld [vmem:[#allocation8 + $0x150] sm:$0xff] }
 0x5bd   :  { %v2255_v27 = vld [vmem:[#allocation8 + $0x160] sm:$0xff] }
 0x5be   :  { %11546 = vtanh.f32 %v12642_v58 }
 0x5c8   :  { %v11547_v22 = vpop.eup %11546 }
 0x5c9   :  { %v1667_v57 = vmul.f32 %v11547_v22, %v11545_v21  ;;  %v2221_v21 = vld [vmem:[#allocation8 + $0x50] sm:$0xff] }
 0x5ca   :  { %v2225_v22 = vld [vmem:[#allocation8 + $0x70] sm:$0xff] }
 0x5cb   :  { %1668 = vst [vmem:[#allocation12 + $0x4] sm:$0x1] %v1667_v57  ;;  %1800 = vmatmul.mubr.f32.vlgmr.msra.gmra.mrb[14].mxu0 %v1667_v57  ;;  %1871 = vmatmul.mubr.f32.vlgmr.msra.gmra.mrb[14].mxu1 %v1667_v57  ;;  %v2228_v57 = vld [vmem:[#allocation8 + $0x88] sm:$0xff] }
 0x5cc   :  { %9731 = vmatpush1.bf16.msra.mxu0 %v12462_v63  ;;  %9763 = vmatpush1.bf16.msra.mxu1 %v12465_v10 }
 0x5cd   :  { %9733 = vmatprep.subr.bf16.mxu0 %v12470_v18  ;;  %9765 = vmatprep.subr.bf16.mxu1 %v12472_v32 }
 0x5ce   :  { %2069 = vmatprep.mubr.f32.mxu0 %v12129_v0  ;;  %2140 = vmatprep.mubr.f32.mxu1 %v12129_v0 }
 0x5d0   :  { %9735 = vmatpush1.bf16.msra.mxu0 %v12474_v35  ;;  %9767 = vmatpush1.bf16.msra.mxu1 %v12477_v1 }
 0x5d1   :  { %9737 = vmatprep.subr.bf16.mxu0 %v12481_v13  ;;  %9769 = vmatprep.subr.bf16.mxu1 %v12483_v14 }
 0x5d4   :  { %9739 = vmatpush1.bf16.msra.mxu0 %v12486_v26  ;;  %9771 = vmatpush1.bf16.msra.mxu1 %v12490_v39 }
 0x5d5   :  { %9741 = vmatprep.subr.bf16.mxu0 %v12492_v40  ;;  %9773 = vmatprep.subr.bf16.mxu1 %v12494_v52  ;;  %v1670_v40 = vld [vmem:[#allocation2 + $0x5] ss:$8 sm:$0xf] }
 0x5d8   :  { %9743 = vmatpush1.bf16.msra.mxu0 %v12497_v6  ;;  %9775 = vmatpush1.bf16.msra.mxu1 %v12501_v23 }
 0x5d9   :  { %9745 = vmatprep.subr.bf16.mxu0 %v12503_v29  ;;  %9777 = vmatprep.subr.bf16.mxu1 %v12506_v47 }
 0x5dc   :  { %9747 = vmatpush1.bf16.msra.mxu0 %v12509_v8  ;;  %9779 = vmatpush1.bf16.msra.mxu1 %v12513_v9 }
 0x5dd   :  { %9749 = vmatprep.subr.bf16.mxu0 %v12515_v12  ;;  %9781 = vmatprep.subr.bf16.mxu1 %v12518_v24 }
 0x5e0   :  { %9751 = vmatpush1.bf16.msra.mxu0 %v12521_v3  ;;  %9783 = vmatpush1.bf16.msra.mxu1 %v12525_v7 }
 0x5e1   :  { %9753 = vmatprep.subr.bf16.mxu0 %v12527_v15  ;;  %9785 = vmatprep.subr.bf16.mxu1 %v12530_v31 }
 0x5e4   :  { %9755 = vmatpush1.bf16.msra.mxu0 %v12533_v4  ;;  %9787 = vmatpush1.bf16.msra.mxu1 %v12537_v5 }
 0x5e5   :  { %9757 = vmatprep.subr.bf16.mxu0 %v12539_v11  ;;  %9789 = vmatprep.subr.bf16.mxu1 %v12542_v33 }
 0x5e8   :  { %9759 = vmatpush1.bf16.msra.mxu0 %v12545_v49  ;;  %9791 = vmatpush1.bf16.msra.mxu1 %v12549_v54 }
 0x5e9   :  { %9793 = vmatprep.subr.bf16.mxu0 %v12686_v16  ;;  %9825 = vmatprep.subr.bf16.mxu1 %v12688_v30 }
 0x69e   :  { %v1801_v63 = vpop.f32.mrb[14].mxu0  ;;  %v1872_v10 = vpop.f32.mrb[14].mxu1 }
 0x69f   :  { %v1803_v18 = vpop.f32.mrb[15].mxu0  ;;  %v1874_v32 = vpop.f32.mrb[15].mxu1 }
 0x6a0   :  { %v1881_v35 = vcombine.low %v1801_v63, %v1803_v18  ;;  %v1882_v1 = vcombine.low %v1872_v10, %v1874_v32  ;;  %v12705_v63 = vpack.c.bf16 %v2225_v22, %v2221_v21  ;;  %v2232_v10 = vld [vmem:[#allocation8 + $0xa8] sm:$0xff]  ;;  %v2230_v18 = vld [vmem:[#allocation8 + $0x98] sm:$0xff] }
 0x6a1   :  { %v2234_v32 = vld [vmem:[#allocation8 + $0xb8] sm:$0xff]  ;;  %v2260_v21 = vld [vmem:[#allocation8 + $0x188] sm:$0xff] }
 0x6a2   :  { %v1889_v13 = vrot.slane %v1881_v35, %v12409_v28  ;;  %v1896_v14 = vrot.slane %v1882_v1, %v12409_v28  ;;  %v12708_v35 = vpack.c.bf16 %v2232_v10, %v2228_v57  ;;  %v12710_v1 = vpack.c.bf16 %v2234_v32, %v2230_v18  ;;  %v2264_v22 = vld [vmem:[#allocation8 + $0x1a8] sm:$0xff]  ;;  %v2262_v57 = vld [vmem:[#allocation8 + $0x198] sm:$0xff] }
 0x6a3   :  { %v2266_v10 = vld [vmem:[#allocation8 + $0x1b8] sm:$0xff]  ;;  %v12749_v18 = vpack.c.bf16 %v2255_v27, %v2251_v19 }
 0x6a4   :  { %v1897_v26 = vcombine.low %v1889_v13, %v1896_v14  ;;  %v2227_v13 = vld [vmem:[#allocation8 + $0x80] sm:$0xff] }
 0x6a5   :  { %v2231_v14 = vld [vmem:[#allocation8 + $0xa0] sm:$0xff] }
 0x6a6   :  { %v1904_v39 = vrot.slane %v1897_v26, %v12409_v28  ;;  %v2229_v26 = vld [vmem:[#allocation8 + $0x90] sm:$0xff] }
 0x6a8   :  { %v1906_v52 = vadd.f32 %v1904_v39, %v1670_v40  ;;  %v12713_v39 = vpack.c.bf16 %v2231_v14, %v2227_v13  ;;  %v2233_v40 = vld [vmem:[#allocation8 + $0xb0] sm:$0xff]  ;;  %v12755_v13 = vpack.c.bf16 %v2264_v22, %v2260_v21  ;;  %v2259_v14 = vld [vmem:[#allocation8 + $0x180] sm:$0xff] }
 0x6aa   :  { %v9231_v6 = vmul.f32 -1.442695, %v1906_v52  ;;  %v1914_v23 = vrot.slane %v1906_v52, 1  ;;  %v1925_v47 = vrot.slane %v1906_v52, 3  ;;  %v1922_v12 = vrot.slane %v1906_v52, 2  ;;  %v2236_v52 = vld [vmem:[#allocation8 + $0xc8] sm:$0xff] }
 0x6ac   :  { %11548 = vpow2.f32 %v9231_v6  ;;  %v9232_v29 = vmul.f32 -1.442695, %v1914_v23  ;;  %v9233_v8 = vmul.f32 -1.442695, %v1925_v47  ;;  %v2240_v6 = vld [vmem:[#allocation8 + $0xe8] sm:$0xff]  ;;  %v12717_v23 = vpack.c.bf16 %v2233_v40, %v2229_v26  ;;  %v2238_v47 = vld [vmem:[#allocation8 + $0xd8] sm:$0xff] }
 0x6ad   :  { %v2263_v26 = vld [vmem:[#allocation8 + $0x1a0] sm:$0xff]  ;;  %v2261_v40 = vld [vmem:[#allocation8 + $0x190] sm:$0xff] }
 0x6ae   :  { %11550 = vpow2.f32 %v9232_v29  ;;  %v12719_v29 = vpack.c.bf16 %v2240_v6, %v2236_v52  ;;  %v12758_v52 = vpack.c.bf16 %v2266_v10, %v2262_v57  ;;  %v2265_v6 = vld [vmem:[#allocation8 + $0x1b0] sm:$0xff] }
 0x6af   :  { %11552 = vpow2.f32 %v9233_v8  ;;  %v2242_v8 = vld [vmem:[#allocation8 + $0xf8] sm:$0xff] }
 0x6b0   :  { %v1940_v57 = vld [vmem:[#allocation2 + $0x6] ss:$8 sm:$0xf] }
 0x6b6   :  { %v11549_v9 = vpop.eup %11548 }
 0x6b7   :  { %v1910_v24 = vadd.f32 1.0, %v11549_v9  ;;  %v2235_v9 = vld [vmem:[#allocation8 + $0xc0] sm:$0xff] }
 0x6b8   :  { %v11551_v3 = vpop.eup %11550 }
 0x6b9   :  { %11554 = vrcp.f32 %v1910_v24  ;;  %v1919_v7 = vadd.f32 1.0, %v11551_v3  ;;  %v11553_v15 = vpop.eup %11552  ;;  %v2239_v24 = vld [vmem:[#allocation8 + $0xe0] sm:$0xff]  ;;  %v2237_v3 = vld [vmem:[#allocation8 + $0xd0] sm:$0xff] }
 0x6ba   :  { %11556 = vtanh.f32 %v1922_v12  ;;  %v1930_v11 = vadd.f32 1.0, %v11553_v15  ;;  %v12722_v12 = vpack.c.bf16 %v2242_v8, %v2238_v47  ;;  %v2244_v15 = vld [vmem:[#allocation8 + $0x108] sm:$0xff] }
 0x6bb   :  { %11558 = vrcp.f32 %v1919_v7  ;;  %v2241_v7 = vld [vmem:[#allocation8 + $0xf0] sm:$0xff]  ;;  %v2268_v47 = vld [vmem:[#allocation8 + $0x1c8] sm:$0xff] }
 0x6bc   :  { %11560 = vrcp.f32 %v1930_v11  ;;  %v2250_v11 = vld [vmem:[#allocation8 + $0x138] sm:$0xff]  ;;  %v2272_v8 = vld [vmem:[#allocation8 + $0x1e8] sm:$0xff] }
 0x6c3   :  { %v11555_v31 = vpop.eup %11554 }
 0x6c4   :  { %v11557_v4 = vpop.eup %11556 }
 0x6c5   :  { %v11559_v5 = vpop.eup %11558  ;;  %v1934_v49 = vmul.f32 %v11557_v4, %v11555_v31  ;;  %v2248_v31 = vld [vmem:[#allocation8 + $0x128] sm:$0xff]  ;;  %v2246_v4 = vld [vmem:[#allocation8 + $0x118] sm:$0xff] }
 0x6c6   :  { %v1933_v33 = vmul.f32 %v11559_v5, %v12642_v58  ;;  %v11561_v25 = vpop.eup %11560  ;;  %v12702_v58 = vpack.c.bf16 %v2223_v50, %v2219_v17  ;;  %v12725_v5 = vpack.c.bf16 %v2239_v24, %v2235_v9  ;;  %v12734_v59 = vpack.c.bf16 %v2250_v11, %v2246_v4  ;;  %v2257_v50 = vld [vmem:[#allocation8 + $0x170] sm:$0xff]  ;;  %v2270_v9 = vld [vmem:[#allocation8 + $0x1d8] sm:$0xff]  ;;  %v2271_v4 = vld [vmem:[#allocation8 + $0x1e0] sm:$0xff] }
 0x6c7   :  { %v12746_v17 = vpack.c.bf16 %v2258_v62, %v2254_v56  ;;  %v12753_v32 = vpack.c.bf16 %v2257_v50, %v2253_v44  ;;  %v2274_v24 = vld [vmem:[#allocation8 + $0x1f8] sm:$0xff] }
 0x6c8   :  { %v12681_v54 = vadd.f32 %v1934_v49, %v1933_v33  ;;  %v12729_v33 = vpack.c.bf16 %v2241_v7, %v2237_v3  ;;  %v12731_v49 = vpack.c.bf16 %v2248_v31, %v2244_v15  ;;  %v12761_v3 = vpack.c.bf16 %v2263_v26, %v2259_v14  ;;  %v2267_v31 = vld [vmem:[#allocation8 + $0x1c0] sm:$0xff] }
 0x6c9   :  { %v12765_v7 = vpack.c.bf16 %v2265_v6, %v2261_v40  ;;  %v12767_v15 = vpack.c.bf16 %v2272_v8, %v2268_v47  ;;  %v12770_v11 = vpack.c.bf16 %v2274_v24, %v2270_v9 }
 0x6ca   :  { %11562 = vtanh.f32 %v12681_v54 }
 0x6d4   :  { %v11563_v46 = vpop.eup %11562 }
 0x6d5   :  { %v1937_v55 = vmul.f32 %v11563_v46, %v11561_v25  ;;  %v2243_v25 = vld [vmem:[#allocation8 + $0x100] sm:$0xff] }
 0x6d6   :  { %v2247_v46 = vld [vmem:[#allocation8 + $0x120] sm:$0xff] }
 0x6d7   :  { %1938 = vst [vmem:[#allocation12 + $0x5] sm:$0x1] %v1937_v55  ;;  %2070 = vmatmul.mubr.f32.vlgmr.msra.gmra.mrb[16].mxu0 %v1937_v55  ;;  %2141 = vmatmul.mubr.f32.vlgmr.msra.gmra.mrb[16].mxu1 %v1937_v55  ;;  %v2245_v55 = vld [vmem:[#allocation8 + $0x110] sm:$0xff]  ;;  %v12737_v34 = vpack.c.bf16 %v2247_v46, %v2243_v25 }
 0x6d8   :  { %2339 = vmatprep.mubr.f32.mxu0 %v12129_v0  ;;  %2410 = vmatprep.mubr.f32.mxu1 %v12129_v0  ;;  %v12741_v53 = vpack.c.bf16 %v2249_v60, %v2245_v55  ;;  %v2269_v25 = vld [vmem:[#allocation8 + $0x1d0] sm:$0xff]  ;;  %v12773_v55 = vpack.c.bf16 %v2271_v4, %v2267_v31 }
 0x6d9   :  { %9795 = vmatpush1.bf16.msra.mxu0 %v12690_v41  ;;  %9827 = vmatpush1.bf16.msra.mxu1 %v12693_v48  ;;  %v2273_v46 = vld [vmem:[#allocation8 + $0x1f0] sm:$0xff] }
 0x6da   :  { %9797 = vmatprep.subr.bf16.mxu0 %v12697_v37  ;;  %9829 = vmatprep.subr.bf16.mxu1 %v12700_v51  ;;  %v12777_v60 = vpack.c.bf16 %v2273_v46, %v2269_v25 }
 0x6dd   :  { %9799 = vmatpush1.bf16.msra.mxu0 %v12702_v58  ;;  %9831 = vmatpush1.bf16.msra.mxu1 %v12705_v63 }
 0x6de   :  { %9801 = vmatprep.subr.bf16.mxu0 %v12708_v35  ;;  %9833 = vmatprep.subr.bf16.mxu1 %v12710_v1 }
 0x6e1   :  { %9803 = vmatpush1.bf16.msra.mxu0 %v12713_v39  ;;  %9835 = vmatpush1.bf16.msra.mxu1 %v12717_v23 }
 0x6e2   :  { %9805 = vmatprep.subr.bf16.mxu0 %v12719_v29  ;;  %9837 = vmatprep.subr.bf16.mxu1 %v12722_v12 }
 0x6e5   :  { %9807 = vmatpush1.bf16.msra.mxu0 %v12725_v5  ;;  %9839 = vmatpush1.bf16.msra.mxu1 %v12729_v33 }
 0x6e6   :  { %9809 = vmatprep.subr.bf16.mxu0 %v12731_v49  ;;  %9841 = vmatprep.subr.bf16.mxu1 %v12734_v59 }
 0x6e9   :  { %9811 = vmatpush1.bf16.msra.mxu0 %v12737_v34  ;;  %9843 = vmatpush1.bf16.msra.mxu1 %v12741_v53 }
 0x6ea   :  { %9813 = vmatprep.subr.bf16.mxu0 %v12743_v2  ;;  %9845 = vmatprep.subr.bf16.mxu1 %v12746_v17 }
 0x6ed   :  { %9815 = vmatpush1.bf16.msra.mxu0 %v12749_v18  ;;  %9847 = vmatpush1.bf16.msra.mxu1 %v12753_v32 }
 0x6ee   :  { %9817 = vmatprep.subr.bf16.mxu0 %v12755_v13  ;;  %9849 = vmatprep.subr.bf16.mxu1 %v12758_v52 }
 0x6f1   :  { %9819 = vmatpush1.bf16.msra.mxu0 %v12761_v3  ;;  %9851 = vmatpush1.bf16.msra.mxu1 %v12765_v7 }
 0x6f2   :  { %9821 = vmatprep.subr.bf16.mxu0 %v12767_v15  ;;  %9853 = vmatprep.subr.bf16.mxu1 %v12770_v11 }
 0x6f5   :  { %9823 = vmatpush1.bf16.msra.mxu0 %v12773_v55  ;;  %9855 = vmatpush1.bf16.msra.mxu1 %v12777_v60 }
 0x6f6   :  { %9857 = vmatprep.subr.bf16.mxu0 %v12686_v16  ;;  %9889 = vmatprep.subr.bf16.mxu1 %v12688_v30 }
 0x7aa   :  { %v2071_v61 = vpop.f32.mrb[16].mxu0  ;;  %v2142_v20 = vpop.f32.mrb[16].mxu1 }
 0x7ab   :  { %v2073_v56 = vpop.f32.mrb[17].mxu0  ;;  %v2144_v62 = vpop.f32.mrb[17].mxu1 }
 0x7ac   :  { %v2151_v19 = vcombine.low %v2071_v61, %v2073_v56  ;;  %v2152_v27 = vcombine.low %v2142_v20, %v2144_v62 }
 0x7ae   :  { %v2159_v44 = vrot.slane %v2151_v19, %v12409_v28  ;;  %v2166_v50 = vrot.slane %v2152_v27, %v12409_v28 }
 0x7b0   :  { %v2167_v21 = vcombine.low %v2159_v44, %v2166_v50 }
 0x7b2   :  { %v2174_v22 = vrot.slane %v2167_v21, %v12409_v28 }
 0x7b4   :  { %v2176_v10 = vadd.f32 %v2174_v22, %v1940_v57 }
 0x7b6   :  { %v9234_v14 = vmul.f32 -1.442695, %v2176_v10  ;;  %v2184_v26 = vrot.slane %v2176_v10, 1  ;;  %v2195_v6 = vrot.slane %v2176_v10, 3  ;;  %v2192_v9 = vrot.slane %v2176_v10, 2 }
 0x7b8   :  { %11564 = vpow2.f32 %v9234_v14  ;;  %v9235_v40 = vmul.f32 -1.442695, %v2184_v26  ;;  %v9236_v47 = vmul.f32 -1.442695, %v2195_v6 }
 0x7ba   :  { %11566 = vpow2.f32 %v9235_v40 }
 0x7bb   :  { %11568 = vpow2.f32 %v9236_v47 }
 0x7c2   :  { %v11565_v8 = vpop.eup %11564 }
 0x7c3   :  { %v2180_v24 = vadd.f32 1.0, %v11565_v8 }
 0x7c4   :  { %v11567_v31 = vpop.eup %11566 }
 0x7c5   :  { %11570 = vrcp.f32 %v2180_v24  ;;  %v2189_v4 = vadd.f32 1.0, %v11567_v31  ;;  %v11569_v25 = vpop.eup %11568 }
 0x7c6   :  { %11572 = vtanh.f32 %v2192_v9  ;;  %v2200_v56 = vadd.f32 1.0, %v11569_v25  ;;  %v2210_v9 = vld [vmem:[#allocation2 + $0x7] ss:$8 sm:$0xf] }
 0x7c7   :  { %11574 = vrcp.f32 %v2189_v4 }
 0x7c8   :  { %11576 = vrcp.f32 %v2200_v56 }
 0x7cf   :  { %v11571_v46 = vpop.eup %11570 }
 0x7d0   :  { %v11573_v61 = vpop.eup %11572 }
 0x7d1   :  { %v11575_v20 = vpop.eup %11574  ;;  %v2204_v19 = vmul.f32 %v11573_v61, %v11571_v46 }
 0x7d2   :  { %v2203_v62 = vmul.f32 %v11575_v20, %v12681_v54  ;;  %v11577_v44 = vpop.eup %11576 }
 0x7d4   :  { %v12788_v27 = vadd.f32 %v2204_v19, %v2203_v62 }
 0x7d6   :  { %11578 = vtanh.f32 %v12788_v27 }
 0x7e0   :  { %v11579_v50 = vpop.eup %11578 }
 0x7e1   :  { %v2207_v21 = vmul.f32 %v11579_v50, %v11577_v44 }
 0x7e3   :  { %2208 = vst [vmem:[#allocation12 + $0x6] sm:$0x1] %v2207_v21  ;;  %2340 = vmatmul.mubr.f32.vlgmr.msra.gmra.mrb[18].mxu0 %v2207_v21  ;;  %2411 = vmatmul.mubr.f32.vlgmr.msra.gmra.mrb[18].mxu1 %v2207_v21 }
 0x7e4   :  { %9859 = vmatpush1.bf16.msra.mxu0 %v12690_v41  ;;  %9891 = vmatpush1.bf16.msra.mxu1 %v12693_v48 }
 0x7e5   :  { %9861 = vmatprep.subr.bf16.mxu0 %v12697_v37  ;;  %9893 = vmatprep.subr.bf16.mxu1 %v12700_v51 }
 0x7e6   :  { %2609 = vmatprep.mubr.f32.mxu0 %v12129_v0  ;;  %2680 = vmatprep.mubr.f32.mxu1 %v12129_v0 }
 0x7e8   :  { %9863 = vmatpush1.bf16.msra.mxu0 %v12702_v58  ;;  %9895 = vmatpush1.bf16.msra.mxu1 %v12705_v63 }
 0x7e9   :  { %9865 = vmatprep.subr.bf16.mxu0 %v12708_v35  ;;  %9897 = vmatprep.subr.bf16.mxu1 %v12710_v1 }
 0x7ec   :  { %9867 = vmatpush1.bf16.msra.mxu0 %v12713_v39  ;;  %9899 = vmatpush1.bf16.msra.mxu1 %v12717_v23 }
 0x7ed   :  { %9869 = vmatprep.subr.bf16.mxu0 %v12719_v29  ;;  %9901 = vmatprep.subr.bf16.mxu1 %v12722_v12 }
 0x7f0   :  { %9871 = vmatpush1.bf16.msra.mxu0 %v12725_v5  ;;  %9903 = vmatpush1.bf16.msra.mxu1 %v12729_v33 }
 0x7f1   :  { %9873 = vmatprep.subr.bf16.mxu0 %v12731_v49  ;;  %9905 = vmatprep.subr.bf16.mxu1 %v12734_v59 }
 0x7f4   :  { %9875 = vmatpush1.bf16.msra.mxu0 %v12737_v34  ;;  %9907 = vmatpush1.bf16.msra.mxu1 %v12741_v53 }
 0x7f5   :  { %9877 = vmatprep.subr.bf16.mxu0 %v12743_v2  ;;  %9909 = vmatprep.subr.bf16.mxu1 %v12746_v17 }
 0x7f8   :  { %9879 = vmatpush1.bf16.msra.mxu0 %v12749_v18  ;;  %9911 = vmatpush1.bf16.msra.mxu1 %v12753_v32 }
 0x7f9   :  { %9881 = vmatprep.subr.bf16.mxu0 %v12755_v13  ;;  %9913 = vmatprep.subr.bf16.mxu1 %v12758_v52 }
 0x7fc   :  { %9883 = vmatpush1.bf16.msra.mxu0 %v12761_v3  ;;  %9915 = vmatpush1.bf16.msra.mxu1 %v12765_v7 }
 0x7fd   :  { %9885 = vmatprep.subr.bf16.mxu0 %v12767_v15  ;;  %9917 = vmatprep.subr.bf16.mxu1 %v12770_v11 }
 0x800   :  { %9887 = vmatpush1.bf16.msra.mxu0 %v12773_v55  ;;  %9919 = vmatpush1.bf16.msra.mxu1 %v12777_v60 }
 0x801   :  { %9921 = vmatprep.subr.bf16.mxu0 %v12686_v16  ;;  %9953 = vmatprep.subr.bf16.mxu1 %v12688_v30 }
 0x8b6   :  { %v2341_v54 = vpop.f32.mrb[18].mxu0  ;;  %v2412_v22 = vpop.f32.mrb[18].mxu1 }
 0x8b7   :  { %v2343_v57 = vpop.f32.mrb[19].mxu0  ;;  %v2414_v10 = vpop.f32.mrb[19].mxu1 }
 0x8b8   :  { %v2421_v14 = vcombine.low %v2341_v54, %v2343_v57  ;;  %v2422_v26 = vcombine.low %v2412_v22, %v2414_v10 }
 0x8ba   :  { %v2429_v40 = vrot.slane %v2421_v14, %v12409_v28  ;;  %v2436_v6 = vrot.slane %v2422_v26, %v12409_v28 }
 0x8bc   :  { %v2437_v47 = vcombine.low %v2429_v40, %v2436_v6 }
 0x8be   :  { %v2444_v8 = vrot.slane %v2437_v47, %v12409_v28 }
 0x8c0   :  { %v2446_v24 = vadd.f32 %v2444_v8, %v2210_v9 }
 0x8c2   :  { %v9237_v31 = vmul.f32 -1.442695, %v2446_v24  ;;  %v2454_v4 = vrot.slane %v2446_v24, 1  ;;  %v2465_v46 = vrot.slane %v2446_v24, 3  ;;  %v2462_v56 = vrot.slane %v2446_v24, 2 }
 0x8c4   :  { %11580 = vpow2.f32 %v9237_v31  ;;  %v9238_v25 = vmul.f32 -1.442695, %v2454_v4  ;;  %v9239_v61 = vmul.f32 -1.442695, %v2465_v46 }
 0x8c6   :  { %11582 = vpow2.f32 %v9238_v25 }
 0x8c7   :  { %11584 = vpow2.f32 %v9239_v61 }
 0x8ce   :  { %v11581_v20 = vpop.eup %11580 }
 0x8cf   :  { %v2450_v62 = vadd.f32 1.0, %v11581_v20 }
 0x8d0   :  { %v11583_v19 = vpop.eup %11582 }
 0x8d1   :  { %11586 = vrcp.f32 %v2450_v62  ;;  %v2459_v44 = vadd.f32 1.0, %v11583_v19  ;;  %v11585_v50 = vpop.eup %11584 }
 0x8d2   :  { %11588 = vtanh.f32 %v2462_v56  ;;  %v2470_v57 = vadd.f32 1.0, %v11585_v50  ;;  %v2480_v56 = vld [vmem:[#allocation2 + $0x20] ss:$8 sm:$0xf] }
 0x8d3   :  { %11590 = vrcp.f32 %v2459_v44 }
 0x8d4   :  { %11592 = vrcp.f32 %v2470_v57 }
 0x8db   :  { %v11587_v21 = vpop.eup %11586 }
 0x8dc   :  { %v11589_v54 = vpop.eup %11588 }
 0x8dd   :  { %v11591_v22 = vpop.eup %11590  ;;  %v2474_v14 = vmul.f32 %v11589_v54, %v11587_v21 }
 0x8de   :  { %v2473_v10 = vmul.f32 %v11591_v22, %v12788_v27  ;;  %v11593_v40 = vpop.eup %11592 }
 0x8e0   :  { %v12829_v26 = vadd.f32 %v2474_v14, %v2473_v10 }
 0x8e2   :  { %11594 = vtanh.f32 %v12829_v26 }
 0x8ec   :  { %v11595_v6 = vpop.eup %11594 }
 0x8ed   :  { %v2477_v47 = vmul.f32 %v11595_v6, %v11593_v40 }
 0x8ef   :  { %2478 = vst [vmem:[#allocation12 + $0x7] sm:$0x1] %v2477_v47  ;;  %2610 = vmatmul.mubr.f32.vlgmr.msra.gmra.mrb[20].mxu0 %v2477_v47  ;;  %2681 = vmatmul.mubr.f32.vlgmr.msra.gmra.mrb[20].mxu1 %v2477_v47 }
 0x8f0   :  { %9923 = vmatpush1.bf16.msra.mxu0 %v12690_v41  ;;  %9955 = vmatpush1.bf16.msra.mxu1 %v12693_v48 }
 0x8f1   :  { %9925 = vmatprep.subr.bf16.mxu0 %v12697_v37  ;;  %9957 = vmatprep.subr.bf16.mxu1 %v12700_v51 }
 0x8f2   :  { %2879 = vmatprep.mubr.f32.mxu0 %v12129_v0  ;;  %2950 = vmatprep.mubr.f32.mxu1 %v12129_v0 }
 0x8f4   :  { %9927 = vmatpush1.bf16.msra.mxu0 %v12702_v58  ;;  %9959 = vmatpush1.bf16.msra.mxu1 %v12705_v63 }
 0x8f5   :  { %9929 = vmatprep.subr.bf16.mxu0 %v12708_v35  ;;  %9961 = vmatprep.subr.bf16.mxu1 %v12710_v1 }
 0x8f8   :  { %9931 = vmatpush1.bf16.msra.mxu0 %v12713_v39  ;;  %9963 = vmatpush1.bf16.msra.mxu1 %v12717_v23 }
 0x8f9   :  { %9933 = vmatprep.subr.bf16.mxu0 %v12719_v29  ;;  %9965 = vmatprep.subr.bf16.mxu1 %v12722_v12 }
 0x8fc   :  { %9935 = vmatpush1.bf16.msra.mxu0 %v12725_v5  ;;  %9967 = vmatpush1.bf16.msra.mxu1 %v12729_v33 }
 0x8fd   :  { %9937 = vmatprep.subr.bf16.mxu0 %v12731_v49  ;;  %9969 = vmatprep.subr.bf16.mxu1 %v12734_v59 }
 0x900   :  { %9939 = vmatpush1.bf16.msra.mxu0 %v12737_v34  ;;  %9971 = vmatpush1.bf16.msra.mxu1 %v12741_v53 }
 0x901   :  { %9941 = vmatprep.subr.bf16.mxu0 %v12743_v2  ;;  %9973 = vmatprep.subr.bf16.mxu1 %v12746_v17 }
 0x904   :  { %9943 = vmatpush1.bf16.msra.mxu0 %v12749_v18  ;;  %9975 = vmatpush1.bf16.msra.mxu1 %v12753_v32 }
 0x905   :  { %9945 = vmatprep.subr.bf16.mxu0 %v12755_v13  ;;  %9977 = vmatprep.subr.bf16.mxu1 %v12758_v52 }
 0x908   :  { %9947 = vmatpush1.bf16.msra.mxu0 %v12761_v3  ;;  %9979 = vmatpush1.bf16.msra.mxu1 %v12765_v7 }
 0x909   :  { %9949 = vmatprep.subr.bf16.mxu0 %v12767_v15  ;;  %9981 = vmatprep.subr.bf16.mxu1 %v12770_v11 }
 0x90c   :  { %9951 = vmatpush1.bf16.msra.mxu0 %v12773_v55  ;;  %9983 = vmatpush1.bf16.msra.mxu1 %v12777_v60 }
 0x90d   :  { %9985 = vmatprep.subr.bf16.mxu0 %v12686_v16  ;;  %10017 = vmatprep.subr.bf16.mxu1 %v12688_v30 }
 0x9c2   :  { %v2611_v27 = vpop.f32.mrb[20].mxu0  ;;  %v2682_v8 = vpop.f32.mrb[20].mxu1 }
 0x9c3   :  { %v2613_v9 = vpop.f32.mrb[21].mxu0  ;;  %v2684_v24 = vpop.f32.mrb[21].mxu1 }
 0x9c4   :  { %v2691_v31 = vcombine.low %v2611_v27, %v2613_v9  ;;  %v2692_v4 = vcombine.low %v2682_v8, %v2684_v24 }
 0x9c6   :  { %v2699_v25 = vrot.slane %v2691_v31, %v12409_v28  ;;  %v2706_v46 = vrot.slane %v2692_v4, %v12409_v28 }
 0x9c8   :  { %v2707_v61 = vcombine.low %v2699_v25, %v2706_v46 }
 0x9ca   :  { %v2714_v20 = vrot.slane %v2707_v61, %v12409_v28 }
 0x9cc   :  { %v2716_v62 = vadd.f32 %v2714_v20, %v2480_v56  ;;  %v3292_v20 = vld [vmem:[#allocation8 + $0x8] sm:$0xff] }
 0x9cd   :  { %v3296_v56 = vld [vmem:[#allocation8 + $0x28] sm:$0xff] }
 0x9ce   :  { %v9240_v19 = vmul.f32 -1.442695, %v2716_v62  ;;  %v2724_v44 = vrot.slane %v2716_v62, 1  ;;  %v2735_v30 = vrot.slane %v2716_v62, 3  ;;  %v2732_v54 = vrot.slane %v2716_v62, 2  ;;  %v3294_v62 = vld [vmem:[#allocation8 + $0x18] sm:$0xff] }
 0x9d0   :  { %11596 = vpow2.f32 %v9240_v19  ;;  %v9241_v16 = vmul.f32 -1.442695, %v2724_v44  ;;  %v9242_v50 = vmul.f32 -1.442695, %v2735_v30  ;;  %v12914_v19 = vpack.c.bf16 %v3296_v56, %v3292_v20  ;;  %v3298_v44 = vld [vmem:[#allocation8 + $0x38] sm:$0xff]  ;;  %v3295_v30 = vld [vmem:[#allocation8 + $0x20] sm:$0xff] }
 0x9d1   :  { %v3329_v56 = vld [vmem:[#allocation8 + $0x130] sm:$0xff] }
 0x9d2   :  { %11598 = vpow2.f32 %v9241_v16  ;;  %v3291_v16 = vld [vmem:[#allocation8] sm:$0xff] }
 0x9d3   :  { %11600 = vpow2.f32 %v9242_v50  ;;  %v12916_v50 = vpack.c.bf16 %v3298_v44, %v3294_v62  ;;  %v3332_v62 = vld [vmem:[#allocation8 + $0x148] sm:$0xff] }
 0x9d4   :  { %v3336_v44 = vld [vmem:[#allocation8 + $0x168] sm:$0xff] }
 0x9da   :  { %v11597_v21 = vpop.eup %11596 }
 0x9db   :  { %v2720_v22 = vadd.f32 1.0, %v11597_v21  ;;  %v12918_v21 = vpack.c.bf16 %v3295_v30, %v3291_v16  ;;  %v3334_v16 = vld [vmem:[#allocation8 + $0x158] sm:$0xff] }
 0x9dc   :  { %v11599_v57 = vpop.eup %11598  ;;  %v3338_v30 = vld [vmem:[#allocation8 + $0x178] sm:$0xff] }
 0x9dd   :  { %11602 = vrcp.f32 %v2720_v22  ;;  %v2729_v10 = vadd.f32 1.0, %v11599_v57  ;;  %v11601_v14 = vpop.eup %11600  ;;  %v3297_v22 = vld [vmem:[#allocation8 + $0x30] sm:$0xff] }
 0x9de   :  { %11604 = vtanh.f32 %v2732_v54  ;;  %v2740_v27 = vadd.f32 1.0, %v11601_v14  ;;  %v3293_v54 = vld [vmem:[#allocation8 + $0x10] sm:$0xff]  ;;  %v3304_v14 = vld [vmem:[#allocation8 + $0x68] sm:$0xff] }
 0x9df   :  { %11606 = vrcp.f32 %v2729_v10  ;;  %v12921_v57 = vpack.c.bf16 %v3297_v22, %v3293_v54  ;;  %v3300_v10 = vld [vmem:[#allocation8 + $0x48] sm:$0xff] }
 0x9e0   :  { %11608 = vrcp.f32 %v2740_v27  ;;  %v3299_v27 = vld [vmem:[#allocation8 + $0x40] sm:$0xff] }
 0x9e7   :  { %v11603_v40 = vpop.eup %11602 }
 0x9e8   :  { %v11605_v6 = vpop.eup %11604 }
 0x9e9   :  { %v11607_v47 = vpop.eup %11606  ;;  %v2744_v9 = vmul.f32 %v11605_v6, %v11603_v40  ;;  %v3302_v40 = vld [vmem:[#allocation8 + $0x58] sm:$0xff]  ;;  %v12925_v6 = vpack.c.bf16 %v3304_v14, %v3300_v10  ;;  %v12971_v10 = vpack.c.bf16 %v3336_v44, %v3332_v62  ;;  %v3331_v14 = vld [vmem:[#allocation8 + $0x140] sm:$0xff] }
 0x9ea   :  { %v2743_v8 = vmul.f32 %v11607_v47, %v12829_v26  ;;  %v11609_v31 = vpop.eup %11608  ;;  %v3306_v47 = vld [vmem:[#allocation8 + $0x78] sm:$0xff] }
 0x9ec   :  { %v12870_v24 = vadd.f32 %v2744_v9, %v2743_v8  ;;  %v3303_v8 = vld [vmem:[#allocation8 + $0x60] sm:$0xff]  ;;  %v12928_v9 = vpack.c.bf16 %v3306_v47, %v3302_v40  ;;  %v3333_v47 = vld [vmem:[#allocation8 + $0x150] sm:$0xff] }
 0x9ed   :  { %v3335_v40 = vld [vmem:[#allocation8 + $0x160] sm:$0xff] }
 0x9ee   :  { %11610 = vtanh.f32 %v12870_v24 }
 0x9f8   :  { %v11611_v4 = vpop.eup %11610 }
 0x9f9   :  { %v2747_v25 = vmul.f32 %v11611_v4, %v11609_v31  ;;  %v3301_v31 = vld [vmem:[#allocation8 + $0x50] sm:$0xff] }
 0x9fa   :  { %v3305_v4 = vld [vmem:[#allocation8 + $0x70] sm:$0xff] }
 0x9fb   :  { %2748 = vst [vmem:[#allocation12 + $0x8] sm:$0x1] %v2747_v25  ;;  %2880 = vmatmul.mubr.f32.vlgmr.msra.gmra.mrb[22].mxu0 %v2747_v25  ;;  %2951 = vmatmul.mubr.f32.vlgmr.msra.gmra.mrb[22].mxu1 %v2747_v25  ;;  %v3308_v25 = vld [vmem:[#allocation8 + $0x88] sm:$0xff] }
 0x9fc   :  { %9987 = vmatpush1.bf16.msra.mxu0 %v12690_v41  ;;  %10019 = vmatpush1.bf16.msra.mxu1 %v12693_v48 }
 0x9fd   :  { %9989 = vmatprep.subr.bf16.mxu0 %v12697_v37  ;;  %10021 = vmatprep.subr.bf16.mxu1 %v12700_v51 }
 0x9fe   :  { %3149 = vmatprep.mubr.f32.mxu0 %v12129_v0  ;;  %3220 = vmatprep.mubr.f32.mxu1 %v12129_v0 }
 0xa00   :  { %9991 = vmatpush1.bf16.msra.mxu0 %v12702_v58  ;;  %10023 = vmatpush1.bf16.msra.mxu1 %v12705_v63 }
 0xa01   :  { %9993 = vmatprep.subr.bf16.mxu0 %v12708_v35  ;;  %10025 = vmatprep.subr.bf16.mxu1 %v12710_v1 }
 0xa04   :  { %9995 = vmatpush1.bf16.msra.mxu0 %v12713_v39  ;;  %10027 = vmatpush1.bf16.msra.mxu1 %v12717_v23 }
 0xa05   :  { %9997 = vmatprep.subr.bf16.mxu0 %v12719_v29  ;;  %10029 = vmatprep.subr.bf16.mxu1 %v12722_v12  ;;  %v2750_v29 = vld [vmem:[#allocation2 + $0x21] ss:$8 sm:$0xf] }
 0xa08   :  { %9999 = vmatpush1.bf16.msra.mxu0 %v12725_v5  ;;  %10031 = vmatpush1.bf16.msra.mxu1 %v12729_v33 }
 0xa09   :  { %10001 = vmatprep.subr.bf16.mxu0 %v12731_v49  ;;  %10033 = vmatprep.subr.bf16.mxu1 %v12734_v59 }
 0xa0c   :  { %10003 = vmatpush1.bf16.msra.mxu0 %v12737_v34  ;;  %10035 = vmatpush1.bf16.msra.mxu1 %v12741_v53 }
 0xa0d   :  { %10005 = vmatprep.subr.bf16.mxu0 %v12743_v2  ;;  %10037 = vmatprep.subr.bf16.mxu1 %v12746_v17 }
 0xa10   :  { %10007 = vmatpush1.bf16.msra.mxu0 %v12749_v18  ;;  %10039 = vmatpush1.bf16.msra.mxu1 %v12753_v32 }
 0xa11   :  { %10009 = vmatprep.subr.bf16.mxu0 %v12755_v13  ;;  %10041 = vmatprep.subr.bf16.mxu1 %v12758_v52 }
 0xa14   :  { %10011 = vmatpush1.bf16.msra.mxu0 %v12761_v3  ;;  %10043 = vmatpush1.bf16.msra.mxu1 %v12765_v7 }
 0xa15   :  { %10013 = vmatprep.subr.bf16.mxu0 %v12767_v15  ;;  %10045 = vmatprep.subr.bf16.mxu1 %v12770_v11 }
 0xa18   :  { %10015 = vmatpush1.bf16.msra.mxu0 %v12773_v55  ;;  %10047 = vmatpush1.bf16.msra.mxu1 %v12777_v60 }
 0xa19   :  { %10049 = vmatprep.subr.bf16.mxu0 %v12914_v19  ;;  %10081 = vmatprep.subr.bf16.mxu1 %v12916_v50 }
 0xace   :  { %v2881_v41 = vpop.f32.mrb[22].mxu0  ;;  %v2952_v48 = vpop.f32.mrb[22].mxu1 }
 0xacf   :  { %v2883_v37 = vpop.f32.mrb[23].mxu0  ;;  %v2954_v51 = vpop.f32.mrb[23].mxu1 }
 0xad0   :  { %v2961_v58 = vcombine.low %v2881_v41, %v2883_v37  ;;  %v2962_v63 = vcombine.low %v2952_v48, %v2954_v51  ;;  %v12933_v41 = vpack.c.bf16 %v3305_v4, %v3301_v31  ;;  %v3312_v48 = vld [vmem:[#allocation8 + $0xa8] sm:$0xff]  ;;  %v3310_v37 = vld [vmem:[#allocation8 + $0x98] sm:$0xff] }
 0xad1   :  { %v3314_v51 = vld [vmem:[#allocation8 + $0xb8] sm:$0xff]  ;;  %v3340_v31 = vld [vmem:[#allocation8 + $0x188] sm:$0xff] }
 0xad2   :  { %v2969_v35 = vrot.slane %v2961_v58, %v12409_v28  ;;  %v2976_v1 = vrot.slane %v2962_v63, %v12409_v28  ;;  %v12936_v58 = vpack.c.bf16 %v3312_v48, %v3308_v25  ;;  %v12938_v63 = vpack.c.bf16 %v3314_v51, %v3310_v37  ;;  %v3344_v4 = vld [vmem:[#allocation8 + $0x1a8] sm:$0xff]  ;;  %v3342_v25 = vld [vmem:[#allocation8 + $0x198] sm:$0xff] }
 0xad3   :  { %v3346_v48 = vld [vmem:[#allocation8 + $0x1b8] sm:$0xff]  ;;  %v12977_v37 = vpack.c.bf16 %v3335_v40, %v3331_v14 }
 0xad4   :  { %v2977_v39 = vcombine.low %v2969_v35, %v2976_v1  ;;  %v3307_v35 = vld [vmem:[#allocation8 + $0x80] sm:$0xff] }
 0xad5   :  { %v3311_v1 = vld [vmem:[#allocation8 + $0xa0] sm:$0xff] }
 0xad6   :  { %v2984_v23 = vrot.slane %v2977_v39, %v12409_v28  ;;  %v3309_v39 = vld [vmem:[#allocation8 + $0x90] sm:$0xff] }
 0xad8   :  { %v2986_v12 = vadd.f32 %v2984_v23, %v2750_v29  ;;  %v12941_v23 = vpack.c.bf16 %v3311_v1, %v3307_v35  ;;  %v3313_v29 = vld [vmem:[#allocation8 + $0xb0] sm:$0xff]  ;;  %v12983_v35 = vpack.c.bf16 %v3344_v4, %v3340_v31  ;;  %v3339_v1 = vld [vmem:[#allocation8 + $0x180] sm:$0xff] }
 0xada   :  { %v9243_v5 = vmul.f32 -1.442695, %v2986_v12  ;;  %v2994_v33 = vrot.slane %v2986_v12, 1  ;;  %v3005_v59 = vrot.slane %v2986_v12, 3  ;;  %v3002_v2 = vrot.slane %v2986_v12, 2  ;;  %v3316_v12 = vld [vmem:[#allocation8 + $0xc8] sm:$0xff] }
 0xadc   :  { %11612 = vpow2.f32 %v9243_v5  ;;  %v9244_v49 = vmul.f32 -1.442695, %v2994_v33  ;;  %v9245_v34 = vmul.f32 -1.442695, %v3005_v59  ;;  %v3320_v5 = vld [vmem:[#allocation8 + $0xe8] sm:$0xff]  ;;  %v12945_v33 = vpack.c.bf16 %v3313_v29, %v3309_v39  ;;  %v3318_v59 = vld [vmem:[#allocation8 + $0xd8] sm:$0xff] }
 0xadd   :  { %v3343_v39 = vld [vmem:[#allocation8 + $0x1a0] sm:$0xff]  ;;  %v3341_v29 = vld [vmem:[#allocation8 + $0x190] sm:$0xff] }
 0xade   :  { %11614 = vpow2.f32 %v9244_v49  ;;  %v12947_v49 = vpack.c.bf16 %v3320_v5, %v3316_v12  ;;  %v12986_v12 = vpack.c.bf16 %v3346_v48, %v3342_v25  ;;  %v3345_v5 = vld [vmem:[#allocation8 + $0x1b0] sm:$0xff] }
 0xadf   :  { %11616 = vpow2.f32 %v9245_v34  ;;  %v3322_v34 = vld [vmem:[#allocation8 + $0xf8] sm:$0xff] }
 0xae0   :  { %v3020_v25 = vld [vmem:[#allocation2 + $0x22] ss:$8 sm:$0xf] }
 0xae6   :  { %v11613_v53 = vpop.eup %11612 }
 0xae7   :  { %v2990_v17 = vadd.f32 1.0, %v11613_v53  ;;  %v3315_v53 = vld [vmem:[#allocation8 + $0xc0] sm:$0xff] }
 0xae8   :  { %v11615_v18 = vpop.eup %11614 }
 0xae9   :  { %11618 = vrcp.f32 %v2990_v17  ;;  %v2999_v32 = vadd.f32 1.0, %v11615_v18  ;;  %v11617_v13 = vpop.eup %11616  ;;  %v3319_v17 = vld [vmem:[#allocation8 + $0xe0] sm:$0xff]  ;;  %v3317_v18 = vld [vmem:[#allocation8 + $0xd0] sm:$0xff] }
 0xaea   :  { %11620 = vtanh.f32 %v3002_v2  ;;  %v3010_v15 = vadd.f32 1.0, %v11617_v13  ;;  %v12950_v2 = vpack.c.bf16 %v3322_v34, %v3318_v59  ;;  %v3324_v13 = vld [vmem:[#allocation8 + $0x108] sm:$0xff] }
 0xaeb   :  { %11622 = vrcp.f32 %v2999_v32  ;;  %v3321_v32 = vld [vmem:[#allocation8 + $0xf0] sm:$0xff]  ;;  %v3348_v59 = vld [vmem:[#allocation8 + $0x1c8] sm:$0xff] }
 0xaec   :  { %11624 = vrcp.f32 %v3010_v15  ;;  %v3330_v15 = vld [vmem:[#allocation8 + $0x138] sm:$0xff]  ;;  %v3352_v34 = vld [vmem:[#allocation8 + $0x1e8] sm:$0xff] }
 0xaf3   :  { %v11619_v52 = vpop.eup %11618 }
 0xaf4   :  { %v11621_v3 = vpop.eup %11620 }
 0xaf5   :  { %v11623_v7 = vpop.eup %11622  ;;  %v3014_v55 = vmul.f32 %v11621_v3, %v11619_v52  ;;  %v3328_v52 = vld [vmem:[#allocation8 + $0x128] sm:$0xff]  ;;  %v3326_v3 = vld [vmem:[#allocation8 + $0x118] sm:$0xff] }
 0xaf6   :  { %v3013_v11 = vmul.f32 %v11623_v7, %v12870_v24  ;;  %v11625_v26 = vpop.eup %11624  ;;  %v12930_v24 = vpack.c.bf16 %v3303_v8, %v3299_v27  ;;  %v12953_v7 = vpack.c.bf16 %v3319_v17, %v3315_v53  ;;  %v12962_v20 = vpack.c.bf16 %v3330_v15, %v3326_v3  ;;  %v3337_v8 = vld [vmem:[#allocation8 + $0x170] sm:$0xff]  ;;  %v3350_v53 = vld [vmem:[#allocation8 + $0x1d8] sm:$0xff]  ;;  %v3351_v3 = vld [vmem:[#allocation8 + $0x1e0] sm:$0xff] }
 0xaf7   :  { %v12974_v27 = vpack.c.bf16 %v3338_v30, %v3334_v16  ;;  %v12981_v51 = vpack.c.bf16 %v3337_v8, %v3333_v47  ;;  %v3354_v17 = vld [vmem:[#allocation8 + $0x1f8] sm:$0xff] }
 0xaf8   :  { %v12909_v60 = vadd.f32 %v3014_v55, %v3013_v11  ;;  %v12957_v11 = vpack.c.bf16 %v3321_v32, %v3317_v18  ;;  %v12959_v55 = vpack.c.bf16 %v3328_v52, %v3324_v13  ;;  %v12989_v18 = vpack.c.bf16 %v3343_v39, %v3339_v1  ;;  %v3347_v52 = vld [vmem:[#allocation8 + $0x1c0] sm:$0xff] }
 0xaf9   :  { %v12993_v32 = vpack.c.bf16 %v3345_v5, %v3341_v29  ;;  %v12995_v13 = vpack.c.bf16 %v3352_v34, %v3348_v59  ;;  %v12998_v15 = vpack.c.bf16 %v3354_v17, %v3350_v53 }
 0xafa   :  { %11626 = vtanh.f32 %v12909_v60 }
 0xb04   :  { %v11627_v46 = vpop.eup %11626 }
 0xb05   :  { %v3017_v61 = vmul.f32 %v11627_v46, %v11625_v26  ;;  %v3323_v26 = vld [vmem:[#allocation8 + $0x100] sm:$0xff] }
 0xb06   :  { %v3327_v46 = vld [vmem:[#allocation8 + $0x120] sm:$0xff] }
 0xb07   :  { %3018 = vst [vmem:[#allocation12 + $0x9] sm:$0x1] %v3017_v61  ;;  %3150 = vmatmul.mubr.f32.vlgmr.msra.gmra.mrb[24].mxu0 %v3017_v61  ;;  %3221 = vmatmul.mubr.f32.vlgmr.msra.gmra.mrb[24].mxu1 %v3017_v61  ;;  %v3325_v61 = vld [vmem:[#allocation8 + $0x110] sm:$0xff]  ;;  %v12965_v54 = vpack.c.bf16 %v3327_v46, %v3323_v26 }
 0xb08   :  { %3419 = vmatprep.mubr.f32.mxu0 %v12129_v0  ;;  %3490 = vmatprep.mubr.f32.mxu1 %v12129_v0  ;;  %v12969_v22 = vpack.c.bf16 %v3329_v56, %v3325_v61  ;;  %v3349_v26 = vld [vmem:[#allocation8 + $0x1d0] sm:$0xff]  ;;  %v13001_v61 = vpack.c.bf16 %v3351_v3, %v3347_v52 }
 0xb09   :  { %10051 = vmatpush1.bf16.msra.mxu0 %v12918_v21  ;;  %10083 = vmatpush1.bf16.msra.mxu1 %v12921_v57  ;;  %v3353_v46 = vld [vmem:[#allocation8 + $0x1f0] sm:$0xff] }
 0xb0a   :  { %10053 = vmatprep.subr.bf16.mxu0 %v12925_v6  ;;  %10085 = vmatprep.subr.bf16.mxu1 %v12928_v9  ;;  %v13005_v56 = vpack.c.bf16 %v3353_v46, %v3349_v26 }
 0xb0d   :  { %10055 = vmatpush1.bf16.msra.mxu0 %v12930_v24  ;;  %10087 = vmatpush1.bf16.msra.mxu1 %v12933_v41 }
 0xb0e   :  { %10057 = vmatprep.subr.bf16.mxu0 %v12936_v58  ;;  %10089 = vmatprep.subr.bf16.mxu1 %v12938_v63 }
 0xb11   :  { %10059 = vmatpush1.bf16.msra.mxu0 %v12941_v23  ;;  %10091 = vmatpush1.bf16.msra.mxu1 %v12945_v33 }
 0xb12   :  { %10061 = vmatprep.subr.bf16.mxu0 %v12947_v49  ;;  %10093 = vmatprep.subr.bf16.mxu1 %v12950_v2 }
 0xb15   :  { %10063 = vmatpush1.bf16.msra.mxu0 %v12953_v7  ;;  %10095 = vmatpush1.bf16.msra.mxu1 %v12957_v11 }
 0xb16   :  { %10065 = vmatprep.subr.bf16.mxu0 %v12959_v55  ;;  %10097 = vmatprep.subr.bf16.mxu1 %v12962_v20 }
 0xb19   :  { %10067 = vmatpush1.bf16.msra.mxu0 %v12965_v54  ;;  %10099 = vmatpush1.bf16.msra.mxu1 %v12969_v22 }
 0xb1a   :  { %10069 = vmatprep.subr.bf16.mxu0 %v12971_v10  ;;  %10101 = vmatprep.subr.bf16.mxu1 %v12974_v27 }
 0xb1d   :  { %10071 = vmatpush1.bf16.msra.mxu0 %v12977_v37  ;;  %10103 = vmatpush1.bf16.msra.mxu1 %v12981_v51 }
 0xb1e   :  { %10073 = vmatprep.subr.bf16.mxu0 %v12983_v35  ;;  %10105 = vmatprep.subr.bf16.mxu1 %v12986_v12 }
 0xb21   :  { %10075 = vmatpush1.bf16.msra.mxu0 %v12989_v18  ;;  %10107 = vmatpush1.bf16.msra.mxu1 %v12993_v32 }
 0xb22   :  { %10077 = vmatprep.subr.bf16.mxu0 %v12995_v13  ;;  %10109 = vmatprep.subr.bf16.mxu1 %v12998_v15 }
 0xb25   :  { %10079 = vmatpush1.bf16.msra.mxu0 %v13001_v61  ;;  %10111 = vmatpush1.bf16.msra.mxu1 %v13005_v56 }
 0xb26   :  { %10113 = vmatprep.subr.bf16.mxu0 %v12914_v19  ;;  %10145 = vmatprep.subr.bf16.mxu1 %v12916_v50 }
 0xbda   :  { %v3151_v62 = vpop.f32.mrb[24].mxu0  ;;  %v3222_v44 = vpop.f32.mrb[24].mxu1 }
 0xbdb   :  { %v3153_v16 = vpop.f32.mrb[25].mxu0  ;;  %v3224_v30 = vpop.f32.mrb[25].mxu1 }
 0xbdc   :  { %v3231_v14 = vcombine.low %v3151_v62, %v3153_v16  ;;  %v3232_v40 = vcombine.low %v3222_v44, %v3224_v30 }
 0xbde   :  { %v3239_v47 = vrot.slane %v3231_v14, %v12409_v28  ;;  %v3246_v8 = vrot.slane %v3232_v40, %v12409_v28 }
 0xbe0   :  { %v3247_v31 = vcombine.low %v3239_v47, %v3246_v8 }
 0xbe2   :  { %v3254_v4 = vrot.slane %v3247_v31, %v12409_v28 }
 0xbe4   :  { %v3256_v48 = vadd.f32 %v3254_v4, %v3020_v25 }
 0xbe6   :  { %v9246_v1 = vmul.f32 -1.442695, %v3256_v48  ;;  %v3264_v39 = vrot.slane %v3256_v48, 1  ;;  %v3275_v5 = vrot.slane %v3256_v48, 3  ;;  %v3272_v53 = vrot.slane %v3256_v48, 2 }
 0xbe8   :  { %11628 = vpow2.f32 %v9246_v1  ;;  %v9247_v29 = vmul.f32 -1.442695, %v3264_v39  ;;  %v9248_v59 = vmul.f32 -1.442695, %v3275_v5 }
 0xbea   :  { %11630 = vpow2.f32 %v9247_v29 }
 0xbeb   :  { %11632 = vpow2.f32 %v9248_v59 }
 0xbf2   :  { %v11629_v34 = vpop.eup %11628 }
 0xbf3   :  { %v3260_v17 = vadd.f32 1.0, %v11629_v34 }
 0xbf4   :  { %v11631_v52 = vpop.eup %11630 }
 0xbf5   :  { %11634 = vrcp.f32 %v3260_v17  ;;  %v3269_v3 = vadd.f32 1.0, %v11631_v52  ;;  %v11633_v26 = vpop.eup %11632 }
 0xbf6   :  { %11636 = vtanh.f32 %v3272_v53  ;;  %v3280_v16 = vadd.f32 1.0, %v11633_v26  ;;  %v3290_v53 = vld [vmem:[#allocation2 + $0x23] ss:$8 sm:$0xf] }
 0xbf7   :  { %11638 = vrcp.f32 %v3269_v3 }
 0xbf8   :  { %11640 = vrcp.f32 %v3280_v16 }
 0xbff   :  { %v11635_v46 = vpop.eup %11634 }
 0xc00   :  { %v11637_v62 = vpop.eup %11636 }
 0xc01   :  { %v11639_v44 = vpop.eup %11638  ;;  %v3284_v14 = vmul.f32 %v11637_v62, %v11635_v46 }
 0xc02   :  { %v3283_v30 = vmul.f32 %v11639_v44, %v12909_v60  ;;  %v11641_v47 = vpop.eup %11640 }
 0xc04   :  { %v13016_v40 = vadd.f32 %v3284_v14, %v3283_v30 }
 0xc06   :  { %11642 = vtanh.f32 %v13016_v40 }
 0xc10   :  { %v11643_v8 = vpop.eup %11642 }
 0xc11   :  { %v3287_v31 = vmul.f32 %v11643_v8, %v11641_v47 }
 0xc13   :  { %3288 = vst [vmem:[#allocation12 + $0xa] sm:$0x1] %v3287_v31  ;;  %3420 = vmatmul.mubr.f32.vlgmr.msra.gmra.mrb[26].mxu0 %v3287_v31  ;;  %3491 = vmatmul.mubr.f32.vlgmr.msra.gmra.mrb[26].mxu1 %v3287_v31 }
 0xc14   :  { %10115 = vmatpush1.bf16.msra.mxu0 %v12918_v21  ;;  %10147 = vmatpush1.bf16.msra.mxu1 %v12921_v57 }
 0xc15   :  { %10117 = vmatprep.subr.bf16.mxu0 %v12925_v6  ;;  %10149 = vmatprep.subr.bf16.mxu1 %v12928_v9 }
 0xc16   :  { %3689 = vmatprep.mubr.f32.mxu0 %v12129_v0  ;;  %3760 = vmatprep.mubr.f32.mxu1 %v12129_v0 }
 0xc18   :  { %10119 = vmatpush1.bf16.msra.mxu0 %v12930_v24  ;;  %10151 = vmatpush1.bf16.msra.mxu1 %v12933_v41 }
 0xc19   :  { %10121 = vmatprep.subr.bf16.mxu0 %v12936_v58  ;;  %10153 = vmatprep.subr.bf16.mxu1 %v12938_v63 }
 0xc1c   :  { %10123 = vmatpush1.bf16.msra.mxu0 %v12941_v23  ;;  %10155 = vmatpush1.bf16.msra.mxu1 %v12945_v33 }
 0xc1d   :  { %10125 = vmatprep.subr.bf16.mxu0 %v12947_v49  ;;  %10157 = vmatprep.subr.bf16.mxu1 %v12950_v2 }
 0xc20   :  { %10127 = vmatpush1.bf16.msra.mxu0 %v12953_v7  ;;  %10159 = vmatpush1.bf16.msra.mxu1 %v12957_v11 }
 0xc21   :  { %10129 = vmatprep.subr.bf16.mxu0 %v12959_v55  ;;  %10161 = vmatprep.subr.bf16.mxu1 %v12962_v20 }
 0xc24   :  { %10131 = vmatpush1.bf16.msra.mxu0 %v12965_v54  ;;  %10163 = vmatpush1.bf16.msra.mxu1 %v12969_v22 }
 0xc25   :  { %10133 = vmatprep.subr.bf16.mxu0 %v12971_v10  ;;  %10165 = vmatprep.subr.bf16.mxu1 %v12974_v27 }
 0xc28   :  { %10135 = vmatpush1.bf16.msra.mxu0 %v12977_v37  ;;  %10167 = vmatpush1.bf16.msra.mxu1 %v12981_v51 }
 0xc29   :  { %10137 = vmatprep.subr.bf16.mxu0 %v12983_v35  ;;  %10169 = vmatprep.subr.bf16.mxu1 %v12986_v12 }
 0xc2c   :  { %10139 = vmatpush1.bf16.msra.mxu0 %v12989_v18  ;;  %10171 = vmatpush1.bf16.msra.mxu1 %v12993_v32 }
 0xc2d   :  { %10141 = vmatprep.subr.bf16.mxu0 %v12995_v13  ;;  %10173 = vmatprep.subr.bf16.mxu1 %v12998_v15 }
 0xc30   :  { %10143 = vmatpush1.bf16.msra.mxu0 %v13001_v61  ;;  %10175 = vmatpush1.bf16.msra.mxu1 %v13005_v56 }
 0xc31   :  { %10177 = vmatprep.subr.bf16.mxu0 %v12914_v19  ;;  %10209 = vmatprep.subr.bf16.mxu1 %v12916_v50 }
 0xce6   :  { %v3421_v60 = vpop.f32.mrb[26].mxu0  ;;  %v3492_v4 = vpop.f32.mrb[26].mxu1 }
 0xce7   :  { %v3423_v25 = vpop.f32.mrb[27].mxu0  ;;  %v3494_v48 = vpop.f32.mrb[27].mxu1 }
 0xce8   :  { %v3501_v1 = vcombine.low %v3421_v60, %v3423_v25  ;;  %v3502_v39 = vcombine.low %v3492_v4, %v3494_v48 }
 0xcea   :  { %v3509_v29 = vrot.slane %v3501_v1, %v12409_v28  ;;  %v3516_v5 = vrot.slane %v3502_v39, %v12409_v28 }
 0xcec   :  { %v3517_v59 = vcombine.low %v3509_v29, %v3516_v5 }
 0xcee   :  { %v3524_v34 = vrot.slane %v3517_v59, %v12409_v28 }
 0xcf0   :  { %v3526_v17 = vadd.f32 %v3524_v34, %v3290_v53 }
 0xcf2   :  { %v9249_v52 = vmul.f32 -1.442695, %v3526_v17  ;;  %v3534_v3 = vrot.slane %v3526_v17, 1  ;;  %v3545_v46 = vrot.slane %v3526_v17, 3  ;;  %v3542_v16 = vrot.slane %v3526_v17, 2 }
 0xcf4   :  { %11644 = vpow2.f32 %v9249_v52  ;;  %v9250_v26 = vmul.f32 -1.442695, %v3534_v3  ;;  %v9251_v62 = vmul.f32 -1.442695, %v3545_v46 }
 0xcf6   :  { %11646 = vpow2.f32 %v9250_v26 }
 0xcf7   :  { %11648 = vpow2.f32 %v9251_v62 }
 0xcfe   :  { %v11645_v44 = vpop.eup %11644 }
 0xcff   :  { %v3530_v30 = vadd.f32 1.0, %v11645_v44 }
 0xd00   :  { %v11647_v14 = vpop.eup %11646 }
 0xd01   :  { %11650 = vrcp.f32 %v3530_v30  ;;  %v3539_v47 = vadd.f32 1.0, %v11647_v14  ;;  %v11649_v8 = vpop.eup %11648 }
 0xd02   :  { %11652 = vtanh.f32 %v3542_v16  ;;  %v3550_v25 = vadd.f32 1.0, %v11649_v8  ;;  %v3560_v16 = vld [vmem:[#allocation2 + $0x24] ss:$8 sm:$0xf] }
 0xd03   :  { %11654 = vrcp.f32 %v3539_v47 }
 0xd04   :  { %11656 = vrcp.f32 %v3550_v25 }
 0xd0b   :  { %v11651_v31 = vpop.eup %11650 }
 0xd0c   :  { %v11653_v60 = vpop.eup %11652 }
 0xd0d   :  { %v11655_v4 = vpop.eup %11654  ;;  %v3554_v1 = vmul.f32 %v11653_v60, %v11651_v31 }
 0xd0e   :  { %v3553_v48 = vmul.f32 %v11655_v4, %v13016_v40  ;;  %v11657_v29 = vpop.eup %11656 }
 0xd10   :  { %v13057_v39 = vadd.f32 %v3554_v1, %v3553_v48 }
 0xd12   :  { %11658 = vtanh.f32 %v13057_v39 }
 0xd1c   :  { %v11659_v5 = vpop.eup %11658 }
 0xd1d   :  { %v3557_v59 = vmul.f32 %v11659_v5, %v11657_v29 }
 0xd1f   :  { %3558 = vst [vmem:[#allocation12 + $0xb] sm:$0x1] %v3557_v59  ;;  %3690 = vmatmul.mubr.f32.vlgmr.msra.gmra.mrb[28].mxu0 %v3557_v59  ;;  %3761 = vmatmul.mubr.f32.vlgmr.msra.gmra.mrb[28].mxu1 %v3557_v59 }
 0xd20   :  { %10179 = vmatpush1.bf16.msra.mxu0 %v12918_v21  ;;  %10211 = vmatpush1.bf16.msra.mxu1 %v12921_v57 }
 0xd21   :  { %10181 = vmatprep.subr.bf16.mxu0 %v12925_v6  ;;  %10213 = vmatprep.subr.bf16.mxu1 %v12928_v9 }
 0xd22   :  { %3959 = vmatprep.mubr.f32.mxu0 %v12129_v0  ;;  %4030 = vmatprep.mubr.f32.mxu1 %v12129_v0 }
 0xd24   :  { %10183 = vmatpush1.bf16.msra.mxu0 %v12930_v24  ;;  %10215 = vmatpush1.bf16.msra.mxu1 %v12933_v41 }
 0xd25   :  { %10185 = vmatprep.subr.bf16.mxu0 %v12936_v58  ;;  %10217 = vmatprep.subr.bf16.mxu1 %v12938_v63 }
 0xd28   :  { %10187 = vmatpush1.bf16.msra.mxu0 %v12941_v23  ;;  %10219 = vmatpush1.bf16.msra.mxu1 %v12945_v33 }
 0xd29   :  { %10189 = vmatprep.subr.bf16.mxu0 %v12947_v49  ;;  %10221 = vmatprep.subr.bf16.mxu1 %v12950_v2 }
 0xd2c   :  { %10191 = vmatpush1.bf16.msra.mxu0 %v12953_v7  ;;  %10223 = vmatpush1.bf16.msra.mxu1 %v12957_v11 }
 0xd2d   :  { %10193 = vmatprep.subr.bf16.mxu0 %v12959_v55  ;;  %10225 = vmatprep.subr.bf16.mxu1 %v12962_v20 }
 0xd30   :  { %10195 = vmatpush1.bf16.msra.mxu0 %v12965_v54  ;;  %10227 = vmatpush1.bf16.msra.mxu1 %v12969_v22 }
 0xd31   :  { %10197 = vmatprep.subr.bf16.mxu0 %v12971_v10  ;;  %10229 = vmatprep.subr.bf16.mxu1 %v12974_v27 }
 0xd34   :  { %10199 = vmatpush1.bf16.msra.mxu0 %v12977_v37  ;;  %10231 = vmatpush1.bf16.msra.mxu1 %v12981_v51 }
 0xd35   :  { %10201 = vmatprep.subr.bf16.mxu0 %v12983_v35  ;;  %10233 = vmatprep.subr.bf16.mxu1 %v12986_v12 }
 0xd38   :  { %10203 = vmatpush1.bf16.msra.mxu0 %v12989_v18  ;;  %10235 = vmatpush1.bf16.msra.mxu1 %v12993_v32 }
 0xd39   :  { %10205 = vmatprep.subr.bf16.mxu0 %v12995_v13  ;;  %10237 = vmatprep.subr.bf16.mxu1 %v12998_v15 }
 0xd3c   :  { %10207 = vmatpush1.bf16.msra.mxu0 %v13001_v61  ;;  %10239 = vmatpush1.bf16.msra.mxu1 %v13005_v56 }
 0xd3d   :  { %10241 = vmatprep.subr.bf16.mxu0 %v12914_v19  ;;  %10273 = vmatprep.subr.bf16.mxu1 %v12916_v50 }
 0xdf2   :  { %v3691_v40 = vpop.f32.mrb[28].mxu0  ;;  %v3762_v34 = vpop.f32.mrb[28].mxu1 }
 0xdf3   :  { %v3693_v53 = vpop.f32.mrb[29].mxu0  ;;  %v3764_v17 = vpop.f32.mrb[29].mxu1 }
 0xdf4   :  { %v3771_v52 = vcombine.low %v3691_v40, %v3693_v53  ;;  %v3772_v3 = vcombine.low %v3762_v34, %v3764_v17 }
 0xdf6   :  { %v3779_v26 = vrot.slane %v3771_v52, %v12409_v28  ;;  %v3786_v46 = vrot.slane %v3772_v3, %v12409_v28 }
 0xdf8   :  { %v3787_v62 = vcombine.low %v3779_v26, %v3786_v46 }
 0xdfa   :  { %v3794_v44 = vrot.slane %v3787_v62, %v12409_v28 }
 0xdfc   :  { %v3796_v30 = vadd.f32 %v3794_v44, %v3560_v16  ;;  %v4372_v44 = vld [vmem:[#allocation8 + $0x8] sm:$0xff] }
 0xdfd   :  { %v4376_v16 = vld [vmem:[#allocation8 + $0x28] sm:$0xff] }
 0xdfe   :  { %v9252_v14 = vmul.f32 -1.442695, %v3796_v30  ;;  %v3804_v47 = vrot.slane %v3796_v30, 1  ;;  %v3815_v50 = vrot.slane %v3796_v30, 3  ;;  %v3812_v60 = vrot.slane %v3796_v30, 2  ;;  %v4374_v30 = vld [vmem:[#allocation8 + $0x18] sm:$0xff] }
 0xe00   :  { %11660 = vpow2.f32 %v9252_v14  ;;  %v9253_v19 = vmul.f32 -1.442695, %v3804_v47  ;;  %v9254_v8 = vmul.f32 -1.442695, %v3815_v50  ;;  %v10304_v14 = vpack.c.bf16 %v4376_v16, %v4372_v44  ;;  %v4378_v47 = vld [vmem:[#allocation8 + $0x38] sm:$0xff]  ;;  %v4375_v50 = vld [vmem:[#allocation8 + $0x20] sm:$0xff] }
 0xe01   :  { %v4405_v44 = vld [vmem:[#allocation8 + $0x110] sm:$0xff] }
 0xe02   :  { %11662 = vpow2.f32 %v9253_v19  ;;  %v4371_v19 = vld [vmem:[#allocation8] sm:$0xff]  ;;  %v4409_v16 = vld [vmem:[#allocation8 + $0x130] sm:$0xff] }
 0xe03   :  { %11664 = vpow2.f32 %v9254_v8  ;;  %v10336_v8 = vpack.c.bf16 %v4378_v47, %v4374_v30  ;;  %v4412_v30 = vld [vmem:[#allocation8 + $0x148] sm:$0xff]  ;;  %v4414_v47 = vld [vmem:[#allocation8 + $0x158] sm:$0xff] }
 0xe0a   :  { %v11661_v31 = vpop.eup %11660 }
 0xe0b   :  { %v3800_v4 = vadd.f32 1.0, %v11661_v31  ;;  %v10306_v31 = vpack.c.bf16 %v4375_v50, %v4371_v19  ;;  %v4418_v19 = vld [vmem:[#allocation8 + $0x178] sm:$0xff] }
 0xe0c   :  { %v11663_v25 = vpop.eup %11662 }
 0xe0d   :  { %11666 = vrcp.f32 %v3800_v4  ;;  %v3809_v48 = vadd.f32 1.0, %v11663_v25  ;;  %v11665_v1 = vpop.eup %11664  ;;  %v4377_v4 = vld [vmem:[#allocation8 + $0x30] sm:$0xff] }
 0xe0e   :  { %11668 = vtanh.f32 %v3812_v60  ;;  %v3820_v40 = vadd.f32 1.0, %v11665_v1  ;;  %v4373_v60 = vld [vmem:[#allocation8 + $0x10] sm:$0xff]  ;;  %v4384_v1 = vld [vmem:[#allocation8 + $0x68] sm:$0xff] }
 0xe0f   :  { %11670 = vrcp.f32 %v3809_v48  ;;  %v10338_v25 = vpack.c.bf16 %v4377_v4, %v4373_v60  ;;  %v4380_v48 = vld [vmem:[#allocation8 + $0x48] sm:$0xff]  ;;  %v4411_v60 = vld [vmem:[#allocation8 + $0x140] sm:$0xff] }
 0xe10   :  { %11672 = vrcp.f32 %v3820_v40  ;;  %v4379_v40 = vld [vmem:[#allocation8 + $0x40] sm:$0xff] }
 0xe11   :  { %v4415_v4 = vld [vmem:[#allocation8 + $0x160] sm:$0xff] }
 0xe17   :  { %v11667_v29 = vpop.eup %11666 }
 0xe18   :  { %v11669_v5 = vpop.eup %11668 }
 0xe19   :  { %v11671_v59 = vpop.eup %11670  ;;  %v3824_v53 = vmul.f32 %v11669_v5, %v11667_v29  ;;  %v4382_v29 = vld [vmem:[#allocation8 + $0x58] sm:$0xff]  ;;  %v10308_v5 = vpack.c.bf16 %v4384_v1, %v4380_v48  ;;  %v10356_v48 = vpack.c.bf16 %v4418_v19, %v4414_v47  ;;  %v4417_v1 = vld [vmem:[#allocation8 + $0x170] sm:$0xff] }
 0xe1a   :  { %v3823_v34 = vmul.f32 %v11671_v59, %v13057_v39  ;;  %v11673_v52 = vpop.eup %11672  ;;  %v4386_v59 = vld [vmem:[#allocation8 + $0x78] sm:$0xff] }
 0xe1c   :  { %v13098_v17 = vadd.f32 %v3824_v53, %v3823_v34  ;;  %v4383_v34 = vld [vmem:[#allocation8 + $0x60] sm:$0xff]  ;;  %v10340_v53 = vpack.c.bf16 %v4386_v59, %v4382_v29  ;;  %v4420_v29 = vld [vmem:[#allocation8 + $0x188] sm:$0xff]  ;;  %v4422_v59 = vld [vmem:[#allocation8 + $0x198] sm:$0xff] }
 0xe1e   :  { %11674 = vtanh.f32 %v13098_v17 }
 0xe28   :  { %v11675_v3 = vpop.eup %11674 }
 0xe29   :  { %v3827_v26 = vmul.f32 %v11675_v3, %v11673_v52  ;;  %v4381_v52 = vld [vmem:[#allocation8 + $0x50] sm:$0xff] }
 0xe2a   :  { %v4385_v3 = vld [vmem:[#allocation8 + $0x70] sm:$0xff] }
 0xe2b   :  { %3828 = vst [vmem:[#allocation12 + $0xc] sm:$0x1] %v3827_v26  ;;  %3960 = vmatmul.mubr.f32.vlgmr.msra.gmra.mrb[30].mxu0 %v3827_v26  ;;  %4031 = vmatmul.mubr.f32.vlgmr.msra.gmra.mrb[30].mxu1 %v3827_v26  ;;  %v4388_v26 = vld [vmem:[#allocation8 + $0x88] sm:$0xff] }
 0xe2c   :  { %10243 = vmatpush1.bf16.msra.mxu0 %v12918_v21  ;;  %10275 = vmatpush1.bf16.msra.mxu1 %v12921_v57 }
 0xe2d   :  { %10245 = vmatprep.subr.bf16.mxu0 %v12925_v6  ;;  %10277 = vmatprep.subr.bf16.mxu1 %v12928_v9 }
 0xe2e   :  { %4229 = vmatprep.mubr.f32.mxu0 %v12129_v0  ;;  %4300 = vmatprep.mubr.f32.mxu1 %v12129_v0 }
 0xe30   :  { %10247 = vmatpush1.bf16.msra.mxu0 %v12930_v24  ;;  %10279 = vmatpush1.bf16.msra.mxu1 %v12933_v41 }
 0xe31   :  { %10249 = vmatprep.subr.bf16.mxu0 %v12936_v58  ;;  %10281 = vmatprep.subr.bf16.mxu1 %v12938_v63 }
 0xe34   :  { %10251 = vmatpush1.bf16.msra.mxu0 %v12941_v23  ;;  %10283 = vmatpush1.bf16.msra.mxu1 %v12945_v33 }
 0xe35   :  { %10253 = vmatprep.subr.bf16.mxu0 %v12947_v49  ;;  %10285 = vmatprep.subr.bf16.mxu1 %v12950_v2  ;;  %v3830_v49 = vld [vmem:[#allocation2 + $0x25] ss:$8 sm:$0xf] }
 0xe38   :  { %10255 = vmatpush1.bf16.msra.mxu0 %v12953_v7  ;;  %10287 = vmatpush1.bf16.msra.mxu1 %v12957_v11 }
 0xe39   :  { %10257 = vmatprep.subr.bf16.mxu0 %v12959_v55  ;;  %10289 = vmatprep.subr.bf16.mxu1 %v12962_v20 }
 0xe3c   :  { %10259 = vmatpush1.bf16.msra.mxu0 %v12965_v54  ;;  %10291 = vmatpush1.bf16.msra.mxu1 %v12969_v22 }
 0xe3d   :  { %10261 = vmatprep.subr.bf16.mxu0 %v12971_v10  ;;  %10293 = vmatprep.subr.bf16.mxu1 %v12974_v27 }
 0xe40   :  { %10263 = vmatpush1.bf16.msra.mxu0 %v12977_v37  ;;  %10295 = vmatpush1.bf16.msra.mxu1 %v12981_v51 }
 0xe41   :  { %10265 = vmatprep.subr.bf16.mxu0 %v12983_v35  ;;  %10297 = vmatprep.subr.bf16.mxu1 %v12986_v12 }
 0xe44   :  { %10267 = vmatpush1.bf16.msra.mxu0 %v12989_v18  ;;  %10299 = vmatpush1.bf16.msra.mxu1 %v12993_v32 }
 0xe45   :  { %10269 = vmatprep.subr.bf16.mxu0 %v12995_v13  ;;  %10301 = vmatprep.subr.bf16.mxu1 %v12998_v15 }
 0xe48   :  { %10271 = vmatpush1.bf16.msra.mxu0 %v13001_v61  ;;  %10303 = vmatpush1.bf16.msra.mxu1 %v13005_v56 }
 0xe49   :  { %10305 = vmatprep.subr.bf16.mxu0 %v10304_v14  ;;  %10337 = vmatprep.subr.bf16.mxu1 %v10336_v8  ;;  %v4416_v14 = vld [vmem:[#allocation8 + $0x168] sm:$0xff]  ;;  %v10354_v8 = vpack.c.bf16 %v4409_v16, %v4405_v44 }
 0xe4a   :  { %v4100_v44 = vld [vmem:[#allocation2 + $0x26] ss:$8 sm:$0xf] }
 0xefe   :  { %v3961_v21 = vpop.f32.mrb[30].mxu0  ;;  %v4032_v57 = vpop.f32.mrb[30].mxu1 }
 0xeff   :  { %v3963_v6 = vpop.f32.mrb[31].mxu0  ;;  %v4034_v9 = vpop.f32.mrb[31].mxu1 }
 0xf00   :  { %v4041_v24 = vcombine.low %v3961_v21, %v3963_v6  ;;  %v4042_v41 = vcombine.low %v4032_v57, %v4034_v9  ;;  %v10342_v21 = vpack.c.bf16 %v4385_v3, %v4381_v52  ;;  %v4392_v57 = vld [vmem:[#allocation8 + $0xa8] sm:$0xff]  ;;  %v4390_v6 = vld [vmem:[#allocation8 + $0x98] sm:$0xff]  ;;  %v4419_v52 = vld [vmem:[#allocation8 + $0x180] sm:$0xff] }
 0xf01   :  { %v4394_v9 = vld [vmem:[#allocation8 + $0xb8] sm:$0xff]  ;;  %v4423_v3 = vld [vmem:[#allocation8 + $0x1a0] sm:$0xff] }
 0xf02   :  { %v4049_v58 = vrot.slane %v4041_v24, %v12409_v28  ;;  %v4056_v63 = vrot.slane %v4042_v41, %v12409_v28  ;;  %v10312_v24 = vpack.c.bf16 %v4392_v57, %v4388_v26  ;;  %v10344_v41 = vpack.c.bf16 %v4394_v9, %v4390_v6  ;;  %v4421_v26 = vld [vmem:[#allocation8 + $0x190] sm:$0xff]  ;;  %v4428_v6 = vld [vmem:[#allocation8 + $0x1c8] sm:$0xff] }
 0xf03   :  { %v4425_v57 = vld [vmem:[#allocation8 + $0x1b0] sm:$0xff]  ;;  %v4432_v9 = vld [vmem:[#allocation8 + $0x1e8] sm:$0xff] }
 0xf04   :  { %v4057_v23 = vcombine.low %v4049_v58, %v4056_v63  ;;  %v4387_v58 = vld [vmem:[#allocation8 + $0x80] sm:$0xff] }
 0xf05   :  { %v4391_v63 = vld [vmem:[#allocation8 + $0xa0] sm:$0xff] }
 0xf06   :  { %v4064_v33 = vrot.slane %v4057_v23, %v12409_v28  ;;  %v4389_v23 = vld [vmem:[#allocation8 + $0x90] sm:$0xff] }
 0xf08   :  { %v4066_v2 = vadd.f32 %v4064_v33, %v3830_v49  ;;  %v10314_v33 = vpack.c.bf16 %v4391_v63, %v4387_v58  ;;  %v4393_v49 = vld [vmem:[#allocation8 + $0xb0] sm:$0xff]  ;;  %v10330_v58 = vpack.c.bf16 %v4423_v3, %v4419_v52  ;;  %v10362_v63 = vpack.c.bf16 %v4425_v57, %v4421_v26  ;;  %v4645_v52 = vld [vmem:[#allocation9 + $0x20] sm:$0xff]  ;;  %v4654_v57 = vld [vmem:[#allocation9 + $0x68] sm:$0xff] }
 0xf09   :  { %v4643_v3 = vld [vmem:[#allocation9 + $0x10] sm:$0xff] }
 0xf0a   :  { %v9255_v7 = vmul.f32 -1.442695, %v4066_v2  ;;  %v4074_v11 = vrot.slane %v4066_v2, 1  ;;  %v4085_v20 = vrot.slane %v4066_v2, 3  ;;  %v4082_v10 = vrot.slane %v4066_v2, 2  ;;  %v4396_v2 = vld [vmem:[#allocation8 + $0xc8] sm:$0xff] }
 0xf0b   :  { %v4647_v26 = vld [vmem:[#allocation9 + $0x30] sm:$0xff] }
 0xf0c   :  { %11676 = vpow2.f32 %v9255_v7  ;;  %v9256_v55 = vmul.f32 -1.442695, %v4074_v11  ;;  %v9257_v54 = vmul.f32 -1.442695, %v4085_v20  ;;  %v4400_v7 = vld [vmem:[#allocation8 + $0xe8] sm:$0xff]  ;;  %v10346_v11 = vpack.c.bf16 %v4393_v49, %v4389_v23  ;;  %v4398_v20 = vld [vmem:[#allocation8 + $0xd8] sm:$0xff] }
 0xf0d   :  { %v10332_v23 = vpack.c.bf16 %v4432_v9, %v4428_v6  ;;  %v4431_v49 = vld [vmem:[#allocation8 + $0x1e0] sm:$0xff]  ;;  %v4652_v6 = vld [vmem:[#allocation9 + $0x58] sm:$0xff] }
 0xf0e   :  { %11678 = vpow2.f32 %v9256_v55  ;;  %v10316_v55 = vpack.c.bf16 %v4400_v7, %v4396_v2  ;;  %v4429_v2 = vld [vmem:[#allocation8 + $0x1d0] sm:$0xff]  ;;  %v4656_v9 = vld [vmem:[#allocation9 + $0x78] sm:$0xff] }
 0xf0f   :  { %11680 = vpow2.f32 %v9257_v54  ;;  %v4402_v54 = vld [vmem:[#allocation8 + $0xf8] sm:$0xff] }
 0xf16   :  { %v11677_v22 = vpop.eup %11676 }
 0xf17   :  { %v4070_v27 = vadd.f32 1.0, %v11677_v22  ;;  %v4395_v22 = vld [vmem:[#allocation8 + $0xc0] sm:$0xff] }
 0xf18   :  { %v11679_v37 = vpop.eup %11678 }
 0xf19   :  { %11682 = vrcp.f32 %v4070_v27  ;;  %v4079_v51 = vadd.f32 1.0, %v11679_v37  ;;  %v11681_v35 = vpop.eup %11680  ;;  %v4399_v27 = vld [vmem:[#allocation8 + $0xe0] sm:$0xff]  ;;  %v4397_v37 = vld [vmem:[#allocation8 + $0xd0] sm:$0xff] }
 0xf1a   :  { %11684 = vtanh.f32 %v4082_v10  ;;  %v4090_v13 = vadd.f32 1.0, %v11681_v35  ;;  %v10348_v10 = vpack.c.bf16 %v4402_v54, %v4398_v20  ;;  %v10318_v35 = vpack.c.bf16 %v4399_v27, %v4395_v22  ;;  %v4646_v20 = vld [vmem:[#allocation9 + $0x28] sm:$0xff]  ;;  %v4644_v54 = vld [vmem:[#allocation9 + $0x18] sm:$0xff] }
 0xf1b   :  { %11686 = vrcp.f32 %v4079_v51  ;;  %v4401_v51 = vld [vmem:[#allocation8 + $0xf0] sm:$0xff]  ;;  %v4648_v22 = vld [vmem:[#allocation9 + $0x38] sm:$0xff] }
 0xf1c   :  { %11688 = vrcp.f32 %v4090_v13  ;;  %v10350_v13 = vpack.c.bf16 %v4401_v51, %v4397_v37  ;;  %v10400_v51 = vpack.c.bf16 %v4648_v22, %v4644_v54  ;;  %v4660_v54 = vld [vmem:[#allocation9 + $0x98] sm:$0xff] }
 0xf1d   :  { %v4664_v22 = vld [vmem:[#allocation9 + $0xb8] sm:$0xff] }
 0xf23   :  { %v11683_v12 = vpop.eup %11682 }
 0xf24   :  { %v11685_v18 = vpop.eup %11684 }
 0xf25   :  { %v11687_v32 = vpop.eup %11686  ;;  %v4094_v61 = vmul.f32 %v11685_v18, %v11683_v12  ;;  %v4404_v12 = vld [vmem:[#allocation8 + $0x108] sm:$0xff] }
 0xf26   :  { %v4093_v15 = vmul.f32 %v11687_v32, %v13098_v17  ;;  %v11689_v39 = vpop.eup %11688  ;;  %v10310_v17 = vpack.c.bf16 %v4383_v34, %v4379_v40  ;;  %v4408_v18 = vld [vmem:[#allocation8 + $0x128] sm:$0xff]  ;;  %v4406_v32 = vld [vmem:[#allocation8 + $0x118] sm:$0xff]  ;;  %v10326_v34 = vpack.c.bf16 %v4415_v4, %v4411_v60 }
 0xf27   :  { %v4426_v40 = vld [vmem:[#allocation8 + $0x1b8] sm:$0xff] }
 0xf28   :  { %v13137_v56 = vadd.f32 %v4094_v61, %v4093_v15  ;;  %v10320_v15 = vpack.c.bf16 %v4408_v18, %v4404_v12  ;;  %v4410_v61 = vld [vmem:[#allocation8 + $0x138] sm:$0xff] }
 0xf2a   :  { %11690 = vtanh.f32 %v13137_v56 }
 0xf34   :  { %v11691_v46 = vpop.eup %11690 }
 0xf35   :  { %v4097_v62 = vmul.f32 %v11691_v46, %v11689_v39  ;;  %v4403_v39 = vld [vmem:[#allocation8 + $0x100] sm:$0xff] }
 0xf36   :  { %v4407_v46 = vld [vmem:[#allocation8 + $0x120] sm:$0xff] }
 0xf37   :  { %4098 = vst [vmem:[#allocation12 + $0xd] sm:$0x1] %v4097_v62  ;;  %4230 = vmatmul.mubr.f32.vlgmr.msra.gmra.mrb[32].mxu0 %v4097_v62  ;;  %4301 = vmatmul.mubr.f32.vlgmr.msra.gmra.mrb[32].mxu1 %v4097_v62  ;;  %v10352_v62 = vpack.c.bf16 %v4410_v61, %v4406_v32  ;;  %v10322_v50 = vpack.c.bf16 %v4407_v46, %v4403_v39 }
 0xf38   :  { %4499 = vmatprep.mubr.f32.mxu0 %v12129_v0  ;;  %4570 = vmatprep.mubr.f32.mxu1 %v12129_v0 }
 0xf39   :  { %10307 = vmatpush1.bf16.msra.mxu0 %v10306_v31  ;;  %10339 = vmatpush1.bf16.msra.mxu1 %v10338_v25  ;;  %v10324_v31 = vpack.c.bf16 %v4416_v14, %v4412_v30  ;;  %v4413_v25 = vld [vmem:[#allocation8 + $0x150] sm:$0xff] }
 0xf3a   :  { %10309 = vmatprep.subr.bf16.mxu0 %v10308_v5  ;;  %10341 = vmatprep.subr.bf16.mxu1 %v10340_v53  ;;  %v4424_v5 = vld [vmem:[#allocation8 + $0x1a8] sm:$0xff]  ;;  %v10358_v53 = vpack.c.bf16 %v4417_v1, %v4413_v25 }
 0xf3d   :  { %10311 = vmatpush1.bf16.msra.mxu0 %v10310_v17  ;;  %10343 = vmatpush1.bf16.msra.mxu1 %v10342_v21  ;;  %v10328_v17 = vpack.c.bf16 %v4424_v5, %v4420_v29  ;;  %v10360_v21 = vpack.c.bf16 %v4426_v40, %v4422_v59 }
 0xf3e   :  { %10313 = vmatprep.subr.bf16.mxu0 %v10312_v24  ;;  %10345 = vmatprep.subr.bf16.mxu1 %v10344_v41  ;;  %v4430_v24 = vld [vmem:[#allocation8 + $0x1d8] sm:$0xff] }
 0xf3f   :  { %v4434_v41 = vld [vmem:[#allocation8 + $0x1f8] sm:$0xff] }
 0xf40   :  { %v10364_v7 = vpack.c.bf16 %v4434_v41, %v4430_v24 }
 0xf41   :  { %10315 = vmatpush1.bf16.msra.mxu0 %v10314_v33  ;;  %10347 = vmatpush1.bf16.msra.mxu1 %v10346_v11  ;;  %v4427_v33 = vld [vmem:[#allocation8 + $0x1c0] sm:$0xff]  ;;  %v4433_v11 = vld [vmem:[#allocation8 + $0x1f0] sm:$0xff] }
 0xf42   :  { %10317 = vmatprep.subr.bf16.mxu0 %v10316_v55  ;;  %10349 = vmatprep.subr.bf16.mxu1 %v10348_v10  ;;  %v4642_v55 = vld [vmem:[#allocation9 + $0x8] sm:$0xff]  ;;  %v10334_v10 = vpack.c.bf16 %v4431_v49, %v4427_v33  ;;  %v10366_v27 = vpack.c.bf16 %v4433_v11, %v4429_v2  ;;  %v10404_v2 = vpack.c.bf16 %v4656_v9, %v4652_v6  ;;  %v4655_v11 = vld [vmem:[#allocation9 + $0x70] sm:$0xff]  ;;  %v4685_v6 = vld [vmem:[#allocation9 + $0x160] sm:$0xff] }
 0xf43   :  { %v10368_v37 = vpack.c.bf16 %v4646_v20, %v4642_v55  ;;  %v4658_v55 = vld [vmem:[#allocation9 + $0x88] sm:$0xff] }
 0xf44   :  { %v4662_v20 = vld [vmem:[#allocation9 + $0xa8] sm:$0xff] }
 0xf45   :  { %10319 = vmatpush1.bf16.msra.mxu0 %v10318_v35  ;;  %10351 = vmatpush1.bf16.msra.mxu1 %v10350_v13 }
 0xf46   :  { %10321 = vmatprep.subr.bf16.mxu0 %v10320_v15  ;;  %10353 = vmatprep.subr.bf16.mxu1 %v10352_v62 }
 0xf49   :  { %10323 = vmatpush1.bf16.msra.mxu0 %v10322_v50  ;;  %10355 = vmatpush1.bf16.msra.mxu1 %v10354_v8 }
 0xf4a   :  { %10325 = vmatprep.subr.bf16.mxu0 %v10324_v31  ;;  %10357 = vmatprep.subr.bf16.mxu1 %v10356_v48 }
 0xf4d   :  { %10327 = vmatpush1.bf16.msra.mxu0 %v10326_v34  ;;  %10359 = vmatpush1.bf16.msra.mxu1 %v10358_v53 }
 0xf4e   :  { %10329 = vmatprep.subr.bf16.mxu0 %v10328_v17  ;;  %10361 = vmatprep.subr.bf16.mxu1 %v10360_v21  ;;  %v4641_v17 = vld [vmem:[#allocation9] sm:$0xff]  ;;  %v4650_v21 = vld [vmem:[#allocation9 + $0x48] sm:$0xff] }
 0xf4f   :  { %v10372_v49 = vpack.c.bf16 %v4654_v57, %v4650_v21  ;;  %v4681_v57 = vld [vmem:[#allocation9 + $0x140] sm:$0xff] }
 0xf51   :  { %10331 = vmatpush1.bf16.msra.mxu0 %v10330_v58  ;;  %10363 = vmatpush1.bf16.msra.mxu1 %v10362_v63  ;;  %v10370_v58 = vpack.c.bf16 %v4645_v52, %v4641_v17  ;;  %v10402_v63 = vpack.c.bf16 %v4647_v26, %v4643_v3  ;;  %v4686_v17 = vld [vmem:[#allocation9 + $0x168] sm:$0xff]  ;;  %v4684_v52 = vld [vmem:[#allocation9 + $0x158] sm:$0xff] }
 0xf52   :  { %10333 = vmatprep.subr.bf16.mxu0 %v10332_v23  ;;  %10365 = vmatprep.subr.bf16.mxu1 %v10364_v7  ;;  %v4649_v23 = vld [vmem:[#allocation9 + $0x40] sm:$0xff]  ;;  %v4651_v7 = vld [vmem:[#allocation9 + $0x50] sm:$0xff]  ;;  %v4688_v3 = vld [vmem:[#allocation9 + $0x178] sm:$0xff] }
 0xf55   :  { %10335 = vmatpush1.bf16.msra.mxu0 %v10334_v10  ;;  %10367 = vmatpush1.bf16.msra.mxu1 %v10366_v27  ;;  %v10406_v27 = vpack.c.bf16 %v4655_v11, %v4651_v7  ;;  %v4689_v7 = vld [vmem:[#allocation9 + $0x180] sm:$0xff] }
 0xf56   :  { %10369 = vmatprep.subr.bf16.mxu0 %v10368_v37  ;;  %10401 = vmatprep.subr.bf16.mxu1 %v10400_v51  ;;  %v4657_v37 = vld [vmem:[#allocation9 + $0x80] sm:$0xff] }
 0xf57   :  { %v4661_v51 = vld [vmem:[#allocation9 + $0xa0] sm:$0xff] }
 0xf58   :  { %v4693_v11 = vld [vmem:[#allocation9 + $0x1a0] sm:$0xff] }
0x100a   :  { %v4231_v35 = vpop.f32.mrb[32].mxu0  ;;  %v4302_v12 = vpop.f32.mrb[32].mxu1 }
0x100b   :  { %v4233_v18 = vpop.f32.mrb[33].mxu0  ;;  %v4304_v32 = vpop.f32.mrb[33].mxu1 }
0x100c   :  { %v4311_v13 = vcombine.low %v4231_v35, %v4233_v18  ;;  %v4312_v15 = vcombine.low %v4302_v12, %v4304_v32  ;;  %v10376_v35 = vpack.c.bf16 %v4662_v20, %v4658_v55  ;;  %v10408_v12 = vpack.c.bf16 %v4664_v22, %v4660_v54  ;;  %v4659_v18 = vld [vmem:[#allocation9 + $0x90] sm:$0xff] }
0x100d   :  { %v4663_v32 = vld [vmem:[#allocation9 + $0xb0] sm:$0xff] }
0x100e   :  { %v4319_v61 = vrot.slane %v4311_v13, %v12409_v28  ;;  %v4326_v39 = vrot.slane %v4312_v15, %v12409_v28  ;;  %v4666_v13 = vld [vmem:[#allocation9 + $0xc8] sm:$0xff]  ;;  %v4691_v54 = vld [vmem:[#allocation9 + $0x190] sm:$0xff] }
0x100f   :  { %v4670_v15 = vld [vmem:[#allocation9 + $0xe8] sm:$0xff]  ;;  %v4695_v22 = vld [vmem:[#allocation9 + $0x1b0] sm:$0xff] }
0x1010   :  { %v4327_v46 = vcombine.low %v4319_v61, %v4326_v39  ;;  %v4668_v61 = vld [vmem:[#allocation9 + $0xd8] sm:$0xff] }
0x1011   :  { %v4672_v39 = vld [vmem:[#allocation9 + $0xf8] sm:$0xff] }
0x1012   :  { %v4334_v62 = vrot.slane %v4327_v46, %v12409_v28  ;;  %v10378_v46 = vpack.c.bf16 %v4661_v51, %v4657_v37  ;;  %v4700_v37 = vld [vmem:[#allocation9 + $0x1d8] sm:$0xff] }
0x1013   :  { %v4704_v51 = vld [vmem:[#allocation9 + $0x1f8] sm:$0xff] }
0x1014   :  { %v4336_v16 = vadd.f32 %v4334_v62, %v4100_v44  ;;  %v10410_v62 = vpack.c.bf16 %v4663_v32, %v4659_v18  ;;  %v4665_v44 = vld [vmem:[#allocation9 + $0xc0] sm:$0xff] }
0x1015   :  { %v4697_v18 = vld [vmem:[#allocation9 + $0x1c0] sm:$0xff] }
0x1016   :  { %v9258_v30 = vmul.f32 -1.442695, %v4336_v16  ;;  %v4344_v14 = vrot.slane %v4336_v16, 1  ;;  %v4355_v19 = vrot.slane %v4336_v16, 3  ;;  %v4352_v31 = vrot.slane %v4336_v16, 2  ;;  %v4669_v16 = vld [vmem:[#allocation9 + $0xe0] sm:$0xff] }
0x1018   :  { %11692 = vpow2.f32 %v9258_v30  ;;  %v9259_v47 = vmul.f32 -1.442695, %v4344_v14  ;;  %v9260_v50 = vmul.f32 -1.442695, %v4355_v19  ;;  %v10380_v30 = vpack.c.bf16 %v4670_v15, %v4666_v13  ;;  %v4671_v19 = vld [vmem:[#allocation9 + $0xf0] sm:$0xff]  ;;  %v4701_v15 = vld [vmem:[#allocation9 + $0x1e0] sm:$0xff] }
0x1019   :  { %v10412_v14 = vpack.c.bf16 %v4672_v39, %v4668_v61  ;;  %v10428_v13 = vpack.c.bf16 %v4704_v51, %v4700_v37  ;;  %v4699_v61 = vld [vmem:[#allocation9 + $0x1d0] sm:$0xff] }
0x101a   :  { %11694 = vpow2.f32 %v9259_v47  ;;  %v4667_v47 = vld [vmem:[#allocation9 + $0xd0] sm:$0xff] }
0x101b   :  { %11696 = vpow2.f32 %v9260_v50  ;;  %v4674_v50 = vld [vmem:[#allocation9 + $0x108] sm:$0xff]  ;;  %v4703_v39 = vld [vmem:[#allocation9 + $0x1f0] sm:$0xff] }
0x1022   :  { %v11693_v8 = vpop.eup %11692 }
0x1023   :  { %v4340_v60 = vadd.f32 1.0, %v11693_v8  ;;  %v4678_v8 = vld [vmem:[#allocation9 + $0x128] sm:$0xff] }
0x1024   :  { %v11695_v4 = vpop.eup %11694 }
0x1025   :  { %11698 = vrcp.f32 %v4340_v60  ;;  %v4349_v25 = vadd.f32 1.0, %v11695_v4  ;;  %v11697_v48 = vpop.eup %11696  ;;  %v4680_v60 = vld [vmem:[#allocation9 + $0x138] sm:$0xff]  ;;  %v10382_v4 = vpack.c.bf16 %v4669_v16, %v4665_v44  ;;  %v4639_v44 = vld [vmem:[#allocation12] sm:$0xff]  ;;  %v4891_v16 = vld [vmem:[#allocation11 + $0x8] sm:$0xff] }
0x1026   :  { %11700 = vtanh.f32 %v4352_v31  ;;  %v4360_v59 = vadd.f32 1.0, %v11697_v48  ;;  %v4676_v31 = vld [vmem:[#allocation9 + $0x118] sm:$0xff]  ;;  %v4673_v48 = vld [vmem:[#allocation9 + $0x100] sm:$0xff] }
0x1027   :  { %11702 = vrcp.f32 %v4349_v25  ;;  %v10414_v25 = vpack.c.bf16 %v4671_v19, %v4667_v47  ;;  %v4897_v19 = vld [vmem:[#allocation11 + $0x38] sm:$0xff] }
0x1028   :  { %11704 = vrcp.f32 %v4360_v59  ;;  %v4675_v59 = vld [vmem:[#allocation9 + $0x110] sm:$0xff] }
0x102f   :  { %v11699_v1 = vpop.eup %11698 }
0x1030   :  { %v11701_v29 = vpop.eup %11700 }
0x1031   :  { %v11703_v5 = vpop.eup %11702  ;;  %v4364_v34 = vmul.f32 %v11701_v29, %v11699_v1  ;;  %v4677_v1 = vld [vmem:[#allocation9 + $0x120] sm:$0xff]  ;;  %v10384_v29 = vpack.c.bf16 %v4678_v8, %v4674_v50 }
0x1032   :  { %v4363_v40 = vmul.f32 %v11703_v5, %v13137_v56  ;;  %v11705_v24 = vpop.eup %11704  ;;  %v4653_v56 = vld [vmem:[#allocation9 + $0x60] sm:$0xff]  ;;  %v10416_v5 = vpack.c.bf16 %v4680_v60, %v4676_v31  ;;  %v10386_v26 = vpack.c.bf16 %v4677_v1, %v4673_v48  ;;  %v4899_v1 = vld [vmem:[#allocation11 + $0x48] sm:$0xff] }
0x1033   :  { %v10374_v10 = vpack.c.bf16 %v4653_v56, %v4649_v23  ;;  %v4694_v23 = vld [vmem:[#allocation9 + $0x1a8] sm:$0xff]  ;;  %v4692_v56 = vld [vmem:[#allocation9 + $0x198] sm:$0xff]  ;;  %v4890_v50 = vld [vmem:[#allocation11] sm:$0xff] }
0x1034   :  { %v13146_v53 = vadd.f32 %v4364_v34, %v4363_v40  ;;  %v4679_v40 = vld [vmem:[#allocation9 + $0x130] sm:$0xff]  ;;  %v4682_v34 = vld [vmem:[#allocation9 + $0x148] sm:$0xff]  ;;  %v4894_v8 = vld [vmem:[#allocation11 + $0x20] sm:$0xff] }
0x1035   :  { %v10418_v21 = vpack.c.bf16 %v4679_v40, %v4675_v59  ;;  %v10388_v9 = vpack.c.bf16 %v4686_v17, %v4682_v34  ;;  %v13157_v60 = vpack.c.bf16 %v4894_v8, %v4890_v50  ;;  %v4905_v40 = vld [vmem:[#allocation11 + $0x78] sm:$0xff]  ;;  %v4898_v34 = vld [vmem:[#allocation11 + $0x40] sm:$0xff]  ;;  %v4931_v50 = vld [vmem:[#allocation11 + $0x148] sm:$0xff] }
0x1036   :  { %11706 = vtanh.f32 %v13146_v53  ;;  %v4902_v17 = vld [vmem:[#allocation11 + $0x60] sm:$0xff]  ;;  %v4935_v8 = vld [vmem:[#allocation11 + $0x168] sm:$0xff] }
0x1040   :  { %v11707_v41 = vpop.eup %11706 }
0x1041   :  { %v4367_v33 = vmul.f32 %v11707_v41, %v11705_v24  ;;  %v10420_v24 = vpack.c.bf16 %v4688_v3, %v4684_v52  ;;  %v4683_v41 = vld [vmem:[#allocation9 + $0x150] sm:$0xff]  ;;  %v13169_v3 = vpack.c.bf16 %v4902_v17, %v4898_v34 }
0x1042   :  { %v4932_v17 = vld [vmem:[#allocation11 + $0x150] sm:$0xff] }
0x1043   :  { %4368 = vst [vmem:[#allocation12 + $0xe] sm:$0x1] %v4367_v33  ;;  %4500 = vmatmul.mubr.f32.vlgmr.msra.gmra.mrb[34].mxu0 %v4367_v33  ;;  %4571 = vmatmul.mubr.f32.vlgmr.msra.gmra.mrb[34].mxu1 %v4367_v33  ;;  %v4696_v33 = vld [vmem:[#allocation9 + $0x1b8] sm:$0xff] }
0x1044   :  { %10371 = vmatpush1.bf16.msra.mxu0 %v10370_v58  ;;  %10403 = vmatpush1.bf16.msra.mxu1 %v10402_v63  ;;  %v4687_v58 = vld [vmem:[#allocation9 + $0x170] sm:$0xff]  ;;  %v4690_v63 = vld [vmem:[#allocation9 + $0x188] sm:$0xff]  ;;  %v10424_v20 = vpack.c.bf16 %v4696_v33, %v4692_v56 }
0x1045   :  { %10373 = vmatprep.subr.bf16.mxu0 %v10372_v49  ;;  %10405 = vmatprep.subr.bf16.mxu1 %v10404_v2  ;;  %v10390_v49 = vpack.c.bf16 %v4685_v6, %v4681_v57  ;;  %v10422_v2 = vpack.c.bf16 %v4687_v58, %v4683_v41  ;;  %v10392_v55 = vpack.c.bf16 %v4694_v23, %v4690_v63  ;;  %v4907_v6 = vld [vmem:[#allocation11 + $0x88] sm:$0xff]  ;;  %v4913_v58 = vld [vmem:[#allocation11 + $0xb8] sm:$0xff]  ;;  %v4906_v63 = vld [vmem:[#allocation11 + $0x80] sm:$0xff] }
0x1046   :  { %4791 = vmatprep.mubr.f32.mxu0 %v12129_v0  ;;  %4868 = vmatprep.mubr.f32.mxu1 %v12129_v0  ;;  %v4910_v23 = vld [vmem:[#allocation11 + $0xa0] sm:$0xff] }
0x1047   :  { %v13181_v33 = vpack.c.bf16 %v4910_v23, %v4906_v63 }
0x1048   :  { %10375 = vmatpush1.bf16.msra.mxu0 %v10374_v10  ;;  %10407 = vmatpush1.bf16.msra.mxu1 %v10406_v27  ;;  %v4698_v10 = vld [vmem:[#allocation9 + $0x1c8] sm:$0xff] }
0x1049   :  { %10377 = vmatprep.subr.bf16.mxu0 %v10376_v35  ;;  %10409 = vmatprep.subr.bf16.mxu1 %v10408_v12  ;;  %v4702_v27 = vld [vmem:[#allocation9 + $0x1e8] sm:$0xff]  ;;  %v10394_v35 = vpack.c.bf16 %v4693_v11, %v4689_v7  ;;  %v10426_v12 = vpack.c.bf16 %v4695_v22, %v4691_v54  ;;  %v4921_v22 = vld [vmem:[#allocation11 + $0xf8] sm:$0xff] }
0x104a   :  { %v10396_v32 = vpack.c.bf16 %v4702_v27, %v4698_v10  ;;  %v4915_v11 = vld [vmem:[#allocation11 + $0xc8] sm:$0xff]  ;;  %v4914_v10 = vld [vmem:[#allocation11 + $0xc0] sm:$0xff] }
0x104b   :  { %v4918_v27 = vld [vmem:[#allocation11 + $0xe0] sm:$0xff] }
0x104c   :  { %10379 = vmatpush1.bf16.msra.mxu0 %v10378_v46  ;;  %10411 = vmatpush1.bf16.msra.mxu1 %v10410_v62  ;;  %v10398_v46 = vpack.c.bf16 %v4701_v15, %v4697_v18  ;;  %v10430_v62 = vpack.c.bf16 %v4703_v39, %v4699_v61  ;;  %v13193_v51 = vpack.c.bf16 %v4918_v27, %v4914_v10  ;;  %v4925_v15 = vld [vmem:[#allocation11 + $0x118] sm:$0xff]  ;;  %v4947_v10 = vld [vmem:[#allocation11 + $0x1c8] sm:$0xff] }
0x104d   :  { %10381 = vmatprep.subr.bf16.mxu0 %v10380_v30  ;;  %10413 = vmatprep.subr.bf16.mxu1 %v10412_v14  ;;  %v4895_v30 = vld [vmem:[#allocation11 + $0x28] sm:$0xff]  ;;  %v4893_v14 = vld [vmem:[#allocation11 + $0x18] sm:$0xff] }
0x104e   :  { %v13153_v47 = vpack.c.bf16 %v4895_v30, %v4891_v16  ;;  %v13155_v31 = vpack.c.bf16 %v4897_v19, %v4893_v14  ;;  %v4929_v39 = vld [vmem:[#allocation11 + $0x138] sm:$0xff]  ;;  %v4924_v30 = vld [vmem:[#allocation11 + $0x110] sm:$0xff]  ;;  %v4951_v27 = vld [vmem:[#allocation11 + $0x1e8] sm:$0xff] }
0x104f   :  { %v4928_v14 = vld [vmem:[#allocation11 + $0x130] sm:$0xff] }
0x1050   :  { %10383 = vmatpush1.bf16.msra.mxu0 %v10382_v4  ;;  %10415 = vmatpush1.bf16.msra.mxu1 %v10414_v25  ;;  %v4892_v4 = vld [vmem:[#allocation11 + $0x10] sm:$0xff]  ;;  %v13208_v19 = vpack.c.bf16 %v4928_v14, %v4924_v30 }
0x1051   :  { %10385 = vmatprep.subr.bf16.mxu0 %v10384_v29  ;;  %10417 = vmatprep.subr.bf16.mxu1 %v10416_v5  ;;  %v4896_v25 = vld [vmem:[#allocation11 + $0x30] sm:$0xff]  ;;  %v4903_v29 = vld [vmem:[#allocation11 + $0x68] sm:$0xff]  ;;  %v4901_v5 = vld [vmem:[#allocation11 + $0x58] sm:$0xff] }
0x1052   :  { %v13160_v48 = vpack.c.bf16 %v4896_v25, %v4892_v4  ;;  %v13165_v59 = vpack.c.bf16 %v4903_v29, %v4899_v1  ;;  %v13167_v52 = vpack.c.bf16 %v4905_v40, %v4901_v5  ;;  %v4933_v4 = vld [vmem:[#allocation11 + $0x158] sm:$0xff]  ;;  %v13212_v25 = vpack.c.bf16 %v4935_v8, %v4931_v50  ;;  %v4930_v29 = vld [vmem:[#allocation11 + $0x140] sm:$0xff]  ;;  %v4952_v30 = vld [vmem:[#allocation11 + $0x1f0] sm:$0xff] }
0x1053   :  { %v4937_v1 = vld [vmem:[#allocation11 + $0x178] sm:$0xff]  ;;  %v4934_v5 = vld [vmem:[#allocation11 + $0x160] sm:$0xff] }
0x1054   :  { %10387 = vmatpush1.bf16.msra.mxu0 %v10386_v26  ;;  %10419 = vmatpush1.bf16.msra.mxu1 %v10418_v21  ;;  %v4900_v26 = vld [vmem:[#allocation11 + $0x50] sm:$0xff]  ;;  %v13215_v40 = vpack.c.bf16 %v4937_v1, %v4933_v4  ;;  %v13217_v34 = vpack.c.bf16 %v4934_v5, %v4930_v29 }
0x1055   :  { %10389 = vmatprep.subr.bf16.mxu0 %v10388_v9  ;;  %10421 = vmatprep.subr.bf16.mxu1 %v10420_v24  ;;  %v4904_v21 = vld [vmem:[#allocation11 + $0x70] sm:$0xff]  ;;  %v4911_v9 = vld [vmem:[#allocation11 + $0xa8] sm:$0xff]  ;;  %v4909_v24 = vld [vmem:[#allocation11 + $0x98] sm:$0xff] }
0x1056   :  { %v13172_v57 = vpack.c.bf16 %v4904_v21, %v4900_v26  ;;  %v13177_v41 = vpack.c.bf16 %v4911_v9, %v4907_v6  ;;  %v13179_v56 = vpack.c.bf16 %v4913_v58, %v4909_v24  ;;  %v4936_v26 = vld [vmem:[#allocation11 + $0x170] sm:$0xff]  ;;  %v4939_v21 = vld [vmem:[#allocation11 + $0x188] sm:$0xff]  ;;  %v4941_v24 = vld [vmem:[#allocation11 + $0x198] sm:$0xff] }
0x1057   :  { %v13220_v6 = vpack.c.bf16 %v4936_v26, %v4932_v17  ;;  %v4943_v9 = vld [vmem:[#allocation11 + $0x1a8] sm:$0xff]  ;;  %v4945_v58 = vld [vmem:[#allocation11 + $0x1b8] sm:$0xff] }
0x1058   :  { %10391 = vmatpush1.bf16.msra.mxu0 %v10390_v49  ;;  %10423 = vmatpush1.bf16.msra.mxu1 %v10422_v2  ;;  %v4908_v49 = vld [vmem:[#allocation11 + $0x90] sm:$0xff]  ;;  %v13223_v63 = vpack.c.bf16 %v4943_v9, %v4939_v21  ;;  %v13225_v23 = vpack.c.bf16 %v4945_v58, %v4941_v24 }
0x1059   :  { %10393 = vmatprep.subr.bf16.mxu0 %v10392_v55  ;;  %10425 = vmatprep.subr.bf16.mxu1 %v10424_v20  ;;  %v4912_v2 = vld [vmem:[#allocation11 + $0xb0] sm:$0xff]  ;;  %v4919_v55 = vld [vmem:[#allocation11 + $0xe8] sm:$0xff]  ;;  %v4917_v20 = vld [vmem:[#allocation11 + $0xd8] sm:$0xff] }
0x105a   :  { %v13184_v7 = vpack.c.bf16 %v4912_v2, %v4908_v49  ;;  %v13189_v54 = vpack.c.bf16 %v4919_v55, %v4915_v11  ;;  %v13191_v37 = vpack.c.bf16 %v4921_v22, %v4917_v20  ;;  %v4938_v49 = vld [vmem:[#allocation11 + $0x180] sm:$0xff]  ;;  %v4940_v11 = vld [vmem:[#allocation11 + $0x190] sm:$0xff] }
0x105b   :  { %v4942_v2 = vld [vmem:[#allocation11 + $0x1a0] sm:$0xff]  ;;  %v4944_v20 = vld [vmem:[#allocation11 + $0x1b0] sm:$0xff] }
0x105c   :  { %10395 = vmatpush1.bf16.msra.mxu0 %v10394_v35  ;;  %10427 = vmatpush1.bf16.msra.mxu1 %v10426_v12  ;;  %v4916_v35 = vld [vmem:[#allocation11 + $0xd0] sm:$0xff]  ;;  %v13228_v55 = vpack.c.bf16 %v4942_v2, %v4938_v49  ;;  %v13232_v22 = vpack.c.bf16 %v4944_v20, %v4940_v11 }
0x105d   :  { %10397 = vmatprep.subr.bf16.mxu0 %v10396_v32  ;;  %10429 = vmatprep.subr.bf16.mxu1 %v10428_v13  ;;  %v4920_v12 = vld [vmem:[#allocation11 + $0xf0] sm:$0xff]  ;;  %v4923_v32 = vld [vmem:[#allocation11 + $0x108] sm:$0xff] }
0x105e   :  { %v13196_v18 = vpack.c.bf16 %v4920_v12, %v4916_v35  ;;  %v4927_v13 = vld [vmem:[#allocation11 + $0x128] sm:$0xff]  ;;  %v4949_v35 = vld [vmem:[#allocation11 + $0x1d8] sm:$0xff]  ;;  %v13236_v12 = vpack.c.bf16 %v4951_v27, %v4947_v10 }
0x105f   :  { %v13201_v61 = vpack.c.bf16 %v4927_v13, %v4923_v32  ;;  %v4953_v32 = vld [vmem:[#allocation11 + $0x1f8] sm:$0xff]  ;;  %v4946_v13 = vld [vmem:[#allocation11 + $0x1c0] sm:$0xff] }
0x1060   :  { %10399 = vmatpush1.bf16.msra.mxu0 %v10398_v46  ;;  %10431 = vmatpush1.bf16.msra.mxu1 %v10430_v62  ;;  %v4922_v46 = vld [vmem:[#allocation11 + $0x100] sm:$0xff] }
0x1061   :  { %10433 = vmatprep.subr.bf16.mxu0 %v13153_v47  ;;  %10465 = vmatprep.subr.bf16.mxu1 %v13155_v31  ;;  %v4926_v62 = vld [vmem:[#allocation11 + $0x120] sm:$0xff] }
0x1062   :  { %v13205_v16 = vpack.c.bf16 %v4926_v62, %v4922_v46  ;;  %v4948_v62 = vld [vmem:[#allocation11 + $0x1d0] sm:$0xff] }
0x1063   :  { %4792 = vmatmul.mubr.f32.vlgmr.msra.gmra.mrb[36].mxu0 %v4639_v44  ;;  %4869 = vmatmul.mubr.f32.vlgmr.msra.gmra.mrb[36].mxu1 %v4639_v44  ;;  %v13203_v44 = vpack.c.bf16 %v4929_v39, %v4925_v15  ;;  %v4950_v15 = vld [vmem:[#allocation11 + $0x1e0] sm:$0xff]  ;;  %v13239_v39 = vpack.c.bf16 %v4953_v32, %v4949_v35  ;;  %v13244_v14 = vpack.c.bf16 %v4952_v30, %v4948_v62 }
0x1064   :  { %4797 = vmatprep.mubr.f32.mxu0 %v12129_v0  ;;  %4874 = vmatprep.mubr.f32.mxu1 %v12129_v0  ;;  %v13241_v46 = vpack.c.bf16 %v4950_v15, %v4946_v13  ;;  %v4370_v24 = vld [vmem:[#allocation2 + $0x27] ss:$8 sm:$0xf]  ;;  %v4705_v15 = vld [vmem:[%s14111_s6] sm:$0xf]  ;;  %s12131_s6 = smov [#allocation12]  }
0x1065   :  { %10435 = vmatpush1.bf16.msra.mxu0 %v13157_v60  ;;  %10467 = vmatpush1.bf16.msra.mxu1 %v13160_v48  ;;  %v13259_v30 = vrot.slane %v4705_v15, %v133_v38  ;;  %s9198_s20 = sshll.u32 %s12131_s6, 4  ;;  %s9199_s20 = int_to_ptr.vmem [resolvable:$true] %s9198_s20 }
0x1066   :  { %10437 = vmatprep.subr.bf16.mxu0 %v13165_v59  ;;  %10469 = vmatprep.subr.bf16.mxu1 %v13167_v52  ;;  %s12090_s21 = scalar_lea.vmem %s9199_s20, 256  ;;  %p12095_p13 = scmp.lt.s32.totalorder %s9199_s20, %s9199_s20 }
0x1067   :  { %p12091_p12 = scmp.ne.s32.totalorder %s9199_s20, %s12090_s21  ;;  %p12096_p0 = scmp.lt.s32.totalorder %s12090_s21, %s12090_s21 }
0x1069   :  { %10439 = vmatpush1.bf16.msra.mxu0 %v13169_v3  ;;  %10471 = vmatpush1.bf16.msra.mxu1 %v13172_v57  ;;  %p12097_p1 = por %p12096_p0, %p12095_p13 }
0x106a   :  { %10441 = vmatprep.subr.bf16.mxu0 %v13177_v41  ;;  %10473 = vmatprep.subr.bf16.mxu1 %v13179_v56 }
0x106b   :  { %p12098_p2 = pnand %p12097_p1, %p12091_p12 }
0x106d   :  { %10443 = vmatpush1.bf16.msra.mxu0 %v13181_v33  ;;  %10475 = vmatpush1.bf16.msra.mxu1 %v13184_v7 }
0x106e   :  { %10445 = vmatprep.subr.bf16.mxu0 %v13189_v54  ;;  %10477 = vmatprep.subr.bf16.mxu1 %v13191_v37 }
0x1071   :  { %10447 = vmatpush1.bf16.msra.mxu0 %v13193_v51  ;;  %10479 = vmatpush1.bf16.msra.mxu1 %v13196_v18 }
0x1072   :  { %10449 = vmatprep.subr.bf16.mxu0 %v13201_v61  ;;  %10481 = vmatprep.subr.bf16.mxu1 %v13203_v44 }
0x1075   :  { %10451 = vmatpush1.bf16.msra.mxu0 %v13205_v16  ;;  %10483 = vmatpush1.bf16.msra.mxu1 %v13208_v19 }
0x1076   :  { %10453 = vmatprep.subr.bf16.mxu0 %v13212_v25  ;;  %10485 = vmatprep.subr.bf16.mxu1 %v13215_v40 }
0x1079   :  { %10455 = vmatpush1.bf16.msra.mxu0 %v13217_v34  ;;  %10487 = vmatpush1.bf16.msra.mxu1 %v13220_v6 }
0x107a   :  { %10457 = vmatprep.subr.bf16.mxu0 %v13223_v63  ;;  %10489 = vmatprep.subr.bf16.mxu1 %v13225_v23 }
0x107d   :  { %10459 = vmatpush1.bf16.msra.mxu0 %v13228_v55  ;;  %10491 = vmatpush1.bf16.msra.mxu1 %v13232_v22 }
0x107e   :  { %10461 = vmatprep.subr.bf16.mxu0 %v13236_v12  ;;  %10493 = vmatprep.subr.bf16.mxu1 %v13239_v39 }
0x1081   :  { %10463 = vmatpush1.bf16.msra.mxu0 %v13241_v46  ;;  %10495 = vmatpush1.bf16.msra.mxu1 %v13244_v14 }
0x1082   :  { %10497 = vmatprep.subr.bf16.mxu0 %v13153_v47  ;;  %10529 = vmatprep.subr.bf16.mxu1 %v13155_v31 }
0x1116   :  { %v4501_v50 = vpop.f32.mrb[34].mxu0  ;;  %v4572_v8 = vpop.f32.mrb[34].mxu1 }
0x1117   :  { %v4503_v4 = vpop.f32.mrb[35].mxu0  ;;  %v4574_v1 = vpop.f32.mrb[35].mxu1 }
0x1118   :  { %v4581_v29 = vcombine.low %v4501_v50, %v4503_v4  ;;  %v4582_v5 = vcombine.low %v4572_v8, %v4574_v1  ;;  %v13263_v50 = vrot.slane %v4705_v15, %v141_v42  ;;  %v13267_v8 = vrot.slane %v4705_v15, %v137_v43 }
0x1119   :  { %v13271_v4 = vrot.slane %v4705_v15, %v145_v45 }
0x111a   :  { %v4589_v17 = vrot.slane %v4581_v29, %v12409_v28  ;;  %v4596_v26 = vrot.slane %v4582_v5, %v12409_v28 }
0x111c   :  { %v4597_v21 = vcombine.low %v4589_v17, %v4596_v26 }
0x111e   :  { %v4604_v9 = vrot.slane %v4597_v21, %v12409_v28 }
0x1120   :  { %v4606_v58 = vadd.f32 %v4604_v9, %v4370_v24 }
0x1122   :  { %v9261_v49 = vmul.f32 -1.442695, %v4606_v58  ;;  %v4614_v2 = vrot.slane %v4606_v58, 1  ;;  %v4625_v20 = vrot.slane %v4606_v58, 3  ;;  %v4622_v35 = vrot.slane %v4606_v58, 2 }
0x1124   :  { %11708 = vpow2.f32 %v9261_v49  ;;  %v9262_v11 = vmul.f32 -1.442695, %v4614_v2  ;;  %v9263_v10 = vmul.f32 -1.442695, %v4625_v20 }
0x1126   :  { %11710 = vpow2.f32 %v9262_v11 }
0x1127   :  { %11712 = vpow2.f32 %v9263_v10 }
0x112e   :  { %v11709_v27 = vpop.eup %11708 }
0x112f   :  { %v4610_v32 = vadd.f32 1.0, %v11709_v27 }
0x1130   :  { %v11711_v13 = vpop.eup %11710 }
0x1131   :  { %11714 = vrcp.f32 %v4610_v32  ;;  %v4619_v62 = vadd.f32 1.0, %v11711_v13  ;;  %v11713_v43 = vpop.eup %11712 }
0x1132   :  { %11716 = vtanh.f32 %v4622_v35  ;;  %v4630_v24 = vadd.f32 1.0, %v11713_v43 }
0x1133   :  { %11718 = vrcp.f32 %v4619_v62 }
0x1134   :  { %11720 = vrcp.f32 %v4630_v24 }
0x1136   :  { %v4793_v1 = vpop.f32.mrb[36].mxu0  ;;  %v4870_v29 = vpop.f32.mrb[36].mxu1 }
0x1137   :  { %v4794_v5 = vadd.f32 %v4793_v1, %v13259_v30  ;;  %v4871_v17 = vadd.f32 %v4870_v29, %v13263_v50  ;;  %v4795_v38 = vpop.f32.mrb[37].mxu0  ;;  %v4872_v26 = vpop.f32.mrb[37].mxu1 }
0x1138   :  { %v4796_v21 = vadd.f32 %v4795_v38, %v13267_v8  ;;  %v4873_v42 = vadd.f32 %v4872_v26, %v13271_v4 }
0x1139   :  { %4881 = vst [vmem:[#allocation2] sm:$0xff] %v4794_v5  ;;  %4883 = vst [vmem:[#allocation2 + $0x10] sm:$0xff] %v4871_v17 }
0x113a   :  { %4882 = vst [vmem:[#allocation2 + $0x8] sm:$0xff] %v4796_v21  ;;  %4884 = vst [vmem:[#allocation2 + $0x18] sm:$0xff] %v4873_v42 }
0x113b   :  { %v11715_v36 = vpop.eup %11714 }
0x113c   :  { %v11717_v45 = vpop.eup %11716 }
0x113d   :  { %v11719_v9 = vpop.eup %11718  ;;  %v4634_v49 = vmul.f32 %v11717_v45, %v11715_v36 }
0x113e   :  { %v4633_v58 = vmul.f32 %v11719_v9, %v13146_v53  ;;  %v11721_v11 = vpop.eup %11720 }
0x1140   :  { %v4635_v2 = vadd.f32 %v4634_v49, %v4633_v58 }
0x1142   :  { %11722 = vtanh.f32 %v4635_v2 }
0x114c   :  { %v11723_v20 = vpop.eup %11722 }
0x114d   :  { %v4637_v10 = vmul.f32 %v11723_v20, %v11721_v11 }
0x114f   :  { %4638 = vst [vmem:[#allocation12 + $0xf] sm:$0x1] %v4637_v10 }
0x1156   :  { %v4640_v27 = vld [vmem:[#allocation12 + $0x8] sm:$0xff] }
0x1157   :  { %4798 = vmatmul.mubr.f32.gmra.mrb[38].mxu0 %v4640_v27  ;;  %4875 = vmatmul.mubr.f32.gmra.mrb[38].mxu1 %v4640_v27 }
0x1158   :  { %5018 = vmatprep.mubr.f32.mxu0 %v12129_v0  ;;  %5089 = vmatprep.mubr.f32.mxu1 %v12129_v0 }
0x115b   :  { %5019 = vmatmul.mubr.f32.vlgmr.msra.gmra.mrb[40].mxu0 %v12129_v0  ;;  %5090 = vmatmul.mubr.f32.vlgmr.msra.gmra.mrb[40].mxu1 %v12129_v0 }
0x115c   :  { %10499 = vmatpush1.bf16.msra.mxu0 %v13157_v60  ;;  %10531 = vmatpush1.bf16.msra.mxu1 %v13160_v48 }
0x115d   :  { %10501 = vmatprep.subr.bf16.mxu0 %v13165_v59  ;;  %10533 = vmatprep.subr.bf16.mxu1 %v13167_v52 }
0x115e   :  { %5287 = vmatprep.mubr.f32.mxu0 %v12129_v0  ;;  %5358 = vmatprep.mubr.f32.mxu1 %v12129_v0 }
0x1160   :  { %10503 = vmatpush1.bf16.msra.mxu0 %v13169_v3  ;;  %10535 = vmatpush1.bf16.msra.mxu1 %v13172_v57 }
0x1161   :  { %10505 = vmatprep.subr.bf16.mxu0 %v13177_v41  ;;  %10537 = vmatprep.subr.bf16.mxu1 %v13179_v56 }
0x1164   :  { %10507 = vmatpush1.bf16.msra.mxu0 %v13181_v33  ;;  %10539 = vmatpush1.bf16.msra.mxu1 %v13184_v7 }
0x1165   :  { %10509 = vmatprep.subr.bf16.mxu0 %v13189_v54  ;;  %10541 = vmatprep.subr.bf16.mxu1 %v13191_v37 }
0x1168   :  { %10511 = vmatpush1.bf16.msra.mxu0 %v13193_v51  ;;  %10543 = vmatpush1.bf16.msra.mxu1 %v13196_v18 }
0x1169   :  { %10513 = vmatprep.subr.bf16.mxu0 %v13201_v61  ;;  %10545 = vmatprep.subr.bf16.mxu1 %v13203_v44 }
0x116c   :  { %10515 = vmatpush1.bf16.msra.mxu0 %v13205_v16  ;;  %10547 = vmatpush1.bf16.msra.mxu1 %v13208_v19 }
0x116d   :  { %10517 = vmatprep.subr.bf16.mxu0 %v13212_v25  ;;  %10549 = vmatprep.subr.bf16.mxu1 %v13215_v40 }
0x1170   :  { %10519 = vmatpush1.bf16.msra.mxu0 %v13217_v34  ;;  %10551 = vmatpush1.bf16.msra.mxu1 %v13220_v6 }
0x1171   :  { %10521 = vmatprep.subr.bf16.mxu0 %v13223_v63  ;;  %10553 = vmatprep.subr.bf16.mxu1 %v13225_v23 }
0x1174   :  { %10523 = vmatpush1.bf16.msra.mxu0 %v13228_v55  ;;  %10555 = vmatpush1.bf16.msra.mxu1 %v13232_v22 }
0x1175   :  { %10525 = vmatprep.subr.bf16.mxu0 %v13236_v12  ;;  %10557 = vmatprep.subr.bf16.mxu1 %v13239_v39 }
0x1178   :  { %10527 = vmatpush1.bf16.msra.mxu0 %v13241_v46  ;;  %10559 = vmatpush1.bf16.msra.mxu1 %v13244_v14 }
0x1179   :  { %10561 = vmatprep.subr.bf16.mxu0 %v13153_v47  ;;  %10593 = vmatprep.subr.bf16.mxu1 %v13155_v31 }
0x122a   :  { %v4799_v53 = vpop.f32.mrb[38].mxu0  ;;  %v4876_v35 = vpop.f32.mrb[38].mxu1 }
0x122b   :  { %v4800_v32 = vadd.f32 %v4799_v53, %v13259_v30  ;;  %v4877_v13 = vadd.f32 %v4876_v35, %v13263_v50  ;;  %v4801_v15 = vpop.f32.mrb[39].mxu0  ;;  %v4878_v62 = vpop.f32.mrb[39].mxu1 }
0x122c   :  { %v4802_v1 = vadd.f32 %v4801_v15, %v13267_v8  ;;  %v4879_v29 = vadd.f32 %v4878_v62, %v13271_v4  ;;  %v4889_v8 = vld [vmem:[#allocation2] ss:$8 sm:$0xf] }
0x122d   :  { %4885 = vst [vmem:[#allocation2 + $0x20] sm:$0xff] %v4800_v32  ;;  %4887 = vst [vmem:[#allocation2 + $0x30] sm:$0xff] %v4877_v13 }
0x122e   :  { %4886 = vst [vmem:[#allocation2 + $0x28] sm:$0xff] %v4802_v1  ;;  %4888 = vst [vmem:[#allocation2 + $0x38] sm:$0xff] %v4879_v29  ;;  %v5020_v5 = vpop.f32.mrb[40].mxu0  ;;  %v5091_v17 = vpop.f32.mrb[40].mxu1 }
0x122f   :  { %v5022_v38 = vpop.f32.mrb[41].mxu0  ;;  %v5093_v26 = vpop.f32.mrb[41].mxu1 }
0x1230   :  { %v5100_v21 = vcombine.low %v5020_v5, %v5022_v38  ;;  %v5101_v42 = vcombine.low %v5091_v17, %v5093_v26 }
0x1232   :  { %v5108_v30 = vrot.slane %v5100_v21, %v12409_v28  ;;  %v5115_v50 = vrot.slane %v5101_v42, %v12409_v28 }
0x1234   :  { %v5116_v43 = vcombine.low %v5108_v30, %v5115_v50 }
0x1236   :  { %v5123_v36 = vrot.slane %v5116_v43, %v12409_v28 }
0x1238   :  { %v5125_v45 = vadd.f32 %v5123_v36, %v4889_v8 }
0x123a   :  { %v9264_v4 = vmul.f32 -1.442695, %v5125_v45  ;;  %v5133_v9 = vrot.slane %v5125_v45, 1  ;;  %v5144_v58 = vrot.slane %v5125_v45, 3  ;;  %v5141_v11 = vrot.slane %v5125_v45, 2 }
0x123c   :  { %11724 = vpow2.f32 %v9264_v4  ;;  %v9265_v24 = vmul.f32 -1.442695, %v5133_v9  ;;  %v9266_v49 = vmul.f32 -1.442695, %v5144_v58 }
0x123d   :  { %v5158_v9 = vld [vmem:[#allocation2 + $0x1] ss:$8 sm:$0xf] }
0x123e   :  { %11726 = vpow2.f32 %v9265_v24 }
0x123f   :  { %11728 = vpow2.f32 %v9266_v49 }
0x1246   :  { %v11725_v2 = vpop.eup %11724 }
0x1247   :  { %v5129_v20 = vadd.f32 1.0, %v11725_v2 }
0x1248   :  { %v11727_v10 = vpop.eup %11726 }
0x1249   :  { %11730 = vrcp.f32 %v5129_v20  ;;  %v5138_v27 = vadd.f32 1.0, %v11727_v10  ;;  %v11729_v53 = vpop.eup %11728 }
0x124a   :  { %11732 = vtanh.f32 %v5141_v11  ;;  %v5149_v15 = vadd.f32 1.0, %v11729_v53 }
0x124b   :  { %11734 = vrcp.f32 %v5138_v27 }
0x124c   :  { %11736 = vrcp.f32 %v5149_v15 }
0x1253   :  { %v11731_v35 = vpop.eup %11730 }
0x1254   :  { %v11733_v32 = vpop.eup %11732 }
0x1255   :  { %v11735_v13 = vpop.eup %11734  ;;  %v5153_v1 = vmul.f32 %v11733_v32, %v11731_v35 }
0x1256   :  { %v5152_v62 = vmul.f32 0.0, %v11735_v13  ;;  %v11737_v5 = vpop.eup %11736 }
0x1258   :  { %v13323_v29 = vadd.f32 %v5153_v1, %v5152_v62 }
0x125a   :  { %11738 = vtanh.f32 %v13323_v29 }
0x1264   :  { %v11739_v17 = vpop.eup %11738 }
0x1265   :  { %v5156_v38 = vmul.f32 %v11739_v17, %v11737_v5 }
0x1267   :  { %5157 = vst [vmem:[#allocation12] sm:$0x1] %v5156_v38  ;;  %5288 = vmatmul.mubr.f32.vlgmr.msra.gmra.mrb[42].mxu0 %v5156_v38  ;;  %5359 = vmatmul.mubr.f32.vlgmr.msra.gmra.mrb[42].mxu1 %v5156_v38 }
0x1268   :  { %10563 = vmatpush1.bf16.msra.mxu0 %v13157_v60  ;;  %10595 = vmatpush1.bf16.msra.mxu1 %v13160_v48 }
0x1269   :  { %10565 = vmatprep.subr.bf16.mxu0 %v13165_v59  ;;  %10597 = vmatprep.subr.bf16.mxu1 %v13167_v52 }
0x126a   :  { %5556 = vmatprep.mubr.f32.mxu0 %v12129_v0  ;;  %5627 = vmatprep.mubr.f32.mxu1 %v12129_v0 }
0x126c   :  { %10567 = vmatpush1.bf16.msra.mxu0 %v13169_v3  ;;  %10599 = vmatpush1.bf16.msra.mxu1 %v13172_v57 }
0x126d   :  { %10569 = vmatprep.subr.bf16.mxu0 %v13177_v41  ;;  %10601 = vmatprep.subr.bf16.mxu1 %v13179_v56 }
0x1270   :  { %10571 = vmatpush1.bf16.msra.mxu0 %v13181_v33  ;;  %10603 = vmatpush1.bf16.msra.mxu1 %v13184_v7 }
0x1271   :  { %10573 = vmatprep.subr.bf16.mxu0 %v13189_v54  ;;  %10605 = vmatprep.subr.bf16.mxu1 %v13191_v37 }
0x1274   :  { %10575 = vmatpush1.bf16.msra.mxu0 %v13193_v51  ;;  %10607 = vmatpush1.bf16.msra.mxu1 %v13196_v18 }
0x1275   :  { %10577 = vmatprep.subr.bf16.mxu0 %v13201_v61  ;;  %10609 = vmatprep.subr.bf16.mxu1 %v13203_v44 }
0x1278   :  { %10579 = vmatpush1.bf16.msra.mxu0 %v13205_v16  ;;  %10611 = vmatpush1.bf16.msra.mxu1 %v13208_v19 }
0x1279   :  { %10581 = vmatprep.subr.bf16.mxu0 %v13212_v25  ;;  %10613 = vmatprep.subr.bf16.mxu1 %v13215_v40 }
0x127c   :  { %10583 = vmatpush1.bf16.msra.mxu0 %v13217_v34  ;;  %10615 = vmatpush1.bf16.msra.mxu1 %v13220_v6 }
0x127d   :  { %10585 = vmatprep.subr.bf16.mxu0 %v13223_v63  ;;  %10617 = vmatprep.subr.bf16.mxu1 %v13225_v23 }
0x1280   :  { %10587 = vmatpush1.bf16.msra.mxu0 %v13228_v55  ;;  %10619 = vmatpush1.bf16.msra.mxu1 %v13232_v22 }
0x1281   :  { %10589 = vmatprep.subr.bf16.mxu0 %v13236_v12  ;;  %10621 = vmatprep.subr.bf16.mxu1 %v13239_v39 }
0x1284   :  { %10591 = vmatpush1.bf16.msra.mxu0 %v13241_v46  ;;  %10623 = vmatpush1.bf16.msra.mxu1 %v13244_v14 }
0x1285   :  { %10625 = vmatprep.subr.bf16.mxu0 %v13153_v47  ;;  %10657 = vmatprep.subr.bf16.mxu1 %v13155_v31 }
0x133a   :  { %v5289_v26 = vpop.f32.mrb[42].mxu0  ;;  %v5360_v21 = vpop.f32.mrb[42].mxu1 }
0x133b   :  { %v5291_v42 = vpop.f32.mrb[43].mxu0  ;;  %v5362_v30 = vpop.f32.mrb[43].mxu1 }
0x133c   :  { %v5369_v50 = vcombine.low %v5289_v26, %v5291_v42  ;;  %v5370_v43 = vcombine.low %v5360_v21, %v5362_v30 }
0x133e   :  { %v5377_v36 = vrot.slane %v5369_v50, %v12409_v28  ;;  %v5384_v8 = vrot.slane %v5370_v43, %v12409_v28  ;;  %v5967_v50 = vld [vmem:[#allocation11 + $0x8] sm:$0xff] }
0x133f   :  { %v5971_v43 = vld [vmem:[#allocation11 + $0x28] sm:$0xff] }
0x1340   :  { %v5385_v45 = vcombine.low %v5377_v36, %v5384_v8  ;;  %v5969_v36 = vld [vmem:[#allocation11 + $0x18] sm:$0xff]  ;;  %v13408_v8 = vpack.c.bf16 %v5971_v43, %v5967_v50 }
0x1341   :  { %v6013_v50 = vld [vmem:[#allocation11 + $0x178] sm:$0xff] }
0x1342   :  { %v5392_v4 = vrot.slane %v5385_v45, %v12409_v28  ;;  %v5973_v45 = vld [vmem:[#allocation11 + $0x38] sm:$0xff] }
0x1344   :  { %v5394_v24 = vadd.f32 %v5392_v4, %v5158_v9  ;;  %v5966_v4 = vld [vmem:[#allocation11] sm:$0xff] }
0x1345   :  { %v5970_v9 = vld [vmem:[#allocation11 + $0x20] sm:$0xff] }
0x1346   :  { %v9267_v58 = vmul.f32 -1.442695, %v5394_v24  ;;  %v5402_v49 = vrot.slane %v5394_v24, 1  ;;  %v5413_v31 = vrot.slane %v5394_v24, 3  ;;  %v5410_v20 = vrot.slane %v5394_v24, 2 }
0x1347   :  { %v13410_v24 = vpack.c.bf16 %v5973_v45, %v5969_v36 }
0x1348   :  { %11740 = vpow2.f32 %v9267_v58  ;;  %v9268_v47 = vmul.f32 -1.442695, %v5402_v49  ;;  %v9269_v2 = vmul.f32 -1.442695, %v5413_v31  ;;  %v13412_v58 = vpack.c.bf16 %v5970_v9, %v5966_v4  ;;  %v5968_v49 = vld [vmem:[#allocation11 + $0x10] sm:$0xff]  ;;  %v6006_v4 = vld [vmem:[#allocation11 + $0x140] sm:$0xff] }
0x1349   :  { %v6010_v9 = vld [vmem:[#allocation11 + $0x160] sm:$0xff] }
0x134a   :  { %11742 = vpow2.f32 %v9268_v47  ;;  %v5972_v47 = vld [vmem:[#allocation11 + $0x30] sm:$0xff] }
0x134b   :  { %11744 = vpow2.f32 %v9269_v2  ;;  %v13415_v31 = vpack.c.bf16 %v5972_v47, %v5968_v49  ;;  %v5975_v2 = vld [vmem:[#allocation11 + $0x48] sm:$0xff]  ;;  %v6008_v49 = vld [vmem:[#allocation11 + $0x150] sm:$0xff] }
0x1352   :  { %v11741_v11 = vpop.eup %11740 }
0x1353   :  { %v5398_v10 = vadd.f32 1.0, %v11741_v11  ;;  %v5979_v11 = vld [vmem:[#allocation11 + $0x68] sm:$0xff] }
0x1354   :  { %v11743_v27 = vpop.eup %11742 }
0x1355   :  { %11746 = vrcp.f32 %v5398_v10  ;;  %v5407_v53 = vadd.f32 1.0, %v11743_v27  ;;  %v11745_v35 = vpop.eup %11744  ;;  %v13419_v10 = vpack.c.bf16 %v5979_v11, %v5975_v2  ;;  %v5981_v27 = vld [vmem:[#allocation11 + $0x78] sm:$0xff]  ;;  %v6012_v2 = vld [vmem:[#allocation11 + $0x170] sm:$0xff]  ;;  %v6015_v11 = vld [vmem:[#allocation11 + $0x188] sm:$0xff] }
0x1356   :  { %11748 = vtanh.f32 %v5410_v20  ;;  %v5418_v62 = vadd.f32 1.0, %v11745_v35  ;;  %v5977_v20 = vld [vmem:[#allocation11 + $0x58] sm:$0xff]  ;;  %v5978_v35 = vld [vmem:[#allocation11 + $0x60] sm:$0xff] }
0x1357   :  { %11750 = vrcp.f32 %v5407_v53  ;;  %v5974_v53 = vld [vmem:[#allocation11 + $0x40] sm:$0xff] }
0x1358   :  { %11752 = vrcp.f32 %v5418_v62  ;;  %v5980_v62 = vld [vmem:[#allocation11 + $0x70] sm:$0xff] }
0x135f   :  { %v11747_v32 = vpop.eup %11746 }
0x1360   :  { %v11749_v13 = vpop.eup %11748 }
0x1361   :  { %v11751_v15 = vpop.eup %11750  ;;  %v5422_v5 = vmul.f32 %v11749_v13, %v11747_v32  ;;  %v13422_v32 = vpack.c.bf16 %v5981_v27, %v5977_v20  ;;  %v13424_v13 = vpack.c.bf16 %v5978_v35, %v5974_v53  ;;  %v6019_v20 = vld [vmem:[#allocation11 + $0x1a8] sm:$0xff]  ;;  %v6017_v27 = vld [vmem:[#allocation11 + $0x198] sm:$0xff]  ;;  %v13471_v35 = vpack.c.bf16 %v6010_v9, %v6006_v4 }
0x1362   :  { %v5421_v1 = vmul.f32 %v11751_v15, %v13323_v29  ;;  %v11753_v38 = vpop.eup %11752  ;;  %v5976_v15 = vld [vmem:[#allocation11 + $0x50] sm:$0xff]  ;;  %v6021_v53 = vld [vmem:[#allocation11 + $0x1b8] sm:$0xff] }
0x1363   :  { %v5696_v9 = vld [vmem:[#allocation2 + $0x3] ss:$8 sm:$0xf] }
0x1364   :  { %v13364_v17 = vadd.f32 %v5422_v5, %v5421_v1  ;;  %v5983_v1 = vld [vmem:[#allocation11 + $0x88] sm:$0xff]  ;;  %v13427_v5 = vpack.c.bf16 %v5980_v62, %v5976_v15  ;;  %v13475_v15 = vpack.c.bf16 %v6012_v2, %v6008_v49  ;;  %v13477_v62 = vpack.c.bf16 %v6019_v20, %v6015_v11 }
0x1366   :  { %11754 = vtanh.f32 %v13364_v17 }
0x1370   :  { %v11755_v26 = vpop.eup %11754 }
0x1371   :  { %v5425_v21 = vmul.f32 %v11755_v26, %v11753_v38  ;;  %v5985_v38 = vld [vmem:[#allocation11 + $0x98] sm:$0xff] }
0x1372   :  { %v5989_v26 = vld [vmem:[#allocation11 + $0xb8] sm:$0xff] }
0x1373   :  { %5426 = vst [vmem:[#allocation12 + $0x1] sm:$0x1] %v5425_v21  ;;  %5557 = vmatmul.mubr.f32.vlgmr.msra.gmra.mrb[44].mxu0 %v5425_v21  ;;  %5628 = vmatmul.mubr.f32.vlgmr.msra.gmra.mrb[44].mxu1 %v5425_v21 }
0x1374   :  { %10627 = vmatpush1.bf16.msra.mxu0 %v13157_v60  ;;  %10659 = vmatpush1.bf16.msra.mxu1 %v13160_v48 }
0x1375   :  { %10629 = vmatprep.subr.bf16.mxu0 %v13165_v59  ;;  %10661 = vmatprep.subr.bf16.mxu1 %v13167_v52 }
0x1376   :  { %5825 = vmatprep.mubr.f32.mxu0 %v12129_v0  ;;  %5896 = vmatprep.mubr.f32.mxu1 %v12129_v0 }
0x1378   :  { %10631 = vmatpush1.bf16.msra.mxu0 %v13169_v3  ;;  %10663 = vmatpush1.bf16.msra.mxu1 %v13172_v57 }
0x1379   :  { %10633 = vmatprep.subr.bf16.mxu0 %v13177_v41  ;;  %10665 = vmatprep.subr.bf16.mxu1 %v13179_v56 }
0x137c   :  { %10635 = vmatpush1.bf16.msra.mxu0 %v13181_v33  ;;  %10667 = vmatpush1.bf16.msra.mxu1 %v13184_v7 }
0x137d   :  { %10637 = vmatprep.subr.bf16.mxu0 %v13189_v54  ;;  %10669 = vmatprep.subr.bf16.mxu1 %v13191_v37  ;;  %v5427_v54 = vld [vmem:[#allocation2 + $0x2] ss:$8 sm:$0xf] }
0x1380   :  { %10639 = vmatpush1.bf16.msra.mxu0 %v13193_v51  ;;  %10671 = vmatpush1.bf16.msra.mxu1 %v13196_v18 }
0x1381   :  { %10641 = vmatprep.subr.bf16.mxu0 %v13201_v61  ;;  %10673 = vmatprep.subr.bf16.mxu1 %v13203_v44 }
0x1384   :  { %10643 = vmatpush1.bf16.msra.mxu0 %v13205_v16  ;;  %10675 = vmatpush1.bf16.msra.mxu1 %v13208_v19 }
0x1385   :  { %10645 = vmatprep.subr.bf16.mxu0 %v13212_v25  ;;  %10677 = vmatprep.subr.bf16.mxu1 %v13215_v40 }
0x1388   :  { %10647 = vmatpush1.bf16.msra.mxu0 %v13217_v34  ;;  %10679 = vmatpush1.bf16.msra.mxu1 %v13220_v6 }
0x1389   :  { %10649 = vmatprep.subr.bf16.mxu0 %v13223_v63  ;;  %10681 = vmatprep.subr.bf16.mxu1 %v13225_v23 }
0x138c   :  { %10651 = vmatpush1.bf16.msra.mxu0 %v13228_v55  ;;  %10683 = vmatpush1.bf16.msra.mxu1 %v13232_v22 }
0x138d   :  { %10653 = vmatprep.subr.bf16.mxu0 %v13236_v12  ;;  %10685 = vmatprep.subr.bf16.mxu1 %v13239_v39 }
0x1390   :  { %10655 = vmatpush1.bf16.msra.mxu0 %v13241_v46  ;;  %10687 = vmatpush1.bf16.msra.mxu1 %v13244_v14 }
0x1391   :  { %10689 = vmatprep.subr.bf16.mxu0 %v13408_v8  ;;  %10721 = vmatprep.subr.bf16.mxu1 %v13410_v24 }
0x1446   :  { %v5558_v60 = vpop.f32.mrb[44].mxu0  ;;  %v5629_v48 = vpop.f32.mrb[44].mxu1 }
0x1447   :  { %v5560_v59 = vpop.f32.mrb[45].mxu0  ;;  %v5631_v52 = vpop.f32.mrb[45].mxu1 }
0x1448   :  { %v5638_v3 = vcombine.low %v5558_v60, %v5560_v59  ;;  %v5639_v57 = vcombine.low %v5629_v48, %v5631_v52  ;;  %v13432_v60 = vpack.c.bf16 %v5989_v26, %v5985_v38  ;;  %v5982_v48 = vld [vmem:[#allocation11 + $0x80] sm:$0xff]  ;;  %v5984_v52 = vld [vmem:[#allocation11 + $0x90] sm:$0xff]  ;;  %v13480_v26 = vpack.c.bf16 %v6021_v53, %v6017_v27 }
0x1449   :  { %v5986_v59 = vld [vmem:[#allocation11 + $0xa0] sm:$0xff]  ;;  %v6016_v38 = vld [vmem:[#allocation11 + $0x190] sm:$0xff] }
0x144a   :  { %v5646_v41 = vrot.slane %v5638_v3, %v12409_v28  ;;  %v5653_v56 = vrot.slane %v5639_v57, %v12409_v28  ;;  %v13435_v3 = vpack.c.bf16 %v5986_v59, %v5982_v48  ;;  %v5988_v57 = vld [vmem:[#allocation11 + $0xb0] sm:$0xff]  ;;  %v6023_v59 = vld [vmem:[#allocation11 + $0x1c8] sm:$0xff] }
0x144b   :  { %v6020_v48 = vld [vmem:[#allocation11 + $0x1b0] sm:$0xff] }
0x144c   :  { %v5654_v33 = vcombine.low %v5646_v41, %v5653_v56  ;;  %v5991_v41 = vld [vmem:[#allocation11 + $0xc8] sm:$0xff] }
0x144d   :  { %v5995_v56 = vld [vmem:[#allocation11 + $0xe8] sm:$0xff] }
0x144e   :  { %v5661_v7 = vrot.slane %v5654_v33, %v12409_v28  ;;  %v13439_v33 = vpack.c.bf16 %v5988_v57, %v5984_v52  ;;  %v6027_v52 = vld [vmem:[#allocation11 + $0x1e8] sm:$0xff]  ;;  %v6025_v57 = vld [vmem:[#allocation11 + $0x1d8] sm:$0xff] }
0x1450   :  { %v5663_v37 = vadd.f32 %v5661_v7, %v5427_v54  ;;  %v13441_v7 = vpack.c.bf16 %v5995_v56, %v5991_v41  ;;  %v5993_v54 = vld [vmem:[#allocation11 + $0xd8] sm:$0xff] }
0x1451   :  { %v6029_v41 = vld [vmem:[#allocation11 + $0x1f8] sm:$0xff] }
0x1452   :  { %v9270_v51 = vmul.f32 -1.442695, %v5663_v37  ;;  %v5671_v18 = vrot.slane %v5663_v37, 1  ;;  %v5682_v44 = vrot.slane %v5663_v37, 3  ;;  %v5679_v25 = vrot.slane %v5663_v37, 2  ;;  %v5997_v37 = vld [vmem:[#allocation11 + $0xf8] sm:$0xff] }
0x1454   :  { %11756 = vpow2.f32 %v9270_v51  ;;  %v9271_v61 = vmul.f32 -1.442695, %v5671_v18  ;;  %v9272_v16 = vmul.f32 -1.442695, %v5682_v44  ;;  %v5990_v51 = vld [vmem:[#allocation11 + $0xc0] sm:$0xff]  ;;  %v13444_v18 = vpack.c.bf16 %v5997_v37, %v5993_v54  ;;  %v5992_v44 = vld [vmem:[#allocation11 + $0xd0] sm:$0xff] }
0x1455   :  { %v13487_v54 = vpack.c.bf16 %v6020_v48, %v6016_v38  ;;  %v13489_v37 = vpack.c.bf16 %v6027_v52, %v6023_v59 }
0x1456   :  { %11758 = vpow2.f32 %v9271_v61  ;;  %v5994_v61 = vld [vmem:[#allocation11 + $0xe0] sm:$0xff] }
0x1457   :  { %11760 = vpow2.f32 %v9272_v16  ;;  %v5996_v16 = vld [vmem:[#allocation11 + $0xf0] sm:$0xff] }
0x145e   :  { %v11757_v19 = vpop.eup %11756 }
0x145f   :  { %v5667_v40 = vadd.f32 1.0, %v11757_v19  ;;  %v5999_v19 = vld [vmem:[#allocation11 + $0x108] sm:$0xff] }
0x1460   :  { %v11759_v34 = vpop.eup %11758 }
0x1461   :  { %11762 = vrcp.f32 %v5667_v40  ;;  %v5676_v6 = vadd.f32 1.0, %v11759_v34  ;;  %v11761_v63 = vpop.eup %11760  ;;  %v6001_v40 = vld [vmem:[#allocation11 + $0x118] sm:$0xff]  ;;  %v13447_v34 = vpack.c.bf16 %v5994_v61, %v5990_v51  ;;  %v6022_v51 = vld [vmem:[#allocation11 + $0x1c0] sm:$0xff] }
0x1462   :  { %11764 = vtanh.f32 %v5679_v25  ;;  %v5687_v12 = vadd.f32 1.0, %v11761_v63  ;;  %v6003_v25 = vld [vmem:[#allocation11 + $0x128] sm:$0xff]  ;;  %v13451_v63 = vpack.c.bf16 %v5996_v16, %v5992_v44  ;;  %v6026_v61 = vld [vmem:[#allocation11 + $0x1e0] sm:$0xff]  ;;  %v13492_v44 = vpack.c.bf16 %v6029_v41, %v6025_v57  ;;  %v6024_v16 = vld [vmem:[#allocation11 + $0x1d0] sm:$0xff] }
0x1463   :  { %11766 = vrcp.f32 %v5676_v6  ;;  %v6005_v6 = vld [vmem:[#allocation11 + $0x138] sm:$0xff] }
0x1464   :  { %11768 = vrcp.f32 %v5687_v12  ;;  %v6000_v12 = vld [vmem:[#allocation11 + $0x110] sm:$0xff] }
0x146b   :  { %v11763_v23 = vpop.eup %11762 }
0x146c   :  { %v11765_v55 = vpop.eup %11764 }
0x146d   :  { %v11767_v22 = vpop.eup %11766  ;;  %v5691_v46 = vmul.f32 %v11765_v55, %v11763_v23  ;;  %v13453_v23 = vpack.c.bf16 %v6003_v25, %v5999_v19  ;;  %v5998_v55 = vld [vmem:[#allocation11 + $0x100] sm:$0xff]  ;;  %v6028_v19 = vld [vmem:[#allocation11 + $0x1f0] sm:$0xff]  ;;  %v13495_v25 = vpack.c.bf16 %v6026_v61, %v6022_v51 }
0x146e   :  { %v5690_v39 = vmul.f32 %v11767_v22, %v13364_v17  ;;  %v11769_v29 = vpop.eup %11768  ;;  %v5987_v17 = vld [vmem:[#allocation11 + $0xa8] sm:$0xff]  ;;  %v6002_v22 = vld [vmem:[#allocation11 + $0x120] sm:$0xff] }
0x146f   :  { %v13430_v21 = vpack.c.bf16 %v5987_v17, %v5983_v1  ;;  %v13459_v43 = vpack.c.bf16 %v6002_v22, %v5998_v55  ;;  %v6014_v1 = vld [vmem:[#allocation11 + $0x180] sm:$0xff] }
0x1470   :  { %v13403_v14 = vadd.f32 %v5691_v46, %v5690_v39  ;;  %v13456_v39 = vpack.c.bf16 %v6005_v6, %v6001_v40  ;;  %v6004_v46 = vld [vmem:[#allocation11 + $0x130] sm:$0xff]  ;;  %v6018_v17 = vld [vmem:[#allocation11 + $0x1a0] sm:$0xff]  ;;  %v13499_v40 = vpack.c.bf16 %v6028_v19, %v6024_v16 }
0x1471   :  { %v13463_v36 = vpack.c.bf16 %v6004_v46, %v6000_v12  ;;  %v13483_v56 = vpack.c.bf16 %v6018_v17, %v6014_v1 }
0x1472   :  { %11770 = vtanh.f32 %v13403_v14 }
0x147c   :  { %v11771_v42 = vpop.eup %11770 }
0x147d   :  { %v5694_v30 = vmul.f32 %v11771_v42, %v11769_v29  ;;  %v6007_v29 = vld [vmem:[#allocation11 + $0x148] sm:$0xff] }
0x147e   :  { %v6011_v42 = vld [vmem:[#allocation11 + $0x168] sm:$0xff] }
0x147f   :  { %5695 = vst [vmem:[#allocation12 + $0x2] sm:$0x1] %v5694_v30  ;;  %5826 = vmatmul.mubr.f32.vlgmr.msra.gmra.mrb[46].mxu0 %v5694_v30  ;;  %5897 = vmatmul.mubr.f32.vlgmr.msra.gmra.mrb[46].mxu1 %v5694_v30  ;;  %v6009_v30 = vld [vmem:[#allocation11 + $0x158] sm:$0xff]  ;;  %v13465_v45 = vpack.c.bf16 %v6011_v42, %v6007_v29 }
0x1480   :  { %6094 = vmatprep.mubr.f32.mxu0 %v12129_v0  ;;  %6165 = vmatprep.mubr.f32.mxu1 %v12129_v0  ;;  %v13468_v47 = vpack.c.bf16 %v6013_v50, %v6009_v30 }
0x1481   :  { %10691 = vmatpush1.bf16.msra.mxu0 %v13412_v58  ;;  %10723 = vmatpush1.bf16.msra.mxu1 %v13415_v31 }
0x1482   :  { %10693 = vmatprep.subr.bf16.mxu0 %v13419_v10  ;;  %10725 = vmatprep.subr.bf16.mxu1 %v13422_v32 }
0x1485   :  { %10695 = vmatpush1.bf16.msra.mxu0 %v13424_v13  ;;  %10727 = vmatpush1.bf16.msra.mxu1 %v13427_v5 }
0x1486   :  { %10697 = vmatprep.subr.bf16.mxu0 %v13430_v21  ;;  %10729 = vmatprep.subr.bf16.mxu1 %v13432_v60 }
0x1489   :  { %10699 = vmatpush1.bf16.msra.mxu0 %v13435_v3  ;;  %10731 = vmatpush1.bf16.msra.mxu1 %v13439_v33 }
0x148a   :  { %10701 = vmatprep.subr.bf16.mxu0 %v13441_v7  ;;  %10733 = vmatprep.subr.bf16.mxu1 %v13444_v18 }
0x148d   :  { %10703 = vmatpush1.bf16.msra.mxu0 %v13447_v34  ;;  %10735 = vmatpush1.bf16.msra.mxu1 %v13451_v63 }
0x148e   :  { %10705 = vmatprep.subr.bf16.mxu0 %v13453_v23  ;;  %10737 = vmatprep.subr.bf16.mxu1 %v13456_v39 }
0x1491   :  { %10707 = vmatpush1.bf16.msra.mxu0 %v13459_v43  ;;  %10739 = vmatpush1.bf16.msra.mxu1 %v13463_v36 }
0x1492   :  { %10709 = vmatprep.subr.bf16.mxu0 %v13465_v45  ;;  %10741 = vmatprep.subr.bf16.mxu1 %v13468_v47 }
0x1495   :  { %10711 = vmatpush1.bf16.msra.mxu0 %v13471_v35  ;;  %10743 = vmatpush1.bf16.msra.mxu1 %v13475_v15 }
0x1496   :  { %10713 = vmatprep.subr.bf16.mxu0 %v13477_v62  ;;  %10745 = vmatprep.subr.bf16.mxu1 %v13480_v26 }
0x1499   :  { %10715 = vmatpush1.bf16.msra.mxu0 %v13483_v56  ;;  %10747 = vmatpush1.bf16.msra.mxu1 %v13487_v54 }
0x149a   :  { %10717 = vmatprep.subr.bf16.mxu0 %v13489_v37  ;;  %10749 = vmatprep.subr.bf16.mxu1 %v13492_v44 }
0x149d   :  { %10719 = vmatpush1.bf16.msra.mxu0 %v13495_v25  ;;  %10751 = vmatpush1.bf16.msra.mxu1 %v13499_v40 }
0x149e   :  { %10753 = vmatprep.subr.bf16.mxu0 %v13408_v8  ;;  %10785 = vmatprep.subr.bf16.mxu1 %v13410_v24 }
0x1552   :  { %v5827_v6 = vpop.f32.mrb[46].mxu0  ;;  %v5898_v55 = vpop.f32.mrb[46].mxu1 }
0x1553   :  { %v5829_v22 = vpop.f32.mrb[47].mxu0  ;;  %v5900_v12 = vpop.f32.mrb[47].mxu1 }
0x1554   :  { %v5907_v46 = vcombine.low %v5827_v6, %v5829_v22  ;;  %v5908_v29 = vcombine.low %v5898_v55, %v5900_v12 }
0x1556   :  { %v5915_v42 = vrot.slane %v5907_v46, %v12409_v28  ;;  %v5922_v30 = vrot.slane %v5908_v29, %v12409_v28 }
0x1558   :  { %v5923_v50 = vcombine.low %v5915_v42, %v5922_v30 }
0x155a   :  { %v5930_v4 = vrot.slane %v5923_v50, %v12409_v28 }
0x155c   :  { %v5932_v49 = vadd.f32 %v5930_v4, %v5696_v9 }
0x155e   :  { %v9273_v2 = vmul.f32 -1.442695, %v5932_v49  ;;  %v5940_v11 = vrot.slane %v5932_v49, 1  ;;  %v5951_v27 = vrot.slane %v5932_v49, 3  ;;  %v5948_v17 = vrot.slane %v5932_v49, 2 }
0x1560   :  { %11772 = vpow2.f32 %v9273_v2  ;;  %v9274_v20 = vmul.f32 -1.442695, %v5940_v11  ;;  %v9275_v53 = vmul.f32 -1.442695, %v5951_v27 }
0x1561   :  { %v5965_v11 = vld [vmem:[#allocation2 + $0x4] ss:$8 sm:$0xf] }
0x1562   :  { %11774 = vpow2.f32 %v9274_v20 }
0x1563   :  { %11776 = vpow2.f32 %v9275_v53 }
0x156a   :  { %v11773_v1 = vpop.eup %11772 }
0x156b   :  { %v5936_v38 = vadd.f32 1.0, %v11773_v1 }
0x156c   :  { %v11775_v48 = vpop.eup %11774 }
0x156d   :  { %11778 = vrcp.f32 %v5936_v38  ;;  %v5945_v59 = vadd.f32 1.0, %v11775_v48  ;;  %v11777_v52 = vpop.eup %11776 }
0x156e   :  { %11780 = vtanh.f32 %v5948_v17  ;;  %v5956_v61 = vadd.f32 1.0, %v11777_v52 }
0x156f   :  { %11782 = vrcp.f32 %v5945_v59 }
0x1570   :  { %11784 = vrcp.f32 %v5956_v61 }
0x1577   :  { %v11779_v57 = vpop.eup %11778 }
0x1578   :  { %v11781_v41 = vpop.eup %11780 }
0x1579   :  { %v11783_v51 = vpop.eup %11782  ;;  %v5960_v19 = vmul.f32 %v11781_v41, %v11779_v57 }
0x157a   :  { %v5959_v16 = vmul.f32 %v11783_v51, %v13403_v14  ;;  %v11785_v55 = vpop.eup %11784 }
0x157c   :  { %v13510_v6 = vadd.f32 %v5960_v19, %v5959_v16 }
0x157e   :  { %11786 = vtanh.f32 %v13510_v6 }
0x1588   :  { %v11787_v22 = vpop.eup %11786 }
0x1589   :  { %v5963_v12 = vmul.f32 %v11787_v22, %v11785_v55 }
0x158b   :  { %5964 = vst [vmem:[#allocation12 + $0x3] sm:$0x1] %v5963_v12  ;;  %6095 = vmatmul.mubr.f32.vlgmr.msra.gmra.mrb[48].mxu0 %v5963_v12  ;;  %6166 = vmatmul.mubr.f32.vlgmr.msra.gmra.mrb[48].mxu1 %v5963_v12 }
0x158c   :  { %10755 = vmatpush1.bf16.msra.mxu0 %v13412_v58  ;;  %10787 = vmatpush1.bf16.msra.mxu1 %v13415_v31 }
0x158d   :  { %10757 = vmatprep.subr.bf16.mxu0 %v13419_v10  ;;  %10789 = vmatprep.subr.bf16.mxu1 %v13422_v32 }
0x158e   :  { %6363 = vmatprep.mubr.f32.mxu0 %v12129_v0  ;;  %6434 = vmatprep.mubr.f32.mxu1 %v12129_v0 }
0x1590   :  { %10759 = vmatpush1.bf16.msra.mxu0 %v13424_v13  ;;  %10791 = vmatpush1.bf16.msra.mxu1 %v13427_v5 }
0x1591   :  { %10761 = vmatprep.subr.bf16.mxu0 %v13430_v21  ;;  %10793 = vmatprep.subr.bf16.mxu1 %v13432_v60 }
0x1594   :  { %10763 = vmatpush1.bf16.msra.mxu0 %v13435_v3  ;;  %10795 = vmatpush1.bf16.msra.mxu1 %v13439_v33 }
0x1595   :  { %10765 = vmatprep.subr.bf16.mxu0 %v13441_v7  ;;  %10797 = vmatprep.subr.bf16.mxu1 %v13444_v18 }
0x1598   :  { %10767 = vmatpush1.bf16.msra.mxu0 %v13447_v34  ;;  %10799 = vmatpush1.bf16.msra.mxu1 %v13451_v63 }
0x1599   :  { %10769 = vmatprep.subr.bf16.mxu0 %v13453_v23  ;;  %10801 = vmatprep.subr.bf16.mxu1 %v13456_v39 }
0x159c   :  { %10771 = vmatpush1.bf16.msra.mxu0 %v13459_v43  ;;  %10803 = vmatpush1.bf16.msra.mxu1 %v13463_v36 }
0x159d   :  { %10773 = vmatprep.subr.bf16.mxu0 %v13465_v45  ;;  %10805 = vmatprep.subr.bf16.mxu1 %v13468_v47 }
0x15a0   :  { %10775 = vmatpush1.bf16.msra.mxu0 %v13471_v35  ;;  %10807 = vmatpush1.bf16.msra.mxu1 %v13475_v15 }
0x15a1   :  { %10777 = vmatprep.subr.bf16.mxu0 %v13477_v62  ;;  %10809 = vmatprep.subr.bf16.mxu1 %v13480_v26 }
0x15a4   :  { %10779 = vmatpush1.bf16.msra.mxu0 %v13483_v56  ;;  %10811 = vmatpush1.bf16.msra.mxu1 %v13487_v54 }
0x15a5   :  { %10781 = vmatprep.subr.bf16.mxu0 %v13489_v37  ;;  %10813 = vmatprep.subr.bf16.mxu1 %v13492_v44 }
0x15a8   :  { %10783 = vmatpush1.bf16.msra.mxu0 %v13495_v25  ;;  %10815 = vmatpush1.bf16.msra.mxu1 %v13499_v40 }
0x15a9   :  { %10817 = vmatprep.subr.bf16.mxu0 %v13408_v8  ;;  %10849 = vmatprep.subr.bf16.mxu1 %v13410_v24 }
0x165e   :  { %v6096_v14 = vpop.f32.mrb[48].mxu0  ;;  %v6167_v46 = vpop.f32.mrb[48].mxu1 }
0x165f   :  { %v6098_v29 = vpop.f32.mrb[49].mxu0  ;;  %v6169_v42 = vpop.f32.mrb[49].mxu1 }
0x1660   :  { %v6176_v30 = vcombine.low %v6096_v14, %v6098_v29  ;;  %v6177_v50 = vcombine.low %v6167_v46, %v6169_v42 }
0x1662   :  { %v6184_v4 = vrot.slane %v6176_v30, %v12409_v28  ;;  %v6191_v9 = vrot.slane %v6177_v50, %v12409_v28 }
0x1664   :  { %v6192_v49 = vcombine.low %v6184_v4, %v6191_v9 }
0x1666   :  { %v6199_v2 = vrot.slane %v6192_v49, %v12409_v28 }
0x1668   :  { %v6201_v20 = vadd.f32 %v6199_v2, %v5965_v11 }
0x166a   :  { %v9276_v27 = vmul.f32 -1.442695, %v6201_v20  ;;  %v6209_v53 = vrot.slane %v6201_v20, 1  ;;  %v6220_v17 = vrot.slane %v6201_v20, 3  ;;  %v6217_v59 = vrot.slane %v6201_v20, 2 }
0x166c   :  { %11788 = vpow2.f32 %v9276_v27  ;;  %v9277_v1 = vmul.f32 -1.442695, %v6209_v53  ;;  %v9278_v38 = vmul.f32 -1.442695, %v6220_v17 }
0x166d   :  { %v6234_v53 = vld [vmem:[#allocation2 + $0x5] ss:$8 sm:$0xf] }
0x166e   :  { %11790 = vpow2.f32 %v9277_v1 }
0x166f   :  { %11792 = vpow2.f32 %v9278_v38 }
0x1676   :  { %v11789_v48 = vpop.eup %11788 }
0x1677   :  { %v6205_v52 = vadd.f32 1.0, %v11789_v48 }
0x1678   :  { %v11791_v57 = vpop.eup %11790 }
0x1679   :  { %11794 = vrcp.f32 %v6205_v52  ;;  %v6214_v41 = vadd.f32 1.0, %v11791_v57  ;;  %v11793_v51 = vpop.eup %11792 }
0x167a   :  { %11796 = vtanh.f32 %v6217_v59  ;;  %v6225_v55 = vadd.f32 1.0, %v11793_v51 }
0x167b   :  { %11798 = vrcp.f32 %v6214_v41 }
0x167c   :  { %11800 = vrcp.f32 %v6225_v55 }
0x1683   :  { %v11795_v61 = vpop.eup %11794 }
0x1684   :  { %v11797_v16 = vpop.eup %11796 }
0x1685   :  { %v11799_v19 = vpop.eup %11798  ;;  %v6229_v12 = vmul.f32 %v11797_v16, %v11795_v61 }
0x1686   :  { %v6228_v22 = vmul.f32 %v11799_v19, %v13510_v6  ;;  %v11801_v46 = vpop.eup %11800 }
0x1688   :  { %v13551_v14 = vadd.f32 %v6229_v12, %v6228_v22 }
0x168a   :  { %11802 = vtanh.f32 %v13551_v14 }
0x1694   :  { %v11803_v29 = vpop.eup %11802 }
0x1695   :  { %v6232_v42 = vmul.f32 %v11803_v29, %v11801_v46 }
0x1697   :  { %6233 = vst [vmem:[#allocation12 + $0x4] sm:$0x1] %v6232_v42  ;;  %6364 = vmatmul.mubr.f32.vlgmr.msra.gmra.mrb[50].mxu0 %v6232_v42  ;;  %6435 = vmatmul.mubr.f32.vlgmr.msra.gmra.mrb[50].mxu1 %v6232_v42 }
0x1698   :  { %10819 = vmatpush1.bf16.msra.mxu0 %v13412_v58  ;;  %10851 = vmatpush1.bf16.msra.mxu1 %v13415_v31 }
0x1699   :  { %10821 = vmatprep.subr.bf16.mxu0 %v13419_v10  ;;  %10853 = vmatprep.subr.bf16.mxu1 %v13422_v32 }
0x169a   :  { %6632 = vmatprep.mubr.f32.mxu0 %v12129_v0  ;;  %6703 = vmatprep.mubr.f32.mxu1 %v12129_v0 }
0x169c   :  { %10823 = vmatpush1.bf16.msra.mxu0 %v13424_v13  ;;  %10855 = vmatpush1.bf16.msra.mxu1 %v13427_v5 }
0x169d   :  { %10825 = vmatprep.subr.bf16.mxu0 %v13430_v21  ;;  %10857 = vmatprep.subr.bf16.mxu1 %v13432_v60 }
0x16a0   :  { %10827 = vmatpush1.bf16.msra.mxu0 %v13435_v3  ;;  %10859 = vmatpush1.bf16.msra.mxu1 %v13439_v33 }
0x16a1   :  { %10829 = vmatprep.subr.bf16.mxu0 %v13441_v7  ;;  %10861 = vmatprep.subr.bf16.mxu1 %v13444_v18 }
0x16a4   :  { %10831 = vmatpush1.bf16.msra.mxu0 %v13447_v34  ;;  %10863 = vmatpush1.bf16.msra.mxu1 %v13451_v63 }
0x16a5   :  { %10833 = vmatprep.subr.bf16.mxu0 %v13453_v23  ;;  %10865 = vmatprep.subr.bf16.mxu1 %v13456_v39 }
0x16a8   :  { %10835 = vmatpush1.bf16.msra.mxu0 %v13459_v43  ;;  %10867 = vmatpush1.bf16.msra.mxu1 %v13463_v36 }
0x16a9   :  { %10837 = vmatprep.subr.bf16.mxu0 %v13465_v45  ;;  %10869 = vmatprep.subr.bf16.mxu1 %v13468_v47 }
0x16ac   :  { %10839 = vmatpush1.bf16.msra.mxu0 %v13471_v35  ;;  %10871 = vmatpush1.bf16.msra.mxu1 %v13475_v15 }
0x16ad   :  { %10841 = vmatprep.subr.bf16.mxu0 %v13477_v62  ;;  %10873 = vmatprep.subr.bf16.mxu1 %v13480_v26 }
0x16b0   :  { %10843 = vmatpush1.bf16.msra.mxu0 %v13483_v56  ;;  %10875 = vmatpush1.bf16.msra.mxu1 %v13487_v54 }
0x16b1   :  { %10845 = vmatprep.subr.bf16.mxu0 %v13489_v37  ;;  %10877 = vmatprep.subr.bf16.mxu1 %v13492_v44 }
0x16b4   :  { %10847 = vmatpush1.bf16.msra.mxu0 %v13495_v25  ;;  %10879 = vmatpush1.bf16.msra.mxu1 %v13499_v40 }
0x16b5   :  { %10881 = vmatprep.subr.bf16.mxu0 %v13408_v8  ;;  %10913 = vmatprep.subr.bf16.mxu1 %v13410_v24 }
0x176a   :  { %v6365_v6 = vpop.f32.mrb[50].mxu0  ;;  %v6436_v30 = vpop.f32.mrb[50].mxu1 }
0x176b   :  { %v6367_v50 = vpop.f32.mrb[51].mxu0  ;;  %v6438_v4 = vpop.f32.mrb[51].mxu1 }
0x176c   :  { %v6445_v9 = vcombine.low %v6365_v6, %v6367_v50  ;;  %v6446_v49 = vcombine.low %v6436_v30, %v6438_v4 }
0x176e   :  { %v6453_v2 = vrot.slane %v6445_v9, %v12409_v28  ;;  %v6460_v11 = vrot.slane %v6446_v49, %v12409_v28  ;;  %v7043_v9 = vld [vmem:[#allocation11 + $0x8] sm:$0xff] }
0x176f   :  { %v7047_v49 = vld [vmem:[#allocation11 + $0x28] sm:$0xff] }
0x1770   :  { %v6461_v20 = vcombine.low %v6453_v2, %v6460_v11  ;;  %v7045_v2 = vld [vmem:[#allocation11 + $0x18] sm:$0xff]  ;;  %v13636_v11 = vpack.c.bf16 %v7047_v49, %v7043_v9 }
0x1771   :  { %v7089_v9 = vld [vmem:[#allocation11 + $0x178] sm:$0xff] }
0x1772   :  { %v6468_v27 = vrot.slane %v6461_v20, %v12409_v28  ;;  %v7049_v20 = vld [vmem:[#allocation11 + $0x38] sm:$0xff] }
0x1774   :  { %v6470_v1 = vadd.f32 %v6468_v27, %v6234_v53  ;;  %v7042_v27 = vld [vmem:[#allocation11] sm:$0xff] }
0x1775   :  { %v7046_v53 = vld [vmem:[#allocation11 + $0x20] sm:$0xff] }
0x1776   :  { %v9279_v17 = vmul.f32 -1.442695, %v6470_v1  ;;  %v6478_v38 = vrot.slane %v6470_v1, 1  ;;  %v6489_v24 = vrot.slane %v6470_v1, 3  ;;  %v6486_v52 = vrot.slane %v6470_v1, 2 }
0x1777   :  { %v13638_v1 = vpack.c.bf16 %v7049_v20, %v7045_v2 }
0x1778   :  { %11804 = vpow2.f32 %v9279_v17  ;;  %v9280_v8 = vmul.f32 -1.442695, %v6478_v38  ;;  %v9281_v48 = vmul.f32 -1.442695, %v6489_v24  ;;  %v13640_v17 = vpack.c.bf16 %v7046_v53, %v7042_v27  ;;  %v7044_v38 = vld [vmem:[#allocation11 + $0x10] sm:$0xff]  ;;  %v7082_v27 = vld [vmem:[#allocation11 + $0x140] sm:$0xff] }
0x1779   :  { %v7086_v53 = vld [vmem:[#allocation11 + $0x160] sm:$0xff] }
0x177a   :  { %11806 = vpow2.f32 %v9280_v8  ;;  %v7048_v8 = vld [vmem:[#allocation11 + $0x30] sm:$0xff] }
0x177b   :  { %11808 = vpow2.f32 %v9281_v48  ;;  %v13643_v24 = vpack.c.bf16 %v7048_v8, %v7044_v38  ;;  %v7051_v48 = vld [vmem:[#allocation11 + $0x48] sm:$0xff]  ;;  %v7084_v38 = vld [vmem:[#allocation11 + $0x150] sm:$0xff] }
0x1782   :  { %v11805_v59 = vpop.eup %11804 }
0x1783   :  { %v6474_v57 = vadd.f32 1.0, %v11805_v59  ;;  %v7055_v59 = vld [vmem:[#allocation11 + $0x68] sm:$0xff] }
0x1784   :  { %v11807_v41 = vpop.eup %11806 }
0x1785   :  { %11810 = vrcp.f32 %v6474_v57  ;;  %v6483_v51 = vadd.f32 1.0, %v11807_v41  ;;  %v11809_v61 = vpop.eup %11808  ;;  %v13647_v57 = vpack.c.bf16 %v7055_v59, %v7051_v48  ;;  %v7057_v41 = vld [vmem:[#allocation11 + $0x78] sm:$0xff]  ;;  %v7088_v48 = vld [vmem:[#allocation11 + $0x170] sm:$0xff]  ;;  %v7091_v59 = vld [vmem:[#allocation11 + $0x188] sm:$0xff] }
0x1786   :  { %11812 = vtanh.f32 %v6486_v52  ;;  %v6494_v22 = vadd.f32 1.0, %v11809_v61  ;;  %v7053_v52 = vld [vmem:[#allocation11 + $0x58] sm:$0xff]  ;;  %v7054_v61 = vld [vmem:[#allocation11 + $0x60] sm:$0xff] }
0x1787   :  { %11814 = vrcp.f32 %v6483_v51  ;;  %v7050_v51 = vld [vmem:[#allocation11 + $0x40] sm:$0xff] }
0x1788   :  { %11816 = vrcp.f32 %v6494_v22  ;;  %v7056_v22 = vld [vmem:[#allocation11 + $0x70] sm:$0xff] }
0x178f   :  { %v11811_v16 = vpop.eup %11810 }
0x1790   :  { %v11813_v19 = vpop.eup %11812 }
0x1791   :  { %v11815_v55 = vpop.eup %11814  ;;  %v6498_v46 = vmul.f32 %v11813_v19, %v11811_v16  ;;  %v13650_v16 = vpack.c.bf16 %v7057_v41, %v7053_v52  ;;  %v13652_v19 = vpack.c.bf16 %v7054_v61, %v7050_v51  ;;  %v7095_v52 = vld [vmem:[#allocation11 + $0x1a8] sm:$0xff]  ;;  %v7093_v41 = vld [vmem:[#allocation11 + $0x198] sm:$0xff]  ;;  %v13699_v61 = vpack.c.bf16 %v7086_v53, %v7082_v27 }
0x1792   :  { %v6497_v12 = vmul.f32 %v11815_v55, %v13551_v14  ;;  %v11817_v42 = vpop.eup %11816  ;;  %v7052_v55 = vld [vmem:[#allocation11 + $0x50] sm:$0xff]  ;;  %v7097_v51 = vld [vmem:[#allocation11 + $0x1b8] sm:$0xff] }
0x1793   :  { %v6772_v53 = vld [vmem:[#allocation2 + $0x7] ss:$8 sm:$0xf] }
0x1794   :  { %v13592_v29 = vadd.f32 %v6498_v46, %v6497_v12  ;;  %v7059_v12 = vld [vmem:[#allocation11 + $0x88] sm:$0xff]  ;;  %v13655_v46 = vpack.c.bf16 %v7056_v22, %v7052_v55  ;;  %v13703_v55 = vpack.c.bf16 %v7088_v48, %v7084_v38  ;;  %v13705_v22 = vpack.c.bf16 %v7095_v52, %v7091_v59 }
0x1796   :  { %11818 = vtanh.f32 %v13592_v29 }
0x17a0   :  { %v11819_v6 = vpop.eup %11818 }
0x17a1   :  { %v6501_v30 = vmul.f32 %v11819_v6, %v11817_v42  ;;  %v7061_v42 = vld [vmem:[#allocation11 + $0x98] sm:$0xff] }
0x17a2   :  { %v7065_v6 = vld [vmem:[#allocation11 + $0xb8] sm:$0xff] }
0x17a3   :  { %6502 = vst [vmem:[#allocation12 + $0x5] sm:$0x1] %v6501_v30  ;;  %6633 = vmatmul.mubr.f32.vlgmr.msra.gmra.mrb[52].mxu0 %v6501_v30  ;;  %6704 = vmatmul.mubr.f32.vlgmr.msra.gmra.mrb[52].mxu1 %v6501_v30 }
0x17a4   :  { %10883 = vmatpush1.bf16.msra.mxu0 %v13412_v58  ;;  %10915 = vmatpush1.bf16.msra.mxu1 %v13415_v31 }
0x17a5   :  { %10885 = vmatprep.subr.bf16.mxu0 %v13419_v10  ;;  %10917 = vmatprep.subr.bf16.mxu1 %v13422_v32 }
0x17a6   :  { %6901 = vmatprep.mubr.f32.mxu0 %v12129_v0  ;;  %6972 = vmatprep.mubr.f32.mxu1 %v12129_v0 }
0x17a8   :  { %10887 = vmatpush1.bf16.msra.mxu0 %v13424_v13  ;;  %10919 = vmatpush1.bf16.msra.mxu1 %v13427_v5 }
0x17a9   :  { %10889 = vmatprep.subr.bf16.mxu0 %v13430_v21  ;;  %10921 = vmatprep.subr.bf16.mxu1 %v13432_v60 }
0x17ac   :  { %10891 = vmatpush1.bf16.msra.mxu0 %v13435_v3  ;;  %10923 = vmatpush1.bf16.msra.mxu1 %v13439_v33 }
0x17ad   :  { %10893 = vmatprep.subr.bf16.mxu0 %v13441_v7  ;;  %10925 = vmatprep.subr.bf16.mxu1 %v13444_v18  ;;  %v6503_v7 = vld [vmem:[#allocation2 + $0x6] ss:$8 sm:$0xf] }
0x17b0   :  { %10895 = vmatpush1.bf16.msra.mxu0 %v13447_v34  ;;  %10927 = vmatpush1.bf16.msra.mxu1 %v13451_v63 }
0x17b1   :  { %10897 = vmatprep.subr.bf16.mxu0 %v13453_v23  ;;  %10929 = vmatprep.subr.bf16.mxu1 %v13456_v39 }
0x17b4   :  { %10899 = vmatpush1.bf16.msra.mxu0 %v13459_v43  ;;  %10931 = vmatpush1.bf16.msra.mxu1 %v13463_v36 }
0x17b5   :  { %10901 = vmatprep.subr.bf16.mxu0 %v13465_v45  ;;  %10933 = vmatprep.subr.bf16.mxu1 %v13468_v47 }
0x17b8   :  { %10903 = vmatpush1.bf16.msra.mxu0 %v13471_v35  ;;  %10935 = vmatpush1.bf16.msra.mxu1 %v13475_v15 }
0x17b9   :  { %10905 = vmatprep.subr.bf16.mxu0 %v13477_v62  ;;  %10937 = vmatprep.subr.bf16.mxu1 %v13480_v26 }
0x17bc   :  { %10907 = vmatpush1.bf16.msra.mxu0 %v13483_v56  ;;  %10939 = vmatpush1.bf16.msra.mxu1 %v13487_v54 }
0x17bd   :  { %10909 = vmatprep.subr.bf16.mxu0 %v13489_v37  ;;  %10941 = vmatprep.subr.bf16.mxu1 %v13492_v44 }
0x17c0   :  { %10911 = vmatpush1.bf16.msra.mxu0 %v13495_v25  ;;  %10943 = vmatpush1.bf16.msra.mxu1 %v13499_v40 }
0x17c1   :  { %10945 = vmatprep.subr.bf16.mxu0 %v13636_v11  ;;  %10977 = vmatprep.subr.bf16.mxu1 %v13638_v1 }
0x1876   :  { %v6634_v58 = vpop.f32.mrb[52].mxu0  ;;  %v6705_v31 = vpop.f32.mrb[52].mxu1 }
0x1877   :  { %v6636_v10 = vpop.f32.mrb[53].mxu0  ;;  %v6707_v32 = vpop.f32.mrb[53].mxu1 }
0x1878   :  { %v6714_v13 = vcombine.low %v6634_v58, %v6636_v10  ;;  %v6715_v5 = vcombine.low %v6705_v31, %v6707_v32  ;;  %v13660_v58 = vpack.c.bf16 %v7065_v6, %v7061_v42  ;;  %v7058_v31 = vld [vmem:[#allocation11 + $0x80] sm:$0xff]  ;;  %v7060_v32 = vld [vmem:[#allocation11 + $0x90] sm:$0xff]  ;;  %v13708_v6 = vpack.c.bf16 %v7097_v51, %v7093_v41 }
0x1879   :  { %v7062_v10 = vld [vmem:[#allocation11 + $0xa0] sm:$0xff]  ;;  %v7092_v42 = vld [vmem:[#allocation11 + $0x190] sm:$0xff] }
0x187a   :  { %v6722_v21 = vrot.slane %v6714_v13, %v12409_v28  ;;  %v6729_v60 = vrot.slane %v6715_v5, %v12409_v28  ;;  %v13663_v13 = vpack.c.bf16 %v7062_v10, %v7058_v31  ;;  %v7064_v5 = vld [vmem:[#allocation11 + $0xb0] sm:$0xff]  ;;  %v7099_v10 = vld [vmem:[#allocation11 + $0x1c8] sm:$0xff] }
0x187b   :  { %v7096_v31 = vld [vmem:[#allocation11 + $0x1b0] sm:$0xff] }
0x187c   :  { %v6730_v3 = vcombine.low %v6722_v21, %v6729_v60  ;;  %v7067_v21 = vld [vmem:[#allocation11 + $0xc8] sm:$0xff] }
0x187d   :  { %v7071_v60 = vld [vmem:[#allocation11 + $0xe8] sm:$0xff] }
0x187e   :  { %v6737_v33 = vrot.slane %v6730_v3, %v12409_v28  ;;  %v13667_v3 = vpack.c.bf16 %v7064_v5, %v7060_v32  ;;  %v7103_v32 = vld [vmem:[#allocation11 + $0x1e8] sm:$0xff]  ;;  %v7101_v5 = vld [vmem:[#allocation11 + $0x1d8] sm:$0xff] }
0x1880   :  { %v6739_v18 = vadd.f32 %v6737_v33, %v6503_v7  ;;  %v13669_v33 = vpack.c.bf16 %v7071_v60, %v7067_v21  ;;  %v7069_v7 = vld [vmem:[#allocation11 + $0xd8] sm:$0xff] }
0x1881   :  { %v7105_v21 = vld [vmem:[#allocation11 + $0x1f8] sm:$0xff] }
0x1882   :  { %v9282_v34 = vmul.f32 -1.442695, %v6739_v18  ;;  %v6747_v63 = vrot.slane %v6739_v18, 1  ;;  %v6758_v39 = vrot.slane %v6739_v18, 3  ;;  %v6755_v45 = vrot.slane %v6739_v18, 2  ;;  %v7073_v18 = vld [vmem:[#allocation11 + $0xf8] sm:$0xff] }
0x1884   :  { %11820 = vpow2.f32 %v9282_v34  ;;  %v9283_v23 = vmul.f32 -1.442695, %v6747_v63  ;;  %v9284_v43 = vmul.f32 -1.442695, %v6758_v39  ;;  %v7066_v34 = vld [vmem:[#allocation11 + $0xc0] sm:$0xff]  ;;  %v13672_v63 = vpack.c.bf16 %v7073_v18, %v7069_v7  ;;  %v7068_v39 = vld [vmem:[#allocation11 + $0xd0] sm:$0xff] }
0x1885   :  { %v13715_v7 = vpack.c.bf16 %v7096_v31, %v7092_v42  ;;  %v13717_v18 = vpack.c.bf16 %v7103_v32, %v7099_v10 }
0x1886   :  { %11822 = vpow2.f32 %v9283_v23  ;;  %v7070_v23 = vld [vmem:[#allocation11 + $0xe0] sm:$0xff] }
0x1887   :  { %11824 = vpow2.f32 %v9284_v43  ;;  %v7072_v43 = vld [vmem:[#allocation11 + $0xf0] sm:$0xff] }
0x188e   :  { %v11821_v36 = vpop.eup %11820 }
0x188f   :  { %v6743_v47 = vadd.f32 1.0, %v11821_v36  ;;  %v7075_v36 = vld [vmem:[#allocation11 + $0x108] sm:$0xff] }
0x1890   :  { %v11823_v35 = vpop.eup %11822 }
0x1891   :  { %11826 = vrcp.f32 %v6743_v47  ;;  %v6752_v15 = vadd.f32 1.0, %v11823_v35  ;;  %v11825_v62 = vpop.eup %11824  ;;  %v7077_v47 = vld [vmem:[#allocation11 + $0x118] sm:$0xff]  ;;  %v13675_v35 = vpack.c.bf16 %v7070_v23, %v7066_v34  ;;  %v7098_v34 = vld [vmem:[#allocation11 + $0x1c0] sm:$0xff] }
0x1892   :  { %11828 = vtanh.f32 %v6755_v45  ;;  %v6763_v37 = vadd.f32 1.0, %v11825_v62  ;;  %v7079_v45 = vld [vmem:[#allocation11 + $0x128] sm:$0xff]  ;;  %v13679_v62 = vpack.c.bf16 %v7072_v43, %v7068_v39  ;;  %v7102_v23 = vld [vmem:[#allocation11 + $0x1e0] sm:$0xff]  ;;  %v13720_v39 = vpack.c.bf16 %v7105_v21, %v7101_v5  ;;  %v7100_v43 = vld [vmem:[#allocation11 + $0x1d0] sm:$0xff] }
0x1893   :  { %11830 = vrcp.f32 %v6752_v15  ;;  %v7081_v15 = vld [vmem:[#allocation11 + $0x138] sm:$0xff] }
0x1894   :  { %11832 = vrcp.f32 %v6763_v37  ;;  %v7076_v37 = vld [vmem:[#allocation11 + $0x110] sm:$0xff] }
0x189b   :  { %v11827_v26 = vpop.eup %11826 }
0x189c   :  { %v11829_v56 = vpop.eup %11828 }
0x189d   :  { %v11831_v54 = vpop.eup %11830  ;;  %v6767_v25 = vmul.f32 %v11829_v56, %v11827_v26  ;;  %v13681_v26 = vpack.c.bf16 %v7079_v45, %v7075_v36  ;;  %v7074_v56 = vld [vmem:[#allocation11 + $0x100] sm:$0xff]  ;;  %v7104_v36 = vld [vmem:[#allocation11 + $0x1f0] sm:$0xff]  ;;  %v13723_v45 = vpack.c.bf16 %v7102_v23, %v7098_v34 }
0x189e   :  { %v6766_v44 = vmul.f32 %v11831_v54, %v13592_v29  ;;  %v11833_v14 = vpop.eup %11832  ;;  %v7063_v29 = vld [vmem:[#allocation11 + $0xa8] sm:$0xff]  ;;  %v7078_v54 = vld [vmem:[#allocation11 + $0x120] sm:$0xff] }
0x189f   :  { %v13658_v30 = vpack.c.bf16 %v7063_v29, %v7059_v12  ;;  %v13687_v49 = vpack.c.bf16 %v7078_v54, %v7074_v56  ;;  %v7090_v12 = vld [vmem:[#allocation11 + $0x180] sm:$0xff] }
0x18a0   :  { %v13631_v40 = vadd.f32 %v6767_v25, %v6766_v44  ;;  %v13684_v44 = vpack.c.bf16 %v7081_v15, %v7077_v47  ;;  %v7080_v25 = vld [vmem:[#allocation11 + $0x130] sm:$0xff]  ;;  %v7094_v29 = vld [vmem:[#allocation11 + $0x1a0] sm:$0xff]  ;;  %v13727_v47 = vpack.c.bf16 %v7104_v36, %v7100_v43 }
0x18a1   :  { %v13691_v2 = vpack.c.bf16 %v7080_v25, %v7076_v37  ;;  %v13711_v60 = vpack.c.bf16 %v7094_v29, %v7090_v12 }
0x18a2   :  { %11834 = vtanh.f32 %v13631_v40 }
0x18ac   :  { %v11835_v50 = vpop.eup %11834 }
0x18ad   :  { %v6770_v4 = vmul.f32 %v11835_v50, %v11833_v14  ;;  %v7083_v14 = vld [vmem:[#allocation11 + $0x148] sm:$0xff] }
0x18ae   :  { %v7087_v50 = vld [vmem:[#allocation11 + $0x168] sm:$0xff] }
0x18af   :  { %6771 = vst [vmem:[#allocation12 + $0x6] sm:$0x1] %v6770_v4  ;;  %6902 = vmatmul.mubr.f32.vlgmr.msra.gmra.mrb[54].mxu0 %v6770_v4  ;;  %6973 = vmatmul.mubr.f32.vlgmr.msra.gmra.mrb[54].mxu1 %v6770_v4  ;;  %v7085_v4 = vld [vmem:[#allocation11 + $0x158] sm:$0xff]  ;;  %v13693_v20 = vpack.c.bf16 %v7087_v50, %v7083_v14 }
0x18b0   :  { %7170 = vmatprep.mubr.f32.mxu0 %v12129_v0  ;;  %7241 = vmatprep.mubr.f32.mxu1 %v12129_v0  ;;  %v13696_v8 = vpack.c.bf16 %v7089_v9, %v7085_v4 }
0x18b1   :  { %10947 = vmatpush1.bf16.msra.mxu0 %v13640_v17  ;;  %10979 = vmatpush1.bf16.msra.mxu1 %v13643_v24 }
0x18b2   :  { %10949 = vmatprep.subr.bf16.mxu0 %v13647_v57  ;;  %10981 = vmatprep.subr.bf16.mxu1 %v13650_v16 }
0x18b5   :  { %10951 = vmatpush1.bf16.msra.mxu0 %v13652_v19  ;;  %10983 = vmatpush1.bf16.msra.mxu1 %v13655_v46 }
0x18b6   :  { %10953 = vmatprep.subr.bf16.mxu0 %v13658_v30  ;;  %10985 = vmatprep.subr.bf16.mxu1 %v13660_v58 }
0x18b9   :  { %10955 = vmatpush1.bf16.msra.mxu0 %v13663_v13  ;;  %10987 = vmatpush1.bf16.msra.mxu1 %v13667_v3 }
0x18ba   :  { %10957 = vmatprep.subr.bf16.mxu0 %v13669_v33  ;;  %10989 = vmatprep.subr.bf16.mxu1 %v13672_v63 }
0x18bd   :  { %10959 = vmatpush1.bf16.msra.mxu0 %v13675_v35  ;;  %10991 = vmatpush1.bf16.msra.mxu1 %v13679_v62 }
0x18be   :  { %10961 = vmatprep.subr.bf16.mxu0 %v13681_v26  ;;  %10993 = vmatprep.subr.bf16.mxu1 %v13684_v44 }
0x18c1   :  { %10963 = vmatpush1.bf16.msra.mxu0 %v13687_v49  ;;  %10995 = vmatpush1.bf16.msra.mxu1 %v13691_v2 }
0x18c2   :  { %10965 = vmatprep.subr.bf16.mxu0 %v13693_v20  ;;  %10997 = vmatprep.subr.bf16.mxu1 %v13696_v8 }
0x18c5   :  { %10967 = vmatpush1.bf16.msra.mxu0 %v13699_v61  ;;  %10999 = vmatpush1.bf16.msra.mxu1 %v13703_v55 }
0x18c6   :  { %10969 = vmatprep.subr.bf16.mxu0 %v13705_v22  ;;  %11001 = vmatprep.subr.bf16.mxu1 %v13708_v6 }
0x18c9   :  { %10971 = vmatpush1.bf16.msra.mxu0 %v13711_v60  ;;  %11003 = vmatpush1.bf16.msra.mxu1 %v13715_v7 }
0x18ca   :  { %10973 = vmatprep.subr.bf16.mxu0 %v13717_v18  ;;  %11005 = vmatprep.subr.bf16.mxu1 %v13720_v39 }
0x18cd   :  { %10975 = vmatpush1.bf16.msra.mxu0 %v13723_v45  ;;  %11007 = vmatpush1.bf16.msra.mxu1 %v13727_v47 }
0x18ce   :  { %11009 = vmatprep.subr.bf16.mxu0 %v13636_v11  ;;  %11041 = vmatprep.subr.bf16.mxu1 %v13638_v1 }
0x1982   :  { %v6903_v15 = vpop.f32.mrb[54].mxu0  ;;  %v6974_v56 = vpop.f32.mrb[54].mxu1 }
0x1983   :  { %v6905_v54 = vpop.f32.mrb[55].mxu0  ;;  %v6976_v37 = vpop.f32.mrb[55].mxu1 }
0x1984   :  { %v6983_v25 = vcombine.low %v6903_v15, %v6905_v54  ;;  %v6984_v14 = vcombine.low %v6974_v56, %v6976_v37 }
0x1986   :  { %v6991_v50 = vrot.slane %v6983_v25, %v12409_v28  ;;  %v6998_v4 = vrot.slane %v6984_v14, %v12409_v28 }
0x1988   :  { %v6999_v9 = vcombine.low %v6991_v50, %v6998_v4 }
0x198a   :  { %v7006_v27 = vrot.slane %v6999_v9, %v12409_v28 }
0x198c   :  { %v7008_v38 = vadd.f32 %v7006_v27, %v6772_v53 }
0x198e   :  { %v9285_v48 = vmul.f32 -1.442695, %v7008_v38  ;;  %v7016_v59 = vrot.slane %v7008_v38, 1  ;;  %v7027_v41 = vrot.slane %v7008_v38, 3  ;;  %v7024_v29 = vrot.slane %v7008_v38, 2 }
0x1990   :  { %11836 = vpow2.f32 %v9285_v48  ;;  %v9286_v52 = vmul.f32 -1.442695, %v7016_v59  ;;  %v9287_v51 = vmul.f32 -1.442695, %v7027_v41 }
0x1991   :  { %v7041_v59 = vld [vmem:[#allocation2 + $0x20] ss:$8 sm:$0xf] }
0x1992   :  { %11838 = vpow2.f32 %v9286_v52 }
0x1993   :  { %11840 = vpow2.f32 %v9287_v51 }
0x199a   :  { %v11837_v12 = vpop.eup %11836 }
0x199b   :  { %v7012_v42 = vadd.f32 1.0, %v11837_v12 }
0x199c   :  { %v11839_v31 = vpop.eup %11838 }
0x199d   :  { %11842 = vrcp.f32 %v7012_v42  ;;  %v7021_v10 = vadd.f32 1.0, %v11839_v31  ;;  %v11841_v32 = vpop.eup %11840 }
0x199e   :  { %11844 = vtanh.f32 %v7024_v29  ;;  %v7032_v23 = vadd.f32 1.0, %v11841_v32 }
0x199f   :  { %11846 = vrcp.f32 %v7021_v10 }
0x19a0   :  { %11848 = vrcp.f32 %v7032_v23 }
0x19a7   :  { %v11843_v5 = vpop.eup %11842 }
0x19a8   :  { %v11845_v21 = vpop.eup %11844 }
0x19a9   :  { %v11847_v34 = vpop.eup %11846  ;;  %v7036_v36 = vmul.f32 %v11845_v21, %v11843_v5 }
0x19aa   :  { %v7035_v43 = vmul.f32 %v11847_v34, %v13631_v40  ;;  %v11849_v56 = vpop.eup %11848 }
0x19ac   :  { %v13738_v15 = vadd.f32 %v7036_v36, %v7035_v43 }
0x19ae   :  { %11850 = vtanh.f32 %v13738_v15 }
0x19b8   :  { %v11851_v54 = vpop.eup %11850 }
0x19b9   :  { %v7039_v37 = vmul.f32 %v11851_v54, %v11849_v56 }
0x19bb   :  { %7040 = vst [vmem:[#allocation12 + $0x7] sm:$0x1] %v7039_v37  ;;  %7171 = vmatmul.mubr.f32.vlgmr.msra.gmra.mrb[56].mxu0 %v7039_v37  ;;  %7242 = vmatmul.mubr.f32.vlgmr.msra.gmra.mrb[56].mxu1 %v7039_v37 }
0x19bc   :  { %11011 = vmatpush1.bf16.msra.mxu0 %v13640_v17  ;;  %11043 = vmatpush1.bf16.msra.mxu1 %v13643_v24 }
0x19bd   :  { %11013 = vmatprep.subr.bf16.mxu0 %v13647_v57  ;;  %11045 = vmatprep.subr.bf16.mxu1 %v13650_v16 }
0x19be   :  { %7439 = vmatprep.mubr.f32.mxu0 %v12129_v0  ;;  %7510 = vmatprep.mubr.f32.mxu1 %v12129_v0 }
0x19c0   :  { %11015 = vmatpush1.bf16.msra.mxu0 %v13652_v19  ;;  %11047 = vmatpush1.bf16.msra.mxu1 %v13655_v46 }
0x19c1   :  { %11017 = vmatprep.subr.bf16.mxu0 %v13658_v30  ;;  %11049 = vmatprep.subr.bf16.mxu1 %v13660_v58 }
0x19c4   :  { %11019 = vmatpush1.bf16.msra.mxu0 %v13663_v13  ;;  %11051 = vmatpush1.bf16.msra.mxu1 %v13667_v3 }
0x19c5   :  { %11021 = vmatprep.subr.bf16.mxu0 %v13669_v33  ;;  %11053 = vmatprep.subr.bf16.mxu1 %v13672_v63 }
0x19c8   :  { %11023 = vmatpush1.bf16.msra.mxu0 %v13675_v35  ;;  %11055 = vmatpush1.bf16.msra.mxu1 %v13679_v62 }
0x19c9   :  { %11025 = vmatprep.subr.bf16.mxu0 %v13681_v26  ;;  %11057 = vmatprep.subr.bf16.mxu1 %v13684_v44 }
0x19cc   :  { %11027 = vmatpush1.bf16.msra.mxu0 %v13687_v49  ;;  %11059 = vmatpush1.bf16.msra.mxu1 %v13691_v2 }
0x19cd   :  { %11029 = vmatprep.subr.bf16.mxu0 %v13693_v20  ;;  %11061 = vmatprep.subr.bf16.mxu1 %v13696_v8 }
0x19d0   :  { %11031 = vmatpush1.bf16.msra.mxu0 %v13699_v61  ;;  %11063 = vmatpush1.bf16.msra.mxu1 %v13703_v55 }
0x19d1   :  { %11033 = vmatprep.subr.bf16.mxu0 %v13705_v22  ;;  %11065 = vmatprep.subr.bf16.mxu1 %v13708_v6 }
0x19d4   :  { %11035 = vmatpush1.bf16.msra.mxu0 %v13711_v60  ;;  %11067 = vmatpush1.bf16.msra.mxu1 %v13715_v7 }
0x19d5   :  { %11037 = vmatprep.subr.bf16.mxu0 %v13717_v18  ;;  %11069 = vmatprep.subr.bf16.mxu1 %v13720_v39 }
0x19d8   :  { %11039 = vmatpush1.bf16.msra.mxu0 %v13723_v45  ;;  %11071 = vmatpush1.bf16.msra.mxu1 %v13727_v47 }
0x19d9   :  { %11073 = vmatprep.subr.bf16.mxu0 %v13636_v11  ;;  %11105 = vmatprep.subr.bf16.mxu1 %v13638_v1 }
0x1a8e   :  { %v7172_v40 = vpop.f32.mrb[56].mxu0  ;;  %v7243_v25 = vpop.f32.mrb[56].mxu1 }
0x1a8f   :  { %v7174_v14 = vpop.f32.mrb[57].mxu0  ;;  %v7245_v50 = vpop.f32.mrb[57].mxu1 }
0x1a90   :  { %v7252_v4 = vcombine.low %v7172_v40, %v7174_v14  ;;  %v7253_v9 = vcombine.low %v7243_v25, %v7245_v50 }
0x1a92   :  { %v7260_v27 = vrot.slane %v7252_v4, %v12409_v28  ;;  %v7267_v53 = vrot.slane %v7253_v9, %v12409_v28 }
0x1a94   :  { %v7268_v38 = vcombine.low %v7260_v27, %v7267_v53 }
0x1a96   :  { %v7275_v48 = vrot.slane %v7268_v38, %v12409_v28 }
0x1a98   :  { %v7277_v52 = vadd.f32 %v7275_v48, %v7041_v59 }
0x1a9a   :  { %v9288_v41 = vmul.f32 -1.442695, %v7277_v52  ;;  %v7285_v51 = vrot.slane %v7277_v52, 1  ;;  %v7296_v29 = vrot.slane %v7277_v52, 3  ;;  %v7293_v10 = vrot.slane %v7277_v52, 2 }
0x1a9c   :  { %11852 = vpow2.f32 %v9288_v41  ;;  %v9289_v12 = vmul.f32 -1.442695, %v7285_v51  ;;  %v9290_v42 = vmul.f32 -1.442695, %v7296_v29 }
0x1a9d   :  { %v7310_v51 = vld [vmem:[#allocation2 + $0x21] ss:$8 sm:$0xf] }
0x1a9e   :  { %11854 = vpow2.f32 %v9289_v12 }
0x1a9f   :  { %11856 = vpow2.f32 %v9290_v42 }
0x1aa6   :  { %v11853_v31 = vpop.eup %11852 }
0x1aa7   :  { %v7281_v32 = vadd.f32 1.0, %v11853_v31 }
0x1aa8   :  { %v11855_v5 = vpop.eup %11854 }
0x1aa9   :  { %11858 = vrcp.f32 %v7281_v32  ;;  %v7290_v21 = vadd.f32 1.0, %v11855_v5  ;;  %v11857_v34 = vpop.eup %11856 }
0x1aaa   :  { %11860 = vtanh.f32 %v7293_v10  ;;  %v7301_v56 = vadd.f32 1.0, %v11857_v34 }
0x1aab   :  { %11862 = vrcp.f32 %v7290_v21 }
0x1aac   :  { %11864 = vrcp.f32 %v7301_v56 }
0x1ab3   :  { %v11859_v23 = vpop.eup %11858 }
0x1ab4   :  { %v11861_v43 = vpop.eup %11860 }
0x1ab5   :  { %v11863_v36 = vpop.eup %11862  ;;  %v7305_v37 = vmul.f32 %v11861_v43, %v11859_v23 }
0x1ab6   :  { %v7304_v54 = vmul.f32 %v11863_v36, %v13738_v15  ;;  %v11865_v25 = vpop.eup %11864 }
0x1ab8   :  { %v13779_v40 = vadd.f32 %v7305_v37, %v7304_v54 }
0x1aba   :  { %11866 = vtanh.f32 %v13779_v40 }
0x1ac4   :  { %v11867_v14 = vpop.eup %11866 }
0x1ac5   :  { %v7308_v50 = vmul.f32 %v11867_v14, %v11865_v25 }
0x1ac7   :  { %7309 = vst [vmem:[#allocation12 + $0x8] sm:$0x1] %v7308_v50  ;;  %7440 = vmatmul.mubr.f32.vlgmr.msra.gmra.mrb[58].mxu0 %v7308_v50  ;;  %7511 = vmatmul.mubr.f32.vlgmr.msra.gmra.mrb[58].mxu1 %v7308_v50 }
0x1ac8   :  { %11075 = vmatpush1.bf16.msra.mxu0 %v13640_v17  ;;  %11107 = vmatpush1.bf16.msra.mxu1 %v13643_v24 }
0x1ac9   :  { %11077 = vmatprep.subr.bf16.mxu0 %v13647_v57  ;;  %11109 = vmatprep.subr.bf16.mxu1 %v13650_v16 }
0x1aca   :  { %7708 = vmatprep.mubr.f32.mxu0 %v12129_v0  ;;  %7779 = vmatprep.mubr.f32.mxu1 %v12129_v0 }
0x1acc   :  { %11079 = vmatpush1.bf16.msra.mxu0 %v13652_v19  ;;  %11111 = vmatpush1.bf16.msra.mxu1 %v13655_v46 }
0x1acd   :  { %11081 = vmatprep.subr.bf16.mxu0 %v13658_v30  ;;  %11113 = vmatprep.subr.bf16.mxu1 %v13660_v58 }
0x1ad0   :  { %11083 = vmatpush1.bf16.msra.mxu0 %v13663_v13  ;;  %11115 = vmatpush1.bf16.msra.mxu1 %v13667_v3 }
0x1ad1   :  { %11085 = vmatprep.subr.bf16.mxu0 %v13669_v33  ;;  %11117 = vmatprep.subr.bf16.mxu1 %v13672_v63 }
0x1ad4   :  { %11087 = vmatpush1.bf16.msra.mxu0 %v13675_v35  ;;  %11119 = vmatpush1.bf16.msra.mxu1 %v13679_v62 }
0x1ad5   :  { %11089 = vmatprep.subr.bf16.mxu0 %v13681_v26  ;;  %11121 = vmatprep.subr.bf16.mxu1 %v13684_v44 }
0x1ad8   :  { %11091 = vmatpush1.bf16.msra.mxu0 %v13687_v49  ;;  %11123 = vmatpush1.bf16.msra.mxu1 %v13691_v2 }
0x1ad9   :  { %11093 = vmatprep.subr.bf16.mxu0 %v13693_v20  ;;  %11125 = vmatprep.subr.bf16.mxu1 %v13696_v8 }
0x1adc   :  { %11095 = vmatpush1.bf16.msra.mxu0 %v13699_v61  ;;  %11127 = vmatpush1.bf16.msra.mxu1 %v13703_v55 }
0x1add   :  { %11097 = vmatprep.subr.bf16.mxu0 %v13705_v22  ;;  %11129 = vmatprep.subr.bf16.mxu1 %v13708_v6 }
0x1ae0   :  { %11099 = vmatpush1.bf16.msra.mxu0 %v13711_v60  ;;  %11131 = vmatpush1.bf16.msra.mxu1 %v13715_v7 }
0x1ae1   :  { %11101 = vmatprep.subr.bf16.mxu0 %v13717_v18  ;;  %11133 = vmatprep.subr.bf16.mxu1 %v13720_v39 }
0x1ae4   :  { %11103 = vmatpush1.bf16.msra.mxu0 %v13723_v45  ;;  %11135 = vmatpush1.bf16.msra.mxu1 %v13727_v47 }
0x1ae5   :  { %11137 = vmatprep.subr.bf16.mxu0 %v13636_v11  ;;  %11169 = vmatprep.subr.bf16.mxu1 %v13638_v1 }
0x1b9a   :  { %v7441_v15 = vpop.f32.mrb[58].mxu0  ;;  %v7512_v4 = vpop.f32.mrb[58].mxu1 }
0x1b9b   :  { %v7443_v9 = vpop.f32.mrb[59].mxu0  ;;  %v7514_v27 = vpop.f32.mrb[59].mxu1 }
0x1b9c   :  { %v7521_v53 = vcombine.low %v7441_v15, %v7443_v9  ;;  %v7522_v38 = vcombine.low %v7512_v4, %v7514_v27 }
0x1b9e   :  { %v7529_v48 = vrot.slane %v7521_v53, %v12409_v28  ;;  %v7536_v59 = vrot.slane %v7522_v38, %v12409_v28  ;;  %v8119_v53 = vld [vmem:[#allocation11 + $0x8] sm:$0xff] }
0x1b9f   :  { %v8123_v38 = vld [vmem:[#allocation11 + $0x28] sm:$0xff] }
0x1ba0   :  { %v7537_v52 = vcombine.low %v7529_v48, %v7536_v59  ;;  %v8121_v48 = vld [vmem:[#allocation11 + $0x18] sm:$0xff]  ;;  %v13864_v59 = vpack.c.bf16 %v8123_v38, %v8119_v53 }
0x1ba1   :  { %v8165_v53 = vld [vmem:[#allocation11 + $0x178] sm:$0xff] }
0x1ba2   :  { %v7544_v41 = vrot.slane %v7537_v52, %v12409_v28  ;;  %v8125_v52 = vld [vmem:[#allocation11 + $0x38] sm:$0xff] }
0x1ba4   :  { %v7546_v12 = vadd.f32 %v7544_v41, %v7310_v51  ;;  %v8118_v41 = vld [vmem:[#allocation11] sm:$0xff] }
0x1ba5   :  { %v8122_v51 = vld [vmem:[#allocation11 + $0x20] sm:$0xff] }
0x1ba6   :  { %v9291_v29 = vmul.f32 -1.442695, %v7546_v12  ;;  %v7554_v42 = vrot.slane %v7546_v12, 1  ;;  %v7565_v1 = vrot.slane %v7546_v12, 3  ;;  %v7562_v32 = vrot.slane %v7546_v12, 2 }
0x1ba7   :  { %v13866_v12 = vpack.c.bf16 %v8125_v52, %v8121_v48 }
0x1ba8   :  { %11868 = vpow2.f32 %v9291_v29  ;;  %v9292_v11 = vmul.f32 -1.442695, %v7554_v42  ;;  %v9293_v31 = vmul.f32 -1.442695, %v7565_v1  ;;  %v13868_v29 = vpack.c.bf16 %v8122_v51, %v8118_v41  ;;  %v8120_v42 = vld [vmem:[#allocation11 + $0x10] sm:$0xff]  ;;  %v8158_v41 = vld [vmem:[#allocation11 + $0x140] sm:$0xff] }
0x1ba9   :  { %v8162_v51 = vld [vmem:[#allocation11 + $0x160] sm:$0xff] }
0x1baa   :  { %11870 = vpow2.f32 %v9292_v11  ;;  %v8124_v11 = vld [vmem:[#allocation11 + $0x30] sm:$0xff] }
0x1bab   :  { %11872 = vpow2.f32 %v9293_v31  ;;  %v13871_v1 = vpack.c.bf16 %v8124_v11, %v8120_v42  ;;  %v8127_v31 = vld [vmem:[#allocation11 + $0x48] sm:$0xff]  ;;  %v8160_v42 = vld [vmem:[#allocation11 + $0x150] sm:$0xff] }
0x1bb2   :  { %v11869_v10 = vpop.eup %11868 }
0x1bb3   :  { %v7550_v5 = vadd.f32 1.0, %v11869_v10  ;;  %v8131_v10 = vld [vmem:[#allocation11 + $0x68] sm:$0xff] }
0x1bb4   :  { %v11871_v21 = vpop.eup %11870 }
0x1bb5   :  { %11874 = vrcp.f32 %v7550_v5  ;;  %v7559_v34 = vadd.f32 1.0, %v11871_v21  ;;  %v11873_v23 = vpop.eup %11872  ;;  %v13875_v5 = vpack.c.bf16 %v8131_v10, %v8127_v31  ;;  %v8133_v21 = vld [vmem:[#allocation11 + $0x78] sm:$0xff]  ;;  %v8164_v31 = vld [vmem:[#allocation11 + $0x170] sm:$0xff]  ;;  %v8167_v10 = vld [vmem:[#allocation11 + $0x188] sm:$0xff] }
0x1bb6   :  { %11876 = vtanh.f32 %v7562_v32  ;;  %v7570_v54 = vadd.f32 1.0, %v11873_v23  ;;  %v8129_v32 = vld [vmem:[#allocation11 + $0x58] sm:$0xff]  ;;  %v8130_v23 = vld [vmem:[#allocation11 + $0x60] sm:$0xff] }
0x1bb7   :  { %11878 = vrcp.f32 %v7559_v34  ;;  %v8126_v34 = vld [vmem:[#allocation11 + $0x40] sm:$0xff] }
0x1bb8   :  { %11880 = vrcp.f32 %v7570_v54  ;;  %v8132_v54 = vld [vmem:[#allocation11 + $0x70] sm:$0xff] }
0x1bbf   :  { %v11875_v43 = vpop.eup %11874 }
0x1bc0   :  { %v11877_v36 = vpop.eup %11876 }
0x1bc1   :  { %v11879_v56 = vpop.eup %11878  ;;  %v7574_v25 = vmul.f32 %v11877_v36, %v11875_v43  ;;  %v13878_v43 = vpack.c.bf16 %v8133_v21, %v8129_v32  ;;  %v13880_v36 = vpack.c.bf16 %v8130_v23, %v8126_v34  ;;  %v8171_v32 = vld [vmem:[#allocation11 + $0x1a8] sm:$0xff]  ;;  %v8169_v21 = vld [vmem:[#allocation11 + $0x198] sm:$0xff]  ;;  %v13927_v23 = vpack.c.bf16 %v8162_v51, %v8158_v41 }
0x1bc2   :  { %v7573_v37 = vmul.f32 %v11879_v56, %v13779_v40  ;;  %v11881_v50 = vpop.eup %11880  ;;  %v8128_v56 = vld [vmem:[#allocation11 + $0x50] sm:$0xff]  ;;  %v8173_v34 = vld [vmem:[#allocation11 + $0x1b8] sm:$0xff] }
0x1bc3   :  { %v7848_v51 = vld [vmem:[#allocation2 + $0x23] ss:$8 sm:$0xf] }
0x1bc4   :  { %v13820_v14 = vadd.f32 %v7574_v25, %v7573_v37  ;;  %v8135_v37 = vld [vmem:[#allocation11 + $0x88] sm:$0xff]  ;;  %v13883_v25 = vpack.c.bf16 %v8132_v54, %v8128_v56  ;;  %v13931_v56 = vpack.c.bf16 %v8164_v31, %v8160_v42  ;;  %v13933_v54 = vpack.c.bf16 %v8171_v32, %v8167_v10 }
0x1bc6   :  { %11882 = vtanh.f32 %v13820_v14 }
0x1bd0   :  { %v11883_v15 = vpop.eup %11882 }
0x1bd1   :  { %v7577_v4 = vmul.f32 %v11883_v15, %v11881_v50  ;;  %v8137_v50 = vld [vmem:[#allocation11 + $0x98] sm:$0xff] }
0x1bd2   :  { %v8141_v15 = vld [vmem:[#allocation11 + $0xb8] sm:$0xff] }
0x1bd3   :  { %7578 = vst [vmem:[#allocation12 + $0x9] sm:$0x1] %v7577_v4  ;;  %7709 = vmatmul.mubr.f32.vlgmr.msra.gmra.mrb[60].mxu0 %v7577_v4  ;;  %7780 = vmatmul.mubr.f32.vlgmr.msra.gmra.mrb[60].mxu1 %v7577_v4 }
0x1bd4   :  { %11139 = vmatpush1.bf16.msra.mxu0 %v13640_v17  ;;  %11171 = vmatpush1.bf16.msra.mxu1 %v13643_v24 }
0x1bd5   :  { %11141 = vmatprep.subr.bf16.mxu0 %v13647_v57  ;;  %11173 = vmatprep.subr.bf16.mxu1 %v13650_v16 }
0x1bd6   :  { %7977 = vmatprep.mubr.f32.mxu0 %v12129_v0  ;;  %8048 = vmatprep.mubr.f32.mxu1 %v12129_v0 }
0x1bd8   :  { %11143 = vmatpush1.bf16.msra.mxu0 %v13652_v19  ;;  %11175 = vmatpush1.bf16.msra.mxu1 %v13655_v46 }
0x1bd9   :  { %11145 = vmatprep.subr.bf16.mxu0 %v13658_v30  ;;  %11177 = vmatprep.subr.bf16.mxu1 %v13660_v58 }
0x1bdc   :  { %11147 = vmatpush1.bf16.msra.mxu0 %v13663_v13  ;;  %11179 = vmatpush1.bf16.msra.mxu1 %v13667_v3 }
0x1bdd   :  { %11149 = vmatprep.subr.bf16.mxu0 %v13669_v33  ;;  %11181 = vmatprep.subr.bf16.mxu1 %v13672_v63  ;;  %v7579_v33 = vld [vmem:[#allocation2 + $0x22] ss:$8 sm:$0xf] }
0x1be0   :  { %11151 = vmatpush1.bf16.msra.mxu0 %v13675_v35  ;;  %11183 = vmatpush1.bf16.msra.mxu1 %v13679_v62 }
0x1be1   :  { %11153 = vmatprep.subr.bf16.mxu0 %v13681_v26  ;;  %11185 = vmatprep.subr.bf16.mxu1 %v13684_v44 }
0x1be4   :  { %11155 = vmatpush1.bf16.msra.mxu0 %v13687_v49  ;;  %11187 = vmatpush1.bf16.msra.mxu1 %v13691_v2 }
0x1be5   :  { %11157 = vmatprep.subr.bf16.mxu0 %v13693_v20  ;;  %11189 = vmatprep.subr.bf16.mxu1 %v13696_v8 }
0x1be8   :  { %11159 = vmatpush1.bf16.msra.mxu0 %v13699_v61  ;;  %11191 = vmatpush1.bf16.msra.mxu1 %v13703_v55 }
0x1be9   :  { %11161 = vmatprep.subr.bf16.mxu0 %v13705_v22  ;;  %11193 = vmatprep.subr.bf16.mxu1 %v13708_v6 }
0x1bec   :  { %11163 = vmatpush1.bf16.msra.mxu0 %v13711_v60  ;;  %11195 = vmatpush1.bf16.msra.mxu1 %v13715_v7 }
0x1bed   :  { %11165 = vmatprep.subr.bf16.mxu0 %v13717_v18  ;;  %11197 = vmatprep.subr.bf16.mxu1 %v13720_v39 }
0x1bf0   :  { %11167 = vmatpush1.bf16.msra.mxu0 %v13723_v45  ;;  %11199 = vmatpush1.bf16.msra.mxu1 %v13727_v47 }
0x1bf1   :  { %11201 = vmatprep.subr.bf16.mxu0 %v13864_v59  ;;  %11233 = vmatprep.subr.bf16.mxu1 %v13866_v12 }
0x1ca6   :  { %v7710_v17 = vpop.f32.mrb[60].mxu0  ;;  %v7781_v24 = vpop.f32.mrb[60].mxu1 }
0x1ca7   :  { %v7712_v57 = vpop.f32.mrb[61].mxu0  ;;  %v7783_v16 = vpop.f32.mrb[61].mxu1 }
0x1ca8   :  { %v7790_v19 = vcombine.low %v7710_v17, %v7712_v57  ;;  %v7791_v46 = vcombine.low %v7781_v24, %v7783_v16  ;;  %v13888_v17 = vpack.c.bf16 %v8141_v15, %v8137_v50  ;;  %v8134_v24 = vld [vmem:[#allocation11 + $0x80] sm:$0xff]  ;;  %v8136_v16 = vld [vmem:[#allocation11 + $0x90] sm:$0xff]  ;;  %v13936_v15 = vpack.c.bf16 %v8173_v34, %v8169_v21 }
0x1ca9   :  { %v8138_v57 = vld [vmem:[#allocation11 + $0xa0] sm:$0xff]  ;;  %v8168_v50 = vld [vmem:[#allocation11 + $0x190] sm:$0xff] }
0x1caa   :  { %v7798_v30 = vrot.slane %v7790_v19, %v12409_v28  ;;  %v7805_v58 = vrot.slane %v7791_v46, %v12409_v28  ;;  %v13891_v19 = vpack.c.bf16 %v8138_v57, %v8134_v24  ;;  %v8140_v46 = vld [vmem:[#allocation11 + $0xb0] sm:$0xff]  ;;  %v8175_v57 = vld [vmem:[#allocation11 + $0x1c8] sm:$0xff] }
0x1cab   :  { %v8172_v24 = vld [vmem:[#allocation11 + $0x1b0] sm:$0xff] }
0x1cac   :  { %v7806_v13 = vcombine.low %v7798_v30, %v7805_v58  ;;  %v8143_v30 = vld [vmem:[#allocation11 + $0xc8] sm:$0xff] }
0x1cad   :  { %v8147_v58 = vld [vmem:[#allocation11 + $0xe8] sm:$0xff] }
0x1cae   :  { %v7813_v3 = vrot.slane %v7806_v13, %v12409_v28  ;;  %v13895_v13 = vpack.c.bf16 %v8140_v46, %v8136_v16  ;;  %v8179_v16 = vld [vmem:[#allocation11 + $0x1e8] sm:$0xff]  ;;  %v8177_v46 = vld [vmem:[#allocation11 + $0x1d8] sm:$0xff] }
0x1cb0   :  { %v7815_v63 = vadd.f32 %v7813_v3, %v7579_v33  ;;  %v13897_v3 = vpack.c.bf16 %v8147_v58, %v8143_v30  ;;  %v8145_v33 = vld [vmem:[#allocation11 + $0xd8] sm:$0xff] }
0x1cb1   :  { %v8181_v30 = vld [vmem:[#allocation11 + $0x1f8] sm:$0xff] }
0x1cb2   :  { %v9294_v35 = vmul.f32 -1.442695, %v7815_v63  ;;  %v7823_v62 = vrot.slane %v7815_v63, 1  ;;  %v7834_v44 = vrot.slane %v7815_v63, 3  ;;  %v7831_v20 = vrot.slane %v7815_v63, 2  ;;  %v8149_v63 = vld [vmem:[#allocation11 + $0xf8] sm:$0xff] }
0x1cb4   :  { %11884 = vpow2.f32 %v9294_v35  ;;  %v9295_v26 = vmul.f32 -1.442695, %v7823_v62  ;;  %v9296_v49 = vmul.f32 -1.442695, %v7834_v44  ;;  %v8142_v35 = vld [vmem:[#allocation11 + $0xc0] sm:$0xff]  ;;  %v13900_v62 = vpack.c.bf16 %v8149_v63, %v8145_v33  ;;  %v8144_v44 = vld [vmem:[#allocation11 + $0xd0] sm:$0xff] }
0x1cb5   :  { %v13943_v33 = vpack.c.bf16 %v8172_v24, %v8168_v50  ;;  %v13945_v63 = vpack.c.bf16 %v8179_v16, %v8175_v57 }
0x1cb6   :  { %11886 = vpow2.f32 %v9295_v26  ;;  %v8146_v26 = vld [vmem:[#allocation11 + $0xe0] sm:$0xff] }
0x1cb7   :  { %11888 = vpow2.f32 %v9296_v49  ;;  %v8148_v49 = vld [vmem:[#allocation11 + $0xf0] sm:$0xff] }
0x1cbe   :  { %v11885_v2 = vpop.eup %11884 }
0x1cbf   :  { %v7819_v8 = vadd.f32 1.0, %v11885_v2  ;;  %v8151_v2 = vld [vmem:[#allocation11 + $0x108] sm:$0xff] }
0x1cc0   :  { %v11887_v61 = vpop.eup %11886 }
0x1cc1   :  { %11890 = vrcp.f32 %v7819_v8  ;;  %v7828_v55 = vadd.f32 1.0, %v11887_v61  ;;  %v11889_v22 = vpop.eup %11888  ;;  %v8153_v8 = vld [vmem:[#allocation11 + $0x118] sm:$0xff]  ;;  %v13903_v61 = vpack.c.bf16 %v8146_v26, %v8142_v35  ;;  %v8174_v35 = vld [vmem:[#allocation11 + $0x1c0] sm:$0xff] }
0x1cc2   :  { %11892 = vtanh.f32 %v7831_v20  ;;  %v7839_v18 = vadd.f32 1.0, %v11889_v22  ;;  %v8155_v20 = vld [vmem:[#allocation11 + $0x128] sm:$0xff]  ;;  %v13907_v22 = vpack.c.bf16 %v8148_v49, %v8144_v44  ;;  %v8178_v26 = vld [vmem:[#allocation11 + $0x1e0] sm:$0xff]  ;;  %v13948_v44 = vpack.c.bf16 %v8181_v30, %v8177_v46  ;;  %v8176_v49 = vld [vmem:[#allocation11 + $0x1d0] sm:$0xff] }
0x1cc3   :  { %11894 = vrcp.f32 %v7828_v55  ;;  %v8157_v55 = vld [vmem:[#allocation11 + $0x138] sm:$0xff] }
0x1cc4   :  { %11896 = vrcp.f32 %v7839_v18  ;;  %v8152_v18 = vld [vmem:[#allocation11 + $0x110] sm:$0xff] }
0x1ccb   :  { %v11891_v6 = vpop.eup %11890 }
0x1ccc   :  { %v11893_v60 = vpop.eup %11892 }
0x1ccd   :  { %v11895_v7 = vpop.eup %11894  ;;  %v7843_v45 = vmul.f32 %v11893_v60, %v11891_v6  ;;  %v13909_v6 = vpack.c.bf16 %v8155_v20, %v8151_v2  ;;  %v8150_v60 = vld [vmem:[#allocation11 + $0x100] sm:$0xff]  ;;  %v8180_v2 = vld [vmem:[#allocation11 + $0x1f0] sm:$0xff]  ;;  %v13951_v20 = vpack.c.bf16 %v8178_v26, %v8174_v35 }
0x1cce   :  { %v7842_v39 = vmul.f32 %v11895_v7, %v13820_v14  ;;  %v11897_v40 = vpop.eup %11896  ;;  %v8139_v14 = vld [vmem:[#allocation11 + $0xa8] sm:$0xff]  ;;  %v8154_v7 = vld [vmem:[#allocation11 + $0x120] sm:$0xff] }
0x1ccf   :  { %v13886_v4 = vpack.c.bf16 %v8139_v14, %v8135_v37  ;;  %v13915_v38 = vpack.c.bf16 %v8154_v7, %v8150_v60  ;;  %v8166_v37 = vld [vmem:[#allocation11 + $0x180] sm:$0xff] }
0x1cd0   :  { %v13859_v47 = vadd.f32 %v7843_v45, %v7842_v39  ;;  %v13912_v39 = vpack.c.bf16 %v8157_v55, %v8153_v8  ;;  %v8156_v45 = vld [vmem:[#allocation11 + $0x130] sm:$0xff]  ;;  %v8170_v14 = vld [vmem:[#allocation11 + $0x1a0] sm:$0xff]  ;;  %v13955_v8 = vpack.c.bf16 %v8180_v2, %v8176_v49 }
0x1cd1   :  { %v13919_v48 = vpack.c.bf16 %v8156_v45, %v8152_v18  ;;  %v13939_v58 = vpack.c.bf16 %v8170_v14, %v8166_v37 }
0x1cd2   :  { %11898 = vtanh.f32 %v13859_v47 }
0x1cdc   :  { %v11899_v9 = vpop.eup %11898 }
0x1cdd   :  { %v7846_v27 = vmul.f32 %v11899_v9, %v11897_v40  ;;  %v8159_v40 = vld [vmem:[#allocation11 + $0x148] sm:$0xff] }
0x1cde   :  { %v8163_v9 = vld [vmem:[#allocation11 + $0x168] sm:$0xff] }
0x1cdf   :  { %7847 = vst [vmem:[#allocation12 + $0xa] sm:$0x1] %v7846_v27  ;;  %7978 = vmatmul.mubr.f32.vlgmr.msra.gmra.mrb[62].mxu0 %v7846_v27  ;;  %8049 = vmatmul.mubr.f32.vlgmr.msra.gmra.mrb[62].mxu1 %v7846_v27  ;;  %v8161_v27 = vld [vmem:[#allocation11 + $0x158] sm:$0xff]  ;;  %v13921_v52 = vpack.c.bf16 %v8163_v9, %v8159_v40 }
0x1ce0   :  { %8246 = vmatprep.mubr.f32.mxu0 %v12129_v0  ;;  %8317 = vmatprep.mubr.f32.mxu1 %v12129_v0  ;;  %v13924_v11 = vpack.c.bf16 %v8165_v53, %v8161_v27 }
0x1ce1   :  { %11203 = vmatpush1.bf16.msra.mxu0 %v13868_v29  ;;  %11235 = vmatpush1.bf16.msra.mxu1 %v13871_v1 }
0x1ce2   :  { %11205 = vmatprep.subr.bf16.mxu0 %v13875_v5  ;;  %11237 = vmatprep.subr.bf16.mxu1 %v13878_v43 }
0x1ce5   :  { %11207 = vmatpush1.bf16.msra.mxu0 %v13880_v36  ;;  %11239 = vmatpush1.bf16.msra.mxu1 %v13883_v25 }
0x1ce6   :  { %11209 = vmatprep.subr.bf16.mxu0 %v13886_v4  ;;  %11241 = vmatprep.subr.bf16.mxu1 %v13888_v17 }
0x1ce9   :  { %11211 = vmatpush1.bf16.msra.mxu0 %v13891_v19  ;;  %11243 = vmatpush1.bf16.msra.mxu1 %v13895_v13 }
0x1cea   :  { %11213 = vmatprep.subr.bf16.mxu0 %v13897_v3  ;;  %11245 = vmatprep.subr.bf16.mxu1 %v13900_v62 }
0x1ced   :  { %11215 = vmatpush1.bf16.msra.mxu0 %v13903_v61  ;;  %11247 = vmatpush1.bf16.msra.mxu1 %v13907_v22 }
0x1cee   :  { %11217 = vmatprep.subr.bf16.mxu0 %v13909_v6  ;;  %11249 = vmatprep.subr.bf16.mxu1 %v13912_v39 }
0x1cf1   :  { %11219 = vmatpush1.bf16.msra.mxu0 %v13915_v38  ;;  %11251 = vmatpush1.bf16.msra.mxu1 %v13919_v48 }
0x1cf2   :  { %11221 = vmatprep.subr.bf16.mxu0 %v13921_v52  ;;  %11253 = vmatprep.subr.bf16.mxu1 %v13924_v11 }
0x1cf5   :  { %11223 = vmatpush1.bf16.msra.mxu0 %v13927_v23  ;;  %11255 = vmatpush1.bf16.msra.mxu1 %v13931_v56 }
0x1cf6   :  { %11225 = vmatprep.subr.bf16.mxu0 %v13933_v54  ;;  %11257 = vmatprep.subr.bf16.mxu1 %v13936_v15 }
0x1cf9   :  { %11227 = vmatpush1.bf16.msra.mxu0 %v13939_v58  ;;  %11259 = vmatpush1.bf16.msra.mxu1 %v13943_v33 }
0x1cfa   :  { %11229 = vmatprep.subr.bf16.mxu0 %v13945_v63  ;;  %11261 = vmatprep.subr.bf16.mxu1 %v13948_v44 }
0x1cfd   :  { %11231 = vmatpush1.bf16.msra.mxu0 %v13951_v20  ;;  %11263 = vmatpush1.bf16.msra.mxu1 %v13955_v8 }
0x1cfe   :  { %11265 = vmatprep.subr.bf16.mxu0 %v13864_v59  ;;  %11297 = vmatprep.subr.bf16.mxu1 %v13866_v12 }
0x1db2   :  { %v7979_v55 = vpop.f32.mrb[62].mxu0  ;;  %v8050_v60 = vpop.f32.mrb[62].mxu1 }
0x1db3   :  { %v7981_v7 = vpop.f32.mrb[63].mxu0  ;;  %v8052_v18 = vpop.f32.mrb[63].mxu1 }
0x1db4   :  { %v8059_v45 = vcombine.low %v7979_v55, %v7981_v7  ;;  %v8060_v40 = vcombine.low %v8050_v60, %v8052_v18 }
0x1db6   :  { %v8067_v9 = vrot.slane %v8059_v45, %v12409_v28  ;;  %v8074_v27 = vrot.slane %v8060_v40, %v12409_v28 }
0x1db8   :  { %v8075_v53 = vcombine.low %v8067_v9, %v8074_v27 }
0x1dba   :  { %v8082_v41 = vrot.slane %v8075_v53, %v12409_v28 }
0x1dbc   :  { %v8084_v42 = vadd.f32 %v8082_v41, %v7848_v51 }
0x1dbe   :  { %v9297_v31 = vmul.f32 -1.442695, %v8084_v42  ;;  %v8092_v10 = vrot.slane %v8084_v42, 1  ;;  %v8103_v21 = vrot.slane %v8084_v42, 3  ;;  %v8100_v14 = vrot.slane %v8084_v42, 2 }
0x1dc0   :  { %11900 = vpow2.f32 %v9297_v31  ;;  %v9298_v32 = vmul.f32 -1.442695, %v8092_v10  ;;  %v9299_v34 = vmul.f32 -1.442695, %v8103_v21 }
0x1dc1   :  { %v8117_v10 = vld [vmem:[#allocation2 + $0x24] ss:$8 sm:$0xf] }
0x1dc2   :  { %11902 = vpow2.f32 %v9298_v32 }
0x1dc3   :  { %11904 = vpow2.f32 %v9299_v34 }
0x1dca   :  { %v11901_v37 = vpop.eup %11900 }
0x1dcb   :  { %v8088_v50 = vadd.f32 1.0, %v11901_v37 }
0x1dcc   :  { %v11903_v24 = vpop.eup %11902 }
0x1dcd   :  { %11906 = vrcp.f32 %v8088_v50  ;;  %v8097_v57 = vadd.f32 1.0, %v11903_v24  ;;  %v11905_v16 = vpop.eup %11904 }
0x1dce   :  { %11908 = vtanh.f32 %v8100_v14  ;;  %v8108_v26 = vadd.f32 1.0, %v11905_v16 }
0x1dcf   :  { %11910 = vrcp.f32 %v8097_v57 }
0x1dd0   :  { %11912 = vrcp.f32 %v8108_v26 }
0x1dd7   :  { %v11907_v46 = vpop.eup %11906 }
0x1dd8   :  { %v11909_v30 = vpop.eup %11908 }
0x1dd9   :  { %v11911_v35 = vpop.eup %11910  ;;  %v8112_v2 = vmul.f32 %v11909_v30, %v11907_v46 }
0x1dda   :  { %v8111_v49 = vmul.f32 %v11911_v35, %v13859_v47  ;;  %v11913_v60 = vpop.eup %11912 }
0x1ddc   :  { %v13966_v55 = vadd.f32 %v8112_v2, %v8111_v49 }
0x1dde   :  { %11914 = vtanh.f32 %v13966_v55 }
0x1de8   :  { %v11915_v7 = vpop.eup %11914 }
0x1de9   :  { %v8115_v18 = vmul.f32 %v11915_v7, %v11913_v60 }
0x1deb   :  { %8116 = vst [vmem:[#allocation12 + $0xb] sm:$0x1] %v8115_v18  ;;  %8247 = vmatmul.mubr.f32.vlgmr.msra.gmra.mrb[64].mxu0 %v8115_v18  ;;  %8318 = vmatmul.mubr.f32.vlgmr.msra.gmra.mrb[64].mxu1 %v8115_v18 }
0x1dec   :  { %11267 = vmatpush1.bf16.msra.mxu0 %v13868_v29  ;;  %11299 = vmatpush1.bf16.msra.mxu1 %v13871_v1 }
0x1ded   :  { %11269 = vmatprep.subr.bf16.mxu0 %v13875_v5  ;;  %11301 = vmatprep.subr.bf16.mxu1 %v13878_v43 }
0x1dee   :  { %8515 = vmatprep.mubr.f32.mxu0 %v12129_v0  ;;  %8586 = vmatprep.mubr.f32.mxu1 %v12129_v0 }
0x1df0   :  { %11271 = vmatpush1.bf16.msra.mxu0 %v13880_v36  ;;  %11303 = vmatpush1.bf16.msra.mxu1 %v13883_v25 }
0x1df1   :  { %11273 = vmatprep.subr.bf16.mxu0 %v13886_v4  ;;  %11305 = vmatprep.subr.bf16.mxu1 %v13888_v17 }
0x1df4   :  { %11275 = vmatpush1.bf16.msra.mxu0 %v13891_v19  ;;  %11307 = vmatpush1.bf16.msra.mxu1 %v13895_v13 }
0x1df5   :  { %11277 = vmatprep.subr.bf16.mxu0 %v13897_v3  ;;  %11309 = vmatprep.subr.bf16.mxu1 %v13900_v62 }
0x1df8   :  { %11279 = vmatpush1.bf16.msra.mxu0 %v13903_v61  ;;  %11311 = vmatpush1.bf16.msra.mxu1 %v13907_v22 }
0x1df9   :  { %11281 = vmatprep.subr.bf16.mxu0 %v13909_v6  ;;  %11313 = vmatprep.subr.bf16.mxu1 %v13912_v39 }
0x1dfc   :  { %11283 = vmatpush1.bf16.msra.mxu0 %v13915_v38  ;;  %11315 = vmatpush1.bf16.msra.mxu1 %v13919_v48 }
0x1dfd   :  { %11285 = vmatprep.subr.bf16.mxu0 %v13921_v52  ;;  %11317 = vmatprep.subr.bf16.mxu1 %v13924_v11 }
0x1e00   :  { %11287 = vmatpush1.bf16.msra.mxu0 %v13927_v23  ;;  %11319 = vmatpush1.bf16.msra.mxu1 %v13931_v56 }
0x1e01   :  { %11289 = vmatprep.subr.bf16.mxu0 %v13933_v54  ;;  %11321 = vmatprep.subr.bf16.mxu1 %v13936_v15 }
0x1e04   :  { %11291 = vmatpush1.bf16.msra.mxu0 %v13939_v58  ;;  %11323 = vmatpush1.bf16.msra.mxu1 %v13943_v33 }
0x1e05   :  { %11293 = vmatprep.subr.bf16.mxu0 %v13945_v63  ;;  %11325 = vmatprep.subr.bf16.mxu1 %v13948_v44 }
0x1e08   :  { %11295 = vmatpush1.bf16.msra.mxu0 %v13951_v20  ;;  %11327 = vmatpush1.bf16.msra.mxu1 %v13955_v8 }
0x1e09   :  { %11329 = vmatprep.subr.bf16.mxu0 %v13864_v59  ;;  %11361 = vmatprep.subr.bf16.mxu1 %v13866_v12 }
0x1ebe   :  { %v8248_v47 = vpop.f32.mrb[64].mxu0  ;;  %v8319_v45 = vpop.f32.mrb[64].mxu1 }
0x1ebf   :  { %v8250_v40 = vpop.f32.mrb[65].mxu0  ;;  %v8321_v9 = vpop.f32.mrb[65].mxu1 }
0x1ec0   :  { %v8328_v27 = vcombine.low %v8248_v47, %v8250_v40  ;;  %v8329_v53 = vcombine.low %v8319_v45, %v8321_v9 }
0x1ec2   :  { %v8336_v41 = vrot.slane %v8328_v27, %v12409_v28  ;;  %v8343_v51 = vrot.slane %v8329_v53, %v12409_v28 }
0x1ec4   :  { %v8344_v42 = vcombine.low %v8336_v41, %v8343_v51 }
0x1ec6   :  { %v8351_v31 = vrot.slane %v8344_v42, %v12409_v28 }
0x1ec8   :  { %v8353_v32 = vadd.f32 %v8351_v31, %v8117_v10 }
0x1eca   :  { %v9300_v21 = vmul.f32 -1.442695, %v8353_v32  ;;  %v8361_v34 = vrot.slane %v8353_v32, 1  ;;  %v8372_v14 = vrot.slane %v8353_v32, 3  ;;  %v8369_v57 = vrot.slane %v8353_v32, 2 }
0x1ecc   :  { %11916 = vpow2.f32 %v9300_v21  ;;  %v9301_v37 = vmul.f32 -1.442695, %v8361_v34  ;;  %v9302_v50 = vmul.f32 -1.442695, %v8372_v14 }
0x1ecd   :  { %v8386_v34 = vld [vmem:[#allocation2 + $0x25] ss:$8 sm:$0xf] }
0x1ece   :  { %11918 = vpow2.f32 %v9301_v37 }
0x1ecf   :  { %11920 = vpow2.f32 %v9302_v50 }
0x1ed6   :  { %v11917_v24 = vpop.eup %11916 }
0x1ed7   :  { %v8357_v16 = vadd.f32 1.0, %v11917_v24 }
0x1ed8   :  { %v11919_v46 = vpop.eup %11918 }
0x1ed9   :  { %11922 = vrcp.f32 %v8357_v16  ;;  %v8366_v30 = vadd.f32 1.0, %v11919_v46  ;;  %v11921_v35 = vpop.eup %11920 }
0x1eda   :  { %11924 = vtanh.f32 %v8369_v57  ;;  %v8377_v60 = vadd.f32 1.0, %v11921_v35 }
0x1edb   :  { %11926 = vrcp.f32 %v8366_v30 }
0x1edc   :  { %11928 = vrcp.f32 %v8377_v60 }
0x1ee3   :  { %v11923_v26 = vpop.eup %11922 }
0x1ee4   :  { %v11925_v49 = vpop.eup %11924 }
0x1ee5   :  { %v11927_v2 = vpop.eup %11926  ;;  %v8381_v18 = vmul.f32 %v11925_v49, %v11923_v26 }
0x1ee6   :  { %v8380_v7 = vmul.f32 %v11927_v2, %v13966_v55  ;;  %v11929_v45 = vpop.eup %11928 }
0x1ee8   :  { %v14007_v47 = vadd.f32 %v8381_v18, %v8380_v7 }
0x1eea   :  { %11930 = vtanh.f32 %v14007_v47 }
0x1ef4   :  { %v11931_v40 = vpop.eup %11930 }
0x1ef5   :  { %v8384_v9 = vmul.f32 %v11931_v40, %v11929_v45 }
0x1ef7   :  { %8385 = vst [vmem:[#allocation12 + $0xc] sm:$0x1] %v8384_v9  ;;  %8516 = vmatmul.mubr.f32.vlgmr.msra.gmra.mrb[66].mxu0 %v8384_v9  ;;  %8587 = vmatmul.mubr.f32.vlgmr.msra.gmra.mrb[66].mxu1 %v8384_v9 }
0x1ef8   :  { %11331 = vmatpush1.bf16.msra.mxu0 %v13868_v29  ;;  %11363 = vmatpush1.bf16.msra.mxu1 %v13871_v1 }
0x1ef9   :  { %11333 = vmatprep.subr.bf16.mxu0 %v13875_v5  ;;  %11365 = vmatprep.subr.bf16.mxu1 %v13878_v43 }
0x1efa   :  { %8784 = vmatprep.mubr.f32.mxu0 %v12129_v0  ;;  %8855 = vmatprep.mubr.f32.mxu1 %v12129_v0 }
0x1efc   :  { %11335 = vmatpush1.bf16.msra.mxu0 %v13880_v36  ;;  %11367 = vmatpush1.bf16.msra.mxu1 %v13883_v25 }
0x1efd   :  { %11337 = vmatprep.subr.bf16.mxu0 %v13886_v4  ;;  %11369 = vmatprep.subr.bf16.mxu1 %v13888_v17 }
0x1f00   :  { %11339 = vmatpush1.bf16.msra.mxu0 %v13891_v19  ;;  %11371 = vmatpush1.bf16.msra.mxu1 %v13895_v13 }
0x1f01   :  { %11341 = vmatprep.subr.bf16.mxu0 %v13897_v3  ;;  %11373 = vmatprep.subr.bf16.mxu1 %v13900_v62 }
0x1f04   :  { %11343 = vmatpush1.bf16.msra.mxu0 %v13903_v61  ;;  %11375 = vmatpush1.bf16.msra.mxu1 %v13907_v22 }
0x1f05   :  { %11345 = vmatprep.subr.bf16.mxu0 %v13909_v6  ;;  %11377 = vmatprep.subr.bf16.mxu1 %v13912_v39 }
0x1f08   :  { %11347 = vmatpush1.bf16.msra.mxu0 %v13915_v38  ;;  %11379 = vmatpush1.bf16.msra.mxu1 %v13919_v48 }
0x1f09   :  { %11349 = vmatprep.subr.bf16.mxu0 %v13921_v52  ;;  %11381 = vmatprep.subr.bf16.mxu1 %v13924_v11 }
0x1f0c   :  { %11351 = vmatpush1.bf16.msra.mxu0 %v13927_v23  ;;  %11383 = vmatpush1.bf16.msra.mxu1 %v13931_v56 }
0x1f0d   :  { %11353 = vmatprep.subr.bf16.mxu0 %v13933_v54  ;;  %11385 = vmatprep.subr.bf16.mxu1 %v13936_v15 }
0x1f10   :  { %11355 = vmatpush1.bf16.msra.mxu0 %v13939_v58  ;;  %11387 = vmatpush1.bf16.msra.mxu1 %v13943_v33 }
0x1f11   :  { %11357 = vmatprep.subr.bf16.mxu0 %v13945_v63  ;;  %11389 = vmatprep.subr.bf16.mxu1 %v13948_v44 }
0x1f14   :  { %11359 = vmatpush1.bf16.msra.mxu0 %v13951_v20  ;;  %11391 = vmatpush1.bf16.msra.mxu1 %v13955_v8 }
0x1f15   :  { %11393 = vmatprep.subr.bf16.mxu0 %v13864_v59  ;;  %11425 = vmatprep.subr.bf16.mxu1 %v13866_v12 }
0x1fca   :  { %v8517_v55 = vpop.f32.mrb[66].mxu0  ;;  %v8588_v27 = vpop.f32.mrb[66].mxu1 }
0x1fcb   :  { %v8519_v53 = vpop.f32.mrb[67].mxu0  ;;  %v8590_v41 = vpop.f32.mrb[67].mxu1 }
0x1fcc   :  { %v8597_v51 = vcombine.low %v8517_v55, %v8519_v53  ;;  %v8598_v42 = vcombine.low %v8588_v27, %v8590_v41 }
0x1fce   :  { %v8605_v31 = vrot.slane %v8597_v51, %v12409_v28  ;;  %v8612_v10 = vrot.slane %v8598_v42, %v12409_v28 }
0x1fd0   :  { %v8613_v32 = vcombine.low %v8605_v31, %v8612_v10 }
0x1fd2   :  { %v8620_v21 = vrot.slane %v8613_v32, %v12409_v28 }
0x1fd4   :  { %v8622_v37 = vadd.f32 %v8620_v21, %v8386_v34 }
0x1fd6   :  { %v9303_v14 = vmul.f32 -1.442695, %v8622_v37  ;;  %v8630_v50 = vrot.slane %v8622_v37, 1  ;;  %v8641_v12 = vrot.slane %v8622_v37, 3  ;;  %v8638_v16 = vrot.slane %v8622_v37, 2 }
0x1fd8   :  { %11932 = vpow2.f32 %v9303_v14  ;;  %v9304_v59 = vmul.f32 -1.442695, %v8630_v50  ;;  %v9305_v24 = vmul.f32 -1.442695, %v8641_v12 }
0x1fd9   :  { %v8924_v50 = vld [vmem:[#allocation2 + $0x27] ss:$8 sm:$0xf] }
0x1fda   :  { %11934 = vpow2.f32 %v9304_v59 }
0x1fdb   :  { %11936 = vpow2.f32 %v9305_v24 }
0x1fe2   :  { %v11933_v57 = vpop.eup %11932 }
0x1fe3   :  { %v8626_v46 = vadd.f32 1.0, %v11933_v57 }
0x1fe4   :  { %v11935_v30 = vpop.eup %11934 }
0x1fe5   :  { %11938 = vrcp.f32 %v8626_v46  ;;  %v8635_v35 = vadd.f32 1.0, %v11935_v30  ;;  %v11937_v26 = vpop.eup %11936 }
0x1fe6   :  { %11940 = vtanh.f32 %v8638_v16  ;;  %v8646_v7 = vadd.f32 1.0, %v11937_v26 }
0x1fe7   :  { %11942 = vrcp.f32 %v8635_v35 }
0x1fe8   :  { %11944 = vrcp.f32 %v8646_v7 }
0x1fef   :  { %v11939_v49 = vpop.eup %11938 }
0x1ff0   :  { %v11941_v2 = vpop.eup %11940 }
0x1ff1   :  { %v11943_v60 = vpop.eup %11942  ;;  %v8650_v45 = vmul.f32 %v11941_v2, %v11939_v49 }
0x1ff2   :  { %v8649_v18 = vmul.f32 %v11943_v60, %v14007_v47  ;;  %v11945_v9 = vpop.eup %11944 }
0x1ff4   :  { %v14048_v40 = vadd.f32 %v8650_v45, %v8649_v18 }
0x1ff6   :  { %11946 = vtanh.f32 %v14048_v40 }
0x2000   :  { %v11947_v55 = vpop.eup %11946 }
0x2001   :  { %v8653_v27 = vmul.f32 %v11947_v55, %v11945_v9 }
0x2003   :  { %8654 = vst [vmem:[#allocation12 + $0xd] sm:$0x1] %v8653_v27  ;;  %8785 = vmatmul.mubr.f32.vlgmr.msra.gmra.mrb[68].mxu0 %v8653_v27  ;;  %8856 = vmatmul.mubr.f32.vlgmr.msra.gmra.mrb[68].mxu1 %v8653_v27 }
0x2004   :  { %11395 = vmatpush1.bf16.msra.mxu0 %v13868_v29  ;;  %11427 = vmatpush1.bf16.msra.mxu1 %v13871_v1 }
0x2005   :  { %11397 = vmatprep.subr.bf16.mxu0 %v13875_v5  ;;  %11429 = vmatprep.subr.bf16.mxu1 %v13878_v43 }
0x2006   :  { %9053 = vmatprep.mubr.f32.mxu0 %v12129_v0  ;;  %9124 = vmatprep.mubr.f32.mxu1 %v12129_v0 }
0x2008   :  { %11399 = vmatpush1.bf16.msra.mxu0 %v13880_v36  ;;  %11431 = vmatpush1.bf16.msra.mxu1 %v13883_v25 }
0x2009   :  { %11401 = vmatprep.subr.bf16.mxu0 %v13886_v4  ;;  %11433 = vmatprep.subr.bf16.mxu1 %v13888_v17 }
0x200c   :  { %11403 = vmatpush1.bf16.msra.mxu0 %v13891_v19  ;;  %11435 = vmatpush1.bf16.msra.mxu1 %v13895_v13  ;;  %v8655_v13 = vld [vmem:[#allocation2 + $0x26] ss:$8 sm:$0xf] }
0x200d   :  { %11405 = vmatprep.subr.bf16.mxu0 %v13897_v3  ;;  %11437 = vmatprep.subr.bf16.mxu1 %v13900_v62 }
0x2010   :  { %11407 = vmatpush1.bf16.msra.mxu0 %v13903_v61  ;;  %11439 = vmatpush1.bf16.msra.mxu1 %v13907_v22 }
0x2011   :  { %11409 = vmatprep.subr.bf16.mxu0 %v13909_v6  ;;  %11441 = vmatprep.subr.bf16.mxu1 %v13912_v39 }
0x2014   :  { %11411 = vmatpush1.bf16.msra.mxu0 %v13915_v38  ;;  %11443 = vmatpush1.bf16.msra.mxu1 %v13919_v48 }
0x2015   :  { %11413 = vmatprep.subr.bf16.mxu0 %v13921_v52  ;;  %11445 = vmatprep.subr.bf16.mxu1 %v13924_v11 }
0x2018   :  { %11415 = vmatpush1.bf16.msra.mxu0 %v13927_v23  ;;  %11447 = vmatpush1.bf16.msra.mxu1 %v13931_v56 }
0x2019   :  { %11417 = vmatprep.subr.bf16.mxu0 %v13933_v54  ;;  %11449 = vmatprep.subr.bf16.mxu1 %v13936_v15 }
0x201c   :  { %11419 = vmatpush1.bf16.msra.mxu0 %v13939_v58  ;;  %11451 = vmatpush1.bf16.msra.mxu1 %v13943_v33 }
0x201d   :  { %11421 = vmatprep.subr.bf16.mxu0 %v13945_v63  ;;  %11453 = vmatprep.subr.bf16.mxu1 %v13948_v44 }
0x2020   :  { %11423 = vmatpush1.bf16.msra.mxu0 %v13951_v20  ;;  %11455 = vmatpush1.bf16.msra.mxu1 %v13955_v8 }
0x20d6   :  { %v8786_v0 = vpop.f32.mrb[68].mxu0  ;;  %v8857_v29 = vpop.f32.mrb[68].mxu1 }
0x20d7   :  { %v8788_v1 = vpop.f32.mrb[69].mxu0  ;;  %v8859_v5 = vpop.f32.mrb[69].mxu1 }
0x20d8   :  { %v8866_v43 = vcombine.low %v8786_v0, %v8788_v1  ;;  %v8867_v36 = vcombine.low %v8857_v29, %v8859_v5 }
0x20da   :  { %v8874_v25 = vrot.slane %v8866_v43, %v12409_v28  ;;  %v8881_v4 = vrot.slane %v8867_v36, %v12409_v28 }
0x20dc   :  { %v8882_v17 = vcombine.low %v8874_v25, %v8881_v4 }
0x20de   :  { %v8889_v19 = vrot.slane %v8882_v17, %v12409_v28 }
0x20e0   :  { %v8891_v3 = vadd.f32 %v8889_v19, %v8655_v13 }
0x20e2   :  { %v9306_v62 = vmul.f32 -1.442695, %v8891_v3  ;;  %v8899_v61 = vrot.slane %v8891_v3, 1  ;;  %v8910_v6 = vrot.slane %v8891_v3, 3  ;;  %v8907_v48 = vrot.slane %v8891_v3, 2 }
0x20e4   :  { %11948 = vpow2.f32 %v9306_v62  ;;  %v9307_v22 = vmul.f32 -1.442695, %v8899_v61  ;;  %v9308_v39 = vmul.f32 -1.442695, %v8910_v6 }
0x20e6   :  { %11950 = vpow2.f32 %v9307_v22 }
0x20e7   :  { %11952 = vpow2.f32 %v9308_v39 }
0x20ee   :  { %v11949_v38 = vpop.eup %11948 }
0x20ef   :  { %v8895_v52 = vadd.f32 1.0, %v11949_v38 }
0x20f0   :  { %v11951_v11 = vpop.eup %11950 }
0x20f1   :  { %11954 = vrcp.f32 %v8895_v52  ;;  %v8904_v23 = vadd.f32 1.0, %v11951_v11  ;;  %v11953_v56 = vpop.eup %11952 }
0x20f2   :  { %11956 = vtanh.f32 %v8907_v48  ;;  %v8915_v33 = vadd.f32 1.0, %v11953_v56 }
0x20f3   :  { %11958 = vrcp.f32 %v8904_v23 }
0x20f4   :  { %11960 = vrcp.f32 %v8915_v33 }
0x20fb   :  { %v11955_v54 = vpop.eup %11954 }
0x20fc   :  { %v11957_v15 = vpop.eup %11956 }
0x20fd   :  { %v11959_v58 = vpop.eup %11958  ;;  %v8919_v44 = vmul.f32 %v11957_v15, %v11955_v54 }
0x20fe   :  { %v8918_v63 = vmul.f32 %v11959_v58, %v14048_v40  ;;  %v11961_v8 = vpop.eup %11960 }
0x2100   :  { %v8920_v20 = vadd.f32 %v8919_v44, %v8918_v63 }
0x2102   :  { %11962 = vtanh.f32 %v8920_v20 }
0x210c   :  { %v11963_v47 = vpop.eup %11962 }
0x210d   :  { %v8922_v53 = vmul.f32 %v11963_v47, %v11961_v8 }
0x210f   :  { %8923 = vst [vmem:[#allocation12 + $0xe] sm:$0x1] %v8922_v53  ;;  %9054 = vmatmul.mubr.f32.vlgmr.msra.gmra.mrb[70].mxu0 %v8922_v53  ;;  %9125 = vmatmul.mubr.f32.vlgmr.msra.gmra.mrb[70].mxu1 %v8922_v53 }
0x21e2   :  { %v9055_v41 = vpop.f32.mrb[70].mxu0  ;;  %v9126_v51 = vpop.f32.mrb[70].mxu1 }
0x21e3   :  { %v9057_v42 = vpop.f32.mrb[71].mxu0  ;;  %v9128_v31 = vpop.f32.mrb[71].mxu1 }
0x21e4   :  { %v9135_v10 = vcombine.low %v9055_v41, %v9057_v42  ;;  %v9136_v32 = vcombine.low %v9126_v51, %v9128_v31 }
0x21e6   :  { %v9143_v21 = vrot.slane %v9135_v10, %v12409_v28  ;;  %v9150_v34 = vrot.slane %v9136_v32, %v12409_v28 }
0x21e8   :  { %v9151_v37 = vcombine.low %v9143_v21, %v9150_v34 }
0x21ea   :  { %v9158_v14 = vrot.slane %v9151_v37, %v12409_v28 }
0x21ec   :  { %v9160_v59 = vadd.f32 %v9158_v14, %v8924_v50 }
0x21ee   :  { %v9309_v12 = vmul.f32 -1.442695, %v9160_v59  ;;  %v9168_v24 = vrot.slane %v9160_v59, 1  ;;  %v9179_v16 = vrot.slane %v9160_v59, 3  ;;  %v9176_v35 = vrot.slane %v9160_v59, 2 }
0x21f0   :  { %11964 = vpow2.f32 %v9309_v12  ;;  %v9310_v57 = vmul.f32 -1.442695, %v9168_v24  ;;  %v9311_v46 = vmul.f32 -1.442695, %v9179_v16 }
0x21f2   :  { %11966 = vpow2.f32 %v9310_v57 }
0x21f3   :  { %11968 = vpow2.f32 %v9311_v46 }
0x21fa   :  { %v11965_v30 = vpop.eup %11964 }
0x21fb   :  { %v9164_v26 = vadd.f32 1.0, %v11965_v30 }
0x21fc   :  { %v11967_v49 = vpop.eup %11966 }
0x21fd   :  { %11970 = vrcp.f32 %v9164_v26  ;;  %v9173_v2 = vadd.f32 1.0, %v11967_v49  ;;  %v11969_v60 = vpop.eup %11968 }
0x21fe   :  { %11972 = vtanh.f32 %v9176_v35  ;;  %v9184_v45 = vadd.f32 1.0, %v11969_v60 }
0x21ff   :  { %11974 = vrcp.f32 %v9173_v2 }
0x2200   :  { %11976 = vrcp.f32 %v9184_v45 }
0x2207   :  { %v11971_v28 = vpop.eup %11970 }
0x2208   :  { %v11973_v7 = vpop.eup %11972 }
0x2209   :  { %v11975_v18 = vpop.eup %11974  ;;  %v9188_v9 = vmul.f32 %v11973_v7, %v11971_v28 }
0x220a   :  { %v9187_v40 = vmul.f32 %v11975_v18, %v8920_v20  ;;  %v11977_v27 = vpop.eup %11976 }
0x220c   :  { %v9189_v55 = vadd.f32 %v9188_v9, %v9187_v40 }
0x220e   :  { %11978 = vtanh.f32 %v9189_v55 }
0x2218   :  { %v11979_v0 = vpop.eup %11978 }
0x2219   :  { %v9191_v29 = vmul.f32 %v11979_v0, %v11977_v27 }
0x221b   :  { %9192 = vst [vmem:[#allocation12 + $0xf] sm:$0x1] %v9191_v29 }
0x221c   :  { %12101 = shalt.err (!%p12098_p2)
}
0x221d   :  { %s12102_s24 = scalar_lea.hbm %s14112_s7, 256 }
0x221e   :  { %p12103_p3 = scmp.ne.s32.totalorder %s14112_s7, %s12102_s24  ;;  %p12106_p4 = scmp.lt.u32.totalorder %s12102_s24, %s14112_s7 }
0x2220   :  { %p12108_p5 = pnand %p12106_p4, %p12103_p3 }
0x2222   :  { %12111 = shalt.err (!%p12108_p5)
}
0x2223   :  { %9204 = dma.vmem_to_hbm [thread:$0]  %s9199_s20, 256, %s14112_s7, [#allocation5], %s12125_s4, %s12125_s4, %s12126_s15  }
0x2224   :  { %12118 = dma.done.wait [#allocation5], 256  }
0x2225   :  { %12119 = vsyncadd [#allocation5], 4294967040 }
0x2226   :  { %9208 = vsyncpa [#allocation4], 1 }
0x2227   :  { %9209 = vsyncpa [#allocation7], 1 }
0x2228   :  { %9210 = vsyncpa [#allocation10], 1 }
0x2229   :  { %9211 = vsyncpa [#allocation5], 1 }

</bundles_post_ra>
